<compile_context>
chip_gen: v7x
topology: tpu7x:2x2x1
jax: 0.10.0
libtpu: 0.0.40
codegen_flags: <defaults>
</compile_context>

<pallas_src>
import functools
import math

import jax
import jax.numpy as jnp
from jax.experimental import pallas as pl
from jax.experimental.pallas import tpu as pltpu

_VMEM_SPEC = functools.partial(pl.BlockSpec, memory_space=pltpu.MemorySpace.VMEM)


# -----------------------------------------------------------------------------
# Bidirectional GRU layer (PyTorch gate order r, z, n), both directions fused.
# -----------------------------------------------------------------------------
def _bigru_layer(x, wih_ref, bih_ref, whhf_ref, bhhf_ref, whhb_ref, bhhb_ref):
    B, S, _ = x.shape
    H = whhf_ref.shape[0]
    wih = wih_ref[...]                                     # (Din, 6H) = [fwd | bwd]
    # Hoisted input projection for BOTH directions in one matmul.
    gi = (jnp.dot(x.reshape(B * S, -1).astype(wih.dtype), wih,
                  preferred_element_type=jnp.float32) + bih_ref[...]
          ).reshape(B, S, 6 * H)
    whhf, whhb = whhf_ref[...], whhb_ref[...]
    bhhf = jnp.broadcast_to(bhhf_ref[...], (B, 3 * H))     # hoisted bias broadcasts
    bhhb = jnp.broadcast_to(bhhb_ref[...], (B, 3 * H))

    hf = jnp.zeros((B, H), jnp.float32)
    hb = jnp.zeros((B, H), jnp.float32)
    hs_f = [None] * S
    hs_b = [None] * S
    for t in range(S):                                     # static unroll (S small)
        tb = S - 1 - t                                     # fwd(t) and bwd(S-1-t)
        ghf = jnp.dot(hf, whhf, preferred_element_type=jnp.float32) + bhhf
        ghb = jnp.dot(hb, whhb, preferred_element_type=jnp.float32) + bhhb
        gif = gi[:, t, 0:3 * H]
        gib = gi[:, tb, 3 * H:6 * H]
        rf = jax.nn.sigmoid(gif[:, 0:H] + ghf[:, 0:H])
        rb = jax.nn.sigmoid(gib[:, 0:H] + ghb[:, 0:H])
        zf = jax.nn.sigmoid(gif[:, H:2 * H] + ghf[:, H:2 * H])
        zb = jax.nn.sigmoid(gib[:, H:2 * H] + ghb[:, H:2 * H])
        nf = jnp.tanh(gif[:, 2 * H:3 * H] + rf * ghf[:, 2 * H:3 * H])
        nb = jnp.tanh(gib[:, 2 * H:3 * H] + rb * ghb[:, 2 * H:3 * H])
        hf = nf + zf * (hf - nf)                           # == (1-z)*n + z*h
        hb = nb + zb * (hb - nb)
        hs_f[t] = hf
        hs_b[tb] = hb
    fwd = jnp.stack(hs_f, axis=1)                          # (B, S, H)
    bwd = jnp.stack(hs_b, axis=1)                          # (B, S, H)
    return jnp.concatenate([fwd, bwd], axis=-1)            # (B, S, 2H)


# -----------------------------------------------------------------------------
# Fully fused PredicateModel forward kernel.
# -----------------------------------------------------------------------------
def predicate_fused_kernel(emb_ref, pos_ref, mask_ref,
                           wih1, bih1, whh1f, bhh1f, whh1b, bhh1b,
                           wih2, bih2, whh2f, bhh2f, whh2b, bhh2b,
                           wproj, bproj, wqkv, bqkv, wo, bo,
                           *rest,
                           num_heads, dilations, kernel_sizes, max_pad):
    n_cnn = 2 * len(dilations)
    cnn_refs = rest[:n_cnn]
    w1, b1, w2, b2 = rest[n_cnn:n_cnn + 4]
    share_ref, pred_ref = rest[n_cnn + 4:n_cnn + 6]
    xpad_ref = rest[n_cnn + 6]                             # (B, S + 2*max_pad, C) scratch

    # ---- RNNEncoder: (emb + pos) -> 2 x bi-GRU -> Linear(2H -> E) ------------
    # TODO(synk): the original RNNEncoder packs padded sequences with `mask`
    #             lengths (pack_padded_sequence) and applies inter-layer dropout;
    #             here padding flows through the GRU (mask is all ones in the
    #             example) and dropout is identity (eval mode).
    x = emb_ref[...] + pos_ref[...]                        # (B, S, E)
    B, S, E = x.shape
    mask = mask_ref[...]                                   # (B, S) float {0,1}

    l1 = _bigru_layer(x, wih1, bih1, whh1f, bhh1f, whh1b, bhh1b)
    l2 = _bigru_layer(l1, wih2, bih2, whh2f, bhh2f, whh2b, bhh2b)

    wp = wproj[...]
    share = (jnp.dot(l2.reshape(B * S, -1).astype(wp.dtype), wp,
                     preferred_element_type=jnp.float32) + bproj[...]
             ).reshape(B, S, E)
    share_ref[...] = share

    # ---- SelfAttention: fused QKV projection + masked multi-head SDPA --------
    # TODO(synk): attention weights (second return of SelfAttention) are discarded
    #             by PredicateModel.forward, so only att_out is produced here.
    dh = E // num_heads
    x2 = share.reshape(B * S, E)
    wqkv_v = wqkv[...]
    qkv = jnp.dot(x2.astype(wqkv_v.dtype), wqkv_v,
                  preferred_element_type=jnp.float32) + bqkv[...]   # (B*S, 3E)
    q = qkv[:, 0:E].reshape(B, S, E)
    k = qkv[:, E:2 * E].reshape(B, S, E)
    v = qkv[:, 2 * E:3 * E].reshape(B, S, E)
    scale = 1.0 / math.sqrt(dh)
    neg = (1.0 - mask)[:, None, :] * (-1e9)                # (B, 1, S) additive key mask

    heads = []
    for hh in range(num_heads):                            # few tiny heads: static loop
        qh = q[:, :, hh * dh:(hh + 1) * dh]
        kh = k[:, :, hh * dh:(hh + 1) * dh]
        vh = v[:, :, hh * dh:(hh + 1) * dh]
        s = jnp.einsum('bqd,bkd->bqk', qh, kh,
                       preferred_element_type=jnp.float32) * scale + neg
        s = s - jnp.max(s, axis=-1, keepdims=True)
        p = jnp.exp(s)
        p = p * pl.reciprocal(jnp.sum(p, axis=-1, keepdims=True), approx=True)
        heads.append(jnp.einsum('bqk,bkd->bqd', p, vh,
                                preferred_element_type=jnp.float32))
    o = jnp.concatenate(heads, axis=-1)                    # (B, S, E)
    wo_v = wo[...]
    att = (jnp.dot(o.reshape(B * S, E).astype(wo_v.dtype), wo_v,
                   preferred_element_type=jnp.float32) + bo[...]).reshape(B, S, E)

    # ---- DGCNNDecoder: 6 residual gated dilated conv1d blocks ----------------
    #   h = Conv1d(x, 2C, k, dilation=d, padding='same'); a, g = split(h)
    #   x = x + sigmoid(g) * (a - x)
    xpad_ref[...] = jnp.zeros_like(xpad_ref)               # zero the pad halo once
    xc = att                                               # (B, S, C), C == E
    C = E
    for i, (dd, ks) in enumerate(zip(dilations, kernel_sizes)):
        w = cnn_refs[2 * i][...]                           # (ks*C, 2C)
        b = cnn_refs[2 * i + 1][...]                       # (1, 2C)
        pad = dd * (ks - 1) // 2
        xpad_ref[:, max_pad:max_pad + S, :] = xc           # halo rows stay zero
        lo = max_pad - pad
        taps = [xpad_ref[:, lo + j * dd:lo + j * dd + S, :] for j in range(ks)]
        xt = jnp.concatenate(taps, axis=-1).reshape(B * S, ks * C)
        h2 = jnp.dot(xt.astype(w.dtype), w,
                     preferred_element_type=jnp.float32) + b        # one wide matmul
        a = h2[:, 0:C].reshape(B, S, C)
        g = jax.nn.sigmoid(h2[:, C:2 * C]).reshape(B, S, C)
        xc = xc + g * (a - xc)                             # gated residual

    # ---- masked max/avg pooling + predicate_fc (Linear-ReLU-Linear) ----------
    m3 = mask[:, :, None]
    maxp = jnp.max(xc + (1.0 - m3) * (-1e9), axis=1)                 # (B, C)
    avgp = jnp.sum(xc * m3, axis=1) / jnp.sum(mask, axis=1, keepdims=True)
    feat = jnp.concatenate([maxp, avgp], axis=-1)                    # (B, 2C)
    w1v, w2v = w1[...], w2[...]
    hfc = jnp.maximum(jnp.dot(feat.astype(w1v.dtype), w1v,
                              preferred_element_type=jnp.float32) + b1[...], 0.0)
    pred_ref[...] = jnp.dot(hfc.astype(w2v.dtype), w2v,
                            preferred_element_type=jnp.float32) + b2[...]


# -----------------------------------------------------------------------------
# Parameters + forward wrapper
# -----------------------------------------------------------------------------
def init_params(key, E, H, forward_dim, num_predicate, dilations, kernel_sizes,
                matmul_dtype=jnp.bfloat16):
    counter = [0]

    def w(shape, dtype=jnp.float32, scale=0.05):
        counter[0] += 1
        return (scale * jax.random.normal(jax.random.fold_in(key, counter[0]),
                                          shape)).astype(dtype)

    p = {}
    gru = []
    for din in (E, 2 * H):                   # layer 1 (input E), layer 2 (input 2H)
        gru += [
            w((din, 6 * H), matmul_dtype),   # w_ih for both directions [fwd | bwd]
            w((1, 6 * H)),                   # b_ih (fwd | bwd), f32
            w((H, 3 * H)), w((1, 3 * H)),    # w_hh_f, b_hh_f (f32: serial recurrence)
            w((H, 3 * H)), w((1, 3 * H)),    # w_hh_b, b_hh_b
        ]
    p['gru'] = gru
    p['proj_w'], p['proj_b'] = w((2 * H, E), matmul_dtype), w((1, E))
    p['attn'] = [w((E, 3 * E), matmul_dtype), w((1, 3 * E)),   # fused QKV
                 w((E, E), matmul_dtype), w((1, E))]            # output projection
    cnn = []
    for d, k in zip(dilations, kernel_sizes):
        cnn += [w((k * E, 2 * E), matmul_dtype), w((1, 2 * E))]
    p['cnn'] = cnn
    p['fc1_w'], p['fc1_b'] = w((2 * E, forward_dim), matmul_dtype), w((1, forward_dim))
    p['fc2_w'], p['fc2_b'] = w((forward_dim, num_predicate), matmul_dtype), w((1, num_predicate))
    return p


def predicate_model_forward(params, input_embedding, mask, position_embedding,
                            *, num_heads, dilations, kernel_sizes):
    B, S, E = input_embedding.shape
    num_predicate = params['fc2_w'].shape[1]
    max_pad = max(d * (k - 1) // 2 for d, k in zip(dilations, kernel_sizes))

    inputs = [input_embedding, position_embedding, mask,
              *params['gru'],
              params['proj_w'], params['proj_b'],
              *params['attn'],
              *params['cnn'],
              params['fc1_w'], params['fc1_b'],
              params['fc2_w'], params['fc2_b']]

    kernel = functools.partial(
        predicate_fused_kernel,
        num_heads=num_heads,
        dilations=tuple(dilations),
        kernel_sizes=tuple(kernel_sizes),
        max_pad=max_pad)

    share, pred = pl.pallas_call(
        kernel,
        out_shape=(jax.ShapeDtypeStruct((B, S, E), jnp.float32),
                   jax.ShapeDtypeStruct((B, num_predicate), jnp.float32)),
        in_specs=[_VMEM_SPEC() for _ in inputs],
        out_specs=(_VMEM_SPEC(), _VMEM_SPEC()),
        scratch_shapes=[pltpu.VMEM((B, S + 2 * max_pad, E), jnp.float32)],
    )(*inputs)
    return share, pred


if __name__ == "__main__":
    # Small shapes consistent with the module's forward.
    B, S = 2, 8
    embedding_size = 32
    rnn_hidden_size = 16
    num_heads = 4
    forward_dim = 32
    num_predicate = 8
    dilations = (1, 2, 3, 1, 2, 3)
    kernel_sizes = (5, 5, 5, 3, 3, 3)

    key = jax.random.PRNGKey(0)
    k_in, k_pos, k_par = jax.random.split(key, 3)
    input_embedding = jax.random.normal(k_in, (B, S, embedding_size), jnp.float32)
    position_embedding = 0.1 * jax.random.normal(k_pos, (B, S, embedding_size), jnp.float32)
    mask = jnp.ones((B, S), jnp.float32)       # all valid tokens

    params = init_params(k_par, embedding_size, rnn_hidden_size,
                         forward_dim, num_predicate, dilations, kernel_sizes,
                         matmul_dtype=jnp.bfloat16)

    fwd = jax.jit(functools.partial(predicate_model_forward,
                                    num_heads=num_heads,
                                    dilations=dilations,
                                    kernel_sizes=kernel_sizes))
    share_feature, predicate_pred = fwd(params, input_embedding, mask, position_embedding)
    jax.block_until_ready((share_feature, predicate_pred))

    assert share_feature.shape == (B, S, embedding_size)
    assert predicate_pred.shape == (B, num_predicate)
    assert bool(jnp.all(jnp.isfinite(share_feature)))
    assert bool(jnp.all(jnp.isfinite(predicate_pred)))
    print("KERNEL_OK")
</pallas_src>

<mosaic_0001>
module attributes {stable_mosaic.version = 11 : i64} {
  func.func @predicate_fused_kernel(%arg0: memref<2x8x32xf32, #tpu.memory_space<vmem>>, %arg1: memref<2x8x32xf32, #tpu.memory_space<vmem>>, %arg2: memref<2x8xf32, #tpu.memory_space<vmem>>, %arg3: memref<32x96xbf16, #tpu.memory_space<vmem>>, %arg4: memref<1x96xf32, #tpu.memory_space<vmem>>, %arg5: memref<16x48xf32, #tpu.memory_space<vmem>>, %arg6: memref<1x48xf32, #tpu.memory_space<vmem>>, %arg7: memref<16x48xf32, #tpu.memory_space<vmem>>, %arg8: memref<1x48xf32, #tpu.memory_space<vmem>>, %arg9: memref<32x96xbf16, #tpu.memory_space<vmem>>, %arg10: memref<1x96xf32, #tpu.memory_space<vmem>>, %arg11: memref<16x48xf32, #tpu.memory_space<vmem>>, %arg12: memref<1x48xf32, #tpu.memory_space<vmem>>, %arg13: memref<16x48xf32, #tpu.memory_space<vmem>>, %arg14: memref<1x48xf32, #tpu.memory_space<vmem>>, %arg15: memref<32x32xbf16, #tpu.memory_space<vmem>>, %arg16: memref<1x32xf32, #tpu.memory_space<vmem>>, %arg17: memref<32x96xbf16, #tpu.memory_space<vmem>>, %arg18: memref<1x96xf32, #tpu.memory_space<vmem>>, %arg19: memref<32x32xbf16, #tpu.memory_space<vmem>>, %arg20: memref<1x32xf32, #tpu.memory_space<vmem>>, %arg21: memref<160x64xbf16, #tpu.memory_space<vmem>>, %arg22: memref<1x64xf32, #tpu.memory_space<vmem>>, %arg23: memref<160x64xbf16, #tpu.memory_space<vmem>>, %arg24: memref<1x64xf32, #tpu.memory_space<vmem>>, %arg25: memref<160x64xbf16, #tpu.memory_space<vmem>>, %arg26: memref<1x64xf32, #tpu.memory_space<vmem>>, %arg27: memref<96x64xbf16, #tpu.memory_space<vmem>>, %arg28: memref<1x64xf32, #tpu.memory_space<vmem>>, %arg29: memref<96x64xbf16, #tpu.memory_space<vmem>>, %arg30: memref<1x64xf32, #tpu.memory_space<vmem>>, %arg31: memref<96x64xbf16, #tpu.memory_space<vmem>>, %arg32: memref<1x64xf32, #tpu.memory_space<vmem>>, %arg33: memref<64x32xbf16, #tpu.memory_space<vmem>>, %arg34: memref<1x32xf32, #tpu.memory_space<vmem>>, %arg35: memref<32x8xbf16, #tpu.memory_space<vmem>>, %arg36: memref<1x8xf32, #tpu.memory_space<vmem>>, %arg37: memref<2x8x32xf32, #tpu.memory_space<vmem>>, %arg38: memref<2x8xf32, #tpu.memory_space<vmem>>, %arg39: memref<2x20x32xf32, #tpu.memory_space<vmem>>) attributes {dimension_semantics = [], scalar_prefetch = 0 : i64, scratch_operands = 1 : i64, tpu.core_type = #tpu.core_type<tc>} {
    %c0 = arith.constant 0 : index
    %c0_0 = arith.constant 0 : index
    %c0_1 = arith.constant 0 : index
    %0 = vector.load %arg0[%c0, %c0_0, %c0_1] : memref<2x8x32xf32, #tpu.memory_space<vmem>>, vector<2x8x32xf32>
    %c0_2 = arith.constant 0 : index
    %c0_3 = arith.constant 0 : index
    %c0_4 = arith.constant 0 : index
    %1 = vector.load %arg1[%c0_2, %c0_3, %c0_4] : memref<2x8x32xf32, #tpu.memory_space<vmem>>, vector<2x8x32xf32>
    %2 = arith.addf %0, %1 : vector<2x8x32xf32>
    %c0_5 = arith.constant 0 : index
    %c0_6 = arith.constant 0 : index
    %3 = vector.load %arg2[%c0_5, %c0_6] : memref<2x8xf32, #tpu.memory_space<vmem>>, vector<2x8xf32>
    %c0_7 = arith.constant 0 : index
    %c0_8 = arith.constant 0 : index
    %4 = vector.load %arg3[%c0_7, %c0_8] : memref<32x96xbf16, #tpu.memory_space<vmem>>, vector<32x96xbf16>
    %5 = vector.shape_cast %2 : vector<2x8x32xf32> to vector<16x32xf32>
    %6 = arith.truncf %5 : vector<16x32xf32> to vector<16x32xbf16>
    %cst = arith.constant dense<0.000000e+00> : vector<16x96xf32>
    %7 = tpu.matmul %6, %4, %cst {dimension_numbers = #tpu.dot_dimension_numbers<[1], [0], [0], [1], [0, 0, 1, 1], [], []>} : vector<16x32xbf16>, vector<32x96xbf16>, vector<16x96xf32> -> vector<16x96xf32>
    %c0_9 = arith.constant 0 : index
    %c0_10 = arith.constant 0 : index
    %8 = vector.load %arg4[%c0_9, %c0_10] : memref<1x96xf32, #tpu.memory_space<vmem>>, vector<1x96xf32>
    %9 = vector.broadcast %8 : vector<1x96xf32> to vector<16x96xf32>
    %10 = arith.addf %7, %9 : vector<16x96xf32>
    %11 = vector.shape_cast %10 : vector<16x96xf32> to vector<2x8x96xf32>
    %c0_11 = arith.constant 0 : index
    %c0_12 = arith.constant 0 : index
    %12 = vector.load %arg5[%c0_11, %c0_12] : memref<16x48xf32, #tpu.memory_space<vmem>>, vector<16x48xf32>
    %c0_13 = arith.constant 0 : index
    %c0_14 = arith.constant 0 : index
    %13 = vector.load %arg7[%c0_13, %c0_14] : memref<16x48xf32, #tpu.memory_space<vmem>>, vector<16x48xf32>
    %c0_15 = arith.constant 0 : index
    %c0_16 = arith.constant 0 : index
    %14 = vector.load %arg6[%c0_15, %c0_16] : memref<1x48xf32, #tpu.memory_space<vmem>>, vector<1x48xf32>
    %15 = vector.shape_cast %14 : vector<1x48xf32> to vector<1x48xf32>
    %16 = vector.broadcast %15 : vector<1x48xf32> to vector<2x48xf32>
    %c0_17 = arith.constant 0 : index
    %c0_18 = arith.constant 0 : index
    %17 = vector.load %arg8[%c0_17, %c0_18] : memref<1x48xf32, #tpu.memory_space<vmem>>, vector<1x48xf32>
    %18 = vector.shape_cast %17 : vector<1x48xf32> to vector<1x48xf32>
    %19 = vector.broadcast %18 : vector<1x48xf32> to vector<2x48xf32>
    %cst_19 = arith.constant 0.000000e+00 : f32
    %20 = vector.broadcast %cst_19 : f32 to vector<2x16xf32>
    %cst_20 = arith.constant 0.000000e+00 : f32
    %21 = vector.broadcast %cst_20 : f32 to vector<2x16xf32>
    %cst_21 = arith.constant dense<0.000000e+00> : vector<2x48xf32>
    %22 = tpu.matmul %20, %12, %cst_21 {dimension_numbers = #tpu.dot_dimension_numbers<[1], [0], [0], [1], [0, 0, 1, 1], [], []>} : vector<2x16xf32>, vector<16x48xf32>, vector<2x48xf32> -> vector<2x48xf32>
    %23 = arith.addf %22, %16 : vector<2x48xf32>
    %cst_22 = arith.constant dense<0.000000e+00> : vector<2x48xf32>
    %24 = tpu.matmul %21, %13, %cst_22 {dimension_numbers = #tpu.dot_dimension_numbers<[1], [0], [0], [1], [0, 0, 1, 1], [], []>} : vector<2x16xf32>, vector<16x48xf32>, vector<2x48xf32> -> vector<2x48xf32>
    %25 = arith.addf %24, %19 : vector<2x48xf32>
    %26 = vector.extract_strided_slice %11 {offsets = [0, 0, 0], sizes = [2, 1, 48], strides = [1, 1, 1]} : vector<2x8x96xf32> to vector<2x1x48xf32>
    %27 = vector.shape_cast %26 : vector<2x1x48xf32> to vector<2x48xf32>
    %28 = vector.extract_strided_slice %11 {offsets = [0, 7, 48], sizes = [2, 1, 48], strides = [1, 1, 1]} : vector<2x8x96xf32> to vector<2x1x48xf32>
    %29 = vector.shape_cast %28 : vector<2x1x48xf32> to vector<2x48xf32>
    %30 = vector.extract_strided_slice %27 {offsets = [0, 0], sizes = [2, 16], strides = [1, 1]} : vector<2x48xf32> to vector<2x16xf32>
    %31 = vector.extract_strided_slice %23 {offsets = [0, 0], sizes = [2, 16], strides = [1, 1]} : vector<2x48xf32> to vector<2x16xf32>
    %32 = arith.addf %30, %31 : vector<2x16xf32>
    %33 = arith.negf %32 : vector<2x16xf32>
    %34 = math.exp %33 : vector<2x16xf32>
    %cst_23 = arith.constant 1.000000e+00 : f32
    %35 = vector.broadcast %cst_23 : f32 to vector<2x16xf32>
    %36 = arith.addf %35, %34 : vector<2x16xf32>
    %37 = arith.divf %35, %36 : vector<2x16xf32>
    %38 = vector.extract_strided_slice %29 {offsets = [0, 0], sizes = [2, 16], strides = [1, 1]} : vector<2x48xf32> to vector<2x16xf32>
    %39 = vector.extract_strided_slice %25 {offsets = [0, 0], sizes = [2, 16], strides = [1, 1]} : vector<2x48xf32> to vector<2x16xf32>
    %40 = arith.addf %38, %39 : vector<2x16xf32>
    %41 = arith.negf %40 : vector<2x16xf32>
    %42 = math.exp %41 : vector<2x16xf32>
    %cst_24 = arith.constant 1.000000e+00 : f32
    %43 = vector.broadcast %cst_24 : f32 to vector<2x16xf32>
    %44 = arith.addf %43, %42 : vector<2x16xf32>
    %45 = arith.divf %43, %44 : vector<2x16xf32>
    %46 = vector.extract_strided_slice %27 {offsets = [0, 16], sizes = [2, 16], strides = [1, 1]} : vector<2x48xf32> to vector<2x16xf32>
    %47 = vector.extract_strided_slice %23 {offsets = [0, 16], sizes = [2, 16], strides = [1, 1]} : vector<2x48xf32> to vector<2x16xf32>
    %48 = arith.addf %46, %47 : vector<2x16xf32>
    %49 = arith.negf %48 : vector<2x16xf32>
    %50 = math.exp %49 : vector<2x16xf32>
    %cst_25 = arith.constant 1.000000e+00 : f32
    %51 = vector.broadcast %cst_25 : f32 to vector<2x16xf32>
    %52 = arith.addf %51, %50 : vector<2x16xf32>
    %53 = arith.divf %51, %52 : vector<2x16xf32>
    %54 = vector.extract_strided_slice %29 {offsets = [0, 16], sizes = [2, 16], strides = [1, 1]} : vector<2x48xf32> to vector<2x16xf32>
    %55 = vector.extract_strided_slice %25 {offsets = [0, 16], sizes = [2, 16], strides = [1, 1]} : vector<2x48xf32> to vector<2x16xf32>
    %56 = arith.addf %54, %55 : vector<2x16xf32>
    %57 = arith.negf %56 : vector<2x16xf32>
    %58 = math.exp %57 : vector<2x16xf32>
    %cst_26 = arith.constant 1.000000e+00 : f32
    %59 = vector.broadcast %cst_26 : f32 to vector<2x16xf32>
    %60 = arith.addf %59, %58 : vector<2x16xf32>
    %61 = arith.divf %59, %60 : vector<2x16xf32>
    %62 = vector.extract_strided_slice %27 {offsets = [0, 32], sizes = [2, 16], strides = [1, 1]} : vector<2x48xf32> to vector<2x16xf32>
    %63 = vector.extract_strided_slice %23 {offsets = [0, 32], sizes = [2, 16], strides = [1, 1]} : vector<2x48xf32> to vector<2x16xf32>
    %64 = arith.mulf %37, %63 : vector<2x16xf32>
    %65 = arith.addf %62, %64 : vector<2x16xf32>
    %66 = math.tanh %65 : vector<2x16xf32>
    %67 = vector.extract_strided_slice %29 {offsets = [0, 32], sizes = [2, 16], strides = [1, 1]} : vector<2x48xf32> to vector<2x16xf32>
    %68 = vector.extract_strided_slice %25 {offsets = [0, 32], sizes = [2, 16], strides = [1, 1]} : vector<2x48xf32> to vector<2x16xf32>
    %69 = arith.mulf %45, %68 : vector<2x16xf32>
    %70 = arith.addf %67, %69 : vector<2x16xf32>
    %71 = math.tanh %70 : vector<2x16xf32>
    %72 = arith.subf %20, %66 : vector<2x16xf32>
    %73 = arith.mulf %53, %72 : vector<2x16xf32>
    %74 = arith.addf %66, %73 : vector<2x16xf32>
    %75 = arith.subf %21, %71 : vector<2x16xf32>
    %76 = arith.mulf %61, %75 : vector<2x16xf32>
    %77 = arith.addf %71, %76 : vector<2x16xf32>
    %cst_27 = arith.constant dense<0.000000e+00> : vector<2x48xf32>
    %78 = tpu.matmul %74, %12, %cst_27 {dimension_numbers = #tpu.dot_dimension_numbers<[1], [0], [0], [1], [0, 0, 1, 1], [], []>} : vector<2x16xf32>, vector<16x48xf32>, vector<2x48xf32> -> vector<2x48xf32>
    %79 = arith.addf %78, %16 : vector<2x48xf32>
    %cst_28 = arith.constant dense<0.000000e+00> : vector<2x48xf32>
    %80 = tpu.matmul %77, %13, %cst_28 {dimension_numbers = #tpu.dot_dimension_numbers<[1], [0], [0], [1], [0, 0, 1, 1], [], []>} : vector<2x16xf32>, vector<16x48xf32>, vector<2x48xf32> -> vector<2x48xf32>
    %81 = arith.addf %80, %19 : vector<2x48xf32>
    %82 = vector.extract_strided_slice %11 {offsets = [0, 1, 0], sizes = [2, 1, 48], strides = [1, 1, 1]} : vector<2x8x96xf32> to vector<2x1x48xf32>
    %83 = vector.shape_cast %82 : vector<2x1x48xf32> to vector<2x48xf32>
    %84 = vector.extract_strided_slice %11 {offsets = [0, 6, 48], sizes = [2, 1, 48], strides = [1, 1, 1]} : vector<2x8x96xf32> to vector<2x1x48xf32>
    %85 = vector.shape_cast %84 : vector<2x1x48xf32> to vector<2x48xf32>
    %86 = vector.extract_strided_slice %83 {offsets = [0, 0], sizes = [2, 16], strides = [1, 1]} : vector<2x48xf32> to vector<2x16xf32>
    %87 = vector.extract_strided_slice %79 {offsets = [0, 0], sizes = [2, 16], strides = [1, 1]} : vector<2x48xf32> to vector<2x16xf32>
    %88 = arith.addf %86, %87 : vector<2x16xf32>
    %89 = arith.negf %88 : vector<2x16xf32>
    %90 = math.exp %89 : vector<2x16xf32>
    %cst_29 = arith.constant 1.000000e+00 : f32
    %91 = vector.broadcast %cst_29 : f32 to vector<2x16xf32>
    %92 = arith.addf %91, %90 : vector<2x16xf32>
    %93 = arith.divf %91, %92 : vector<2x16xf32>
    %94 = vector.extract_strided_slice %85 {offsets = [0, 0], sizes = [2, 16], strides = [1, 1]} : vector<2x48xf32> to vector<2x16xf32>
    %95 = vector.extract_strided_slice %81 {offsets = [0, 0], sizes = [2, 16], strides = [1, 1]} : vector<2x48xf32> to vector<2x16xf32>
    %96 = arith.addf %94, %95 : vector<2x16xf32>
    %97 = arith.negf %96 : vector<2x16xf32>
    %98 = math.exp %97 : vector<2x16xf32>
    %cst_30 = arith.constant 1.000000e+00 : f32
    %99 = vector.broadcast %cst_30 : f32 to vector<2x16xf32>
    %100 = arith.addf %99, %98 : vector<2x16xf32>
    %101 = arith.divf %99, %100 : vector<2x16xf32>
    %102 = vector.extract_strided_slice %83 {offsets = [0, 16], sizes = [2, 16], strides = [1, 1]} : vector<2x48xf32> to vector<2x16xf32>
    %103 = vector.extract_strided_slice %79 {offsets = [0, 16], sizes = [2, 16], strides = [1, 1]} : vector<2x48xf32> to vector<2x16xf32>
    %104 = arith.addf %102, %103 : vector<2x16xf32>
    %105 = arith.negf %104 : vector<2x16xf32>
    %106 = math.exp %105 : vector<2x16xf32>
    %cst_31 = arith.constant 1.000000e+00 : f32
    %107 = vector.broadcast %cst_31 : f32 to vector<2x16xf32>
    %108 = arith.addf %107, %106 : vector<2x16xf32>
    %109 = arith.divf %107, %108 : vector<2x16xf32>
    %110 = vector.extract_strided_slice %85 {offsets = [0, 16], sizes = [2, 16], strides = [1, 1]} : vector<2x48xf32> to vector<2x16xf32>
    %111 = vector.extract_strided_slice %81 {offsets = [0, 16], sizes = [2, 16], strides = [1, 1]} : vector<2x48xf32> to vector<2x16xf32>
    %112 = arith.addf %110, %111 : vector<2x16xf32>
    %113 = arith.negf %112 : vector<2x16xf32>
    %114 = math.exp %113 : vector<2x16xf32>
    %cst_32 = arith.constant 1.000000e+00 : f32
    %115 = vector.broadcast %cst_32 : f32 to vector<2x16xf32>
    %116 = arith.addf %115, %114 : vector<2x16xf32>
    %117 = arith.divf %115, %116 : vector<2x16xf32>
    %118 = vector.extract_strided_slice %83 {offsets = [0, 32], sizes = [2, 16], strides = [1, 1]} : vector<2x48xf32> to vector<2x16xf32>
    %119 = vector.extract_strided_slice %79 {offsets = [0, 32], sizes = [2, 16], strides = [1, 1]} : vector<2x48xf32> to vector<2x16xf32>
    %120 = arith.mulf %93, %119 : vector<2x16xf32>
    %121 = arith.addf %118, %120 : vector<2x16xf32>
    %122 = math.tanh %121 : vector<2x16xf32>
    %123 = vector.extract_strided_slice %85 {offsets = [0, 32], sizes = [2, 16], strides = [1, 1]} : vector<2x48xf32> to vector<2x16xf32>
    %124 = vector.extract_strided_slice %81 {offsets = [0, 32], sizes = [2, 16], strides = [1, 1]} : vector<2x48xf32> to vector<2x16xf32>
    %125 = arith.mulf %101, %124 : vector<2x16xf32>
    %126 = arith.addf %123, %125 : vector<2x16xf32>
    %127 = math.tanh %126 : vector<2x16xf32>
    %128 = arith.subf %74, %122 : vector<2x16xf32>
    %129 = arith.mulf %109, %128 : vector<2x16xf32>
    %130 = arith.addf %122, %129 : vector<2x16xf32>
    %131 = arith.subf %77, %127 : vector<2x16xf32>
    %132 = arith.mulf %117, %131 : vector<2x16xf32>
    %133 = arith.addf %127, %132 : vector<2x16xf32>
    %cst_33 = arith.constant dense<0.000000e+00> : vector<2x48xf32>
    %134 = tpu.matmul %130, %12, %cst_33 {dimension_numbers = #tpu.dot_dimension_numbers<[1], [0], [0], [1], [0, 0, 1, 1], [], []>} : vector<2x16xf32>, vector<16x48xf32>, vector<2x48xf32> -> vector<2x48xf32>
    %135 = arith.addf %134, %16 : vector<2x48xf32>
    %cst_34 = arith.constant dense<0.000000e+00> : vector<2x48xf32>
    %136 = tpu.matmul %133, %13, %cst_34 {dimension_numbers = #tpu.dot_dimension_numbers<[1], [0], [0], [1], [0, 0, 1, 1], [], []>} : vector<2x16xf32>, vector<16x48xf32>, vector<2x48xf32> -> vector<2x48xf32>
    %137 = arith.addf %136, %19 : vector<2x48xf32>
    %138 = vector.extract_strided_slice %11 {offsets = [0, 2, 0], sizes = [2, 1, 48], strides = [1, 1, 1]} : vector<2x8x96xf32> to vector<2x1x48xf32>
    %139 = vector.shape_cast %138 : vector<2x1x48xf32> to vector<2x48xf32>
    %140 = vector.extract_strided_slice %11 {offsets = [0, 5, 48], sizes = [2, 1, 48], strides = [1, 1, 1]} : vector<2x8x96xf32> to vector<2x1x48xf32>
    %141 = vector.shape_cast %140 : vector<2x1x48xf32> to vector<2x48xf32>
    %142 = vector.extract_strided_slice %139 {offsets = [0, 0], sizes = [2, 16], strides = [1, 1]} : vector<2x48xf32> to vector<2x16xf32>
    %143 = vector.extract_strided_slice %135 {offsets = [0, 0], sizes = [2, 16], strides = [1, 1]} : vector<2x48xf32> to vector<2x16xf32>
    %144 = arith.addf %142, %143 : vector<2x16xf32>
    %145 = arith.negf %144 : vector<2x16xf32>
    %146 = math.exp %145 : vector<2x16xf32>
    %cst_35 = arith.constant 1.000000e+00 : f32
    %147 = vector.broadcast %cst_35 : f32 to vector<2x16xf32>
    %148 = arith.addf %147, %146 : vector<2x16xf32>
    %149 = arith.divf %147, %148 : vector<2x16xf32>
    %150 = vector.extract_strided_slice %141 {offsets = [0, 0], sizes = [2, 16], strides = [1, 1]} : vector<2x48xf32> to vector<2x16xf32>
    %151 = vector.extract_strided_slice %137 {offsets = [0, 0], sizes = [2, 16], strides = [1, 1]} : vector<2x48xf32> to vector<2x16xf32>
    %152 = arith.addf %150, %151 : vector<2x16xf32>
    %153 = arith.negf %152 : vector<2x16xf32>
    %154 = math.exp %153 : vector<2x16xf32>
    %cst_36 = arith.constant 1.000000e+00 : f32
    %155 = vector.broadcast %cst_36 : f32 to vector<2x16xf32>
    %156 = arith.addf %155, %154 : vector<2x16xf32>
    %157 = arith.divf %155, %156 : vector<2x16xf32>
    %158 = vector.extract_strided_slice %139 {offsets = [0, 16], sizes = [2, 16], strides = [1, 1]} : vector<2x48xf32> to vector<2x16xf32>
    %159 = vector.extract_strided_slice %135 {offsets = [0, 16], sizes = [2, 16], strides = [1, 1]} : vector<2x48xf32> to vector<2x16xf32>
    %160 = arith.addf %158, %159 : vector<2x16xf32>
    %161 = arith.negf %160 : vector<2x16xf32>
    %162 = math.exp %161 : vector<2x16xf32>
    %cst_37 = arith.constant 1.000000e+00 : f32
    %163 = vector.broadcast %cst_37 : f32 to vector<2x16xf32>
    %164 = arith.addf %163, %162 : vector<2x16xf32>
    %165 = arith.divf %163, %164 : vector<2x16xf32>
    %166 = vector.extract_strided_slice %141 {offsets = [0, 16], sizes = [2, 16], strides = [1, 1]} : vector<2x48xf32> to vector<2x16xf32>
    %167 = vector.extract_strided_slice %137 {offsets = [0, 16], sizes = [2, 16], strides = [1, 1]} : vector<2x48xf32> to vector<2x16xf32>
    %168 = arith.addf %166, %167 : vector<2x16xf32>
    %169 = arith.negf %168 : vector<2x16xf32>
    %170 = math.exp %169 : vector<2x16xf32>
    %cst_38 = arith.constant 1.000000e+00 : f32
    %171 = vector.broadcast %cst_38 : f32 to vector<2x16xf32>
    %172 = arith.addf %171, %170 : vector<2x16xf32>
    %173 = arith.divf %171, %172 : vector<2x16xf32>
    %174 = vector.extract_strided_slice %139 {offsets = [0, 32], sizes = [2, 16], strides = [1, 1]} : vector<2x48xf32> to vector<2x16xf32>
    %175 = vector.extract_strided_slice %135 {offsets = [0, 32], sizes = [2, 16], strides = [1, 1]} : vector<2x48xf32> to vector<2x16xf32>
    %176 = arith.mulf %149, %175 : vector<2x16xf32>
    %177 = arith.addf %174, %176 : vector<2x16xf32>
    %178 = math.tanh %177 : vector<2x16xf32>
    %179 = vector.extract_strided_slice %141 {offsets = [0, 32], sizes = [2, 16], strides = [1, 1]} : vector<2x48xf32> to vector<2x16xf32>
    %180 = vector.extract_strided_slice %137 {offsets = [0, 32], sizes = [2, 16], strides = [1, 1]} : vector<2x48xf32> to vector<2x16xf32>
    %181 = arith.mulf %157, %180 : vector<2x16xf32>
    %182 = arith.addf %179, %181 : vector<2x16xf32>
    %183 = math.tanh %182 : vector<2x16xf32>
    %184 = arith.subf %130, %178 : vector<2x16xf32>
    %185 = arith.mulf %165, %184 : vector<2x16xf32>
    %186 = arith.addf %178, %185 : vector<2x16xf32>
    %187 = arith.subf %133, %183 : vector<2x16xf32>
    %188 = arith.mulf %173, %187 : vector<2x16xf32>
    %189 = arith.addf %183, %188 : vector<2x16xf32>
    %cst_39 = arith.constant dense<0.000000e+00> : vector<2x48xf32>
    %190 = tpu.matmul %186, %12, %cst_39 {dimension_numbers = #tpu.dot_dimension_numbers<[1], [0], [0], [1], [0, 0, 1, 1], [], []>} : vector<2x16xf32>, vector<16x48xf32>, vector<2x48xf32> -> vector<2x48xf32>
    %191 = arith.addf %190, %16 : vector<2x48xf32>
    %cst_40 = arith.constant dense<0.000000e+00> : vector<2x48xf32>
    %192 = tpu.matmul %189, %13, %cst_40 {dimension_numbers = #tpu.dot_dimension_numbers<[1], [0], [0], [1], [0, 0, 1, 1], [], []>} : vector<2x16xf32>, vector<16x48xf32>, vector<2x48xf32> -> vector<2x48xf32>
    %193 = arith.addf %192, %19 : vector<2x48xf32>
    %194 = vector.extract_strided_slice %11 {offsets = [0, 3, 0], sizes = [2, 1, 48], strides = [1, 1, 1]} : vector<2x8x96xf32> to vector<2x1x48xf32>
    %195 = vector.shape_cast %194 : vector<2x1x48xf32> to vector<2x48xf32>
    %196 = vector.extract_strided_slice %11 {offsets = [0, 4, 48], sizes = [2, 1, 48], strides = [1, 1, 1]} : vector<2x8x96xf32> to vector<2x1x48xf32>
    %197 = vector.shape_cast %196 : vector<2x1x48xf32> to vector<2x48xf32>
    %198 = vector.extract_strided_slice %195 {offsets = [0, 0], sizes = [2, 16], strides = [1, 1]} : vector<2x48xf32> to vector<2x16xf32>
    %199 = vector.extract_strided_slice %191 {offsets = [0, 0], sizes = [2, 16], strides = [1, 1]} : vector<2x48xf32> to vector<2x16xf32>
    %200 = arith.addf %198, %199 : vector<2x16xf32>
    %201 = arith.negf %200 : vector<2x16xf32>
    %202 = math.exp %201 : vector<2x16xf32>
    %cst_41 = arith.constant 1.000000e+00 : f32
    %203 = vector.broadcast %cst_41 : f32 to vector<2x16xf32>
    %204 = arith.addf %203, %202 : vector<2x16xf32>
    %205 = arith.divf %203, %204 : vector<2x16xf32>
    %206 = vector.extract_strided_slice %197 {offsets = [0, 0], sizes = [2, 16], strides = [1, 1]} : vector<2x48xf32> to vector<2x16xf32>
    %207 = vector.extract_strided_slice %193 {offsets = [0, 0], sizes = [2, 16], strides = [1, 1]} : vector<2x48xf32> to vector<2x16xf32>
    %208 = arith.addf %206, %207 : vector<2x16xf32>
    %209 = arith.negf %208 : vector<2x16xf32>
    %210 = math.exp %209 : vector<2x16xf32>
    %cst_42 = arith.constant 1.000000e+00 : f32
    %211 = vector.broadcast %cst_42 : f32 to vector<2x16xf32>
    %212 = arith.addf %211, %210 : vector<2x16xf32>
    %213 = arith.divf %211, %212 : vector<2x16xf32>
    %214 = vector.extract_strided_slice %195 {offsets = [0, 16], sizes = [2, 16], strides = [1, 1]} : vector<2x48xf32> to vector<2x16xf32>
    %215 = vector.extract_strided_slice %191 {offsets = [0, 16], sizes = [2, 16], strides = [1, 1]} : vector<2x48xf32> to vector<2x16xf32>
    %216 = arith.addf %214, %215 : vector<2x16xf32>
    %217 = arith.negf %216 : vector<2x16xf32>
    %218 = math.exp %217 : vector<2x16xf32>
    %cst_43 = arith.constant 1.000000e+00 : f32
    %219 = vector.broadcast %cst_43 : f32 to vector<2x16xf32>
    %220 = arith.addf %219, %218 : vector<2x16xf32>
    %221 = arith.divf %219, %220 : vector<2x16xf32>
    %222 = vector.extract_strided_slice %197 {offsets = [0, 16], sizes = [2, 16], strides = [1, 1]} : vector<2x48xf32> to vector<2x16xf32>
    %223 = vector.extract_strided_slice %193 {offsets = [0, 16], sizes = [2, 16], strides = [1, 1]} : vector<2x48xf32> to vector<2x16xf32>
    %224 = arith.addf %222, %223 : vector<2x16xf32>
    %225 = arith.negf %224 : vector<2x16xf32>
    %226 = math.exp %225 : vector<2x16xf32>
    %cst_44 = arith.constant 1.000000e+00 : f32
    %227 = vector.broadcast %cst_44 : f32 to vector<2x16xf32>
    %228 = arith.addf %227, %226 : vector<2x16xf32>
    %229 = arith.divf %227, %228 : vector<2x16xf32>
    %230 = vector.extract_strided_slice %195 {offsets = [0, 32], sizes = [2, 16], strides = [1, 1]} : vector<2x48xf32> to vector<2x16xf32>
    %231 = vector.extract_strided_slice %191 {offsets = [0, 32], sizes = [2, 16], strides = [1, 1]} : vector<2x48xf32> to vector<2x16xf32>
    %232 = arith.mulf %205, %231 : vector<2x16xf32>
    %233 = arith.addf %230, %232 : vector<2x16xf32>
    %234 = math.tanh %233 : vector<2x16xf32>
    %235 = vector.extract_strided_slice %197 {offsets = [0, 32], sizes = [2, 16], strides = [1, 1]} : vector<2x48xf32> to vector<2x16xf32>
    %236 = vector.extract_strided_slice %193 {offsets = [0, 32], sizes = [2, 16], strides = [1, 1]} : vector<2x48xf32> to vector<2x16xf32>
    %237 = arith.mulf %213, %236 : vector<2x16xf32>
    %238 = arith.addf %235, %237 : vector<2x16xf32>
    %239 = math.tanh %238 : vector<2x16xf32>
    %240 = arith.subf %186, %234 : vector<2x16xf32>
    %241 = arith.mulf %221, %240 : vector<2x16xf32>
    %242 = arith.addf %234, %241 : vector<2x16xf32>
    %243 = arith.subf %189, %239 : vector<2x16xf32>
    %244 = arith.mulf %229, %243 : vector<2x16xf32>
    %245 = arith.addf %239, %244 : vector<2x16xf32>
    %cst_45 = arith.constant dense<0.000000e+00> : vector<2x48xf32>
    %246 = tpu.matmul %242, %12, %cst_45 {dimension_numbers = #tpu.dot_dimension_numbers<[1], [0], [0], [1], [0, 0, 1, 1], [], []>} : vector<2x16xf32>, vector<16x48xf32>, vector<2x48xf32> -> vector<2x48xf32>
    %247 = arith.addf %246, %16 : vector<2x48xf32>
    %cst_46 = arith.constant dense<0.000000e+00> : vector<2x48xf32>
    %248 = tpu.matmul %245, %13, %cst_46 {dimension_numbers = #tpu.dot_dimension_numbers<[1], [0], [0], [1], [0, 0, 1, 1], [], []>} : vector<2x16xf32>, vector<16x48xf32>, vector<2x48xf32> -> vector<2x48xf32>
    %249 = arith.addf %248, %19 : vector<2x48xf32>
    %250 = vector.extract_strided_slice %11 {offsets = [0, 4, 0], sizes = [2, 1, 48], strides = [1, 1, 1]} : vector<2x8x96xf32> to vector<2x1x48xf32>
    %251 = vector.shape_cast %250 : vector<2x1x48xf32> to vector<2x48xf32>
    %252 = vector.extract_strided_slice %11 {offsets = [0, 3, 48], sizes = [2, 1, 48], strides = [1, 1, 1]} : vector<2x8x96xf32> to vector<2x1x48xf32>
    %253 = vector.shape_cast %252 : vector<2x1x48xf32> to vector<2x48xf32>
    %254 = vector.extract_strided_slice %251 {offsets = [0, 0], sizes = [2, 16], strides = [1, 1]} : vector<2x48xf32> to vector<2x16xf32>
    %255 = vector.extract_strided_slice %247 {offsets = [0, 0], sizes = [2, 16], strides = [1, 1]} : vector<2x48xf32> to vector<2x16xf32>
    %256 = arith.addf %254, %255 : vector<2x16xf32>
    %257 = arith.negf %256 : vector<2x16xf32>
    %258 = math.exp %257 : vector<2x16xf32>
    %cst_47 = arith.constant 1.000000e+00 : f32
    %259 = vector.broadcast %cst_47 : f32 to vector<2x16xf32>
    %260 = arith.addf %259, %258 : vector<2x16xf32>
    %261 = arith.divf %259, %260 : vector<2x16xf32>
    %262 = vector.extract_strided_slice %253 {offsets = [0, 0], sizes = [2, 16], strides = [1, 1]} : vector<2x48xf32> to vector<2x16xf32>
    %263 = vector.extract_strided_slice %249 {offsets = [0, 0], sizes = [2, 16], strides = [1, 1]} : vector<2x48xf32> to vector<2x16xf32>
    %264 = arith.addf %262, %263 : vector<2x16xf32>
    %265 = arith.negf %264 : vector<2x16xf32>
    %266 = math.exp %265 : vector<2x16xf32>
    %cst_48 = arith.constant 1.000000e+00 : f32
    %267 = vector.broadcast %cst_48 : f32 to vector<2x16xf32>
    %268 = arith.addf %267, %266 : vector<2x16xf32>
    %269 = arith.divf %267, %268 : vector<2x16xf32>
    %270 = vector.extract_strided_slice %251 {offsets = [0, 16], sizes = [2, 16], strides = [1, 1]} : vector<2x48xf32> to vector<2x16xf32>
    %271 = vector.extract_strided_slice %247 {offsets = [0, 16], sizes = [2, 16], strides = [1, 1]} : vector<2x48xf32> to vector<2x16xf32>
    %272 = arith.addf %270, %271 : vector<2x16xf32>
    %273 = arith.negf %272 : vector<2x16xf32>
    %274 = math.exp %273 : vector<2x16xf32>
    %cst_49 = arith.constant 1.000000e+00 : f32
    %275 = vector.broadcast %cst_49 : f32 to vector<2x16xf32>
    %276 = arith.addf %275, %274 : vector<2x16xf32>
    %277 = arith.divf %275, %276 : vector<2x16xf32>
    %278 = vector.extract_strided_slice %253 {offsets = [0, 16], sizes = [2, 16], strides = [1, 1]} : vector<2x48xf32> to vector<2x16xf32>
    %279 = vector.extract_strided_slice %249 {offsets = [0, 16], sizes = [2, 16], strides = [1, 1]} : vector<2x48xf32> to vector<2x16xf32>
    %280 = arith.addf %278, %279 : vector<2x16xf32>
    %281 = arith.negf %280 : vector<2x16xf32>
    %282 = math.exp %281 : vector<2x16xf32>
    %cst_50 = arith.constant 1.000000e+00 : f32
    %283 = vector.broadcast %cst_50 : f32 to vector<2x16xf32>
    %284 = arith.addf %283, %282 : vector<2x16xf32>
    %285 = arith.divf %283, %284 : vector<2x16xf32>
    %286 = vector.extract_strided_slice %251 {offsets = [0, 32], sizes = [2, 16], strides = [1, 1]} : vector<2x48xf32> to vector<2x16xf32>
    %287 = vector.extract_strided_slice %247 {offsets = [0, 32], sizes = [2, 16], strides = [1, 1]} : vector<2x48xf32> to vector<2x16xf32>
    %288 = arith.mulf %261, %287 : vector<2x16xf32>
    %289 = arith.addf %286, %288 : vector<2x16xf32>
    %290 = math.tanh %289 : vector<2x16xf32>
    %291 = vector.extract_strided_slice %253 {offsets = [0, 32], sizes = [2, 16], strides = [1, 1]} : vector<2x48xf32> to vector<2x16xf32>
    %292 = vector.extract_strided_slice %249 {offsets = [0, 32], sizes = [2, 16], strides = [1, 1]} : vector<2x48xf32> to vector<2x16xf32>
    %293 = arith.mulf %269, %292 : vector<2x16xf32>
    %294 = arith.addf %291, %293 : vector<2x16xf32>
    %295 = math.tanh %294 : vector<2x16xf32>
    %296 = arith.subf %242, %290 : vector<2x16xf32>
    %297 = arith.mulf %277, %296 : vector<2x16xf32>
    %298 = arith.addf %290, %297 : vector<2x16xf32>
    %299 = arith.subf %245, %295 : vector<2x16xf32>
    %300 = arith.mulf %285, %299 : vector<2x16xf32>
    %301 = arith.addf %295, %300 : vector<2x16xf32>
    %cst_51 = arith.constant dense<0.000000e+00> : vector<2x48xf32>
    %302 = tpu.matmul %298, %12, %cst_51 {dimension_numbers = #tpu.dot_dimension_numbers<[1], [0], [0], [1], [0, 0, 1, 1], [], []>} : vector<2x16xf32>, vector<16x48xf32>, vector<2x48xf32> -> vector<2x48xf32>
    %303 = arith.addf %302, %16 : vector<2x48xf32>
    %cst_52 = arith.constant dense<0.000000e+00> : vector<2x48xf32>
    %304 = tpu.matmul %301, %13, %cst_52 {dimension_numbers = #tpu.dot_dimension_numbers<[1], [0], [0], [1], [0, 0, 1, 1], [], []>} : vector<2x16xf32>, vector<16x48xf32>, vector<2x48xf32> -> vector<2x48xf32>
    %305 = arith.addf %304, %19 : vector<2x48xf32>
    %306 = vector.extract_strided_slice %11 {offsets = [0, 5, 0], sizes = [2, 1, 48], strides = [1, 1, 1]} : vector<2x8x96xf32> to vector<2x1x48xf32>
    %307 = vector.shape_cast %306 : vector<2x1x48xf32> to vector<2x48xf32>
    %308 = vector.extract_strided_slice %11 {offsets = [0, 2, 48], sizes = [2, 1, 48], strides = [1, 1, 1]} : vector<2x8x96xf32> to vector<2x1x48xf32>
    %309 = vector.shape_cast %308 : vector<2x1x48xf32> to vector<2x48xf32>
    %310 = vector.extract_strided_slice %307 {offsets = [0, 0], sizes = [2, 16], strides = [1, 1]} : vector<2x48xf32> to vector<2x16xf32>
    %311 = vector.extract_strided_slice %303 {offsets = [0, 0], sizes = [2, 16], strides = [1, 1]} : vector<2x48xf32> to vector<2x16xf32>
    %312 = arith.addf %310, %311 : vector<2x16xf32>
    %313 = arith.negf %312 : vector<2x16xf32>
    %314 = math.exp %313 : vector<2x16xf32>
    %cst_53 = arith.constant 1.000000e+00 : f32
    %315 = vector.broadcast %cst_53 : f32 to vector<2x16xf32>
    %316 = arith.addf %315, %314 : vector<2x16xf32>
    %317 = arith.divf %315, %316 : vector<2x16xf32>
    %318 = vector.extract_strided_slice %309 {offsets = [0, 0], sizes = [2, 16], strides = [1, 1]} : vector<2x48xf32> to vector<2x16xf32>
    %319 = vector.extract_strided_slice %305 {offsets = [0, 0], sizes = [2, 16], strides = [1, 1]} : vector<2x48xf32> to vector<2x16xf32>
    %320 = arith.addf %318, %319 : vector<2x16xf32>
    %321 = arith.negf %320 : vector<2x16xf32>
    %322 = math.exp %321 : vector<2x16xf32>
    %cst_54 = arith.constant 1.000000e+00 : f32
    %323 = vector.broadcast %cst_54 : f32 to vector<2x16xf32>
    %324 = arith.addf %323, %322 : vector<2x16xf32>
    %325 = arith.divf %323, %324 : vector<2x16xf32>
    %326 = vector.extract_strided_slice %307 {offsets = [0, 16], sizes = [2, 16], strides = [1, 1]} : vector<2x48xf32> to vector<2x16xf32>
    %327 = vector.extract_strided_slice %303 {offsets = [0, 16], sizes = [2, 16], strides = [1, 1]} : vector<2x48xf32> to vector<2x16xf32>
    %328 = arith.addf %326, %327 : vector<2x16xf32>
    %329 = arith.negf %328 : vector<2x16xf32>
    %330 = math.exp %329 : vector<2x16xf32>
    %cst_55 = arith.constant 1.000000e+00 : f32
    %331 = vector.broadcast %cst_55 : f32 to vector<2x16xf32>
    %332 = arith.addf %331, %330 : vector<2x16xf32>
    %333 = arith.divf %331, %332 : vector<2x16xf32>
    %334 = vector.extract_strided_slice %309 {offsets = [0, 16], sizes = [2, 16], strides = [1, 1]} : vector<2x48xf32> to vector<2x16xf32>
    %335 = vector.extract_strided_slice %305 {offsets = [0, 16], sizes = [2, 16], strides = [1, 1]} : vector<2x48xf32> to vector<2x16xf32>
    %336 = arith.addf %334, %335 : vector<2x16xf32>
    %337 = arith.negf %336 : vector<2x16xf32>
    %338 = math.exp %337 : vector<2x16xf32>
    %cst_56 = arith.constant 1.000000e+00 : f32
    %339 = vector.broadcast %cst_56 : f32 to vector<2x16xf32>
    %340 = arith.addf %339, %338 : vector<2x16xf32>
    %341 = arith.divf %339, %340 : vector<2x16xf32>
    %342 = vector.extract_strided_slice %307 {offsets = [0, 32], sizes = [2, 16], strides = [1, 1]} : vector<2x48xf32> to vector<2x16xf32>
    %343 = vector.extract_strided_slice %303 {offsets = [0, 32], sizes = [2, 16], strides = [1, 1]} : vector<2x48xf32> to vector<2x16xf32>
    %344 = arith.mulf %317, %343 : vector<2x16xf32>
    %345 = arith.addf %342, %344 : vector<2x16xf32>
    %346 = math.tanh %345 : vector<2x16xf32>
    %347 = vector.extract_strided_slice %309 {offsets = [0, 32], sizes = [2, 16], strides = [1, 1]} : vector<2x48xf32> to vector<2x16xf32>
    %348 = vector.extract_strided_slice %305 {offsets = [0, 32], sizes = [2, 16], strides = [1, 1]} : vector<2x48xf32> to vector<2x16xf32>
    %349 = arith.mulf %325, %348 : vector<2x16xf32>
    %350 = arith.addf %347, %349 : vector<2x16xf32>
    %351 = math.tanh %350 : vector<2x16xf32>
    %352 = arith.subf %298, %346 : vector<2x16xf32>
    %353 = arith.mulf %333, %352 : vector<2x16xf32>
    %354 = arith.addf %346, %353 : vector<2x16xf32>
    %355 = arith.subf %301, %351 : vector<2x16xf32>
    %356 = arith.mulf %341, %355 : vector<2x16xf32>
    %357 = arith.addf %351, %356 : vector<2x16xf32>
    %cst_57 = arith.constant dense<0.000000e+00> : vector<2x48xf32>
    %358 = tpu.matmul %354, %12, %cst_57 {dimension_numbers = #tpu.dot_dimension_numbers<[1], [0], [0], [1], [0, 0, 1, 1], [], []>} : vector<2x16xf32>, vector<16x48xf32>, vector<2x48xf32> -> vector<2x48xf32>
    %359 = arith.addf %358, %16 : vector<2x48xf32>
    %cst_58 = arith.constant dense<0.000000e+00> : vector<2x48xf32>
    %360 = tpu.matmul %357, %13, %cst_58 {dimension_numbers = #tpu.dot_dimension_numbers<[1], [0], [0], [1], [0, 0, 1, 1], [], []>} : vector<2x16xf32>, vector<16x48xf32>, vector<2x48xf32> -> vector<2x48xf32>
    %361 = arith.addf %360, %19 : vector<2x48xf32>
    %362 = vector.extract_strided_slice %11 {offsets = [0, 6, 0], sizes = [2, 1, 48], strides = [1, 1, 1]} : vector<2x8x96xf32> to vector<2x1x48xf32>
    %363 = vector.shape_cast %362 : vector<2x1x48xf32> to vector<2x48xf32>
    %364 = vector.extract_strided_slice %11 {offsets = [0, 1, 48], sizes = [2, 1, 48], strides = [1, 1, 1]} : vector<2x8x96xf32> to vector<2x1x48xf32>
    %365 = vector.shape_cast %364 : vector<2x1x48xf32> to vector<2x48xf32>
    %366 = vector.extract_strided_slice %363 {offsets = [0, 0], sizes = [2, 16], strides = [1, 1]} : vector<2x48xf32> to vector<2x16xf32>
    %367 = vector.extract_strided_slice %359 {offsets = [0, 0], sizes = [2, 16], strides = [1, 1]} : vector<2x48xf32> to vector<2x16xf32>
    %368 = arith.addf %366, %367 : vector<2x16xf32>
    %369 = arith.negf %368 : vector<2x16xf32>
    %370 = math.exp %369 : vector<2x16xf32>
    %cst_59 = arith.constant 1.000000e+00 : f32
    %371 = vector.broadcast %cst_59 : f32 to vector<2x16xf32>
    %372 = arith.addf %371, %370 : vector<2x16xf32>
    %373 = arith.divf %371, %372 : vector<2x16xf32>
    %374 = vector.extract_strided_slice %365 {offsets = [0, 0], sizes = [2, 16], strides = [1, 1]} : vector<2x48xf32> to vector<2x16xf32>
    %375 = vector.extract_strided_slice %361 {offsets = [0, 0], sizes = [2, 16], strides = [1, 1]} : vector<2x48xf32> to vector<2x16xf32>
    %376 = arith.addf %374, %375 : vector<2x16xf32>
    %377 = arith.negf %376 : vector<2x16xf32>
    %378 = math.exp %377 : vector<2x16xf32>
    %cst_60 = arith.constant 1.000000e+00 : f32
    %379 = vector.broadcast %cst_60 : f32 to vector<2x16xf32>
    %380 = arith.addf %379, %378 : vector<2x16xf32>
    %381 = arith.divf %379, %380 : vector<2x16xf32>
    %382 = vector.extract_strided_slice %363 {offsets = [0, 16], sizes = [2, 16], strides = [1, 1]} : vector<2x48xf32> to vector<2x16xf32>
    %383 = vector.extract_strided_slice %359 {offsets = [0, 16], sizes = [2, 16], strides = [1, 1]} : vector<2x48xf32> to vector<2x16xf32>
    %384 = arith.addf %382, %383 : vector<2x16xf32>
    %385 = arith.negf %384 : vector<2x16xf32>
    %386 = math.exp %385 : vector<2x16xf32>
    %cst_61 = arith.constant 1.000000e+00 : f32
    %387 = vector.broadcast %cst_61 : f32 to vector<2x16xf32>
    %388 = arith.addf %387, %386 : vector<2x16xf32>
    %389 = arith.divf %387, %388 : vector<2x16xf32>
    %390 = vector.extract_strided_slice %365 {offsets = [0, 16], sizes = [2, 16], strides = [1, 1]} : vector<2x48xf32> to vector<2x16xf32>
    %391 = vector.extract_strided_slice %361 {offsets = [0, 16], sizes = [2, 16], strides = [1, 1]} : vector<2x48xf32> to vector<2x16xf32>
    %392 = arith.addf %390, %391 : vector<2x16xf32>
    %393 = arith.negf %392 : vector<2x16xf32>
    %394 = math.exp %393 : vector<2x16xf32>
    %cst_62 = arith.constant 1.000000e+00 : f32
    %395 = vector.broadcast %cst_62 : f32 to vector<2x16xf32>
    %396 = arith.addf %395, %394 : vector<2x16xf32>
    %397 = arith.divf %395, %396 : vector<2x16xf32>
    %398 = vector.extract_strided_slice %363 {offsets = [0, 32], sizes = [2, 16], strides = [1, 1]} : vector<2x48xf32> to vector<2x16xf32>
    %399 = vector.extract_strided_slice %359 {offsets = [0, 32], sizes = [2, 16], strides = [1, 1]} : vector<2x48xf32> to vector<2x16xf32>
    %400 = arith.mulf %373, %399 : vector<2x16xf32>
    %401 = arith.addf %398, %400 : vector<2x16xf32>
    %402 = math.tanh %401 : vector<2x16xf32>
    %403 = vector.extract_strided_slice %365 {offsets = [0, 32], sizes = [2, 16], strides = [1, 1]} : vector<2x48xf32> to vector<2x16xf32>
    %404 = vector.extract_strided_slice %361 {offsets = [0, 32], sizes = [2, 16], strides = [1, 1]} : vector<2x48xf32> to vector<2x16xf32>
    %405 = arith.mulf %381, %404 : vector<2x16xf32>
    %406 = arith.addf %403, %405 : vector<2x16xf32>
    %407 = math.tanh %406 : vector<2x16xf32>
    %408 = arith.subf %354, %402 : vector<2x16xf32>
    %409 = arith.mulf %389, %408 : vector<2x16xf32>
    %410 = arith.addf %402, %409 : vector<2x16xf32>
    %411 = arith.subf %357, %407 : vector<2x16xf32>
    %412 = arith.mulf %397, %411 : vector<2x16xf32>
    %413 = arith.addf %407, %412 : vector<2x16xf32>
    %cst_63 = arith.constant dense<0.000000e+00> : vector<2x48xf32>
    %414 = tpu.matmul %410, %12, %cst_63 {dimension_numbers = #tpu.dot_dimension_numbers<[1], [0], [0], [1], [0, 0, 1, 1], [], []>} : vector<2x16xf32>, vector<16x48xf32>, vector<2x48xf32> -> vector<2x48xf32>
    %415 = arith.addf %414, %16 : vector<2x48xf32>
    %cst_64 = arith.constant dense<0.000000e+00> : vector<2x48xf32>
    %416 = tpu.matmul %413, %13, %cst_64 {dimension_numbers = #tpu.dot_dimension_numbers<[1], [0], [0], [1], [0, 0, 1, 1], [], []>} : vector<2x16xf32>, vector<16x48xf32>, vector<2x48xf32> -> vector<2x48xf32>
    %417 = arith.addf %416, %19 : vector<2x48xf32>
    %418 = vector.extract_strided_slice %11 {offsets = [0, 7, 0], sizes = [2, 1, 48], strides = [1, 1, 1]} : vector<2x8x96xf32> to vector<2x1x48xf32>
    %419 = vector.shape_cast %418 : vector<2x1x48xf32> to vector<2x48xf32>
    %420 = vector.extract_strided_slice %11 {offsets = [0, 0, 48], sizes = [2, 1, 48], strides = [1, 1, 1]} : vector<2x8x96xf32> to vector<2x1x48xf32>
    %421 = vector.shape_cast %420 : vector<2x1x48xf32> to vector<2x48xf32>
    %422 = vector.extract_strided_slice %419 {offsets = [0, 0], sizes = [2, 16], strides = [1, 1]} : vector<2x48xf32> to vector<2x16xf32>
    %423 = vector.extract_strided_slice %415 {offsets = [0, 0], sizes = [2, 16], strides = [1, 1]} : vector<2x48xf32> to vector<2x16xf32>
    %424 = arith.addf %422, %423 : vector<2x16xf32>
    %425 = arith.negf %424 : vector<2x16xf32>
    %426 = math.exp %425 : vector<2x16xf32>
    %cst_65 = arith.constant 1.000000e+00 : f32
    %427 = vector.broadcast %cst_65 : f32 to vector<2x16xf32>
    %428 = arith.addf %427, %426 : vector<2x16xf32>
    %429 = arith.divf %427, %428 : vector<2x16xf32>
    %430 = vector.extract_strided_slice %421 {offsets = [0, 0], sizes = [2, 16], strides = [1, 1]} : vector<2x48xf32> to vector<2x16xf32>
    %431 = vector.extract_strided_slice %417 {offsets = [0, 0], sizes = [2, 16], strides = [1, 1]} : vector<2x48xf32> to vector<2x16xf32>
    %432 = arith.addf %430, %431 : vector<2x16xf32>
    %433 = arith.negf %432 : vector<2x16xf32>
    %434 = math.exp %433 : vector<2x16xf32>
    %cst_66 = arith.constant 1.000000e+00 : f32
    %435 = vector.broadcast %cst_66 : f32 to vector<2x16xf32>
    %436 = arith.addf %435, %434 : vector<2x16xf32>
    %437 = arith.divf %435, %436 : vector<2x16xf32>
    %438 = vector.extract_strided_slice %419 {offsets = [0, 16], sizes = [2, 16], strides = [1, 1]} : vector<2x48xf32> to vector<2x16xf32>
    %439 = vector.extract_strided_slice %415 {offsets = [0, 16], sizes = [2, 16], strides = [1, 1]} : vector<2x48xf32> to vector<2x16xf32>
    %440 = arith.addf %438, %439 : vector<2x16xf32>
    %441 = arith.negf %440 : vector<2x16xf32>
    %442 = math.exp %441 : vector<2x16xf32>
    %cst_67 = arith.constant 1.000000e+00 : f32
    %443 = vector.broadcast %cst_67 : f32 to vector<2x16xf32>
    %444 = arith.addf %443, %442 : vector<2x16xf32>
    %445 = arith.divf %443, %444 : vector<2x16xf32>
    %446 = vector.extract_strided_slice %421 {offsets = [0, 16], sizes = [2, 16], strides = [1, 1]} : vector<2x48xf32> to vector<2x16xf32>
    %447 = vector.extract_strided_slice %417 {offsets = [0, 16], sizes = [2, 16], strides = [1, 1]} : vector<2x48xf32> to vector<2x16xf32>
    %448 = arith.addf %446, %447 : vector<2x16xf32>
    %449 = arith.negf %448 : vector<2x16xf32>
    %450 = math.exp %449 : vector<2x16xf32>
    %cst_68 = arith.constant 1.000000e+00 : f32
    %451 = vector.broadcast %cst_68 : f32 to vector<2x16xf32>
    %452 = arith.addf %451, %450 : vector<2x16xf32>
    %453 = arith.divf %451, %452 : vector<2x16xf32>
    %454 = vector.extract_strided_slice %419 {offsets = [0, 32], sizes = [2, 16], strides = [1, 1]} : vector<2x48xf32> to vector<2x16xf32>
    %455 = vector.extract_strided_slice %415 {offsets = [0, 32], sizes = [2, 16], strides = [1, 1]} : vector<2x48xf32> to vector<2x16xf32>
    %456 = arith.mulf %429, %455 : vector<2x16xf32>
    %457 = arith.addf %454, %456 : vector<2x16xf32>
    %458 = math.tanh %457 : vector<2x16xf32>
    %459 = vector.extract_strided_slice %421 {offsets = [0, 32], sizes = [2, 16], strides = [1, 1]} : vector<2x48xf32> to vector<2x16xf32>
    %460 = vector.extract_strided_slice %417 {offsets = [0, 32], sizes = [2, 16], strides = [1, 1]} : vector<2x48xf32> to vector<2x16xf32>
    %461 = arith.mulf %437, %460 : vector<2x16xf32>
    %462 = arith.addf %459, %461 : vector<2x16xf32>
    %463 = math.tanh %462 : vector<2x16xf32>
    %464 = arith.subf %410, %458 : vector<2x16xf32>
    %465 = arith.mulf %445, %464 : vector<2x16xf32>
    %466 = arith.addf %458, %465 : vector<2x16xf32>
    %467 = arith.subf %413, %463 : vector<2x16xf32>
    %468 = arith.mulf %453, %467 : vector<2x16xf32>
    %469 = arith.addf %463, %468 : vector<2x16xf32>
    %470 = vector.shape_cast %74 : vector<2x16xf32> to vector<2x1x16xf32>
    %471 = vector.shape_cast %130 : vector<2x16xf32> to vector<2x1x16xf32>
    %472 = vector.shape_cast %186 : vector<2x16xf32> to vector<2x1x16xf32>
    %473 = vector.shape_cast %242 : vector<2x16xf32> to vector<2x1x16xf32>
    %474 = vector.shape_cast %298 : vector<2x16xf32> to vector<2x1x16xf32>
    %475 = vector.shape_cast %354 : vector<2x16xf32> to vector<2x1x16xf32>
    %476 = vector.shape_cast %410 : vector<2x16xf32> to vector<2x1x16xf32>
    %477 = vector.shape_cast %466 : vector<2x16xf32> to vector<2x1x16xf32>
    %478 = tpu.concatenate %470, %471, %472, %473, %474, %475, %476, %477 in 1 : vector<2x1x16xf32>, vector<2x1x16xf32>, vector<2x1x16xf32>, vector<2x1x16xf32>, vector<2x1x16xf32>, vector<2x1x16xf32>, vector<2x1x16xf32>, vector<2x1x16xf32> -> vector<2x8x16xf32>
    %479 = vector.shape_cast %469 : vector<2x16xf32> to vector<2x1x16xf32>
    %480 = vector.shape_cast %413 : vector<2x16xf32> to vector<2x1x16xf32>
    %481 = vector.shape_cast %357 : vector<2x16xf32> to vector<2x1x16xf32>
    %482 = vector.shape_cast %301 : vector<2x16xf32> to vector<2x1x16xf32>
    %483 = vector.shape_cast %245 : vector<2x16xf32> to vector<2x1x16xf32>
    %484 = vector.shape_cast %189 : vector<2x16xf32> to vector<2x1x16xf32>
    %485 = vector.shape_cast %133 : vector<2x16xf32> to vector<2x1x16xf32>
    %486 = vector.shape_cast %77 : vector<2x16xf32> to vector<2x1x16xf32>
    %487 = tpu.concatenate %479, %480, %481, %482, %483, %484, %485, %486 in 1 : vector<2x1x16xf32>, vector<2x1x16xf32>, vector<2x1x16xf32>, vector<2x1x16xf32>, vector<2x1x16xf32>, vector<2x1x16xf32>, vector<2x1x16xf32>, vector<2x1x16xf32> -> vector<2x8x16xf32>
    %488 = tpu.concatenate %478, %487 in 2 : vector<2x8x16xf32>, vector<2x8x16xf32> -> vector<2x8x32xf32>
    %c0_69 = arith.constant 0 : index
    %c0_70 = arith.constant 0 : index
    %489 = vector.load %arg9[%c0_69, %c0_70] : memref<32x96xbf16, #tpu.memory_space<vmem>>, vector<32x96xbf16>
    %490 = vector.shape_cast %488 : vector<2x8x32xf32> to vector<16x32xf32>
    %491 = arith.truncf %490 : vector<16x32xf32> to vector<16x32xbf16>
    %cst_71 = arith.constant dense<0.000000e+00> : vector<16x96xf32>
    %492 = tpu.matmul %491, %489, %cst_71 {dimension_numbers = #tpu.dot_dimension_numbers<[1], [0], [0], [1], [0, 0, 1, 1], [], []>} : vector<16x32xbf16>, vector<32x96xbf16>, vector<16x96xf32> -> vector<16x96xf32>
    %c0_72 = arith.constant 0 : index
    %c0_73 = arith.constant 0 : index
    %493 = vector.load %arg10[%c0_72, %c0_73] : memref<1x96xf32, #tpu.memory_space<vmem>>, vector<1x96xf32>
    %494 = vector.broadcast %493 : vector<1x96xf32> to vector<16x96xf32>
    %495 = arith.addf %492, %494 : vector<16x96xf32>
    %496 = vector.shape_cast %495 : vector<16x96xf32> to vector<2x8x96xf32>
    %c0_74 = arith.constant 0 : index
    %c0_75 = arith.constant 0 : index
    %497 = vector.load %arg11[%c0_74, %c0_75] : memref<16x48xf32, #tpu.memory_space<vmem>>, vector<16x48xf32>
    %c0_76 = arith.constant 0 : index
    %c0_77 = arith.constant 0 : index
    %498 = vector.load %arg13[%c0_76, %c0_77] : memref<16x48xf32, #tpu.memory_space<vmem>>, vector<16x48xf32>
    %c0_78 = arith.constant 0 : index
    %c0_79 = arith.constant 0 : index
    %499 = vector.load %arg12[%c0_78, %c0_79] : memref<1x48xf32, #tpu.memory_space<vmem>>, vector<1x48xf32>
    %500 = vector.shape_cast %499 : vector<1x48xf32> to vector<1x48xf32>
    %501 = vector.broadcast %500 : vector<1x48xf32> to vector<2x48xf32>
    %c0_80 = arith.constant 0 : index
    %c0_81 = arith.constant 0 : index
    %502 = vector.load %arg14[%c0_80, %c0_81] : memref<1x48xf32, #tpu.memory_space<vmem>>, vector<1x48xf32>
    %503 = vector.shape_cast %502 : vector<1x48xf32> to vector<1x48xf32>
    %504 = vector.broadcast %503 : vector<1x48xf32> to vector<2x48xf32>
    %cst_82 = arith.constant 0.000000e+00 : f32
    %505 = vector.broadcast %cst_82 : f32 to vector<2x16xf32>
    %cst_83 = arith.constant 0.000000e+00 : f32
    %506 = vector.broadcast %cst_83 : f32 to vector<2x16xf32>
    %cst_84 = arith.constant dense<0.000000e+00> : vector<2x48xf32>
    %507 = tpu.matmul %505, %497, %cst_84 {dimension_numbers = #tpu.dot_dimension_numbers<[1], [0], [0], [1], [0, 0, 1, 1], [], []>} : vector<2x16xf32>, vector<16x48xf32>, vector<2x48xf32> -> vector<2x48xf32>
    %508 = arith.addf %507, %501 : vector<2x48xf32>
    %cst_85 = arith.constant dense<0.000000e+00> : vector<2x48xf32>
    %509 = tpu.matmul %506, %498, %cst_85 {dimension_numbers = #tpu.dot_dimension_numbers<[1], [0], [0], [1], [0, 0, 1, 1], [], []>} : vector<2x16xf32>, vector<16x48xf32>, vector<2x48xf32> -> vector<2x48xf32>
    %510 = arith.addf %509, %504 : vector<2x48xf32>
    %511 = vector.extract_strided_slice %496 {offsets = [0, 0, 0], sizes = [2, 1, 48], strides = [1, 1, 1]} : vector<2x8x96xf32> to vector<2x1x48xf32>
    %512 = vector.shape_cast %511 : vector<2x1x48xf32> to vector<2x48xf32>
    %513 = vector.extract_strided_slice %496 {offsets = [0, 7, 48], sizes = [2, 1, 48], strides = [1, 1, 1]} : vector<2x8x96xf32> to vector<2x1x48xf32>
    %514 = vector.shape_cast %513 : vector<2x1x48xf32> to vector<2x48xf32>
    %515 = vector.extract_strided_slice %512 {offsets = [0, 0], sizes = [2, 16], strides = [1, 1]} : vector<2x48xf32> to vector<2x16xf32>
    %516 = vector.extract_strided_slice %508 {offsets = [0, 0], sizes = [2, 16], strides = [1, 1]} : vector<2x48xf32> to vector<2x16xf32>
    %517 = arith.addf %515, %516 : vector<2x16xf32>
    %518 = arith.negf %517 : vector<2x16xf32>
    %519 = math.exp %518 : vector<2x16xf32>
    %cst_86 = arith.constant 1.000000e+00 : f32
    %520 = vector.broadcast %cst_86 : f32 to vector<2x16xf32>
    %521 = arith.addf %520, %519 : vector<2x16xf32>
    %522 = arith.divf %520, %521 : vector<2x16xf32>
    %523 = vector.extract_strided_slice %514 {offsets = [0, 0], sizes = [2, 16], strides = [1, 1]} : vector<2x48xf32> to vector<2x16xf32>
    %524 = vector.extract_strided_slice %510 {offsets = [0, 0], sizes = [2, 16], strides = [1, 1]} : vector<2x48xf32> to vector<2x16xf32>
    %525 = arith.addf %523, %524 : vector<2x16xf32>
    %526 = arith.negf %525 : vector<2x16xf32>
    %527 = math.exp %526 : vector<2x16xf32>
    %cst_87 = arith.constant 1.000000e+00 : f32
    %528 = vector.broadcast %cst_87 : f32 to vector<2x16xf32>
    %529 = arith.addf %528, %527 : vector<2x16xf32>
    %530 = arith.divf %528, %529 : vector<2x16xf32>
    %531 = vector.extract_strided_slice %512 {offsets = [0, 16], sizes = [2, 16], strides = [1, 1]} : vector<2x48xf32> to vector<2x16xf32>
    %532 = vector.extract_strided_slice %508 {offsets = [0, 16], sizes = [2, 16], strides = [1, 1]} : vector<2x48xf32> to vector<2x16xf32>
    %533 = arith.addf %531, %532 : vector<2x16xf32>
    %534 = arith.negf %533 : vector<2x16xf32>
    %535 = math.exp %534 : vector<2x16xf32>
    %cst_88 = arith.constant 1.000000e+00 : f32
    %536 = vector.broadcast %cst_88 : f32 to vector<2x16xf32>
    %537 = arith.addf %536, %535 : vector<2x16xf32>
    %538 = arith.divf %536, %537 : vector<2x16xf32>
    %539 = vector.extract_strided_slice %514 {offsets = [0, 16], sizes = [2, 16], strides = [1, 1]} : vector<2x48xf32> to vector<2x16xf32>
    %540 = vector.extract_strided_slice %510 {offsets = [0, 16], sizes = [2, 16], strides = [1, 1]} : vector<2x48xf32> to vector<2x16xf32>
    %541 = arith.addf %539, %540 : vector<2x16xf32>
    %542 = arith.negf %541 : vector<2x16xf32>
    %543 = math.exp %542 : vector<2x16xf32>
    %cst_89 = arith.constant 1.000000e+00 : f32
    %544 = vector.broadcast %cst_89 : f32 to vector<2x16xf32>
    %545 = arith.addf %544, %543 : vector<2x16xf32>
    %546 = arith.divf %544, %545 : vector<2x16xf32>
    %547 = vector.extract_strided_slice %512 {offsets = [0, 32], sizes = [2, 16], strides = [1, 1]} : vector<2x48xf32> to vector<2x16xf32>
    %548 = vector.extract_strided_slice %508 {offsets = [0, 32], sizes = [2, 16], strides = [1, 1]} : vector<2x48xf32> to vector<2x16xf32>
    %549 = arith.mulf %522, %548 : vector<2x16xf32>
    %550 = arith.addf %547, %549 : vector<2x16xf32>
    %551 = math.tanh %550 : vector<2x16xf32>
    %552 = vector.extract_strided_slice %514 {offsets = [0, 32], sizes = [2, 16], strides = [1, 1]} : vector<2x48xf32> to vector<2x16xf32>
    %553 = vector.extract_strided_slice %510 {offsets = [0, 32], sizes = [2, 16], strides = [1, 1]} : vector<2x48xf32> to vector<2x16xf32>
    %554 = arith.mulf %530, %553 : vector<2x16xf32>
    %555 = arith.addf %552, %554 : vector<2x16xf32>
    %556 = math.tanh %555 : vector<2x16xf32>
    %557 = arith.subf %505, %551 : vector<2x16xf32>
    %558 = arith.mulf %538, %557 : vector<2x16xf32>
    %559 = arith.addf %551, %558 : vector<2x16xf32>
    %560 = arith.subf %506, %556 : vector<2x16xf32>
    %561 = arith.mulf %546, %560 : vector<2x16xf32>
    %562 = arith.addf %556, %561 : vector<2x16xf32>
    %cst_90 = arith.constant dense<0.000000e+00> : vector<2x48xf32>
    %563 = tpu.matmul %559, %497, %cst_90 {dimension_numbers = #tpu.dot_dimension_numbers<[1], [0], [0], [1], [0, 0, 1, 1], [], []>} : vector<2x16xf32>, vector<16x48xf32>, vector<2x48xf32> -> vector<2x48xf32>
    %564 = arith.addf %563, %501 : vector<2x48xf32>
    %cst_91 = arith.constant dense<0.000000e+00> : vector<2x48xf32>
    %565 = tpu.matmul %562, %498, %cst_91 {dimension_numbers = #tpu.dot_dimension_numbers<[1], [0], [0], [1], [0, 0, 1, 1], [], []>} : vector<2x16xf32>, vector<16x48xf32>, vector<2x48xf32> -> vector<2x48xf32>
    %566 = arith.addf %565, %504 : vector<2x48xf32>
    %567 = vector.extract_strided_slice %496 {offsets = [0, 1, 0], sizes = [2, 1, 48], strides = [1, 1, 1]} : vector<2x8x96xf32> to vector<2x1x48xf32>
    %568 = vector.shape_cast %567 : vector<2x1x48xf32> to vector<2x48xf32>
    %569 = vector.extract_strided_slice %496 {offsets = [0, 6, 48], sizes = [2, 1, 48], strides = [1, 1, 1]} : vector<2x8x96xf32> to vector<2x1x48xf32>
    %570 = vector.shape_cast %569 : vector<2x1x48xf32> to vector<2x48xf32>
    %571 = vector.extract_strided_slice %568 {offsets = [0, 0], sizes = [2, 16], strides = [1, 1]} : vector<2x48xf32> to vector<2x16xf32>
    %572 = vector.extract_strided_slice %564 {offsets = [0, 0], sizes = [2, 16], strides = [1, 1]} : vector<2x48xf32> to vector<2x16xf32>
    %573 = arith.addf %571, %572 : vector<2x16xf32>
    %574 = arith.negf %573 : vector<2x16xf32>
    %575 = math.exp %574 : vector<2x16xf32>
    %cst_92 = arith.constant 1.000000e+00 : f32
    %576 = vector.broadcast %cst_92 : f32 to vector<2x16xf32>
    %577 = arith.addf %576, %575 : vector<2x16xf32>
    %578 = arith.divf %576, %577 : vector<2x16xf32>
    %579 = vector.extract_strided_slice %570 {offsets = [0, 0], sizes = [2, 16], strides = [1, 1]} : vector<2x48xf32> to vector<2x16xf32>
    %580 = vector.extract_strided_slice %566 {offsets = [0, 0], sizes = [2, 16], strides = [1, 1]} : vector<2x48xf32> to vector<2x16xf32>
    %581 = arith.addf %579, %580 : vector<2x16xf32>
    %582 = arith.negf %581 : vector<2x16xf32>
    %583 = math.exp %582 : vector<2x16xf32>
    %cst_93 = arith.constant 1.000000e+00 : f32
    %584 = vector.broadcast %cst_93 : f32 to vector<2x16xf32>
    %585 = arith.addf %584, %583 : vector<2x16xf32>
    %586 = arith.divf %584, %585 : vector<2x16xf32>
    %587 = vector.extract_strided_slice %568 {offsets = [0, 16], sizes = [2, 16], strides = [1, 1]} : vector<2x48xf32> to vector<2x16xf32>
    %588 = vector.extract_strided_slice %564 {offsets = [0, 16], sizes = [2, 16], strides = [1, 1]} : vector<2x48xf32> to vector<2x16xf32>
    %589 = arith.addf %587, %588 : vector<2x16xf32>
    %590 = arith.negf %589 : vector<2x16xf32>
    %591 = math.exp %590 : vector<2x16xf32>
    %cst_94 = arith.constant 1.000000e+00 : f32
    %592 = vector.broadcast %cst_94 : f32 to vector<2x16xf32>
    %593 = arith.addf %592, %591 : vector<2x16xf32>
    %594 = arith.divf %592, %593 : vector<2x16xf32>
    %595 = vector.extract_strided_slice %570 {offsets = [0, 16], sizes = [2, 16], strides = [1, 1]} : vector<2x48xf32> to vector<2x16xf32>
    %596 = vector.extract_strided_slice %566 {offsets = [0, 16], sizes = [2, 16], strides = [1, 1]} : vector<2x48xf32> to vector<2x16xf32>
    %597 = arith.addf %595, %596 : vector<2x16xf32>
    %598 = arith.negf %597 : vector<2x16xf32>
    %599 = math.exp %598 : vector<2x16xf32>
    %cst_95 = arith.constant 1.000000e+00 : f32
    %600 = vector.broadcast %cst_95 : f32 to vector<2x16xf32>
    %601 = arith.addf %600, %599 : vector<2x16xf32>
    %602 = arith.divf %600, %601 : vector<2x16xf32>
    %603 = vector.extract_strided_slice %568 {offsets = [0, 32], sizes = [2, 16], strides = [1, 1]} : vector<2x48xf32> to vector<2x16xf32>
    %604 = vector.extract_strided_slice %564 {offsets = [0, 32], sizes = [2, 16], strides = [1, 1]} : vector<2x48xf32> to vector<2x16xf32>
    %605 = arith.mulf %578, %604 : vector<2x16xf32>
    %606 = arith.addf %603, %605 : vector<2x16xf32>
    %607 = math.tanh %606 : vector<2x16xf32>
    %608 = vector.extract_strided_slice %570 {offsets = [0, 32], sizes = [2, 16], strides = [1, 1]} : vector<2x48xf32> to vector<2x16xf32>
    %609 = vector.extract_strided_slice %566 {offsets = [0, 32], sizes = [2, 16], strides = [1, 1]} : vector<2x48xf32> to vector<2x16xf32>
    %610 = arith.mulf %586, %609 : vector<2x16xf32>
    %611 = arith.addf %608, %610 : vector<2x16xf32>
    %612 = math.tanh %611 : vector<2x16xf32>
    %613 = arith.subf %559, %607 : vector<2x16xf32>
    %614 = arith.mulf %594, %613 : vector<2x16xf32>
    %615 = arith.addf %607, %614 : vector<2x16xf32>
    %616 = arith.subf %562, %612 : vector<2x16xf32>
    %617 = arith.mulf %602, %616 : vector<2x16xf32>
    %618 = arith.addf %612, %617 : vector<2x16xf32>
    %cst_96 = arith.constant dense<0.000000e+00> : vector<2x48xf32>
    %619 = tpu.matmul %615, %497, %cst_96 {dimension_numbers = #tpu.dot_dimension_numbers<[1], [0], [0], [1], [0, 0, 1, 1], [], []>} : vector<2x16xf32>, vector<16x48xf32>, vector<2x48xf32> -> vector<2x48xf32>
    %620 = arith.addf %619, %501 : vector<2x48xf32>
    %cst_97 = arith.constant dense<0.000000e+00> : vector<2x48xf32>
    %621 = tpu.matmul %618, %498, %cst_97 {dimension_numbers = #tpu.dot_dimension_numbers<[1], [0], [0], [1], [0, 0, 1, 1], [], []>} : vector<2x16xf32>, vector<16x48xf32>, vector<2x48xf32> -> vector<2x48xf32>
    %622 = arith.addf %621, %504 : vector<2x48xf32>
    %623 = vector.extract_strided_slice %496 {offsets = [0, 2, 0], sizes = [2, 1, 48], strides = [1, 1, 1]} : vector<2x8x96xf32> to vector<2x1x48xf32>
    %624 = vector.shape_cast %623 : vector<2x1x48xf32> to vector<2x48xf32>
    %625 = vector.extract_strided_slice %496 {offsets = [0, 5, 48], sizes = [2, 1, 48], strides = [1, 1, 1]} : vector<2x8x96xf32> to vector<2x1x48xf32>
    %626 = vector.shape_cast %625 : vector<2x1x48xf32> to vector<2x48xf32>
    %627 = vector.extract_strided_slice %624 {offsets = [0, 0], sizes = [2, 16], strides = [1, 1]} : vector<2x48xf32> to vector<2x16xf32>
    %628 = vector.extract_strided_slice %620 {offsets = [0, 0], sizes = [2, 16], strides = [1, 1]} : vector<2x48xf32> to vector<2x16xf32>
    %629 = arith.addf %627, %628 : vector<2x16xf32>
    %630 = arith.negf %629 : vector<2x16xf32>
    %631 = math.exp %630 : vector<2x16xf32>
    %cst_98 = arith.constant 1.000000e+00 : f32
    %632 = vector.broadcast %cst_98 : f32 to vector<2x16xf32>
    %633 = arith.addf %632, %631 : vector<2x16xf32>
    %634 = arith.divf %632, %633 : vector<2x16xf32>
    %635 = vector.extract_strided_slice %626 {offsets = [0, 0], sizes = [2, 16], strides = [1, 1]} : vector<2x48xf32> to vector<2x16xf32>
    %636 = vector.extract_strided_slice %622 {offsets = [0, 0], sizes = [2, 16], strides = [1, 1]} : vector<2x48xf32> to vector<2x16xf32>
    %637 = arith.addf %635, %636 : vector<2x16xf32>
    %638 = arith.negf %637 : vector<2x16xf32>
    %639 = math.exp %638 : vector<2x16xf32>
    %cst_99 = arith.constant 1.000000e+00 : f32
    %640 = vector.broadcast %cst_99 : f32 to vector<2x16xf32>
    %641 = arith.addf %640, %639 : vector<2x16xf32>
    %642 = arith.divf %640, %641 : vector<2x16xf32>
    %643 = vector.extract_strided_slice %624 {offsets = [0, 16], sizes = [2, 16], strides = [1, 1]} : vector<2x48xf32> to vector<2x16xf32>
    %644 = vector.extract_strided_slice %620 {offsets = [0, 16], sizes = [2, 16], strides = [1, 1]} : vector<2x48xf32> to vector<2x16xf32>
    %645 = arith.addf %643, %644 : vector<2x16xf32>
    %646 = arith.negf %645 : vector<2x16xf32>
    %647 = math.exp %646 : vector<2x16xf32>
    %cst_100 = arith.constant 1.000000e+00 : f32
    %648 = vector.broadcast %cst_100 : f32 to vector<2x16xf32>
    %649 = arith.addf %648, %647 : vector<2x16xf32>
    %650 = arith.divf %648, %649 : vector<2x16xf32>
    %651 = vector.extract_strided_slice %626 {offsets = [0, 16], sizes = [2, 16], strides = [1, 1]} : vector<2x48xf32> to vector<2x16xf32>
    %652 = vector.extract_strided_slice %622 {offsets = [0, 16], sizes = [2, 16], strides = [1, 1]} : vector<2x48xf32> to vector<2x16xf32>
    %653 = arith.addf %651, %652 : vector<2x16xf32>
    %654 = arith.negf %653 : vector<2x16xf32>
    %655 = math.exp %654 : vector<2x16xf32>
    %cst_101 = arith.constant 1.000000e+00 : f32
    %656 = vector.broadcast %cst_101 : f32 to vector<2x16xf32>
    %657 = arith.addf %656, %655 : vector<2x16xf32>
    %658 = arith.divf %656, %657 : vector<2x16xf32>
    %659 = vector.extract_strided_slice %624 {offsets = [0, 32], sizes = [2, 16], strides = [1, 1]} : vector<2x48xf32> to vector<2x16xf32>
    %660 = vector.extract_strided_slice %620 {offsets = [0, 32], sizes = [2, 16], strides = [1, 1]} : vector<2x48xf32> to vector<2x16xf32>
    %661 = arith.mulf %634, %660 : vector<2x16xf32>
    %662 = arith.addf %659, %661 : vector<2x16xf32>
    %663 = math.tanh %662 : vector<2x16xf32>
    %664 = vector.extract_strided_slice %626 {offsets = [0, 32], sizes = [2, 16], strides = [1, 1]} : vector<2x48xf32> to vector<2x16xf32>
    %665 = vector.extract_strided_slice %622 {offsets = [0, 32], sizes = [2, 16], strides = [1, 1]} : vector<2x48xf32> to vector<2x16xf32>
    %666 = arith.mulf %642, %665 : vector<2x16xf32>
    %667 = arith.addf %664, %666 : vector<2x16xf32>
    %668 = math.tanh %667 : vector<2x16xf32>
    %669 = arith.subf %615, %663 : vector<2x16xf32>
    %670 = arith.mulf %650, %669 : vector<2x16xf32>
    %671 = arith.addf %663, %670 : vector<2x16xf32>
    %672 = arith.subf %618, %668 : vector<2x16xf32>
    %673 = arith.mulf %658, %672 : vector<2x16xf32>
    %674 = arith.addf %668, %673 : vector<2x16xf32>
    %cst_102 = arith.constant dense<0.000000e+00> : vector<2x48xf32>
    %675 = tpu.matmul %671, %497, %cst_102 {dimension_numbers = #tpu.dot_dimension_numbers<[1], [0], [0], [1], [0, 0, 1, 1], [], []>} : vector<2x16xf32>, vector<16x48xf32>, vector<2x48xf32> -> vector<2x48xf32>
    %676 = arith.addf %675, %501 : vector<2x48xf32>
    %cst_103 = arith.constant dense<0.000000e+00> : vector<2x48xf32>
    %677 = tpu.matmul %674, %498, %cst_103 {dimension_numbers = #tpu.dot_dimension_numbers<[1], [0], [0], [1], [0, 0, 1, 1], [], []>} : vector<2x16xf32>, vector<16x48xf32>, vector<2x48xf32> -> vector<2x48xf32>
    %678 = arith.addf %677, %504 : vector<2x48xf32>
    %679 = vector.extract_strided_slice %496 {offsets = [0, 3, 0], sizes = [2, 1, 48], strides = [1, 1, 1]} : vector<2x8x96xf32> to vector<2x1x48xf32>
    %680 = vector.shape_cast %679 : vector<2x1x48xf32> to vector<2x48xf32>
    %681 = vector.extract_strided_slice %496 {offsets = [0, 4, 48], sizes = [2, 1, 48], strides = [1, 1, 1]} : vector<2x8x96xf32> to vector<2x1x48xf32>
    %682 = vector.shape_cast %681 : vector<2x1x48xf32> to vector<2x48xf32>
    %683 = vector.extract_strided_slice %680 {offsets = [0, 0], sizes = [2, 16], strides = [1, 1]} : vector<2x48xf32> to vector<2x16xf32>
    %684 = vector.extract_strided_slice %676 {offsets = [0, 0], sizes = [2, 16], strides = [1, 1]} : vector<2x48xf32> to vector<2x16xf32>
    %685 = arith.addf %683, %684 : vector<2x16xf32>
    %686 = arith.negf %685 : vector<2x16xf32>
    %687 = math.exp %686 : vector<2x16xf32>
    %cst_104 = arith.constant 1.000000e+00 : f32
    %688 = vector.broadcast %cst_104 : f32 to vector<2x16xf32>
    %689 = arith.addf %688, %687 : vector<2x16xf32>
    %690 = arith.divf %688, %689 : vector<2x16xf32>
    %691 = vector.extract_strided_slice %682 {offsets = [0, 0], sizes = [2, 16], strides = [1, 1]} : vector<2x48xf32> to vector<2x16xf32>
    %692 = vector.extract_strided_slice %678 {offsets = [0, 0], sizes = [2, 16], strides = [1, 1]} : vector<2x48xf32> to vector<2x16xf32>
    %693 = arith.addf %691, %692 : vector<2x16xf32>
    %694 = arith.negf %693 : vector<2x16xf32>
    %695 = math.exp %694 : vector<2x16xf32>
    %cst_105 = arith.constant 1.000000e+00 : f32
    %696 = vector.broadcast %cst_105 : f32 to vector<2x16xf32>
    %697 = arith.addf %696, %695 : vector<2x16xf32>
    %698 = arith.divf %696, %697 : vector<2x16xf32>
    %699 = vector.extract_strided_slice %680 {offsets = [0, 16], sizes = [2, 16], strides = [1, 1]} : vector<2x48xf32> to vector<2x16xf32>
    %700 = vector.extract_strided_slice %676 {offsets = [0, 16], sizes = [2, 16], strides = [1, 1]} : vector<2x48xf32> to vector<2x16xf32>
    %701 = arith.addf %699, %700 : vector<2x16xf32>
    %702 = arith.negf %701 : vector<2x16xf32>
    %703 = math.exp %702 : vector<2x16xf32>
    %cst_106 = arith.constant 1.000000e+00 : f32
    %704 = vector.broadcast %cst_106 : f32 to vector<2x16xf32>
    %705 = arith.addf %704, %703 : vector<2x16xf32>
    %706 = arith.divf %704, %705 : vector<2x16xf32>
    %707 = vector.extract_strided_slice %682 {offsets = [0, 16], sizes = [2, 16], strides = [1, 1]} : vector<2x48xf32> to vector<2x16xf32>
    %708 = vector.extract_strided_slice %678 {offsets = [0, 16], sizes = [2, 16], strides = [1, 1]} : vector<2x48xf32> to vector<2x16xf32>
    %709 = arith.addf %707, %708 : vector<2x16xf32>
    %710 = arith.negf %709 : vector<2x16xf32>
    %711 = math.exp %710 : vector<2x16xf32>
    %cst_107 = arith.constant 1.000000e+00 : f32
    %712 = vector.broadcast %cst_107 : f32 to vector<2x16xf32>
    %713 = arith.addf %712, %711 : vector<2x16xf32>
    %714 = arith.divf %712, %713 : vector<2x16xf32>
    %715 = vector.extract_strided_slice %680 {offsets = [0, 32], sizes = [2, 16], strides = [1, 1]} : vector<2x48xf32> to vector<2x16xf32>
    %716 = vector.extract_strided_slice %676 {offsets = [0, 32], sizes = [2, 16], strides = [1, 1]} : vector<2x48xf32> to vector<2x16xf32>
    %717 = arith.mulf %690, %716 : vector<2x16xf32>
    %718 = arith.addf %715, %717 : vector<2x16xf32>
    %719 = math.tanh %718 : vector<2x16xf32>
    %720 = vector.extract_strided_slice %682 {offsets = [0, 32], sizes = [2, 16], strides = [1, 1]} : vector<2x48xf32> to vector<2x16xf32>
    %721 = vector.extract_strided_slice %678 {offsets = [0, 32], sizes = [2, 16], strides = [1, 1]} : vector<2x48xf32> to vector<2x16xf32>
    %722 = arith.mulf %698, %721 : vector<2x16xf32>
    %723 = arith.addf %720, %722 : vector<2x16xf32>
    %724 = math.tanh %723 : vector<2x16xf32>
    %725 = arith.subf %671, %719 : vector<2x16xf32>
    %726 = arith.mulf %706, %725 : vector<2x16xf32>
    %727 = arith.addf %719, %726 : vector<2x16xf32>
    %728 = arith.subf %674, %724 : vector<2x16xf32>
    %729 = arith.mulf %714, %728 : vector<2x16xf32>
    %730 = arith.addf %724, %729 : vector<2x16xf32>
    %cst_108 = arith.constant dense<0.000000e+00> : vector<2x48xf32>
    %731 = tpu.matmul %727, %497, %cst_108 {dimension_numbers = #tpu.dot_dimension_numbers<[1], [0], [0], [1], [0, 0, 1, 1], [], []>} : vector<2x16xf32>, vector<16x48xf32>, vector<2x48xf32> -> vector<2x48xf32>
    %732 = arith.addf %731, %501 : vector<2x48xf32>
    %cst_109 = arith.constant dense<0.000000e+00> : vector<2x48xf32>
    %733 = tpu.matmul %730, %498, %cst_109 {dimension_numbers = #tpu.dot_dimension_numbers<[1], [0], [0], [1], [0, 0, 1, 1], [], []>} : vector<2x16xf32>, vector<16x48xf32>, vector<2x48xf32> -> vector<2x48xf32>
    %734 = arith.addf %733, %504 : vector<2x48xf32>
    %735 = vector.extract_strided_slice %496 {offsets = [0, 4, 0], sizes = [2, 1, 48], strides = [1, 1, 1]} : vector<2x8x96xf32> to vector<2x1x48xf32>
    %736 = vector.shape_cast %735 : vector<2x1x48xf32> to vector<2x48xf32>
    %737 = vector.extract_strided_slice %496 {offsets = [0, 3, 48], sizes = [2, 1, 48], strides = [1, 1, 1]} : vector<2x8x96xf32> to vector<2x1x48xf32>
    %738 = vector.shape_cast %737 : vector<2x1x48xf32> to vector<2x48xf32>
    %739 = vector.extract_strided_slice %736 {offsets = [0, 0], sizes = [2, 16], strides = [1, 1]} : vector<2x48xf32> to vector<2x16xf32>
    %740 = vector.extract_strided_slice %732 {offsets = [0, 0], sizes = [2, 16], strides = [1, 1]} : vector<2x48xf32> to vector<2x16xf32>
    %741 = arith.addf %739, %740 : vector<2x16xf32>
    %742 = arith.negf %741 : vector<2x16xf32>
    %743 = math.exp %742 : vector<2x16xf32>
    %cst_110 = arith.constant 1.000000e+00 : f32
    %744 = vector.broadcast %cst_110 : f32 to vector<2x16xf32>
    %745 = arith.addf %744, %743 : vector<2x16xf32>
    %746 = arith.divf %744, %745 : vector<2x16xf32>
    %747 = vector.extract_strided_slice %738 {offsets = [0, 0], sizes = [2, 16], strides = [1, 1]} : vector<2x48xf32> to vector<2x16xf32>
    %748 = vector.extract_strided_slice %734 {offsets = [0, 0], sizes = [2, 16], strides = [1, 1]} : vector<2x48xf32> to vector<2x16xf32>
    %749 = arith.addf %747, %748 : vector<2x16xf32>
    %750 = arith.negf %749 : vector<2x16xf32>
    %751 = math.exp %750 : vector<2x16xf32>
    %cst_111 = arith.constant 1.000000e+00 : f32
    %752 = vector.broadcast %cst_111 : f32 to vector<2x16xf32>
    %753 = arith.addf %752, %751 : vector<2x16xf32>
    %754 = arith.divf %752, %753 : vector<2x16xf32>
    %755 = vector.extract_strided_slice %736 {offsets = [0, 16], sizes = [2, 16], strides = [1, 1]} : vector<2x48xf32> to vector<2x16xf32>
    %756 = vector.extract_strided_slice %732 {offsets = [0, 16], sizes = [2, 16], strides = [1, 1]} : vector<2x48xf32> to vector<2x16xf32>
    %757 = arith.addf %755, %756 : vector<2x16xf32>
    %758 = arith.negf %757 : vector<2x16xf32>
    %759 = math.exp %758 : vector<2x16xf32>
    %cst_112 = arith.constant 1.000000e+00 : f32
    %760 = vector.broadcast %cst_112 : f32 to vector<2x16xf32>
    %761 = arith.addf %760, %759 : vector<2x16xf32>
    %762 = arith.divf %760, %761 : vector<2x16xf32>
    %763 = vector.extract_strided_slice %738 {offsets = [0, 16], sizes = [2, 16], strides = [1, 1]} : vector<2x48xf32> to vector<2x16xf32>
    %764 = vector.extract_strided_slice %734 {offsets = [0, 16], sizes = [2, 16], strides = [1, 1]} : vector<2x48xf32> to vector<2x16xf32>
    %765 = arith.addf %763, %764 : vector<2x16xf32>
    %766 = arith.negf %765 : vector<2x16xf32>
    %767 = math.exp %766 : vector<2x16xf32>
    %cst_113 = arith.constant 1.000000e+00 : f32
    %768 = vector.broadcast %cst_113 : f32 to vector<2x16xf32>
    %769 = arith.addf %768, %767 : vector<2x16xf32>
    %770 = arith.divf %768, %769 : vector<2x16xf32>
    %771 = vector.extract_strided_slice %736 {offsets = [0, 32], sizes = [2, 16], strides = [1, 1]} : vector<2x48xf32> to vector<2x16xf32>
    %772 = vector.extract_strided_slice %732 {offsets = [0, 32], sizes = [2, 16], strides = [1, 1]} : vector<2x48xf32> to vector<2x16xf32>
    %773 = arith.mulf %746, %772 : vector<2x16xf32>
    %774 = arith.addf %771, %773 : vector<2x16xf32>
    %775 = math.tanh %774 : vector<2x16xf32>
    %776 = vector.extract_strided_slice %738 {offsets = [0, 32], sizes = [2, 16], strides = [1, 1]} : vector<2x48xf32> to vector<2x16xf32>
    %777 = vector.extract_strided_slice %734 {offsets = [0, 32], sizes = [2, 16], strides = [1, 1]} : vector<2x48xf32> to vector<2x16xf32>
    %778 = arith.mulf %754, %777 : vector<2x16xf32>
    %779 = arith.addf %776, %778 : vector<2x16xf32>
    %780 = math.tanh %779 : vector<2x16xf32>
    %781 = arith.subf %727, %775 : vector<2x16xf32>
    %782 = arith.mulf %762, %781 : vector<2x16xf32>
    %783 = arith.addf %775, %782 : vector<2x16xf32>
    %784 = arith.subf %730, %780 : vector<2x16xf32>
    %785 = arith.mulf %770, %784 : vector<2x16xf32>
    %786 = arith.addf %780, %785 : vector<2x16xf32>
    %cst_114 = arith.constant dense<0.000000e+00> : vector<2x48xf32>
    %787 = tpu.matmul %783, %497, %cst_114 {dimension_numbers = #tpu.dot_dimension_numbers<[1], [0], [0], [1], [0, 0, 1, 1], [], []>} : vector<2x16xf32>, vector<16x48xf32>, vector<2x48xf32> -> vector<2x48xf32>
    %788 = arith.addf %787, %501 : vector<2x48xf32>
    %cst_115 = arith.constant dense<0.000000e+00> : vector<2x48xf32>
    %789 = tpu.matmul %786, %498, %cst_115 {dimension_numbers = #tpu.dot_dimension_numbers<[1], [0], [0], [1], [0, 0, 1, 1], [], []>} : vector<2x16xf32>, vector<16x48xf32>, vector<2x48xf32> -> vector<2x48xf32>
    %790 = arith.addf %789, %504 : vector<2x48xf32>
    %791 = vector.extract_strided_slice %496 {offsets = [0, 5, 0], sizes = [2, 1, 48], strides = [1, 1, 1]} : vector<2x8x96xf32> to vector<2x1x48xf32>
    %792 = vector.shape_cast %791 : vector<2x1x48xf32> to vector<2x48xf32>
    %793 = vector.extract_strided_slice %496 {offsets = [0, 2, 48], sizes = [2, 1, 48], strides = [1, 1, 1]} : vector<2x8x96xf32> to vector<2x1x48xf32>
    %794 = vector.shape_cast %793 : vector<2x1x48xf32> to vector<2x48xf32>
    %795 = vector.extract_strided_slice %792 {offsets = [0, 0], sizes = [2, 16], strides = [1, 1]} : vector<2x48xf32> to vector<2x16xf32>
    %796 = vector.extract_strided_slice %788 {offsets = [0, 0], sizes = [2, 16], strides = [1, 1]} : vector<2x48xf32> to vector<2x16xf32>
    %797 = arith.addf %795, %796 : vector<2x16xf32>
    %798 = arith.negf %797 : vector<2x16xf32>
    %799 = math.exp %798 : vector<2x16xf32>
    %cst_116 = arith.constant 1.000000e+00 : f32
    %800 = vector.broadcast %cst_116 : f32 to vector<2x16xf32>
    %801 = arith.addf %800, %799 : vector<2x16xf32>
    %802 = arith.divf %800, %801 : vector<2x16xf32>
    %803 = vector.extract_strided_slice %794 {offsets = [0, 0], sizes = [2, 16], strides = [1, 1]} : vector<2x48xf32> to vector<2x16xf32>
    %804 = vector.extract_strided_slice %790 {offsets = [0, 0], sizes = [2, 16], strides = [1, 1]} : vector<2x48xf32> to vector<2x16xf32>
    %805 = arith.addf %803, %804 : vector<2x16xf32>
    %806 = arith.negf %805 : vector<2x16xf32>
    %807 = math.exp %806 : vector<2x16xf32>
    %cst_117 = arith.constant 1.000000e+00 : f32
    %808 = vector.broadcast %cst_117 : f32 to vector<2x16xf32>
    %809 = arith.addf %808, %807 : vector<2x16xf32>
    %810 = arith.divf %808, %809 : vector<2x16xf32>
    %811 = vector.extract_strided_slice %792 {offsets = [0, 16], sizes = [2, 16], strides = [1, 1]} : vector<2x48xf32> to vector<2x16xf32>
    %812 = vector.extract_strided_slice %788 {offsets = [0, 16], sizes = [2, 16], strides = [1, 1]} : vector<2x48xf32> to vector<2x16xf32>
    %813 = arith.addf %811, %812 : vector<2x16xf32>
    %814 = arith.negf %813 : vector<2x16xf32>
    %815 = math.exp %814 : vector<2x16xf32>
    %cst_118 = arith.constant 1.000000e+00 : f32
    %816 = vector.broadcast %cst_118 : f32 to vector<2x16xf32>
    %817 = arith.addf %816, %815 : vector<2x16xf32>
    %818 = arith.divf %816, %817 : vector<2x16xf32>
    %819 = vector.extract_strided_slice %794 {offsets = [0, 16], sizes = [2, 16], strides = [1, 1]} : vector<2x48xf32> to vector<2x16xf32>
    %820 = vector.extract_strided_slice %790 {offsets = [0, 16], sizes = [2, 16], strides = [1, 1]} : vector<2x48xf32> to vector<2x16xf32>
    %821 = arith.addf %819, %820 : vector<2x16xf32>
    %822 = arith.negf %821 : vector<2x16xf32>
    %823 = math.exp %822 : vector<2x16xf32>
    %cst_119 = arith.constant 1.000000e+00 : f32
    %824 = vector.broadcast %cst_119 : f32 to vector<2x16xf32>
    %825 = arith.addf %824, %823 : vector<2x16xf32>
    %826 = arith.divf %824, %825 : vector<2x16xf32>
    %827 = vector.extract_strided_slice %792 {offsets = [0, 32], sizes = [2, 16], strides = [1, 1]} : vector<2x48xf32> to vector<2x16xf32>
    %828 = vector.extract_strided_slice %788 {offsets = [0, 32], sizes = [2, 16], strides = [1, 1]} : vector<2x48xf32> to vector<2x16xf32>
    %829 = arith.mulf %802, %828 : vector<2x16xf32>
    %830 = arith.addf %827, %829 : vector<2x16xf32>
    %831 = math.tanh %830 : vector<2x16xf32>
    %832 = vector.extract_strided_slice %794 {offsets = [0, 32], sizes = [2, 16], strides = [1, 1]} : vector<2x48xf32> to vector<2x16xf32>
    %833 = vector.extract_strided_slice %790 {offsets = [0, 32], sizes = [2, 16], strides = [1, 1]} : vector<2x48xf32> to vector<2x16xf32>
    %834 = arith.mulf %810, %833 : vector<2x16xf32>
    %835 = arith.addf %832, %834 : vector<2x16xf32>
    %836 = math.tanh %835 : vector<2x16xf32>
    %837 = arith.subf %783, %831 : vector<2x16xf32>
    %838 = arith.mulf %818, %837 : vector<2x16xf32>
    %839 = arith.addf %831, %838 : vector<2x16xf32>
    %840 = arith.subf %786, %836 : vector<2x16xf32>
    %841 = arith.mulf %826, %840 : vector<2x16xf32>
    %842 = arith.addf %836, %841 : vector<2x16xf32>
    %cst_120 = arith.constant dense<0.000000e+00> : vector<2x48xf32>
    %843 = tpu.matmul %839, %497, %cst_120 {dimension_numbers = #tpu.dot_dimension_numbers<[1], [0], [0], [1], [0, 0, 1, 1], [], []>} : vector<2x16xf32>, vector<16x48xf32>, vector<2x48xf32> -> vector<2x48xf32>
    %844 = arith.addf %843, %501 : vector<2x48xf32>
    %cst_121 = arith.constant dense<0.000000e+00> : vector<2x48xf32>
    %845 = tpu.matmul %842, %498, %cst_121 {dimension_numbers = #tpu.dot_dimension_numbers<[1], [0], [0], [1], [0, 0, 1, 1], [], []>} : vector<2x16xf32>, vector<16x48xf32>, vector<2x48xf32> -> vector<2x48xf32>
    %846 = arith.addf %845, %504 : vector<2x48xf32>
    %847 = vector.extract_strided_slice %496 {offsets = [0, 6, 0], sizes = [2, 1, 48], strides = [1, 1, 1]} : vector<2x8x96xf32> to vector<2x1x48xf32>
    %848 = vector.shape_cast %847 : vector<2x1x48xf32> to vector<2x48xf32>
    %849 = vector.extract_strided_slice %496 {offsets = [0, 1, 48], sizes = [2, 1, 48], strides = [1, 1, 1]} : vector<2x8x96xf32> to vector<2x1x48xf32>
    %850 = vector.shape_cast %849 : vector<2x1x48xf32> to vector<2x48xf32>
    %851 = vector.extract_strided_slice %848 {offsets = [0, 0], sizes = [2, 16], strides = [1, 1]} : vector<2x48xf32> to vector<2x16xf32>
    %852 = vector.extract_strided_slice %844 {offsets = [0, 0], sizes = [2, 16], strides = [1, 1]} : vector<2x48xf32> to vector<2x16xf32>
    %853 = arith.addf %851, %852 : vector<2x16xf32>
    %854 = arith.negf %853 : vector<2x16xf32>
    %855 = math.exp %854 : vector<2x16xf32>
    %cst_122 = arith.constant 1.000000e+00 : f32
    %856 = vector.broadcast %cst_122 : f32 to vector<2x16xf32>
    %857 = arith.addf %856, %855 : vector<2x16xf32>
    %858 = arith.divf %856, %857 : vector<2x16xf32>
    %859 = vector.extract_strided_slice %850 {offsets = [0, 0], sizes = [2, 16], strides = [1, 1]} : vector<2x48xf32> to vector<2x16xf32>
    %860 = vector.extract_strided_slice %846 {offsets = [0, 0], sizes = [2, 16], strides = [1, 1]} : vector<2x48xf32> to vector<2x16xf32>
    %861 = arith.addf %859, %860 : vector<2x16xf32>
    %862 = arith.negf %861 : vector<2x16xf32>
    %863 = math.exp %862 : vector<2x16xf32>
    %cst_123 = arith.constant 1.000000e+00 : f32
    %864 = vector.broadcast %cst_123 : f32 to vector<2x16xf32>
    %865 = arith.addf %864, %863 : vector<2x16xf32>
    %866 = arith.divf %864, %865 : vector<2x16xf32>
    %867 = vector.extract_strided_slice %848 {offsets = [0, 16], sizes = [2, 16], strides = [1, 1]} : vector<2x48xf32> to vector<2x16xf32>
    %868 = vector.extract_strided_slice %844 {offsets = [0, 16], sizes = [2, 16], strides = [1, 1]} : vector<2x48xf32> to vector<2x16xf32>
    %869 = arith.addf %867, %868 : vector<2x16xf32>
    %870 = arith.negf %869 : vector<2x16xf32>
    %871 = math.exp %870 : vector<2x16xf32>
    %cst_124 = arith.constant 1.000000e+00 : f32
    %872 = vector.broadcast %cst_124 : f32 to vector<2x16xf32>
    %873 = arith.addf %872, %871 : vector<2x16xf32>
    %874 = arith.divf %872, %873 : vector<2x16xf32>
    %875 = vector.extract_strided_slice %850 {offsets = [0, 16], sizes = [2, 16], strides = [1, 1]} : vector<2x48xf32> to vector<2x16xf32>
    %876 = vector.extract_strided_slice %846 {offsets = [0, 16], sizes = [2, 16], strides = [1, 1]} : vector<2x48xf32> to vector<2x16xf32>
    %877 = arith.addf %875, %876 : vector<2x16xf32>
    %878 = arith.negf %877 : vector<2x16xf32>
    %879 = math.exp %878 : vector<2x16xf32>
    %cst_125 = arith.constant 1.000000e+00 : f32
    %880 = vector.broadcast %cst_125 : f32 to vector<2x16xf32>
    %881 = arith.addf %880, %879 : vector<2x16xf32>
    %882 = arith.divf %880, %881 : vector<2x16xf32>
    %883 = vector.extract_strided_slice %848 {offsets = [0, 32], sizes = [2, 16], strides = [1, 1]} : vector<2x48xf32> to vector<2x16xf32>
    %884 = vector.extract_strided_slice %844 {offsets = [0, 32], sizes = [2, 16], strides = [1, 1]} : vector<2x48xf32> to vector<2x16xf32>
    %885 = arith.mulf %858, %884 : vector<2x16xf32>
    %886 = arith.addf %883, %885 : vector<2x16xf32>
    %887 = math.tanh %886 : vector<2x16xf32>
    %888 = vector.extract_strided_slice %850 {offsets = [0, 32], sizes = [2, 16], strides = [1, 1]} : vector<2x48xf32> to vector<2x16xf32>
    %889 = vector.extract_strided_slice %846 {offsets = [0, 32], sizes = [2, 16], strides = [1, 1]} : vector<2x48xf32> to vector<2x16xf32>
    %890 = arith.mulf %866, %889 : vector<2x16xf32>
    %891 = arith.addf %888, %890 : vector<2x16xf32>
    %892 = math.tanh %891 : vector<2x16xf32>
    %893 = arith.subf %839, %887 : vector<2x16xf32>
    %894 = arith.mulf %874, %893 : vector<2x16xf32>
    %895 = arith.addf %887, %894 : vector<2x16xf32>
    %896 = arith.subf %842, %892 : vector<2x16xf32>
    %897 = arith.mulf %882, %896 : vector<2x16xf32>
    %898 = arith.addf %892, %897 : vector<2x16xf32>
    %cst_126 = arith.constant dense<0.000000e+00> : vector<2x48xf32>
    %899 = tpu.matmul %895, %497, %cst_126 {dimension_numbers = #tpu.dot_dimension_numbers<[1], [0], [0], [1], [0, 0, 1, 1], [], []>} : vector<2x16xf32>, vector<16x48xf32>, vector<2x48xf32> -> vector<2x48xf32>
    %900 = arith.addf %899, %501 : vector<2x48xf32>
    %cst_127 = arith.constant dense<0.000000e+00> : vector<2x48xf32>
    %901 = tpu.matmul %898, %498, %cst_127 {dimension_numbers = #tpu.dot_dimension_numbers<[1], [0], [0], [1], [0, 0, 1, 1], [], []>} : vector<2x16xf32>, vector<16x48xf32>, vector<2x48xf32> -> vector<2x48xf32>
    %902 = arith.addf %901, %504 : vector<2x48xf32>
    %903 = vector.extract_strided_slice %496 {offsets = [0, 7, 0], sizes = [2, 1, 48], strides = [1, 1, 1]} : vector<2x8x96xf32> to vector<2x1x48xf32>
    %904 = vector.shape_cast %903 : vector<2x1x48xf32> to vector<2x48xf32>
    %905 = vector.extract_strided_slice %496 {offsets = [0, 0, 48], sizes = [2, 1, 48], strides = [1, 1, 1]} : vector<2x8x96xf32> to vector<2x1x48xf32>
    %906 = vector.shape_cast %905 : vector<2x1x48xf32> to vector<2x48xf32>
    %907 = vector.extract_strided_slice %904 {offsets = [0, 0], sizes = [2, 16], strides = [1, 1]} : vector<2x48xf32> to vector<2x16xf32>
    %908 = vector.extract_strided_slice %900 {offsets = [0, 0], sizes = [2, 16], strides = [1, 1]} : vector<2x48xf32> to vector<2x16xf32>
    %909 = arith.addf %907, %908 : vector<2x16xf32>
    %910 = arith.negf %909 : vector<2x16xf32>
    %911 = math.exp %910 : vector<2x16xf32>
    %cst_128 = arith.constant 1.000000e+00 : f32
    %912 = vector.broadcast %cst_128 : f32 to vector<2x16xf32>
    %913 = arith.addf %912, %911 : vector<2x16xf32>
    %914 = arith.divf %912, %913 : vector<2x16xf32>
    %915 = vector.extract_strided_slice %906 {offsets = [0, 0], sizes = [2, 16], strides = [1, 1]} : vector<2x48xf32> to vector<2x16xf32>
    %916 = vector.extract_strided_slice %902 {offsets = [0, 0], sizes = [2, 16], strides = [1, 1]} : vector<2x48xf32> to vector<2x16xf32>
    %917 = arith.addf %915, %916 : vector<2x16xf32>
    %918 = arith.negf %917 : vector<2x16xf32>
    %919 = math.exp %918 : vector<2x16xf32>
    %cst_129 = arith.constant 1.000000e+00 : f32
    %920 = vector.broadcast %cst_129 : f32 to vector<2x16xf32>
    %921 = arith.addf %920, %919 : vector<2x16xf32>
    %922 = arith.divf %920, %921 : vector<2x16xf32>
    %923 = vector.extract_strided_slice %904 {offsets = [0, 16], sizes = [2, 16], strides = [1, 1]} : vector<2x48xf32> to vector<2x16xf32>
    %924 = vector.extract_strided_slice %900 {offsets = [0, 16], sizes = [2, 16], strides = [1, 1]} : vector<2x48xf32> to vector<2x16xf32>
    %925 = arith.addf %923, %924 : vector<2x16xf32>
    %926 = arith.negf %925 : vector<2x16xf32>
    %927 = math.exp %926 : vector<2x16xf32>
    %cst_130 = arith.constant 1.000000e+00 : f32
    %928 = vector.broadcast %cst_130 : f32 to vector<2x16xf32>
    %929 = arith.addf %928, %927 : vector<2x16xf32>
    %930 = arith.divf %928, %929 : vector<2x16xf32>
    %931 = vector.extract_strided_slice %906 {offsets = [0, 16], sizes = [2, 16], strides = [1, 1]} : vector<2x48xf32> to vector<2x16xf32>
    %932 = vector.extract_strided_slice %902 {offsets = [0, 16], sizes = [2, 16], strides = [1, 1]} : vector<2x48xf32> to vector<2x16xf32>
    %933 = arith.addf %931, %932 : vector<2x16xf32>
    %934 = arith.negf %933 : vector<2x16xf32>
    %935 = math.exp %934 : vector<2x16xf32>
    %cst_131 = arith.constant 1.000000e+00 : f32
    %936 = vector.broadcast %cst_131 : f32 to vector<2x16xf32>
    %937 = arith.addf %936, %935 : vector<2x16xf32>
    %938 = arith.divf %936, %937 : vector<2x16xf32>
    %939 = vector.extract_strided_slice %904 {offsets = [0, 32], sizes = [2, 16], strides = [1, 1]} : vector<2x48xf32> to vector<2x16xf32>
    %940 = vector.extract_strided_slice %900 {offsets = [0, 32], sizes = [2, 16], strides = [1, 1]} : vector<2x48xf32> to vector<2x16xf32>
    %941 = arith.mulf %914, %940 : vector<2x16xf32>
    %942 = arith.addf %939, %941 : vector<2x16xf32>
    %943 = math.tanh %942 : vector<2x16xf32>
    %944 = vector.extract_strided_slice %906 {offsets = [0, 32], sizes = [2, 16], strides = [1, 1]} : vector<2x48xf32> to vector<2x16xf32>
    %945 = vector.extract_strided_slice %902 {offsets = [0, 32], sizes = [2, 16], strides = [1, 1]} : vector<2x48xf32> to vector<2x16xf32>
    %946 = arith.mulf %922, %945 : vector<2x16xf32>
    %947 = arith.addf %944, %946 : vector<2x16xf32>
    %948 = math.tanh %947 : vector<2x16xf32>
    %949 = arith.subf %895, %943 : vector<2x16xf32>
    %950 = arith.mulf %930, %949 : vector<2x16xf32>
    %951 = arith.addf %943, %950 : vector<2x16xf32>
    %952 = arith.subf %898, %948 : vector<2x16xf32>
    %953 = arith.mulf %938, %952 : vector<2x16xf32>
    %954 = arith.addf %948, %953 : vector<2x16xf32>
    %955 = vector.shape_cast %559 : vector<2x16xf32> to vector<2x1x16xf32>
    %956 = vector.shape_cast %615 : vector<2x16xf32> to vector<2x1x16xf32>
    %957 = vector.shape_cast %671 : vector<2x16xf32> to vector<2x1x16xf32>
    %958 = vector.shape_cast %727 : vector<2x16xf32> to vector<2x1x16xf32>
    %959 = vector.shape_cast %783 : vector<2x16xf32> to vector<2x1x16xf32>
    %960 = vector.shape_cast %839 : vector<2x16xf32> to vector<2x1x16xf32>
    %961 = vector.shape_cast %895 : vector<2x16xf32> to vector<2x1x16xf32>
    %962 = vector.shape_cast %951 : vector<2x16xf32> to vector<2x1x16xf32>
    %963 = tpu.concatenate %955, %956, %957, %958, %959, %960, %961, %962 in 1 : vector<2x1x16xf32>, vector<2x1x16xf32>, vector<2x1x16xf32>, vector<2x1x16xf32>, vector<2x1x16xf32>, vector<2x1x16xf32>, vector<2x1x16xf32>, vector<2x1x16xf32> -> vector<2x8x16xf32>
    %964 = vector.shape_cast %954 : vector<2x16xf32> to vector<2x1x16xf32>
    %965 = vector.shape_cast %898 : vector<2x16xf32> to vector<2x1x16xf32>
    %966 = vector.shape_cast %842 : vector<2x16xf32> to vector<2x1x16xf32>
    %967 = vector.shape_cast %786 : vector<2x16xf32> to vector<2x1x16xf32>
    %968 = vector.shape_cast %730 : vector<2x16xf32> to vector<2x1x16xf32>
    %969 = vector.shape_cast %674 : vector<2x16xf32> to vector<2x1x16xf32>
    %970 = vector.shape_cast %618 : vector<2x16xf32> to vector<2x1x16xf32>
    %971 = vector.shape_cast %562 : vector<2x16xf32> to vector<2x1x16xf32>
    %972 = tpu.concatenate %964, %965, %966, %967, %968, %969, %970, %971 in 1 : vector<2x1x16xf32>, vector<2x1x16xf32>, vector<2x1x16xf32>, vector<2x1x16xf32>, vector<2x1x16xf32>, vector<2x1x16xf32>, vector<2x1x16xf32>, vector<2x1x16xf32> -> vector<2x8x16xf32>
    %973 = tpu.concatenate %963, %972 in 2 : vector<2x8x16xf32>, vector<2x8x16xf32> -> vector<2x8x32xf32>
    %c0_132 = arith.constant 0 : index
    %c0_133 = arith.constant 0 : index
    %974 = vector.load %arg15[%c0_132, %c0_133] : memref<32x32xbf16, #tpu.memory_space<vmem>>, vector<32x32xbf16>
    %975 = vector.shape_cast %973 : vector<2x8x32xf32> to vector<16x32xf32>
    %976 = arith.truncf %975 : vector<16x32xf32> to vector<16x32xbf16>
    %cst_134 = arith.constant dense<0.000000e+00> : vector<16x32xf32>
    %977 = tpu.matmul %976, %974, %cst_134 {dimension_numbers = #tpu.dot_dimension_numbers<[1], [0], [0], [1], [0, 0, 1, 1], [], []>} : vector<16x32xbf16>, vector<32x32xbf16>, vector<16x32xf32> -> vector<16x32xf32>
    %c0_135 = arith.constant 0 : index
    %c0_136 = arith.constant 0 : index
    %978 = vector.load %arg16[%c0_135, %c0_136] : memref<1x32xf32, #tpu.memory_space<vmem>>, vector<1x32xf32>
    %979 = vector.broadcast %978 : vector<1x32xf32> to vector<16x32xf32>
    %980 = arith.addf %977, %979 : vector<16x32xf32>
    %981 = vector.shape_cast %980 : vector<16x32xf32> to vector<2x8x32xf32>
    %c0_137 = arith.constant 0 : index
    %c0_138 = arith.constant 0 : index
    %c0_139 = arith.constant 0 : index
    %982 = vector.load %arg37[%c0_137, %c0_138, %c0_139] : memref<2x8x32xf32, #tpu.memory_space<vmem>>, vector<2x8x32xf32>
    tpu.vector_store %arg37[%c0_137, %c0_138, %c0_139], %981 {strides = array<i32>} : memref<2x8x32xf32, #tpu.memory_space<vmem>>, vector<2x8x32xf32>,
    %983 = vector.shape_cast %981 : vector<2x8x32xf32> to vector<16x32xf32>
    %c0_140 = arith.constant 0 : index
    %c0_141 = arith.constant 0 : index
    %984 = vector.load %arg17[%c0_140, %c0_141] : memref<32x96xbf16, #tpu.memory_space<vmem>>, vector<32x96xbf16>
    %985 = arith.truncf %983 : vector<16x32xf32> to vector<16x32xbf16>
    %cst_142 = arith.constant dense<0.000000e+00> : vector<16x96xf32>
    %986 = tpu.matmul %985, %984, %cst_142 {dimension_numbers = #tpu.dot_dimension_numbers<[1], [0], [0], [1], [0, 0, 1, 1], [], []>} : vector<16x32xbf16>, vector<32x96xbf16>, vector<16x96xf32> -> vector<16x96xf32>
    %c0_143 = arith.constant 0 : index
    %c0_144 = arith.constant 0 : index
    %987 = vector.load %arg18[%c0_143, %c0_144] : memref<1x96xf32, #tpu.memory_space<vmem>>, vector<1x96xf32>
    %988 = vector.broadcast %987 : vector<1x96xf32> to vector<16x96xf32>
    %989 = arith.addf %986, %988 : vector<16x96xf32>
    %990 = vector.extract_strided_slice %989 {offsets = [0, 0], sizes = [16, 32], strides = [1, 1]} : vector<16x96xf32> to vector<16x32xf32>
    %991 = vector.shape_cast %990 : vector<16x32xf32> to vector<2x8x32xf32>
    %992 = vector.extract_strided_slice %989 {offsets = [0, 32], sizes = [16, 32], strides = [1, 1]} : vector<16x96xf32> to vector<16x32xf32>
    %993 = vector.shape_cast %992 : vector<16x32xf32> to vector<2x8x32xf32>
    %994 = vector.extract_strided_slice %989 {offsets = [0, 64], sizes = [16, 32], strides = [1, 1]} : vector<16x96xf32> to vector<16x32xf32>
    %995 = vector.shape_cast %994 : vector<16x32xf32> to vector<2x8x32xf32>
    %cst_145 = arith.constant 1.000000e+00 : f32
    %996 = vector.broadcast %cst_145 : f32 to vector<2x8xf32>
    %997 = arith.subf %996, %3 : vector<2x8xf32>
    %998 = vector.shape_cast %997 : vector<2x8xf32> to vector<2x1x8xf32>
    %cst_146 = arith.constant -1.000000e+09 : f32
    %999 = vector.broadcast %cst_146 : f32 to vector<2x1x8xf32>
    %1000 = arith.mulf %998, %999 : vector<2x1x8xf32>
    %1001 = vector.extract_strided_slice %991 {offsets = [0, 0, 0], sizes = [2, 8, 8], strides = [1, 1, 1]} : vector<2x8x32xf32> to vector<2x8x8xf32>
    %1002 = vector.extract_strided_slice %993 {offsets = [0, 0, 0], sizes = [2, 8, 8], strides = [1, 1, 1]} : vector<2x8x32xf32> to vector<2x8x8xf32>
    %1003 = vector.extract_strided_slice %995 {offsets = [0, 0, 0], sizes = [2, 8, 8], strides = [1, 1, 1]} : vector<2x8x32xf32> to vector<2x8x8xf32>
    "tpu.trace_start"() <{level = 10 : i32, message = "bqd,bkd->bqk"}> : () -> ()
    %cst_147 = arith.constant dense<0.000000e+00> : vector<2x8x8xf32>
    %1004 = tpu.matmul %1001, %1002, %cst_147 {dimension_numbers = #tpu.dot_dimension_numbers<[2], [2], [1], [1], [0, 0, 0, 1, 1, 1], [0], [0]>} : vector<2x8x8xf32>, vector<2x8x8xf32>, vector<2x8x8xf32> -> vector<2x8x8xf32>
    "tpu.trace_stop"() : () -> ()
    %cst_148 = arith.constant 0.353553385 : f32
    %1005 = vector.broadcast %cst_148 : f32 to vector<2x8x8xf32>
    %1006 = arith.mulf %1004, %1005 : vector<2x8x8xf32>
    %1007 = vector.broadcast %1000 : vector<2x1x8xf32> to vector<2x8x8xf32>
    %1008 = arith.addf %1006, %1007 : vector<2x8x8xf32>
    %cst_149 = arith.constant dense<0xFF800000> : vector<2x8xf32>
    %1009 = vector.multi_reduction <maximumf>, %1008, %cst_149 [2] : vector<2x8x8xf32> to vector<2x8xf32>
    %1010 = vector.shape_cast %1009 : vector<2x8xf32> to vector<2x8x1xf32>
    %1011 = vector.broadcast %1010 : vector<2x8x1xf32> to vector<2x8x8xf32>
    %1012 = arith.subf %1008, %1011 : vector<2x8x8xf32>
    %1013 = math.exp %1012 : vector<2x8x8xf32>
    %cst_150 = arith.constant dense<0.000000e+00> : vector<2x8xf32>
    %1014 = vector.multi_reduction <add>, %1013, %cst_150 [2] : vector<2x8x8xf32> to vector<2x8xf32>
    %1015 = vector.shape_cast %1014 : vector<2x8xf32> to vector<2x8x1xf32>
    %1016 = tpu.reciprocal %1015 {approx = true} : vector<2x8x1xf32> -> vector<2x8x1xf32>
    %1017 = vector.broadcast %1016 : vector<2x8x1xf32> to vector<2x8x8xf32>
    %1018 = arith.mulf %1013, %1017 : vector<2x8x8xf32>
    "tpu.trace_start"() <{level = 10 : i32, message = "bqk,bkd->bqd"}> : () -> ()
    %cst_151 = arith.constant dense<0.000000e+00> : vector<2x8x8xf32>
    %1019 = tpu.matmul %1018, %1003, %cst_151 {dimension_numbers = #tpu.dot_dimension_numbers<[2], [1], [1], [2], [0, 0, 0, 1, 1, 2], [0], [0]>} : vector<2x8x8xf32>, vector<2x8x8xf32>, vector<2x8x8xf32> -> vector<2x8x8xf32>
    "tpu.trace_stop"() : () -> ()
    %1020 = vector.extract_strided_slice %991 {offsets = [0, 0, 8], sizes = [2, 8, 8], strides = [1, 1, 1]} : vector<2x8x32xf32> to vector<2x8x8xf32>
    %1021 = vector.extract_strided_slice %993 {offsets = [0, 0, 8], sizes = [2, 8, 8], strides = [1, 1, 1]} : vector<2x8x32xf32> to vector<2x8x8xf32>
    %1022 = vector.extract_strided_slice %995 {offsets = [0, 0, 8], sizes = [2, 8, 8], strides = [1, 1, 1]} : vector<2x8x32xf32> to vector<2x8x8xf32>
    "tpu.trace_start"() <{level = 10 : i32, message = "bqd,bkd->bqk"}> : () -> ()
    %cst_152 = arith.constant dense<0.000000e+00> : vector<2x8x8xf32>
    %1023 = tpu.matmul %1020, %1021, %cst_152 {dimension_numbers = #tpu.dot_dimension_numbers<[2], [2], [1], [1], [0, 0, 0, 1, 1, 1], [0], [0]>} : vector<2x8x8xf32>, vector<2x8x8xf32>, vector<2x8x8xf32> -> vector<2x8x8xf32>
    "tpu.trace_stop"() : () -> ()
    %cst_153 = arith.constant 0.353553385 : f32
    %1024 = vector.broadcast %cst_153 : f32 to vector<2x8x8xf32>
    %1025 = arith.mulf %1023, %1024 : vector<2x8x8xf32>
    %1026 = vector.broadcast %1000 : vector<2x1x8xf32> to vector<2x8x8xf32>
    %1027 = arith.addf %1025, %1026 : vector<2x8x8xf32>
    %cst_154 = arith.constant dense<0xFF800000> : vector<2x8xf32>
    %1028 = vector.multi_reduction <maximumf>, %1027, %cst_154 [2] : vector<2x8x8xf32> to vector<2x8xf32>
    %1029 = vector.shape_cast %1028 : vector<2x8xf32> to vector<2x8x1xf32>
    %1030 = vector.broadcast %1029 : vector<2x8x1xf32> to vector<2x8x8xf32>
    %1031 = arith.subf %1027, %1030 : vector<2x8x8xf32>
    %1032 = math.exp %1031 : vector<2x8x8xf32>
    %cst_155 = arith.constant dense<0.000000e+00> : vector<2x8xf32>
    %1033 = vector.multi_reduction <add>, %1032, %cst_155 [2] : vector<2x8x8xf32> to vector<2x8xf32>
    %1034 = vector.shape_cast %1033 : vector<2x8xf32> to vector<2x8x1xf32>
    %1035 = tpu.reciprocal %1034 {approx = true} : vector<2x8x1xf32> -> vector<2x8x1xf32>
    %1036 = vector.broadcast %1035 : vector<2x8x1xf32> to vector<2x8x8xf32>
    %1037 = arith.mulf %1032, %1036 : vector<2x8x8xf32>
    "tpu.trace_start"() <{level = 10 : i32, message = "bqk,bkd->bqd"}> : () -> ()
    %cst_156 = arith.constant dense<0.000000e+00> : vector<2x8x8xf32>
    %1038 = tpu.matmul %1037, %1022, %cst_156 {dimension_numbers = #tpu.dot_dimension_numbers<[2], [1], [1], [2], [0, 0, 0, 1, 1, 2], [0], [0]>} : vector<2x8x8xf32>, vector<2x8x8xf32>, vector<2x8x8xf32> -> vector<2x8x8xf32>
    "tpu.trace_stop"() : () -> ()
    %1039 = vector.extract_strided_slice %991 {offsets = [0, 0, 16], sizes = [2, 8, 8], strides = [1, 1, 1]} : vector<2x8x32xf32> to vector<2x8x8xf32>
    %1040 = vector.extract_strided_slice %993 {offsets = [0, 0, 16], sizes = [2, 8, 8], strides = [1, 1, 1]} : vector<2x8x32xf32> to vector<2x8x8xf32>
    %1041 = vector.extract_strided_slice %995 {offsets = [0, 0, 16], sizes = [2, 8, 8], strides = [1, 1, 1]} : vector<2x8x32xf32> to vector<2x8x8xf32>
    "tpu.trace_start"() <{level = 10 : i32, message = "bqd,bkd->bqk"}> : () -> ()
    %cst_157 = arith.constant dense<0.000000e+00> : vector<2x8x8xf32>
    %1042 = tpu.matmul %1039, %1040, %cst_157 {dimension_numbers = #tpu.dot_dimension_numbers<[2], [2], [1], [1], [0, 0, 0, 1, 1, 1], [0], [0]>} : vector<2x8x8xf32>, vector<2x8x8xf32>, vector<2x8x8xf32> -> vector<2x8x8xf32>
    "tpu.trace_stop"() : () -> ()
    %cst_158 = arith.constant 0.353553385 : f32
    %1043 = vector.broadcast %cst_158 : f32 to vector<2x8x8xf32>
    %1044 = arith.mulf %1042, %1043 : vector<2x8x8xf32>
    %1045 = vector.broadcast %1000 : vector<2x1x8xf32> to vector<2x8x8xf32>
    %1046 = arith.addf %1044, %1045 : vector<2x8x8xf32>
    %cst_159 = arith.constant dense<0xFF800000> : vector<2x8xf32>
    %1047 = vector.multi_reduction <maximumf>, %1046, %cst_159 [2] : vector<2x8x8xf32> to vector<2x8xf32>
    %1048 = vector.shape_cast %1047 : vector<2x8xf32> to vector<2x8x1xf32>
    %1049 = vector.broadcast %1048 : vector<2x8x1xf32> to vector<2x8x8xf32>
    %1050 = arith.subf %1046, %1049 : vector<2x8x8xf32>
    %1051 = math.exp %1050 : vector<2x8x8xf32>
    %cst_160 = arith.constant dense<0.000000e+00> : vector<2x8xf32>
    %1052 = vector.multi_reduction <add>, %1051, %cst_160 [2] : vector<2x8x8xf32> to vector<2x8xf32>
    %1053 = vector.shape_cast %1052 : vector<2x8xf32> to vector<2x8x1xf32>
    %1054 = tpu.reciprocal %1053 {approx = true} : vector<2x8x1xf32> -> vector<2x8x1xf32>
    %1055 = vector.broadcast %1054 : vector<2x8x1xf32> to vector<2x8x8xf32>
    %1056 = arith.mulf %1051, %1055 : vector<2x8x8xf32>
    "tpu.trace_start"() <{level = 10 : i32, message = "bqk,bkd->bqd"}> : () -> ()
    %cst_161 = arith.constant dense<0.000000e+00> : vector<2x8x8xf32>
    %1057 = tpu.matmul %1056, %1041, %cst_161 {dimension_numbers = #tpu.dot_dimension_numbers<[2], [1], [1], [2], [0, 0, 0, 1, 1, 2], [0], [0]>} : vector<2x8x8xf32>, vector<2x8x8xf32>, vector<2x8x8xf32> -> vector<2x8x8xf32>
    "tpu.trace_stop"() : () -> ()
    %1058 = vector.extract_strided_slice %991 {offsets = [0, 0, 24], sizes = [2, 8, 8], strides = [1, 1, 1]} : vector<2x8x32xf32> to vector<2x8x8xf32>
    %1059 = vector.extract_strided_slice %993 {offsets = [0, 0, 24], sizes = [2, 8, 8], strides = [1, 1, 1]} : vector<2x8x32xf32> to vector<2x8x8xf32>
    %1060 = vector.extract_strided_slice %995 {offsets = [0, 0, 24], sizes = [2, 8, 8], strides = [1, 1, 1]} : vector<2x8x32xf32> to vector<2x8x8xf32>
    "tpu.trace_start"() <{level = 10 : i32, message = "bqd,bkd->bqk"}> : () -> ()
    %cst_162 = arith.constant dense<0.000000e+00> : vector<2x8x8xf32>
    %1061 = tpu.matmul %1058, %1059, %cst_162 {dimension_numbers = #tpu.dot_dimension_numbers<[2], [2], [1], [1], [0, 0, 0, 1, 1, 1], [0], [0]>} : vector<2x8x8xf32>, vector<2x8x8xf32>, vector<2x8x8xf32> -> vector<2x8x8xf32>
    "tpu.trace_stop"() : () -> ()
    %cst_163 = arith.constant 0.353553385 : f32
    %1062 = vector.broadcast %cst_163 : f32 to vector<2x8x8xf32>
    %1063 = arith.mulf %1061, %1062 : vector<2x8x8xf32>
    %1064 = vector.broadcast %1000 : vector<2x1x8xf32> to vector<2x8x8xf32>
    %1065 = arith.addf %1063, %1064 : vector<2x8x8xf32>
    %cst_164 = arith.constant dense<0xFF800000> : vector<2x8xf32>
    %1066 = vector.multi_reduction <maximumf>, %1065, %cst_164 [2] : vector<2x8x8xf32> to vector<2x8xf32>
    %1067 = vector.shape_cast %1066 : vector<2x8xf32> to vector<2x8x1xf32>
    %1068 = vector.broadcast %1067 : vector<2x8x1xf32> to vector<2x8x8xf32>
    %1069 = arith.subf %1065, %1068 : vector<2x8x8xf32>
    %1070 = math.exp %1069 : vector<2x8x8xf32>
    %cst_165 = arith.constant dense<0.000000e+00> : vector<2x8xf32>
    %1071 = vector.multi_reduction <add>, %1070, %cst_165 [2] : vector<2x8x8xf32> to vector<2x8xf32>
    %1072 = vector.shape_cast %1071 : vector<2x8xf32> to vector<2x8x1xf32>
    %1073 = tpu.reciprocal %1072 {approx = true} : vector<2x8x1xf32> -> vector<2x8x1xf32>
    %1074 = vector.broadcast %1073 : vector<2x8x1xf32> to vector<2x8x8xf32>
    %1075 = arith.mulf %1070, %1074 : vector<2x8x8xf32>
    "tpu.trace_start"() <{level = 10 : i32, message = "bqk,bkd->bqd"}> : () -> ()
    %cst_166 = arith.constant dense<0.000000e+00> : vector<2x8x8xf32>
    %1076 = tpu.matmul %1075, %1060, %cst_166 {dimension_numbers = #tpu.dot_dimension_numbers<[2], [1], [1], [2], [0, 0, 0, 1, 1, 2], [0], [0]>} : vector<2x8x8xf32>, vector<2x8x8xf32>, vector<2x8x8xf32> -> vector<2x8x8xf32>
    "tpu.trace_stop"() : () -> ()
    %1077 = tpu.concatenate %1019, %1038, %1057, %1076 in 2 : vector<2x8x8xf32>, vector<2x8x8xf32>, vector<2x8x8xf32>, vector<2x8x8xf32> -> vector<2x8x32xf32>
    %c0_167 = arith.constant 0 : index
    %c0_168 = arith.constant 0 : index
    %1078 = vector.load %arg19[%c0_167, %c0_168] : memref<32x32xbf16, #tpu.memory_space<vmem>>, vector<32x32xbf16>
    %1079 = vector.shape_cast %1077 : vector<2x8x32xf32> to vector<16x32xf32>
    %1080 = arith.truncf %1079 : vector<16x32xf32> to vector<16x32xbf16>
    %cst_169 = arith.constant dense<0.000000e+00> : vector<16x32xf32>
    %1081 = tpu.matmul %1080, %1078, %cst_169 {dimension_numbers = #tpu.dot_dimension_numbers<[1], [0], [0], [1], [0, 0, 1, 1], [], []>} : vector<16x32xbf16>, vector<32x32xbf16>, vector<16x32xf32> -> vector<16x32xf32>
    %c0_170 = arith.constant 0 : index
    %c0_171 = arith.constant 0 : index
    %1082 = vector.load %arg20[%c0_170, %c0_171] : memref<1x32xf32, #tpu.memory_space<vmem>>, vector<1x32xf32>
    %1083 = vector.broadcast %1082 : vector<1x32xf32> to vector<16x32xf32>
    %1084 = arith.addf %1081, %1083 : vector<16x32xf32>
    %1085 = vector.shape_cast %1084 : vector<16x32xf32> to vector<2x8x32xf32>
    %cst_172 = arith.constant 0.000000e+00 : f32
    %1086 = vector.broadcast %cst_172 : f32 to vector<2x20x32xf32>
    %c0_173 = arith.constant 0 : index
    %c0_174 = arith.constant 0 : index
    %c0_175 = arith.constant 0 : index
    %1087 = vector.load %arg39[%c0_173, %c0_174, %c0_175] : memref<2x20x32xf32, #tpu.memory_space<vmem>>, vector<2x20x32xf32>
    tpu.vector_store %arg39[%c0_173, %c0_174, %c0_175], %1086 {strides = array<i32>} : memref<2x20x32xf32, #tpu.memory_space<vmem>>, vector<2x20x32xf32>,
    %c0_176 = arith.constant 0 : index
    %c0_177 = arith.constant 0 : index
    %1088 = vector.load %arg21[%c0_176, %c0_177] : memref<160x64xbf16, #tpu.memory_space<vmem>>, vector<160x64xbf16>
    %c0_178 = arith.constant 0 : index
    %c0_179 = arith.constant 0 : index
    %1089 = vector.load %arg22[%c0_178, %c0_179] : memref<1x64xf32, #tpu.memory_space<vmem>>, vector<1x64xf32>
    %c0_180 = arith.constant 0 : index
    %c6 = arith.constant 6 : index
    %c0_181 = arith.constant 0 : index
    %1090 = vector.load %arg39[%c0_180, %c6, %c0_181] : memref<2x20x32xf32, #tpu.memory_space<vmem>>, vector<2x8x32xf32>
    tpu.vector_store %arg39[%c0_180, %c6, %c0_181], %1085 {strides = array<i32>} : memref<2x20x32xf32, #tpu.memory_space<vmem>>, vector<2x8x32xf32>,
    %c0_182 = arith.constant 0 : index
    %c4 = arith.constant 4 : index
    %c0_183 = arith.constant 0 : index
    %1091 = vector.load %arg39[%c0_182, %c4, %c0_183] : memref<2x20x32xf32, #tpu.memory_space<vmem>>, vector<2x8x32xf32>
    %c0_184 = arith.constant 0 : index
    %c5 = arith.constant 5 : index
    %c0_185 = arith.constant 0 : index
    %1092 = vector.load %arg39[%c0_184, %c5, %c0_185] : memref<2x20x32xf32, #tpu.memory_space<vmem>>, vector<2x8x32xf32>
    %c0_186 = arith.constant 0 : index
    %c6_187 = arith.constant 6 : index
    %c0_188 = arith.constant 0 : index
    %1093 = vector.load %arg39[%c0_186, %c6_187, %c0_188] : memref<2x20x32xf32, #tpu.memory_space<vmem>>, vector<2x8x32xf32>
    %c0_189 = arith.constant 0 : index
    %c7 = arith.constant 7 : index
    %c0_190 = arith.constant 0 : index
    %1094 = vector.load %arg39[%c0_189, %c7, %c0_190] : memref<2x20x32xf32, #tpu.memory_space<vmem>>, vector<2x8x32xf32>
    %c0_191 = arith.constant 0 : index
    %c8 = arith.constant 8 : index
    %c0_192 = arith.constant 0 : index
    %1095 = vector.load %arg39[%c0_191, %c8, %c0_192] : memref<2x20x32xf32, #tpu.memory_space<vmem>>, vector<2x8x32xf32>
    %1096 = tpu.concatenate %1091, %1092, %1093, %1094, %1095 in 2 : vector<2x8x32xf32>, vector<2x8x32xf32>, vector<2x8x32xf32>, vector<2x8x32xf32>, vector<2x8x32xf32> -> vector<2x8x160xf32>
    %1097 = vector.shape_cast %1096 : vector<2x8x160xf32> to vector<16x160xf32>
    %1098 = arith.truncf %1097 : vector<16x160xf32> to vector<16x160xbf16>
    %cst_193 = arith.constant dense<0.000000e+00> : vector<16x64xf32>
    %1099 = tpu.matmul %1098, %1088, %cst_193 {dimension_numbers = #tpu.dot_dimension_numbers<[1], [0], [0], [1], [0, 0, 1, 1], [], []>} : vector<16x160xbf16>, vector<160x64xbf16>, vector<16x64xf32> -> vector<16x64xf32>
    %1100 = vector.broadcast %1089 : vector<1x64xf32> to vector<16x64xf32>
    %1101 = arith.addf %1099, %1100 : vector<16x64xf32>
    %1102 = vector.extract_strided_slice %1101 {offsets = [0, 0], sizes = [16, 32], strides = [1, 1]} : vector<16x64xf32> to vector<16x32xf32>
    %1103 = vector.shape_cast %1102 : vector<16x32xf32> to vector<2x8x32xf32>
    %1104 = vector.extract_strided_slice %1101 {offsets = [0, 32], sizes = [16, 32], strides = [1, 1]} : vector<16x64xf32> to vector<16x32xf32>
    %1105 = arith.negf %1104 : vector<16x32xf32>
    %1106 = math.exp %1105 : vector<16x32xf32>
    %cst_194 = arith.constant 1.000000e+00 : f32
    %1107 = vector.broadcast %cst_194 : f32 to vector<16x32xf32>
    %1108 = arith.addf %1107, %1106 : vector<16x32xf32>
    %1109 = arith.divf %1107, %1108 : vector<16x32xf32>
    %1110 = vector.shape_cast %1109 : vector<16x32xf32> to vector<2x8x32xf32>
    %1111 = arith.subf %1103, %1085 : vector<2x8x32xf32>
    %1112 = arith.mulf %1110, %1111 : vector<2x8x32xf32>
    %1113 = arith.addf %1085, %1112 : vector<2x8x32xf32>
    %c0_195 = arith.constant 0 : index
    %c0_196 = arith.constant 0 : index
    %1114 = vector.load %arg23[%c0_195, %c0_196] : memref<160x64xbf16, #tpu.memory_space<vmem>>, vector<160x64xbf16>
    %c0_197 = arith.constant 0 : index
    %c0_198 = arith.constant 0 : index
    %1115 = vector.load %arg24[%c0_197, %c0_198] : memref<1x64xf32, #tpu.memory_space<vmem>>, vector<1x64xf32>
    %c0_199 = arith.constant 0 : index
    %c6_200 = arith.constant 6 : index
    %c0_201 = arith.constant 0 : index
    %1116 = vector.load %arg39[%c0_199, %c6_200, %c0_201] : memref<2x20x32xf32, #tpu.memory_space<vmem>>, vector<2x8x32xf32>
    tpu.vector_store %arg39[%c0_199, %c6_200, %c0_201], %1113 {strides = array<i32>} : memref<2x20x32xf32, #tpu.memory_space<vmem>>, vector<2x8x32xf32>,
    %c0_202 = arith.constant 0 : index
    %c2 = arith.constant 2 : index
    %c0_203 = arith.constant 0 : index
    %1117 = vector.load %arg39[%c0_202, %c2, %c0_203] : memref<2x20x32xf32, #tpu.memory_space<vmem>>, vector<2x8x32xf32>
    %c0_204 = arith.constant 0 : index
    %c4_205 = arith.constant 4 : index
    %c0_206 = arith.constant 0 : index
    %1118 = vector.load %arg39[%c0_204, %c4_205, %c0_206] : memref<2x20x32xf32, #tpu.memory_space<vmem>>, vector<2x8x32xf32>
    %c0_207 = arith.constant 0 : index
    %c6_208 = arith.constant 6 : index
    %c0_209 = arith.constant 0 : index
    %1119 = vector.load %arg39[%c0_207, %c6_208, %c0_209] : memref<2x20x32xf32, #tpu.memory_space<vmem>>, vector<2x8x32xf32>
    %c0_210 = arith.constant 0 : index
    %c8_211 = arith.constant 8 : index
    %c0_212 = arith.constant 0 : index
    %1120 = vector.load %arg39[%c0_210, %c8_211, %c0_212] : memref<2x20x32xf32, #tpu.memory_space<vmem>>, vector<2x8x32xf32>
    %c0_213 = arith.constant 0 : index
    %c10 = arith.constant 10 : index
    %c0_214 = arith.constant 0 : index
    %1121 = vector.load %arg39[%c0_213, %c10, %c0_214] : memref<2x20x32xf32, #tpu.memory_space<vmem>>, vector<2x8x32xf32>
    %1122 = tpu.concatenate %1117, %1118, %1119, %1120, %1121 in 2 : vector<2x8x32xf32>, vector<2x8x32xf32>, vector<2x8x32xf32>, vector<2x8x32xf32>, vector<2x8x32xf32> -> vector<2x8x160xf32>
    %1123 = vector.shape_cast %1122 : vector<2x8x160xf32> to vector<16x160xf32>
    %1124 = arith.truncf %1123 : vector<16x160xf32> to vector<16x160xbf16>
    %cst_215 = arith.constant dense<0.000000e+00> : vector<16x64xf32>
    %1125 = tpu.matmul %1124, %1114, %cst_215 {dimension_numbers = #tpu.dot_dimension_numbers<[1], [0], [0], [1], [0, 0, 1, 1], [], []>} : vector<16x160xbf16>, vector<160x64xbf16>, vector<16x64xf32> -> vector<16x64xf32>
    %1126 = vector.broadcast %1115 : vector<1x64xf32> to vector<16x64xf32>
    %1127 = arith.addf %1125, %1126 : vector<16x64xf32>
    %1128 = vector.extract_strided_slice %1127 {offsets = [0, 0], sizes = [16, 32], strides = [1, 1]} : vector<16x64xf32> to vector<16x32xf32>
    %1129 = vector.shape_cast %1128 : vector<16x32xf32> to vector<2x8x32xf32>
    %1130 = vector.extract_strided_slice %1127 {offsets = [0, 32], sizes = [16, 32], strides = [1, 1]} : vector<16x64xf32> to vector<16x32xf32>
    %1131 = arith.negf %1130 : vector<16x32xf32>
    %1132 = math.exp %1131 : vector<16x32xf32>
    %cst_216 = arith.constant 1.000000e+00 : f32
    %1133 = vector.broadcast %cst_216 : f32 to vector<16x32xf32>
    %1134 = arith.addf %1133, %1132 : vector<16x32xf32>
    %1135 = arith.divf %1133, %1134 : vector<16x32xf32>
    %1136 = vector.shape_cast %1135 : vector<16x32xf32> to vector<2x8x32xf32>
    %1137 = arith.subf %1129, %1113 : vector<2x8x32xf32>
    %1138 = arith.mulf %1136, %1137 : vector<2x8x32xf32>
    %1139 = arith.addf %1113, %1138 : vector<2x8x32xf32>
    %c0_217 = arith.constant 0 : index
    %c0_218 = arith.constant 0 : index
    %1140 = vector.load %arg25[%c0_217, %c0_218] : memref<160x64xbf16, #tpu.memory_space<vmem>>, vector<160x64xbf16>
    %c0_219 = arith.constant 0 : index
    %c0_220 = arith.constant 0 : index
    %1141 = vector.load %arg26[%c0_219, %c0_220] : memref<1x64xf32, #tpu.memory_space<vmem>>, vector<1x64xf32>
    %c0_221 = arith.constant 0 : index
    %c6_222 = arith.constant 6 : index
    %c0_223 = arith.constant 0 : index
    %1142 = vector.load %arg39[%c0_221, %c6_222, %c0_223] : memref<2x20x32xf32, #tpu.memory_space<vmem>>, vector<2x8x32xf32>
    tpu.vector_store %arg39[%c0_221, %c6_222, %c0_223], %1139 {strides = array<i32>} : memref<2x20x32xf32, #tpu.memory_space<vmem>>, vector<2x8x32xf32>,
    %c0_224 = arith.constant 0 : index
    %c0_225 = arith.constant 0 : index
    %c0_226 = arith.constant 0 : index
    %1143 = vector.load %arg39[%c0_224, %c0_225, %c0_226] : memref<2x20x32xf32, #tpu.memory_space<vmem>>, vector<2x8x32xf32>
    %c0_227 = arith.constant 0 : index
    %c3 = arith.constant 3 : index
    %c0_228 = arith.constant 0 : index
    %1144 = vector.load %arg39[%c0_227, %c3, %c0_228] : memref<2x20x32xf32, #tpu.memory_space<vmem>>, vector<2x8x32xf32>
    %c0_229 = arith.constant 0 : index
    %c6_230 = arith.constant 6 : index
    %c0_231 = arith.constant 0 : index
    %1145 = vector.load %arg39[%c0_229, %c6_230, %c0_231] : memref<2x20x32xf32, #tpu.memory_space<vmem>>, vector<2x8x32xf32>
    %c0_232 = arith.constant 0 : index
    %c9 = arith.constant 9 : index
    %c0_233 = arith.constant 0 : index
    %1146 = vector.load %arg39[%c0_232, %c9, %c0_233] : memref<2x20x32xf32, #tpu.memory_space<vmem>>, vector<2x8x32xf32>
    %c0_234 = arith.constant 0 : index
    %c12 = arith.constant 12 : index
    %c0_235 = arith.constant 0 : index
    %1147 = vector.load %arg39[%c0_234, %c12, %c0_235] : memref<2x20x32xf32, #tpu.memory_space<vmem>>, vector<2x8x32xf32>
    %1148 = tpu.concatenate %1143, %1144, %1145, %1146, %1147 in 2 : vector<2x8x32xf32>, vector<2x8x32xf32>, vector<2x8x32xf32>, vector<2x8x32xf32>, vector<2x8x32xf32> -> vector<2x8x160xf32>
    %1149 = vector.shape_cast %1148 : vector<2x8x160xf32> to vector<16x160xf32>
    %1150 = arith.truncf %1149 : vector<16x160xf32> to vector<16x160xbf16>
    %cst_236 = arith.constant dense<0.000000e+00> : vector<16x64xf32>
    %1151 = tpu.matmul %1150, %1140, %cst_236 {dimension_numbers = #tpu.dot_dimension_numbers<[1], [0], [0], [1], [0, 0, 1, 1], [], []>} : vector<16x160xbf16>, vector<160x64xbf16>, vector<16x64xf32> -> vector<16x64xf32>
    %1152 = vector.broadcast %1141 : vector<1x64xf32> to vector<16x64xf32>
    %1153 = arith.addf %1151, %1152 : vector<16x64xf32>
    %1154 = vector.extract_strided_slice %1153 {offsets = [0, 0], sizes = [16, 32], strides = [1, 1]} : vector<16x64xf32> to vector<16x32xf32>
    %1155 = vector.shape_cast %1154 : vector<16x32xf32> to vector<2x8x32xf32>
    %1156 = vector.extract_strided_slice %1153 {offsets = [0, 32], sizes = [16, 32], strides = [1, 1]} : vector<16x64xf32> to vector<16x32xf32>
    %1157 = arith.negf %1156 : vector<16x32xf32>
    %1158 = math.exp %1157 : vector<16x32xf32>
    %cst_237 = arith.constant 1.000000e+00 : f32
    %1159 = vector.broadcast %cst_237 : f32 to vector<16x32xf32>
    %1160 = arith.addf %1159, %1158 : vector<16x32xf32>
    %1161 = arith.divf %1159, %1160 : vector<16x32xf32>
    %1162 = vector.shape_cast %1161 : vector<16x32xf32> to vector<2x8x32xf32>
    %1163 = arith.subf %1155, %1139 : vector<2x8x32xf32>
    %1164 = arith.mulf %1162, %1163 : vector<2x8x32xf32>
    %1165 = arith.addf %1139, %1164 : vector<2x8x32xf32>
    %c0_238 = arith.constant 0 : index
    %c0_239 = arith.constant 0 : index
    %1166 = vector.load %arg27[%c0_238, %c0_239] : memref<96x64xbf16, #tpu.memory_space<vmem>>, vector<96x64xbf16>
    %c0_240 = arith.constant 0 : index
    %c0_241 = arith.constant 0 : index
    %1167 = vector.load %arg28[%c0_240, %c0_241] : memref<1x64xf32, #tpu.memory_space<vmem>>, vector<1x64xf32>
    %c0_242 = arith.constant 0 : index
    %c6_243 = arith.constant 6 : index
    %c0_244 = arith.constant 0 : index
    %1168 = vector.load %arg39[%c0_242, %c6_243, %c0_244] : memref<2x20x32xf32, #tpu.memory_space<vmem>>, vector<2x8x32xf32>
    tpu.vector_store %arg39[%c0_242, %c6_243, %c0_244], %1165 {strides = array<i32>} : memref<2x20x32xf32, #tpu.memory_space<vmem>>, vector<2x8x32xf32>,
    %c0_245 = arith.constant 0 : index
    %c5_246 = arith.constant 5 : index
    %c0_247 = arith.constant 0 : index
    %1169 = vector.load %arg39[%c0_245, %c5_246, %c0_247] : memref<2x20x32xf32, #tpu.memory_space<vmem>>, vector<2x8x32xf32>
    %c0_248 = arith.constant 0 : index
    %c6_249 = arith.constant 6 : index
    %c0_250 = arith.constant 0 : index
    %1170 = vector.load %arg39[%c0_248, %c6_249, %c0_250] : memref<2x20x32xf32, #tpu.memory_space<vmem>>, vector<2x8x32xf32>
    %c0_251 = arith.constant 0 : index
    %c7_252 = arith.constant 7 : index
    %c0_253 = arith.constant 0 : index
    %1171 = vector.load %arg39[%c0_251, %c7_252, %c0_253] : memref<2x20x32xf32, #tpu.memory_space<vmem>>, vector<2x8x32xf32>
    %1172 = tpu.concatenate %1169, %1170, %1171 in 2 : vector<2x8x32xf32>, vector<2x8x32xf32>, vector<2x8x32xf32> -> vector<2x8x96xf32>
    %1173 = vector.shape_cast %1172 : vector<2x8x96xf32> to vector<16x96xf32>
    %1174 = arith.truncf %1173 : vector<16x96xf32> to vector<16x96xbf16>
    %cst_254 = arith.constant dense<0.000000e+00> : vector<16x64xf32>
    %1175 = tpu.matmul %1174, %1166, %cst_254 {dimension_numbers = #tpu.dot_dimension_numbers<[1], [0], [0], [1], [0, 0, 1, 1], [], []>} : vector<16x96xbf16>, vector<96x64xbf16>, vector<16x64xf32> -> vector<16x64xf32>
    %1176 = vector.broadcast %1167 : vector<1x64xf32> to vector<16x64xf32>
    %1177 = arith.addf %1175, %1176 : vector<16x64xf32>
    %1178 = vector.extract_strided_slice %1177 {offsets = [0, 0], sizes = [16, 32], strides = [1, 1]} : vector<16x64xf32> to vector<16x32xf32>
    %1179 = vector.shape_cast %1178 : vector<16x32xf32> to vector<2x8x32xf32>
    %1180 = vector.extract_strided_slice %1177 {offsets = [0, 32], sizes = [16, 32], strides = [1, 1]} : vector<16x64xf32> to vector<16x32xf32>
    %1181 = arith.negf %1180 : vector<16x32xf32>
    %1182 = math.exp %1181 : vector<16x32xf32>
    %cst_255 = arith.constant 1.000000e+00 : f32
    %1183 = vector.broadcast %cst_255 : f32 to vector<16x32xf32>
    %1184 = arith.addf %1183, %1182 : vector<16x32xf32>
    %1185 = arith.divf %1183, %1184 : vector<16x32xf32>
    %1186 = vector.shape_cast %1185 : vector<16x32xf32> to vector<2x8x32xf32>
    %1187 = arith.subf %1179, %1165 : vector<2x8x32xf32>
    %1188 = arith.mulf %1186, %1187 : vector<2x8x32xf32>
    %1189 = arith.addf %1165, %1188 : vector<2x8x32xf32>
    %c0_256 = arith.constant 0 : index
    %c0_257 = arith.constant 0 : index
    %1190 = vector.load %arg29[%c0_256, %c0_257] : memref<96x64xbf16, #tpu.memory_space<vmem>>, vector<96x64xbf16>
    %c0_258 = arith.constant 0 : index
    %c0_259 = arith.constant 0 : index
    %1191 = vector.load %arg30[%c0_258, %c0_259] : memref<1x64xf32, #tpu.memory_space<vmem>>, vector<1x64xf32>
    %c0_260 = arith.constant 0 : index
    %c6_261 = arith.constant 6 : index
    %c0_262 = arith.constant 0 : index
    %1192 = vector.load %arg39[%c0_260, %c6_261, %c0_262] : memref<2x20x32xf32, #tpu.memory_space<vmem>>, vector<2x8x32xf32>
    tpu.vector_store %arg39[%c0_260, %c6_261, %c0_262], %1189 {strides = array<i32>} : memref<2x20x32xf32, #tpu.memory_space<vmem>>, vector<2x8x32xf32>,
    %c0_263 = arith.constant 0 : index
    %c4_264 = arith.constant 4 : index
    %c0_265 = arith.constant 0 : index
    %1193 = vector.load %arg39[%c0_263, %c4_264, %c0_265] : memref<2x20x32xf32, #tpu.memory_space<vmem>>, vector<2x8x32xf32>
    %c0_266 = arith.constant 0 : index
    %c6_267 = arith.constant 6 : index
    %c0_268 = arith.constant 0 : index
    %1194 = vector.load %arg39[%c0_266, %c6_267, %c0_268] : memref<2x20x32xf32, #tpu.memory_space<vmem>>, vector<2x8x32xf32>
    %c0_269 = arith.constant 0 : index
    %c8_270 = arith.constant 8 : index
    %c0_271 = arith.constant 0 : index
    %1195 = vector.load %arg39[%c0_269, %c8_270, %c0_271] : memref<2x20x32xf32, #tpu.memory_space<vmem>>, vector<2x8x32xf32>
    %1196 = tpu.concatenate %1193, %1194, %1195 in 2 : vector<2x8x32xf32>, vector<2x8x32xf32>, vector<2x8x32xf32> -> vector<2x8x96xf32>
    %1197 = vector.shape_cast %1196 : vector<2x8x96xf32> to vector<16x96xf32>
    %1198 = arith.truncf %1197 : vector<16x96xf32> to vector<16x96xbf16>
    %cst_272 = arith.constant dense<0.000000e+00> : vector<16x64xf32>
    %1199 = tpu.matmul %1198, %1190, %cst_272 {dimension_numbers = #tpu.dot_dimension_numbers<[1], [0], [0], [1], [0, 0, 1, 1], [], []>} : vector<16x96xbf16>, vector<96x64xbf16>, vector<16x64xf32> -> vector<16x64xf32>
    %1200 = vector.broadcast %1191 : vector<1x64xf32> to vector<16x64xf32>
    %1201 = arith.addf %1199, %1200 : vector<16x64xf32>
    %1202 = vector.extract_strided_slice %1201 {offsets = [0, 0], sizes = [16, 32], strides = [1, 1]} : vector<16x64xf32> to vector<16x32xf32>
    %1203 = vector.shape_cast %1202 : vector<16x32xf32> to vector<2x8x32xf32>
    %1204 = vector.extract_strided_slice %1201 {offsets = [0, 32], sizes = [16, 32], strides = [1, 1]} : vector<16x64xf32> to vector<16x32xf32>
    %1205 = arith.negf %1204 : vector<16x32xf32>
    %1206 = math.exp %1205 : vector<16x32xf32>
    %cst_273 = arith.constant 1.000000e+00 : f32
    %1207 = vector.broadcast %cst_273 : f32 to vector<16x32xf32>
    %1208 = arith.addf %1207, %1206 : vector<16x32xf32>
    %1209 = arith.divf %1207, %1208 : vector<16x32xf32>
    %1210 = vector.shape_cast %1209 : vector<16x32xf32> to vector<2x8x32xf32>
    %1211 = arith.subf %1203, %1189 : vector<2x8x32xf32>
    %1212 = arith.mulf %1210, %1211 : vector<2x8x32xf32>
    %1213 = arith.addf %1189, %1212 : vector<2x8x32xf32>
    %c0_274 = arith.constant 0 : index
    %c0_275 = arith.constant 0 : index
    %1214 = vector.load %arg31[%c0_274, %c0_275] : memref<96x64xbf16, #tpu.memory_space<vmem>>, vector<96x64xbf16>
    %c0_276 = arith.constant 0 : index
    %c0_277 = arith.constant 0 : index
    %1215 = vector.load %arg32[%c0_276, %c0_277] : memref<1x64xf32, #tpu.memory_space<vmem>>, vector<1x64xf32>
    %c0_278 = arith.constant 0 : index
    %c6_279 = arith.constant 6 : index
    %c0_280 = arith.constant 0 : index
    %1216 = vector.load %arg39[%c0_278, %c6_279, %c0_280] : memref<2x20x32xf32, #tpu.memory_space<vmem>>, vector<2x8x32xf32>
    tpu.vector_store %arg39[%c0_278, %c6_279, %c0_280], %1213 {strides = array<i32>} : memref<2x20x32xf32, #tpu.memory_space<vmem>>, vector<2x8x32xf32>,
    %c0_281 = arith.constant 0 : index
    %c3_282 = arith.constant 3 : index
    %c0_283 = arith.constant 0 : index
    %1217 = vector.load %arg39[%c0_281, %c3_282, %c0_283] : memref<2x20x32xf32, #tpu.memory_space<vmem>>, vector<2x8x32xf32>
    %c0_284 = arith.constant 0 : index
    %c6_285 = arith.constant 6 : index
    %c0_286 = arith.constant 0 : index
    %1218 = vector.load %arg39[%c0_284, %c6_285, %c0_286] : memref<2x20x32xf32, #tpu.memory_space<vmem>>, vector<2x8x32xf32>
    %c0_287 = arith.constant 0 : index
    %c9_288 = arith.constant 9 : index
    %c0_289 = arith.constant 0 : index
    %1219 = vector.load %arg39[%c0_287, %c9_288, %c0_289] : memref<2x20x32xf32, #tpu.memory_space<vmem>>, vector<2x8x32xf32>
    %1220 = tpu.concatenate %1217, %1218, %1219 in 2 : vector<2x8x32xf32>, vector<2x8x32xf32>, vector<2x8x32xf32> -> vector<2x8x96xf32>
    %1221 = vector.shape_cast %1220 : vector<2x8x96xf32> to vector<16x96xf32>
    %1222 = arith.truncf %1221 : vector<16x96xf32> to vector<16x96xbf16>
    %cst_290 = arith.constant dense<0.000000e+00> : vector<16x64xf32>
    %1223 = tpu.matmul %1222, %1214, %cst_290 {dimension_numbers = #tpu.dot_dimension_numbers<[1], [0], [0], [1], [0, 0, 1, 1], [], []>} : vector<16x96xbf16>, vector<96x64xbf16>, vector<16x64xf32> -> vector<16x64xf32>
    %1224 = vector.broadcast %1215 : vector<1x64xf32> to vector<16x64xf32>
    %1225 = arith.addf %1223, %1224 : vector<16x64xf32>
    %1226 = vector.extract_strided_slice %1225 {offsets = [0, 0], sizes = [16, 32], strides = [1, 1]} : vector<16x64xf32> to vector<16x32xf32>
    %1227 = vector.shape_cast %1226 : vector<16x32xf32> to vector<2x8x32xf32>
    %1228 = vector.extract_strided_slice %1225 {offsets = [0, 32], sizes = [16, 32], strides = [1, 1]} : vector<16x64xf32> to vector<16x32xf32>
    %1229 = arith.negf %1228 : vector<16x32xf32>
    %1230 = math.exp %1229 : vector<16x32xf32>
    %cst_291 = arith.constant 1.000000e+00 : f32
    %1231 = vector.broadcast %cst_291 : f32 to vector<16x32xf32>
    %1232 = arith.addf %1231, %1230 : vector<16x32xf32>
    %1233 = arith.divf %1231, %1232 : vector<16x32xf32>
    %1234 = vector.shape_cast %1233 : vector<16x32xf32> to vector<2x8x32xf32>
    %1235 = arith.subf %1227, %1213 : vector<2x8x32xf32>
    %1236 = arith.mulf %1234, %1235 : vector<2x8x32xf32>
    %1237 = arith.addf %1213, %1236 : vector<2x8x32xf32>
    %1238 = vector.shape_cast %3 : vector<2x8xf32> to vector<2x8x1xf32>
    %cst_292 = arith.constant 1.000000e+00 : f32
    %1239 = vector.broadcast %cst_292 : f32 to vector<2x8x1xf32>
    %1240 = arith.subf %1239, %1238 : vector<2x8x1xf32>
    %cst_293 = arith.constant -1.000000e+09 : f32
    %1241 = vector.broadcast %cst_293 : f32 to vector<2x8x1xf32>
    %1242 = arith.mulf %1240, %1241 : vector<2x8x1xf32>
    %1243 = vector.broadcast %1242 : vector<2x8x1xf32> to vector<2x8x32xf32>
    %1244 = arith.addf %1237, %1243 : vector<2x8x32xf32>
    %cst_294 = arith.constant dense<0xFF800000> : vector<2x32xf32>
    %1245 = vector.multi_reduction <maximumf>, %1244, %cst_294 [1] : vector<2x8x32xf32> to vector<2x32xf32>
    %1246 = vector.broadcast %1238 : vector<2x8x1xf32> to vector<2x8x32xf32>
    %1247 = arith.mulf %1237, %1246 : vector<2x8x32xf32>
    %cst_295 = arith.constant dense<0.000000e+00> : vector<2x32xf32>
    %1248 = vector.multi_reduction <add>, %1247, %cst_295 [1] : vector<2x8x32xf32> to vector<2x32xf32>
    %cst_296 = arith.constant dense<0.000000e+00> : vector<2xf32>
    %1249 = vector.multi_reduction <add>, %3, %cst_296 [1] : vector<2x8xf32> to vector<2xf32>
    %1250 = vector.shape_cast %1249 : vector<2xf32> to vector<2x1xf32>
    %1251 = vector.broadcast %1250 : vector<2x1xf32> to vector<2x32xf32>
    %1252 = arith.divf %1248, %1251 : vector<2x32xf32>
    %1253 = tpu.concatenate %1245, %1252 in 1 : vector<2x32xf32>, vector<2x32xf32> -> vector<2x64xf32>
    %c0_297 = arith.constant 0 : index
    %c0_298 = arith.constant 0 : index
    %1254 = vector.load %arg33[%c0_297, %c0_298] : memref<64x32xbf16, #tpu.memory_space<vmem>>, vector<64x32xbf16>
    %c0_299 = arith.constant 0 : index
    %c0_300 = arith.constant 0 : index
    %1255 = vector.load %arg35[%c0_299, %c0_300] : memref<32x8xbf16, #tpu.memory_space<vmem>>, vector<32x8xbf16>
    %1256 = arith.truncf %1253 : vector<2x64xf32> to vector<2x64xbf16>
    %cst_301 = arith.constant dense<0.000000e+00> : vector<2x32xf32>
    %1257 = tpu.matmul %1256, %1254, %cst_301 {dimension_numbers = #tpu.dot_dimension_numbers<[1], [0], [0], [1], [0, 0, 1, 1], [], []>} : vector<2x64xbf16>, vector<64x32xbf16>, vector<2x32xf32> -> vector<2x32xf32>
    %c0_302 = arith.constant 0 : index
    %c0_303 = arith.constant 0 : index
    %1258 = vector.load %arg34[%c0_302, %c0_303] : memref<1x32xf32, #tpu.memory_space<vmem>>, vector<1x32xf32>
    %1259 = vector.broadcast %1258 : vector<1x32xf32> to vector<2x32xf32>
    %1260 = arith.addf %1257, %1259 : vector<2x32xf32>
    %cst_304 = arith.constant 0.000000e+00 : f32
    %1261 = vector.broadcast %cst_304 : f32 to vector<2x32xf32>
    %1262 = arith.maximumf %1260, %1261 : vector<2x32xf32>
    %1263 = arith.truncf %1262 : vector<2x32xf32> to vector<2x32xbf16>
    %cst_305 = arith.constant dense<0.000000e+00> : vector<2x8xf32>
    %1264 = tpu.matmul %1263, %1255, %cst_305 {dimension_numbers = #tpu.dot_dimension_numbers<[1], [0], [0], [1], [0, 0, 1, 1], [], []>} : vector<2x32xbf16>, vector<32x8xbf16>, vector<2x8xf32> -> vector<2x8xf32>
    %c0_306 = arith.constant 0 : index
    %c0_307 = arith.constant 0 : index
    %1265 = vector.load %arg36[%c0_306, %c0_307] : memref<1x8xf32, #tpu.memory_space<vmem>>, vector<1x8xf32>
    %1266 = vector.broadcast %1265 : vector<1x8xf32> to vector<2x8xf32>
    %1267 = arith.addf %1264, %1266 : vector<2x8xf32>
    %c0_308 = arith.constant 0 : index
    %c0_309 = arith.constant 0 : index
    %1268 = vector.load %arg38[%c0_308, %c0_309] : memref<2x8xf32, #tpu.memory_space<vmem>>, vector<2x8xf32>
    tpu.vector_store %arg38[%c0_308, %c0_309], %1267 {strides = array<i32>} : memref<2x8xf32, #tpu.memory_space<vmem>>, vector<2x8xf32>,
    return
  }
}

</mosaic_0001>

<bundles_post_ra>
// kernel: predicate_model_forward.1
= control target key start
LH: loop header
LB: loop body
LE: loop exit
PB: predicated region body
PF: predicated region fallthrough
CT: control target
= control target key end

     0   :  { %s9848_s6 = smov 1   ;;  %s9849_s10 = smov 2   ;;  %s11703_s0 = inlined_call_operand.smem [shape: u32[39], index: -1, kind: input, shape index: {}] }
   0x1   :  { %s9917_s5 = sld [smem:[%s11703_s0]]   ;;  %s9850_s14 = smov 3  }
   0x2   :  { %s9922_s9 = sld [smem:[%s11703_s0 + %s9848_s6]]   ;;  %s9851_s18 = smov 4  }
   0x3   :  { %s9927_s13 = sld [smem:[%s11703_s0 + %s9849_s10]]   ;;  %s9852_s22 = smov 5  }
   0x4   :  { %s9932_s17 = sld [smem:[%s11703_s0 + %s9850_s14]]   ;;  %s9853_s26 = smov 6  }
   0x5   :  { %s9937_s21 = sld [smem:[%s11703_s0 + %s9851_s18]]   ;;  %s9854_s30 = smov 7  }
   0x6   :  { %s9942_s25 = sld [smem:[%s11703_s0 + %s9852_s22]]   ;;  %s9855_s4 = smov 8  }
   0x7   :  { %s9947_s29 = sld [smem:[%s11703_s0 + %s9853_s26]]   ;;  %s9856_s10 = smov 9  }
   0x8   :  { %s9952_s3 = sld [smem:[%s11703_s0 + %s9854_s30]]   ;;  %s9857_s15 = smov 10  }
   0x9   :  { %11715 = sst [smem:[#allocation9_spill]] %s9927_s13  ;;  %s9858_s20 = smov 11  }
   0xa   :  { %s9957_s8 = sld [smem:[%s11703_s0 + %s9855_s4]]   ;;  %s9859_s26 = smov 12  }
   0xb   :  { %s9962_s14 = sld [smem:[%s11703_s0 + %s9856_s10]]   ;;  %s9860_s1 = smov 13  }
   0xc   :  { %s9967_s19 = sld [smem:[%s11703_s0 + %s9857_s15]]   ;;  %s9861_s7 = smov 14  }
   0xd   :  { %s9972_s24 = sld [smem:[%s11703_s0 + %s9858_s20]]   ;;  %s9862_s15 = smov 15  }
   0xe   :  { %s9977_s30 = sld [smem:[%s11703_s0 + %s9859_s26]]   ;;  %s9863_s22 = smov 16  }
   0xf   :  { %s9982_s6 = sld [smem:[%s11703_s0 + %s9860_s1]]   ;;  %s9864_s28 = smov 17  }
  0x10   :  { %s9987_s12 = sld [smem:[%s11703_s0 + %s9861_s7]]   ;;  %s9865_s7 = smov 18  }
  0x11   :  { %s9992_s20 = sld [smem:[%s11703_s0 + %s9862_s15]]   ;;  %s9866_s15 = smov 19  }
  0x12   :  { %s9997_s27 = sld [smem:[%s11703_s0 + %s9863_s22]]   ;;  %s9867_s22 = smov 20  }
  0x13   :  { %s10002_s4 = sld [smem:[%s11703_s0 + %s9864_s28]]   ;;  %s9868_s28 = smov 21  }
  0x14   :  { %s10007_s13 = sld [smem:[%s11703_s0 + %s9865_s7]]   ;;  %s9869_s7 = smov 22  }
  0x17   :  { %11716 = sst [smem:[#allocation10_spill]] %s9992_s20 }
  0x18   :  { %11717 = sst [smem:[#allocation11_spill]] %s9997_s27 }
  0x19   :  { %11718 = sst [smem:[#allocation12_spill]] %s10002_s4 }
  0x1a   :  { %11719 = sst [smem:[#allocation13_spill]] %s10007_s13 }
  0x1b   :  { %s10012_s20 = sld [smem:[%s11703_s0 + %s9866_s15]]   ;;  %s9870_s15 = smov 23  }
  0x1c   :  { %s10017_s27 = sld [smem:[%s11703_s0 + %s9867_s22]]   ;;  %s9871_s22 = smov 24  }
  0x1d   :  { %s10022_s4 = sld [smem:[%s11703_s0 + %s9868_s28]]   ;;  %s9872_s28 = smov 25  }
  0x1e   :  { %s10027_s13 = sld [smem:[%s11703_s0 + %s9869_s7]]   ;;  %s9873_s7 = smov 26  }
  0x21   :  { %11720 = sst [smem:[#allocation14_spill]] %s10012_s20 }
  0x22   :  { %11721 = sst [smem:[#allocation15_spill]] %s10017_s27 }
  0x23   :  { %11722 = sst [smem:[#allocation16_spill]] %s10022_s4 }
  0x24   :  { %11723 = sst [smem:[#allocation17_spill]] %s10027_s13 }
  0x25   :  { %s10032_s20 = sld [smem:[%s11703_s0 + %s9870_s15]]   ;;  %s9874_s15 = smov 27  }
  0x26   :  { %s10037_s27 = sld [smem:[%s11703_s0 + %s9871_s22]]   ;;  %s9875_s22 = smov 28  }
  0x27   :  { %s10042_s4 = sld [smem:[%s11703_s0 + %s9872_s28]]   ;;  %s9876_s28 = smov 29  }
  0x28   :  { %s10047_s13 = sld [smem:[%s11703_s0 + %s9873_s7]]   ;;  %s9877_s7 = smov 30  }
  0x2b   :  { %11724 = sst [smem:[#allocation18_spill]] %s10032_s20 }
  0x2c   :  { %11725 = sst [smem:[#allocation19_spill]] %s10037_s27 }
  0x2d   :  { %11726 = sst [smem:[#allocation20_spill]] %s10042_s4 }
  0x2e   :  { %11727 = sst [smem:[#allocation21_spill]] %s10047_s13 }
  0x2f   :  { %s10052_s20 = sld [smem:[%s11703_s0 + %s9874_s15]]   ;;  %s9878_s15 = smov 31  }
  0x30   :  { %s10057_s27 = sld [smem:[%s11703_s0 + %s9875_s22]]   ;;  %s9879_s22 = smov 32  }
  0x31   :  { %s10062_s4 = sld [smem:[%s11703_s0 + %s9876_s28]]   ;;  %s9880_s28 = smov 33  }
  0x32   :  { %s10067_s13 = sld [smem:[%s11703_s0 + %s9877_s7]]   ;;  %s9881_s7 = smov 34  }
  0x35   :  { %11728 = sst [smem:[#allocation22_spill]] %s10052_s20 }
  0x36   :  { %11729 = sst [smem:[#allocation23_spill]] %s10057_s27 }
  0x37   :  { %11730 = sst [smem:[#allocation24_spill]] %s10062_s4 }
  0x38   :  { %11731 = sst [smem:[#allocation25_spill]] %s10067_s13 }
  0x39   :  { %s10072_s20 = sld [smem:[%s11703_s0 + %s9878_s15]]   ;;  %s9882_s15 = smov 35  }
  0x3a   :  { %s10077_s27 = sld [smem:[%s11703_s0 + %s9879_s22]]   ;;  %s9883_s22 = smov 36  }
  0x3b   :  { %s10082_s4 = sld [smem:[%s11703_s0 + %s9880_s28]]   ;;  %s9884_s28 = smov 37  }
  0x3c   :  { %s10087_s13 = sld [smem:[%s11703_s0 + %s9881_s7]]   ;;  %s9885_s7 = smov 38  }
  0x3f   :  { %11732 = sst [smem:[#allocation26_spill]] %s10072_s20 }
  0x40   :  { %11733 = sst [smem:[#allocation27_spill]] %s10077_s27 }
  0x41   :  { %11734 = sst [smem:[#allocation28_spill]] %s10082_s4 }
  0x42   :  { %11735 = sst [smem:[#allocation29_spill]] %s10087_s13 }
  0x43   :  { %s10092_s20 = sld [smem:[%s11703_s0 + %s9882_s15]]  }
  0x44   :  { %s10097_s27 = sld [smem:[%s11703_s0 + %s9883_s22]]  }
  0x45   :  { %s10102_s4 = sld [smem:[%s11703_s0 + %s9884_s28]]  }
  0x46   :  { %s10107_s13 = sld [smem:[%s11703_s0 + %s9885_s7]]  }
  0x47   :  { %83 = vsyncpa [#allocation4], 0  ;;  %v9886_v0 = vmov 0.0   ;;  %v9887_v1 = vmov 0.0|0.0   ;;  %v9263_v2 = vld [vmem:[%s9932_s17] sm:$0xff]   ;;  %v237_v4 = vld [vmem:[%s9942_s25 + $0x8] sm:$0xff] }
  0x48   :  { %8584 = vmatprep.subr.bf16.mxu0 %v9886_v0  ;;  %8996 = vmatprep.subr.bf16.mxu1 %v9887_v1  ;;  %v236_v3 = vld [vmem:[%s9942_s25] sm:$0xff]  ;;  %vm191_vm0 = vcmask 261120   ;;  %vm9888_vm1 = vmmov 0   ;;  %v9264_v6 = vld [vmem:[%s9932_s17 + $0x8] sm:$0xff]  }
  0x49   :  { %v10114_v5 = vpack.c.bf16 %v237_v4, %v236_v3  ;;  %8596 = vmatprep.mubr.msk.f32.mxu1 %vm9888_vm1, %v9886_v0  ;;  %8588 = vmatprep.mubr.msk.bf16.mxu0 %vm9888_vm1, %v9886_v0  ;;  %6774 = vst.msk [vmem:[#allocation2] sm:$0xff] %vm191_vm0, %v9886_v0  ;;  %6775 = vst.msk [vmem:[#allocation2 + $0x8] sm:$0xff] %vm191_vm0, %v9886_v0  ;;  %v238_v7 = vld [vmem:[%s9952_s3] sm:$0xff]  ;;  %v239_v8 = vld [vmem:[%s9952_s3 + $0x8] sm:$0xff] }
  0x4a   :  { %6778 = vst.msk [vmem:[#allocation2 + $0x18] sm:$0xff] %vm191_vm0, %v9886_v0  ;;  %6779 = vst.msk [vmem:[#allocation2 + $0x20] sm:$0xff] %vm191_vm0, %v9886_v0  ;;  %8585 = vmatpush3.bf16.msra.mxu0 %v9263_v2  ;;  %v160_v9 = vld [vmem:[%s9917_s5] sm:$0xff]  ;;  %v10134_v10 = vpack.c.bf16 %v239_v8, %v238_v7  ;;  %v161_v11 = vld [vmem:[%s9917_s5 + $0x8] sm:$0xff] }
  0x4b   :  { %8998 = vmatpush3.bf16.msra.mxu1 %v10114_v5  ;;  %8586 = vmatprep.subr.bf16.mxu0 %v9886_v0  ;;  %v162_v12 = vld [vmem:[%s9922_s9] sm:$0xff]  ;;  %v163_v13 = vld [vmem:[%s9922_s9 + $0x8] sm:$0xff] }
  0x4c   :  { %8999 = vmatprep.subr.bf16.mxu1 %v9887_v1  ;;  %v164_v14 = vadd.f32 %v162_v12, %v160_v9  ;;  %v165_v15 = vadd.f32 %v163_v13, %v161_v11 }
  0x4e   :  { %8597 = vmatmul.mubr.f32.vlgmr.msra.gmra.mrb[0].mxu1 %v9886_v0  ;;  %8587 = vmatpush3.bf16.msra.mxu0 %v9264_v6  ;;  %v171_v16 = vpack.c.bf16 %v165_v15, %v164_v14 }
  0x4f   :  { %9001 = vmatpush3.bf16.msra.mxu1 %v10134_v10  ;;  %8603 = vmatprep.mubr.msk.f32.mxu1 %vm9888_vm1, %v9886_v0 }
  0x50   :  { %9005 = vmatprep.subr.bf16.mxu0 %v9887_v1  ;;  %9002 = vmatprep.subr.bf16.mxu1 %v9887_v1 }
  0x51   :  { %8589 = vmatmul.mubr.msk.bf16.vlgmr.msra.gmra.mrb[0].mxu0 %vm191_vm0, %v171_v16 }
  0x52   :  { %8604 = vmatmul.mubr.f32.vlgmr.msra.gmra.mrb[2].mxu1 %v9886_v0  ;;  %9007 = vmatpush3.bf16.msra.mxu0 %v10134_v10 }
  0x53   :  { %8617 = vmatprep.mubr.msk.f32.mxu0 %vm9888_vm1, %v9886_v0  ;;  %9004 = vmatpush3.bf16.msra.mxu1 %v10114_v5 }
  0x54   :  { %8610 = vmatprep.mubr.msk.f32.mxu1 %vm9888_vm1, %v9886_v0  ;;  %9011 = vmatprep.subr.bf16.mxu0 %v9887_v1 }
  0x55   :  { %9008 = vmatprep.subr.bf16.mxu1 %v9887_v1 }
  0x56   :  { %84 = vsyncpa [#allocation6], 0  ;;  %v10157_v19 = vld [vmem:[%s9957_s8] ss:$0 sm:$0xff]  ;;  %s9889_s0 = smov 16   ;;  %s9890_s5 = smov 48  }
  0x57   :  { %v8190_v29 = vld [vmem:[%s9937_s21] ss:$0 sm:$0xff]  ;;  %s9891_s9 = smov 32   ;;  %s9892_s17 = smov 112   ;;  %vm526_vm2 = vcmask 1041409   ;;  %vm254_vm3 = vcmask 130048  }
  0x58   :  { %v10178_v56 = vld [vmem:[%s9947_s29] ss:$0 sm:$0xff]  ;;  %s9893_s21 = smov 96   ;;  %vm2618_vm4 = vcmask 1040384   ;;  %vm2621_vm5 = vcmask 1041408   ;;  %vm2624_vm6 = vcmask 1042432  }
  0x59   :  { %vm2627_vm7 = vcmask 1043456   ;;  %vm2630_vm8 = vcmask 1044480   ;;  %vm2633_vm9 = vcmask 1045504   ;;  %vm2636_vm10 = vcmask 1046528   ;;  %s9894_s25 = smov 64   ;;  %s11737_s3 = sld [smem:[#allocation12_spill]] }
  0x5a   :  { %vm5331_vm11 = vcmask 64512   ;;  %s9900_s15 = smov 72   ;;  %s9901_s16 = smov 104   ;;  %vm6703_vm12 = vcmask 195584   ;;  %vm6840_vm13 = vcmask 523264   ;;  %vm6843_vm14 = vcmask 785408  }
  0x5b   :  { %s9902_s18 = smov 40   ;;  %s9903_s22 = smov 8   ;;  %vm6776_vm15 = vcmask 257024  }
  0x5c   :  { %s11741_s23 = sld [smem:[#allocation14_spill]]  ;;  %s9904_s26 = smov 24   ;;  %6777 = vst.msk [vmem:[#allocation2 + $0x10] sm:$0xf] %vm6776_vm15, %v9886_v0  ;;  %6780 = vst.msk [vmem:[#allocation2 + $0x28] sm:$0xf] %vm6776_vm15, %v9886_v0 }
  0x5d   :  { %s11742_s28 = sld [smem:[#allocation16_spill]]  ;;  %s11743_s1 = sld [smem:[#allocation15_spill]] }
  0x5e   :  { %s11744_s2 = sld [smem:[#allocation17_spill]]  ;;  %s11745_s7 = sld [smem:[#allocation18_spill]] }
  0x5f   :  { %s11746_s10 = sld [smem:[#allocation19_spill]]  ;;  %s11747_s11 = sld [smem:[#allocation20_spill]] }
 0x121   :  { %v324_v17 = vpop.f32.mrb[0].mxu1 }
 0x122   :  { %v8598_v18 = vpop.f32.mrb[1].mxu1  ;;  %v325_v58 = vadd.f32 %v10178_v56, %v324_v17 }
 0x124   :  { %v229_v20 = vpop.f32.mrb[0].mxu0  ;;  %v399_v62 = vrot.slane %v325_v58, 1 }
 0x125   :  { %v394_v21 = vpop.f32.mrb[2].mxu1  ;;  %v8590_v22 = vpop.f32.mrb[1].mxu0  ;;  %v10165_v30 = vadd.f32 %v8190_v29, %v229_v20 }
 0x126   :  { %v395_v23 = vadd.f32 %v10157_v19, %v394_v21  ;;  %v8605_v24 = vpop.f32.mrb[3].mxu1  ;;  %v232_v25 = vpop.f32.mrb[2].mxu0 }
 0x127   :  { %v8591_v26 = vpop.f32.mrb[3].mxu0  ;;  %v10168_v33 = vadd.f32 %v8190_v29, %v232_v25  ;;  %v402_v3 = vadd.f32 %v325_v58, %v10165_v30 }
 0x128   :  { %v417_v27 = vrot.slane %v395_v23, 1  ;;  %v418_v28 = vrot.slane %v395_v23, 2 }
 0x129   :  { %v403_v63 = vadd.f32 %v399_v62, %v10168_v33  ;;  %v8196_v4 = vmul.f32 -1.442695, %v402_v3 }
 0x12a   :  { %459 = vrot.lane.b32.xlu1 %v417_v27, %s9889_s0  ;;  %419 = vrot.lane.b32.xlu0 %v417_v27, %s9890_s5 }
 0x12b   :  { %v8197_v2 = vmul.f32 -1.442695, %v403_v63 }
 0x12e   :  { %461 = vrot.lane.b32.xlu1 %v418_v28, %s9889_s0  ;;  %421 = vrot.lane.b32.xlu0 %v418_v28, %s9890_s5 }
 0x19c   :  { %v420_v31 = vpop.permute.xlu0 %419  ;;  %v460_v42 = vpop.permute.xlu1 %459 }
 0x19d   :  { %v425_v32 = vadd.f32 %v420_v31, %v10165_v30 }
 0x19f   :  { %v8198_v34 = vmul.f32 -1.442695, %v425_v32 }
 0x1a0   :  { %v422_v35 = vpop.permute.xlu0 %421  ;;  %v462_v46 = vpop.permute.xlu1 %461 }
 0x1a1   :  { %9327 = vpow2.f32 %v8198_v34  ;;  %v426_v36 = vadd.f32 %v422_v35, %v10168_v33 }
 0x1a3   :  { %v8199_v37 = vmul.f32 -1.442695, %v426_v36 }
 0x1a5   :  { %9329 = vpow2.f32 %v8199_v37 }
 0x1ab   :  { %v9328_v38 = vpop.eup %9327 }
 0x1ac   :  { %v433_v39 = vadd.f32 1.0, %v9328_v38 }
 0x1ae   :  { %9331 = vrcp.f32 %v433_v39 }
 0x1af   :  { %v9330_v40 = vpop.eup %9329 }
 0x1b0   :  { %v434_v41 = vadd.f32 1.0, %v9330_v40 }
 0x1b2   :  { %9333 = vrcp.f32 %v434_v41 }
 0x1b8   :  { %v9332_v43 = vpop.eup %9331 }
 0x1b9   :  { %v465_v44 = vmul.f32 %v9332_v43, %v460_v42 }
 0x1bb   :  { %469 = vrot.lane.b32.xlu0 %v465_v44, %s9891_s9 }
 0x1bc   :  { %v9334_v45 = vpop.eup %9333 }
 0x1bd   :  { %v466_v47 = vmul.f32 %v9334_v45, %v462_v46 }
 0x1bf   :  { %471 = vrot.lane.b32.xlu1 %v466_v47, %s9891_s9 }
 0x22d   :  { %v470_v48 = vpop.permute.xlu0 %469 }
 0x22e   :  { %v475_v49 = vadd.f32 %v470_v48, %v10165_v30 }
 0x230   :  { %9335 = vtanh.f32 %v475_v49 }
 0x231   :  { %v472_v50 = vpop.permute.xlu1 %471 }
 0x232   :  { %v476_v51 = vadd.f32 %v472_v50, %v10168_v33 }
 0x234   :  { %9337 = vtanh.f32 %v476_v51 }
 0x235   :  { %9339 = vpow2.f32 %v8197_v2 }
 0x236   :  { %9341 = vpow2.f32 %v8196_v4 }
 0x23a   :  { %v9336_v52 = vpop.eup %9335 }
 0x23b   :  { %v501_v53 = vsub.f32 0.0, %v9336_v52 }
 0x23d   :  { %505 = vrot.lane.b32.xlu0 %v501_v53, %s9892_s17 }
 0x23e   :  { %v9338_v54 = vpop.eup %9337 }
 0x23f   :  { %v502_v55 = vsub.f32 0.0, %v9338_v54  ;;  %v9340_v6 = vpop.eup %9339 }
 0x240   :  { %v411_v7 = vadd.f32 1.0, %v9340_v6  ;;  %v9342_v8 = vpop.eup %9341 }
 0x241   :  { %507 = vrot.lane.b32.xlu1 %v502_v55, %s9892_s17  ;;  %v410_v9 = vadd.f32 1.0, %v9342_v8 }
 0x242   :  { %9343 = vrcp.f32 %v411_v7 }
 0x243   :  { %9345 = vrcp.f32 %v410_v9 }
 0x24c   :  { %v9344_v13 = vpop.eup %9343 }
 0x24d   :  { %v9346_v23 = vpop.eup %9345 }
 0x2af   :  { %v506_v57 = vpop.permute.xlu0 %505 }
 0x2b0   :  { %v511_v59 = vmul.f32 %v9332_v43, %v506_v57 }
 0x2b2   :  { %515 = vrot.lane.b32.xlu0 %v511_v59, %s9889_s0 }
 0x2b3   :  { %v508_v60 = vpop.permute.xlu1 %507 }
 0x2b4   :  { %v512_v61 = vmul.f32 %v9334_v45, %v508_v60 }
 0x2b6   :  { %441 = vrot.lane.b32.xlu0 %v399_v62, %s9893_s21  ;;  %517 = vrot.lane.b32.xlu1 %v512_v61, %s9889_s0 }
 0x2ba   :  { %439 = vrot.lane.b32.xlu1 %v325_v58, %s9893_s21 }
 0x324   :  { %v516_v11 = vpop.permute.xlu0 %515 }
 0x325   :  { %v10187_v12 = vadd.f32 %v9336_v52, %v516_v11 }
 0x327   :  { %v604_v18 = vrot.slane %v10187_v12, 7 }
 0x328   :  { %v442_v14 = vpop.permute.xlu0 %441  ;;  %v518_v15 = vpop.permute.xlu1 %517 }
 0x329   :  { %v446_v16 = vmul.f32 %v9344_v13, %v442_v14  ;;  %v10189_v17 = vadd.f32 %v9338_v54, %v518_v15 }
 0x32b   :  { %451 = vrot.lane.b32.xlu1 %v446_v16, %s9891_s9  ;;  %v605_v20 = vrot.slane %v10189_v17, 6 }
 0x32c   :  { %v440_v21 = vpop.permute.xlu1 %439 }
 0x32d   :  { %v606_v22 = vsel %vm526_vm2, %v605_v20, %v604_v18  ;;  %v445_v24 = vmul.f32 %v9346_v23, %v440_v21 }
 0x32e   :  { %607 = vrot.lane.b32.xlu0 %v606_v22, %s9890_s5 }
 0x332   :  { %449 = vrot.lane.b32.xlu0 %v445_v24, %s9891_s9 }
 0x39d   :  { %v452_v25 = vpop.permute.xlu1 %451 }
 0x39e   :  { %v456_v26 = vadd.f32 %v452_v25, %v10168_v33 }
 0x3a0   :  { %9347 = vtanh.f32 %v456_v26  ;;  %v608_v27 = vpop.permute.xlu0 %607 }
 0x3a1   :  { %8618 = vmatmul.mubr.msk.f32.vlgmr.msra.gmra.mrb[4].mxu0 %vm254_vm3, %v608_v27 }
 0x3a2   :  { %9013 = vmatpush3.bf16.msra.mxu0 %v10134_v10  ;;  %8631 = vmatprep.mubr.msk.f32.mxu0 %vm9888_vm1, %v9886_v0 }
 0x3a3   :  { %9017 = vmatprep.subr.bf16.mxu0 %v9887_v1 }
 0x3a4   :  { %v450_v28 = vpop.permute.xlu0 %449 }
 0x3a5   :  { %v455_v29 = vadd.f32 %v450_v28, %v10165_v30 }
 0x3a7   :  { %9349 = vtanh.f32 %v455_v29 }
 0x3aa   :  { %v9348_v31 = vpop.eup %9347 }
 0x3ab   :  { %v480_v32 = vsub.f32 0.0, %v9348_v31 }
 0x3ad   :  { %485 = vrot.lane.b32.xlu1 %v480_v32, %s9892_s17 }
 0x3b1   :  { %v9350_v34 = vpop.eup %9349 }
 0x3b2   :  { %v479_v35 = vsub.f32 0.0, %v9350_v34 }
 0x3b4   :  { %483 = vrot.lane.b32.xlu0 %v479_v35, %s9892_s17 }
 0x41f   :  { %v486_v36 = vpop.permute.xlu1 %485 }
 0x420   :  { %v490_v37 = vmul.f32 %v9344_v13, %v486_v36 }
 0x422   :  { %495 = vrot.lane.b32.xlu1 %v490_v37, %s9889_s0 }
 0x426   :  { %v484_v38 = vpop.permute.xlu0 %483 }
 0x427   :  { %v489_v39 = vmul.f32 %v9346_v23, %v484_v38 }
 0x429   :  { %493 = vrot.lane.b32.xlu0 %v489_v39, %s9889_s0 }
 0x474   :  { %v677_v40 = vpop.f32.mrb[4].mxu0 }
 0x475   :  { %v678_v41 = vadd.f32 %v10157_v19, %v677_v40  ;;  %v8619_v42 = vpop.f32.mrb[5].mxu0 }
 0x477   :  { %v700_v43 = vrot.slane %v678_v41, 2  ;;  %v701_v50 = vrot.slane %v678_v41, 3 }
 0x479   :  { %702 = vrot.lane.b32.xlu0 %v700_v43, %s9890_s5 }
 0x47d   :  { %742 = vrot.lane.b32.xlu0 %v700_v43, %s9889_s0 }
 0x494   :  { %v496_v44 = vpop.permute.xlu1 %495 }
 0x495   :  { %v10211_v45 = vadd.f32 %v9348_v31, %v496_v44 }
 0x497   :  { %v525_v48 = vrot.slane %v10211_v45, 7 }
 0x49b   :  { %v494_v46 = vpop.permute.xlu0 %493 }
 0x49c   :  { %v10213_v47 = vadd.f32 %v9350_v34, %v494_v46 }
 0x49e   :  { %v527_v49 = vsel %vm526_vm2, %v525_v48, %v10213_v47 }
 0x49f   :  { %528 = vrot.lane.b32.xlu1 %v527_v49, %s9893_s21 }
 0x4a3   :  { %704 = vrot.lane.b32.xlu1 %v701_v50, %s9890_s5 }
 0x4a7   :  { %744 = vrot.lane.b32.xlu1 %v701_v50, %s9889_s0 }
 0x4eb   :  { %v703_v51 = vpop.permute.xlu0 %702 }
 0x4ec   :  { %v708_v52 = vadd.f32 %v703_v51, %v10165_v30 }
 0x4ee   :  { %v8204_v53 = vmul.f32 -1.442695, %v708_v52 }
 0x4ef   :  { %v743_v58 = vpop.permute.xlu0 %742 }
 0x4f0   :  { %9351 = vpow2.f32 %v8204_v53 }
 0x4fa   :  { %v9352_v54 = vpop.eup %9351 }
 0x4fb   :  { %v716_v55 = vadd.f32 1.0, %v9352_v54 }
 0x4fd   :  { %9353 = vrcp.f32 %v716_v55 }
 0x507   :  { %v9354_v57 = vpop.eup %9353 }
 0x508   :  { %v748_v59 = vmul.f32 %v9354_v57, %v743_v58 }
 0x50a   :  { %752 = vrot.lane.b32.xlu0 %v748_v59, %s9891_s9 }
 0x511   :  { %v529_v60 = vpop.permute.xlu1 %528 }
 0x512   :  { %8611 = vmatmul.mubr.msk.f32.vlgmr.msra.gmra.mrb[4].mxu1 %vm254_vm3, %v529_v60 }
 0x513   :  { %9010 = vmatpush3.bf16.msra.mxu1 %v10114_v5  ;;  %8624 = vmatprep.mubr.msk.f32.mxu1 %vm9888_vm1, %v9886_v0 }
 0x514   :  { %9014 = vmatprep.subr.bf16.mxu1 %v9887_v1 }
 0x515   :  { %v705_v61 = vpop.permute.xlu1 %704 }
 0x516   :  { %v709_v62 = vadd.f32 %v705_v61, %v10168_v33 }
 0x518   :  { %v8205_v63 = vmul.f32 -1.442695, %v709_v62 }
 0x519   :  { %v745_v6 = vpop.permute.xlu1 %744 }
 0x51a   :  { %9355 = vpow2.f32 %v8205_v63 }
 0x524   :  { %v9356_v2 = vpop.eup %9355 }
 0x525   :  { %v717_v3 = vadd.f32 1.0, %v9356_v2 }
 0x527   :  { %9357 = vrcp.f32 %v717_v3 }
 0x531   :  { %v9358_v4 = vpop.eup %9357 }
 0x532   :  { %v749_v7 = vmul.f32 %v9358_v4, %v745_v6 }
 0x534   :  { %754 = vrot.lane.b32.xlu1 %v749_v7, %s9891_s9 }
 0x57c   :  { %v753_v8 = vpop.permute.xlu0 %752 }
 0x57d   :  { %v758_v9 = vadd.f32 %v753_v8, %v10165_v30 }
 0x57f   :  { %9359 = vtanh.f32 %v758_v9 }
 0x589   :  { %v9360_v11 = vpop.eup %9359 }
 0x58a   :  { %v794_v13 = vrot.slane %v9360_v11, 7 }
 0x58c   :  { %v798_v14 = vsub.f32 %v10187_v12, %v794_v13 }
 0x58e   :  { %v802_v15 = vrot.slane %v798_v14, 1 }
 0x590   :  { %804 = vrot.lane.b32.xlu0 %v802_v15, %s9892_s17 }
 0x5a6   :  { %v755_v16 = vpop.permute.xlu1 %754 }
 0x5a7   :  { %v759_v18 = vadd.f32 %v755_v16, %v10168_v33 }
 0x5a9   :  { %9361 = vtanh.f32 %v759_v18 }
 0x5b3   :  { %v9362_v20 = vpop.eup %9361 }
 0x5b4   :  { %v795_v21 = vrot.slane %v9362_v20, 7 }
 0x5b6   :  { %v799_v22 = vsub.f32 %v10189_v17, %v795_v21 }
 0x5b8   :  { %v803_v23 = vrot.slane %v799_v22, 1 }
 0x5ba   :  { %806 = vrot.lane.b32.xlu1 %v803_v23, %s9892_s17 }
 0x5e5   :  { %v598_v24 = vpop.f32.mrb[4].mxu1 }
 0x5e6   :  { %v599_v25 = vadd.f32 %v10178_v56, %v598_v24  ;;  %v8612_v26 = vpop.f32.mrb[5].mxu1 }
 0x5e8   :  { %724 = vrot.lane.b32.xlu1 %v599_v25, %s9893_s21  ;;  %v682_v27 = vrot.slane %v599_v25, 7  ;;  %v686_v34 = vadd.f32 %v599_v25, %v10168_v33 }
 0x5ea   :  { %722 = vrot.lane.b32.xlu0 %v682_v27, %s9893_s21  ;;  %v685_v35 = vadd.f32 %v682_v27, %v10165_v30  ;;  %v8203_v36 = vmul.f32 -1.442695, %v686_v34 }
 0x5ec   :  { %v8202_v37 = vmul.f32 -1.442695, %v685_v35  ;;  %9363 = vpow2.f32 %v8203_v36 }
 0x5ee   :  { %9365 = vpow2.f32 %v8202_v37 }
 0x5f6   :  { %v9364_v38 = vpop.eup %9363 }
 0x5f7   :  { %v694_v40 = vadd.f32 1.0, %v9364_v38 }
 0x5f8   :  { %v9366_v39 = vpop.eup %9365 }
 0x5f9   :  { %v693_v41 = vadd.f32 1.0, %v9366_v39  ;;  %9367 = vrcp.f32 %v694_v40 }
 0x5fb   :  { %9369 = vrcp.f32 %v693_v41 }
 0x602   :  { %v805_v28 = vpop.permute.xlu0 %804 }
 0x603   :  { %v810_v29 = vmul.f32 %v9354_v57, %v805_v28  ;;  %v9368_v42 = vpop.eup %9367 }
 0x605   :  { %814 = vrot.lane.b32.xlu0 %v810_v29, %s9889_s0  ;;  %v9370_v46 = vpop.eup %9369 }
 0x62c   :  { %v807_v31 = vpop.permute.xlu1 %806 }
 0x62d   :  { %v811_v32 = vmul.f32 %v9358_v4, %v807_v31 }
 0x62f   :  { %816 = vrot.lane.b32.xlu1 %v811_v32, %s9889_s0 }
 0x65a   :  { %v725_v43 = vpop.permute.xlu1 %724 }
 0x65b   :  { %v729_v44 = vmul.f32 %v9368_v42, %v725_v43 }
 0x65c   :  { %v723_v48 = vpop.permute.xlu0 %722 }
 0x65d   :  { %v728_v49 = vmul.f32 %v9370_v46, %v723_v48  ;;  %734 = vrot.lane.b32.xlu1 %v729_v44, %s9891_s9 }
 0x65f   :  { %732 = vrot.lane.b32.xlu0 %v728_v49, %s9891_s9 }
 0x677   :  { %v815_v50 = vpop.permute.xlu0 %814 }
 0x678   :  { %v10245_v51 = vadd.f32 %v9360_v11, %v815_v50 }
 0x67a   :  { %v902_v54 = vrot.slane %v10245_v51, 6 }
 0x6a1   :  { %v817_v52 = vpop.permute.xlu1 %816 }
 0x6a2   :  { %v10247_v53 = vadd.f32 %v9362_v20, %v817_v52 }
 0x6a4   :  { %v903_v55 = vrot.slane %v10247_v53, 5 }
 0x6a6   :  { %v904_v57 = vsel %vm526_vm2, %v903_v55, %v902_v54 }
 0x6a7   :  { %905 = vrot.lane.b32.xlu0 %v904_v57, %s9890_s5 }
 0x6cf   :  { %v735_v58 = vpop.permute.xlu1 %734 }
 0x6d0   :  { %v739_v59 = vadd.f32 %v735_v58, %v10168_v33 }
 0x6d1   :  { %v733_v60 = vpop.permute.xlu0 %732 }
 0x6d2   :  { %9371 = vtanh.f32 %v739_v59  ;;  %v738_v61 = vadd.f32 %v733_v60, %v10165_v30 }
 0x6d4   :  { %9373 = vtanh.f32 %v738_v61 }
 0x6dc   :  { %v9372_v62 = vpop.eup %9371 }
 0x6dd   :  { %v765_v63 = vrot.slane %v9372_v62, 1 }
 0x6de   :  { %v9374_v2 = vpop.eup %9373 }
 0x6df   :  { %v769_v3 = vsub.f32 %v10211_v45, %v765_v63  ;;  %v764_v4 = vrot.slane %v9374_v2, 1 }
 0x6e1   :  { %v773_v6 = vrot.slane %v769_v3, 7  ;;  %v768_v7 = vsub.f32 %v10213_v47, %v764_v4 }
 0x6e3   :  { %776 = vrot.lane.b32.xlu0 %v773_v6, %s9892_s17  ;;  %v772_v8 = vrot.slane %v768_v7, 7 }
 0x6e5   :  { %774 = vrot.lane.b32.xlu1 %v772_v8, %s9892_s17 }
 0x719   :  { %v906_v9 = vpop.permute.xlu0 %905 }
 0x71a   :  { %8632 = vmatmul.mubr.msk.f32.vlgmr.msra.gmra.mrb[6].mxu0 %vm254_vm3, %v906_v9 }
 0x71b   :  { %9019 = vmatpush3.bf16.msra.mxu0 %v10134_v10  ;;  %8645 = vmatprep.mubr.msk.f32.mxu0 %vm9888_vm1, %v9886_v0 }
 0x71c   :  { %9023 = vmatprep.subr.bf16.mxu0 %v9887_v1 }
 0x755   :  { %v777_v11 = vpop.permute.xlu0 %776 }
 0x756   :  { %v781_v13 = vmul.f32 %v9368_v42, %v777_v11 }
 0x757   :  { %v775_v14 = vpop.permute.xlu1 %774 }
 0x758   :  { %v780_v15 = vmul.f32 %v9370_v46, %v775_v14  ;;  %786 = vrot.lane.b32.xlu0 %v781_v13, %s9889_s0 }
 0x75a   :  { %784 = vrot.lane.b32.xlu1 %v780_v15, %s9889_s0 }
 0x7ca   :  { %v787_v16 = vpop.permute.xlu0 %786 }
 0x7cb   :  { %v10268_v21 = vadd.f32 %v9372_v62, %v787_v16 }
 0x7cc   :  { %v785_v18 = vpop.permute.xlu1 %784 }
 0x7cd   :  { %v10266_v20 = vadd.f32 %v9374_v2, %v785_v18 }
 0x7cf   :  { %v824_v22 = vrot.slane %v10266_v20, 1 }
 0x7d1   :  { %v825_v23 = vsel %vm526_vm2, %v10268_v21, %v824_v22 }
 0x7d2   :  { %826 = vrot.lane.b32.xlu1 %v825_v23, %s9893_s21 }
 0x7ed   :  { %v975_v24 = vpop.f32.mrb[6].mxu0 }
 0x7ee   :  { %v976_v25 = vadd.f32 %v10157_v19, %v975_v24  ;;  %v8633_v26 = vpop.f32.mrb[7].mxu0 }
 0x7f0   :  { %v999_v27 = vrot.slane %v976_v25, 3  ;;  %v1000_v28 = vrot.slane %v976_v25, 4 }
 0x7f2   :  { %1003 = vrot.lane.b32.xlu1 %v1000_v28, %s9890_s5  ;;  %1001 = vrot.lane.b32.xlu0 %v999_v27, %s9890_s5 }
 0x7f6   :  { %1043 = vrot.lane.b32.xlu1 %v1000_v28, %s9889_s0  ;;  %1041 = vrot.lane.b32.xlu0 %v999_v27, %s9889_s0 }
 0x844   :  { %v827_v29 = vpop.permute.xlu1 %826 }
 0x845   :  { %8625 = vmatmul.mubr.msk.f32.vlgmr.msra.gmra.mrb[6].mxu1 %vm254_vm3, %v827_v29 }
 0x846   :  { %9016 = vmatpush3.bf16.msra.mxu1 %v10114_v5  ;;  %8638 = vmatprep.mubr.msk.f32.mxu1 %vm9888_vm1, %v9886_v0 }
 0x847   :  { %9020 = vmatprep.subr.bf16.mxu1 %v9887_v1 }
 0x864   :  { %v1004_v31 = vpop.permute.xlu1 %1003  ;;  %v1002_v32 = vpop.permute.xlu0 %1001 }
 0x865   :  { %v1008_v34 = vadd.f32 %v1004_v31, %v10168_v33  ;;  %v1007_v35 = vadd.f32 %v1002_v32, %v10165_v30 }
 0x867   :  { %v8211_v36 = vmul.f32 -1.442695, %v1008_v34  ;;  %v8210_v37 = vmul.f32 -1.442695, %v1007_v35 }
 0x868   :  { %v1044_v43 = vpop.permute.xlu1 %1043  ;;  %v1042_v48 = vpop.permute.xlu0 %1041 }
 0x869   :  { %9375 = vpow2.f32 %v8211_v36 }
 0x86a   :  { %9377 = vpow2.f32 %v8210_v37 }
 0x873   :  { %v9376_v38 = vpop.eup %9375 }
 0x874   :  { %v9378_v39 = vpop.eup %9377  ;;  %v1016_v40 = vadd.f32 1.0, %v9376_v38 }
 0x875   :  { %v1015_v41 = vadd.f32 1.0, %v9378_v39 }
 0x876   :  { %9379 = vrcp.f32 %v1016_v40 }
 0x877   :  { %9381 = vrcp.f32 %v1015_v41 }
 0x880   :  { %v9380_v42 = vpop.eup %9379 }
 0x881   :  { %v9382_v44 = vpop.eup %9381  ;;  %v1048_v46 = vmul.f32 %v9380_v42, %v1044_v43 }
 0x882   :  { %v1047_v49 = vmul.f32 %v9382_v44, %v1042_v48 }
 0x883   :  { %1053 = vrot.lane.b32.xlu1 %v1048_v46, %s9891_s9 }
 0x884   :  { %1051 = vrot.lane.b32.xlu0 %v1047_v49, %s9891_s9 }
 0x8f5   :  { %v1054_v50 = vpop.permute.xlu1 %1053 }
 0x8f6   :  { %v1058_v52 = vadd.f32 %v1054_v50, %v10168_v33  ;;  %v1052_v54 = vpop.permute.xlu0 %1051 }
 0x8f7   :  { %v1057_v55 = vadd.f32 %v1052_v54, %v10165_v30 }
 0x8f8   :  { %9383 = vtanh.f32 %v1058_v52 }
 0x8f9   :  { %9385 = vtanh.f32 %v1057_v55 }
 0x902   :  { %v9384_v57 = vpop.eup %9383 }
 0x903   :  { %v9386_v58 = vpop.eup %9385  ;;  %v1094_v59 = vrot.slane %v9384_v57, 7 }
 0x904   :  { %v1093_v60 = vrot.slane %v9386_v58, 7 }
 0x905   :  { %v1098_v61 = vsub.f32 %v10247_v53, %v1094_v59 }
 0x906   :  { %v1097_v62 = vsub.f32 %v10245_v51, %v1093_v60 }
 0x907   :  { %v1102_v63 = vrot.slane %v1098_v61, 1 }
 0x908   :  { %v1101_v2 = vrot.slane %v1097_v62, 1 }
 0x909   :  { %1105 = vrot.lane.b32.xlu1 %v1102_v63, %s9892_s17 }
 0x90a   :  { %1103 = vrot.lane.b32.xlu0 %v1101_v2, %s9892_s17 }
 0x918   :  { %v896_v3 = vpop.f32.mrb[6].mxu1 }
 0x919   :  { %v897_v4 = vadd.f32 %v10178_v56, %v896_v3  ;;  %v8626_v6 = vpop.f32.mrb[7].mxu1 }
 0x91b   :  { %v980_v7 = vrot.slane %v897_v4, 6  ;;  %v981_v8 = vrot.slane %v897_v4, 7 }
 0x91d   :  { %1023 = vrot.lane.b32.xlu1 %v981_v8, %s9893_s21  ;;  %1021 = vrot.lane.b32.xlu0 %v980_v7, %s9893_s21  ;;  %v984_v9 = vadd.f32 %v980_v7, %v10165_v30  ;;  %v985_v11 = vadd.f32 %v981_v8, %v10168_v33 }
 0x91f   :  { %v8208_v13 = vmul.f32 -1.442695, %v984_v9  ;;  %v8209_v14 = vmul.f32 -1.442695, %v985_v11 }
 0x921   :  { %9387 = vpow2.f32 %v8208_v13 }
 0x922   :  { %9389 = vpow2.f32 %v8209_v14 }
 0x92b   :  { %v9388_v22 = vpop.eup %9387 }
 0x92c   :  { %v9390_v24 = vpop.eup %9389  ;;  %v992_v25 = vadd.f32 1.0, %v9388_v22 }
 0x92d   :  { %v993_v26 = vadd.f32 1.0, %v9390_v24 }
 0x92e   :  { %9391 = vrcp.f32 %v992_v25 }
 0x92f   :  { %9393 = vrcp.f32 %v993_v26 }
 0x938   :  { %v9392_v27 = vpop.eup %9391 }
 0x939   :  { %v9394_v28 = vpop.eup %9393 }
 0x97b   :  { %v1106_v15 = vpop.permute.xlu1 %1105 }
 0x97c   :  { %v1110_v16 = vmul.f32 %v9380_v42, %v1106_v15  ;;  %v1104_v18 = vpop.permute.xlu0 %1103 }
 0x97d   :  { %v1109_v23 = vmul.f32 %v9382_v44, %v1104_v18 }
 0x97e   :  { %1115 = vrot.lane.b32.xlu1 %v1110_v16, %s9889_s0 }
 0x97f   :  { %1113 = vrot.lane.b32.xlu0 %v1109_v23, %s9889_s0 }
 0x98f   :  { %v1024_v29 = vpop.permute.xlu1 %1023  ;;  %v1022_v31 = vpop.permute.xlu0 %1021 }
 0x990   :  { %v1028_v32 = vmul.f32 %v9394_v28, %v1024_v29  ;;  %v1027_v34 = vmul.f32 %v9392_v27, %v1022_v31 }
 0x992   :  { %1033 = vrot.lane.b32.xlu1 %v1028_v32, %s9891_s9  ;;  %1031 = vrot.lane.b32.xlu0 %v1027_v34, %s9891_s9 }
 0x9f0   :  { %v1116_v35 = vpop.permute.xlu1 %1115 }
 0x9f1   :  { %v10303_v36 = vadd.f32 %v9384_v57, %v1116_v35  ;;  %v1114_v37 = vpop.permute.xlu0 %1113 }
 0x9f2   :  { %v10305_v38 = vadd.f32 %v9386_v58, %v1114_v37 }
 0x9f3   :  { %v1203_v39 = vrot.slane %v10303_v36, 4 }
 0x9f4   :  { %v1202_v40 = vrot.slane %v10305_v38, 5 }
 0x9f6   :  { %v1204_v41 = vsel %vm526_vm2, %v1203_v39, %v1202_v40 }
 0x9f7   :  { %1205 = vrot.lane.b32.xlu0 %v1204_v41, %s9890_s5 }
 0xa04   :  { %v1034_v42 = vpop.permute.xlu1 %1033  ;;  %v1032_v43 = vpop.permute.xlu0 %1031 }
 0xa05   :  { %v1038_v44 = vadd.f32 %v1034_v42, %v10168_v33  ;;  %v1037_v46 = vadd.f32 %v1032_v43, %v10165_v30 }
 0xa07   :  { %9395 = vtanh.f32 %v1038_v44 }
 0xa08   :  { %9397 = vtanh.f32 %v1037_v46 }
 0xa11   :  { %v9396_v48 = vpop.eup %9395 }
 0xa12   :  { %v9398_v49 = vpop.eup %9397  ;;  %v1064_v50 = vrot.slane %v9396_v48, 1 }
 0xa13   :  { %v1063_v52 = vrot.slane %v9398_v49, 1 }
 0xa14   :  { %v1068_v54 = vsub.f32 %v10268_v21, %v1064_v50 }
 0xa15   :  { %v1067_v55 = vsub.f32 %v10266_v20, %v1063_v52 }
 0xa16   :  { %v1072_v57 = vrot.slane %v1068_v54, 7 }
 0xa17   :  { %v1071_v58 = vrot.slane %v1067_v55, 7 }
 0xa18   :  { %1075 = vrot.lane.b32.xlu0 %v1072_v57, %s9892_s17 }
 0xa19   :  { %1073 = vrot.lane.b32.xlu1 %v1071_v58, %s9892_s17 }
 0xa69   :  { %v1206_v59 = vpop.permute.xlu0 %1205 }
 0xa6a   :  { %8646 = vmatmul.mubr.msk.f32.vlgmr.msra.gmra.mrb[8].mxu0 %vm254_vm3, %v1206_v59 }
 0xa6b   :  { %9025 = vmatpush3.bf16.msra.mxu0 %v10134_v10  ;;  %8659 = vmatprep.mubr.msk.f32.mxu0 %vm9888_vm1, %v9886_v0 }
 0xa6c   :  { %9029 = vmatprep.subr.bf16.mxu0 %v9887_v1 }
 0xa8a   :  { %v1076_v60 = vpop.permute.xlu0 %1075 }
 0xa8b   :  { %v1074_v61 = vpop.permute.xlu1 %1073  ;;  %v1080_v62 = vmul.f32 %v9394_v28, %v1076_v60 }
 0xa8c   :  { %v1079_v63 = vmul.f32 %v9392_v27, %v1074_v61 }
 0xa8d   :  { %1085 = vrot.lane.b32.xlu0 %v1080_v62, %s9889_s0 }
 0xa8e   :  { %1083 = vrot.lane.b32.xlu1 %v1079_v63, %s9889_s0 }
 0xaff   :  { %v1086_v2 = vpop.permute.xlu0 %1085 }
 0xb00   :  { %v1084_v3 = vpop.permute.xlu1 %1083  ;;  %v10324_v4 = vadd.f32 %v9396_v48, %v1086_v2 }
 0xb01   :  { %v10326_v6 = vadd.f32 %v9398_v49, %v1084_v3 }
 0xb02   :  { %v1124_v7 = vrot.slane %v10324_v4, 1 }
 0xb03   :  { %v1123_v8 = vrot.slane %v10326_v6, 2 }
 0xb05   :  { %v1125_v9 = vsel %vm526_vm2, %v1124_v7, %v1123_v8 }
 0xb06   :  { %1126 = vrot.lane.b32.xlu1 %v1125_v9, %s9893_s21 }
 0xb3d   :  { %v1275_v11 = vpop.f32.mrb[8].mxu0 }
 0xb3e   :  { %v1276_v13 = vadd.f32 %v10157_v19, %v1275_v11  ;;  %v8647_v14 = vpop.f32.mrb[9].mxu0 }
 0xb40   :  { %v1299_v15 = vrot.slane %v1276_v13, 4  ;;  %v1300_v16 = vrot.slane %v1276_v13, 5 }
 0xb42   :  { %1303 = vrot.lane.b32.xlu1 %v1300_v16, %s9890_s5  ;;  %1301 = vrot.lane.b32.xlu0 %v1299_v15, %s9890_s5 }
 0xb46   :  { %1343 = vrot.lane.b32.xlu1 %v1300_v16, %s9889_s0  ;;  %1341 = vrot.lane.b32.xlu0 %v1299_v15, %s9889_s0 }
 0xb78   :  { %v1127_v18 = vpop.permute.xlu1 %1126 }
 0xb79   :  { %8639 = vmatmul.mubr.msk.f32.vlgmr.msra.gmra.mrb[8].mxu1 %vm254_vm3, %v1127_v18 }
 0xb7a   :  { %9022 = vmatpush3.bf16.msra.mxu1 %v10114_v5  ;;  %8652 = vmatprep.mubr.msk.f32.mxu1 %vm9888_vm1, %v9886_v0 }
 0xb7b   :  { %9026 = vmatprep.subr.bf16.mxu1 %v9887_v1 }
 0xbb4   :  { %v1304_v22 = vpop.permute.xlu1 %1303  ;;  %v1302_v23 = vpop.permute.xlu0 %1301 }
 0xbb5   :  { %v1308_v24 = vadd.f32 %v1304_v22, %v10168_v33  ;;  %v1307_v25 = vadd.f32 %v1302_v23, %v10165_v30 }
 0xbb7   :  { %v8217_v26 = vmul.f32 -1.442695, %v1308_v24  ;;  %v8216_v27 = vmul.f32 -1.442695, %v1307_v25 }
 0xbb8   :  { %v1344_v35 = vpop.permute.xlu1 %1343  ;;  %v1342_v40 = vpop.permute.xlu0 %1341 }
 0xbb9   :  { %9399 = vpow2.f32 %v8217_v26 }
 0xbba   :  { %9401 = vpow2.f32 %v8216_v27 }
 0xbc3   :  { %v9400_v28 = vpop.eup %9399 }
 0xbc4   :  { %v9402_v29 = vpop.eup %9401  ;;  %v1316_v31 = vadd.f32 1.0, %v9400_v28 }
 0xbc5   :  { %v1315_v32 = vadd.f32 1.0, %v9402_v29 }
 0xbc6   :  { %9403 = vrcp.f32 %v1316_v31 }
 0xbc7   :  { %9405 = vrcp.f32 %v1315_v32 }
 0xbd0   :  { %v9404_v34 = vpop.eup %9403 }
 0xbd1   :  { %v9406_v37 = vpop.eup %9405  ;;  %v1348_v39 = vmul.f32 %v9404_v34, %v1344_v35 }
 0xbd2   :  { %v1347_v41 = vmul.f32 %v9406_v37, %v1342_v40 }
 0xbd3   :  { %1353 = vrot.lane.b32.xlu1 %v1348_v39, %s9891_s9 }
 0xbd4   :  { %1351 = vrot.lane.b32.xlu0 %v1347_v41, %s9891_s9 }
 0xc45   :  { %v1354_v42 = vpop.permute.xlu1 %1353 }
 0xc46   :  { %v1358_v43 = vadd.f32 %v1354_v42, %v10168_v33  ;;  %v1352_v44 = vpop.permute.xlu0 %1351 }
 0xc47   :  { %v1357_v46 = vadd.f32 %v1352_v44, %v10165_v30 }
 0xc48   :  { %9407 = vtanh.f32 %v1358_v43 }
 0xc49   :  { %9409 = vtanh.f32 %v1357_v46 }
 0xc4c   :  { %v1196_v48 = vpop.f32.mrb[8].mxu1 }
 0xc4d   :  { %v1197_v49 = vadd.f32 %v10178_v56, %v1196_v48  ;;  %v8640_v50 = vpop.f32.mrb[9].mxu1 }
 0xc4f   :  { %v1280_v52 = vrot.slane %v1197_v49, 5  ;;  %v1281_v54 = vrot.slane %v1197_v49, 6 }
 0xc51   :  { %1323 = vrot.lane.b32.xlu1 %v1281_v54, %s9893_s21  ;;  %1321 = vrot.lane.b32.xlu0 %v1280_v52, %s9893_s21  ;;  %v1284_v2 = vadd.f32 %v1280_v52, %v10165_v30  ;;  %v1285_v3 = vadd.f32 %v1281_v54, %v10168_v33 }
 0xc52   :  { %v9408_v55 = vpop.eup %9407 }
 0xc53   :  { %v9410_v57 = vpop.eup %9409  ;;  %v1394_v58 = vrot.slane %v9408_v55, 7  ;;  %v8214_v7 = vmul.f32 -1.442695, %v1284_v2  ;;  %v8215_v8 = vmul.f32 -1.442695, %v1285_v3 }
 0xc54   :  { %v1393_v59 = vrot.slane %v9410_v57, 7 }
 0xc55   :  { %v1398_v60 = vsub.f32 %v10303_v36, %v1394_v58  ;;  %9411 = vpow2.f32 %v8214_v7 }
 0xc56   :  { %v1397_v61 = vsub.f32 %v10305_v38, %v1393_v59  ;;  %9413 = vpow2.f32 %v8215_v8 }
 0xc57   :  { %v1402_v62 = vrot.slane %v1398_v60, 1 }
 0xc58   :  { %v1401_v63 = vrot.slane %v1397_v61, 1 }
 0xc59   :  { %1405 = vrot.lane.b32.xlu1 %v1402_v62, %s9892_s17 }
 0xc5a   :  { %1403 = vrot.lane.b32.xlu0 %v1401_v63, %s9892_s17 }
 0xc5f   :  { %v9412_v9 = vpop.eup %9411 }
 0xc60   :  { %v9414_v11 = vpop.eup %9413  ;;  %v1292_v13 = vadd.f32 1.0, %v9412_v9 }
 0xc61   :  { %v1293_v14 = vadd.f32 1.0, %v9414_v11 }
 0xc62   :  { %9415 = vrcp.f32 %v1292_v13 }
 0xc63   :  { %9417 = vrcp.f32 %v1293_v14 }
 0xc6c   :  { %v9416_v15 = vpop.eup %9415 }
 0xc6d   :  { %v9418_v16 = vpop.eup %9417 }
 0xcc3   :  { %v1324_v18 = vpop.permute.xlu1 %1323  ;;  %v1322_v22 = vpop.permute.xlu0 %1321 }
 0xcc4   :  { %v1328_v23 = vmul.f32 %v9418_v16, %v1324_v18  ;;  %v1327_v24 = vmul.f32 %v9416_v15, %v1322_v22 }
 0xcc6   :  { %1333 = vrot.lane.b32.xlu1 %v1328_v23, %s9891_s9  ;;  %1331 = vrot.lane.b32.xlu0 %v1327_v24, %s9891_s9 }
 0xccb   :  { %v1406_v25 = vpop.permute.xlu1 %1405 }
 0xccc   :  { %v1410_v26 = vmul.f32 %v9404_v34, %v1406_v25  ;;  %v1404_v27 = vpop.permute.xlu0 %1403 }
 0xccd   :  { %v1409_v28 = vmul.f32 %v9406_v37, %v1404_v27 }
 0xcce   :  { %1415 = vrot.lane.b32.xlu1 %v1410_v26, %s9889_s0 }
 0xccf   :  { %1413 = vrot.lane.b32.xlu0 %v1409_v28, %s9889_s0 }
 0xd38   :  { %v1334_v29 = vpop.permute.xlu1 %1333  ;;  %v1332_v31 = vpop.permute.xlu0 %1331 }
 0xd39   :  { %v1338_v32 = vadd.f32 %v1334_v29, %v10168_v33  ;;  %v1337_v35 = vadd.f32 %v1332_v31, %v10165_v30 }
 0xd3b   :  { %9419 = vtanh.f32 %v1338_v32 }
 0xd3c   :  { %9421 = vtanh.f32 %v1337_v35 }
 0xd40   :  { %v1416_v40 = vpop.permute.xlu1 %1415 }
 0xd41   :  { %v1414_v41 = vpop.permute.xlu0 %1413  ;;  %v10363_v44 = vadd.f32 %v9408_v55, %v1416_v40 }
 0xd42   :  { %v10365_v37 = vadd.f32 %v9410_v57, %v1414_v41 }
 0xd43   :  { %v1503_v54 = vrot.slane %v10363_v44, 3 }
 0xd44   :  { %v1502_v52 = vrot.slane %v10365_v37, 4 }
 0xd45   :  { %v9420_v39 = vpop.eup %9419 }
 0xd46   :  { %v9422_v42 = vpop.eup %9421  ;;  %v1364_v43 = vrot.slane %v9420_v39, 1  ;;  %v1504_v58 = vsel %vm526_vm2, %v1503_v54, %v1502_v52 }
 0xd47   :  { %v1363_v34 = vrot.slane %v9422_v42, 1 }
 0xd48   :  { %v1368_v46 = vsub.f32 %v10324_v4, %v1364_v43 }
 0xd49   :  { %v1367_v48 = vsub.f32 %v10326_v6, %v1363_v34 }
 0xd4a   :  { %v1372_v49 = vrot.slane %v1368_v46, 7 }
 0xd4b   :  { %v1371_v50 = vrot.slane %v1367_v48, 7 }
 0xd4c   :  { %1375 = vrot.lane.b32.xlu1 %v1372_v49, %s9892_s17 }
 0xd4d   :  { %1373 = vrot.lane.b32.xlu0 %v1371_v50, %s9892_s17 }
 0xd51   :  { %1505 = vrot.lane.b32.xlu0 %v1504_v58, %s9890_s5 }
 0xdbe   :  { %v1376_v55 = vpop.permute.xlu1 %1375 }
 0xdbf   :  { %v1380_v57 = vmul.f32 %v9418_v16, %v1376_v55  ;;  %v1374_v59 = vpop.permute.xlu0 %1373 }
 0xdc0   :  { %v1379_v60 = vmul.f32 %v9416_v15, %v1374_v59 }
 0xdc1   :  { %1385 = vrot.lane.b32.xlu0 %v1380_v57, %s9889_s0 }
 0xdc2   :  { %1383 = vrot.lane.b32.xlu1 %v1379_v60, %s9889_s0 }
 0xdc3   :  { %v1506_v61 = vpop.permute.xlu0 %1505 }
 0xdc4   :  { %8660 = vmatmul.mubr.msk.f32.vlgmr.msra.gmra.mrb[10].mxu0 %vm254_vm3, %v1506_v61 }
 0xdc5   :  { %9031 = vmatpush3.bf16.msra.mxu0 %v10134_v10  ;;  %8673 = vmatprep.mubr.msk.f32.mxu0 %vm9888_vm1, %v9886_v0 }
 0xdc6   :  { %9035 = vmatprep.subr.bf16.mxu0 %v9887_v1 }
 0xe33   :  { %v1386_v62 = vpop.permute.xlu0 %1385 }
 0xe34   :  { %v1384_v63 = vpop.permute.xlu1 %1383  ;;  %v10382_v2 = vadd.f32 %v9420_v39, %v1386_v62 }
 0xe35   :  { %v10384_v3 = vadd.f32 %v9422_v42, %v1384_v63 }
 0xe36   :  { %v1424_v7 = vrot.slane %v10382_v2, 2 }
 0xe37   :  { %v1423_v8 = vrot.slane %v10384_v3, 3 }
 0xe39   :  { %v1425_v9 = vsel %vm526_vm2, %v1424_v7, %v1423_v8 }
 0xe3a   :  { %1426 = vrot.lane.b32.xlu1 %v1425_v9, %s9893_s21 }
 0xe97   :  { %v1575_v11 = vpop.f32.mrb[10].mxu0 }
 0xe98   :  { %v1576_v13 = vadd.f32 %v10157_v19, %v1575_v11  ;;  %v8661_v14 = vpop.f32.mrb[11].mxu0 }
 0xe9a   :  { %v1599_v15 = vrot.slane %v1576_v13, 5  ;;  %v1600_v16 = vrot.slane %v1576_v13, 6 }
 0xe9c   :  { %1603 = vrot.lane.b32.xlu1 %v1600_v16, %s9890_s5  ;;  %1601 = vrot.lane.b32.xlu0 %v1599_v15, %s9890_s5 }
 0xea0   :  { %1643 = vrot.lane.b32.xlu1 %v1600_v16, %s9889_s0  ;;  %1641 = vrot.lane.b32.xlu0 %v1599_v15, %s9889_s0 }
 0xeac   :  { %v1427_v18 = vpop.permute.xlu1 %1426 }
 0xead   :  { %8653 = vmatmul.mubr.msk.f32.vlgmr.msra.gmra.mrb[10].mxu1 %vm254_vm3, %v1427_v18 }
 0xeae   :  { %9028 = vmatpush3.bf16.msra.mxu1 %v10114_v5  ;;  %8666 = vmatprep.mubr.msk.f32.mxu1 %vm9888_vm1, %v9886_v0 }
 0xeaf   :  { %9032 = vmatprep.subr.bf16.mxu1 %v9887_v1 }
 0xf0e   :  { %v1604_v19 = vpop.permute.xlu1 %1603  ;;  %v1602_v22 = vpop.permute.xlu0 %1601 }
 0xf0f   :  { %v1608_v23 = vadd.f32 %v1604_v19, %v10168_v33  ;;  %v1607_v24 = vadd.f32 %v1602_v22, %v10165_v30 }
 0xf11   :  { %v8223_v25 = vmul.f32 -1.442695, %v1608_v23  ;;  %v8222_v26 = vmul.f32 -1.442695, %v1607_v24 }
 0xf12   :  { %v1644_v35 = vpop.permute.xlu1 %1643  ;;  %v1642_v41 = vpop.permute.xlu0 %1641 }
 0xf13   :  { %9423 = vpow2.f32 %v8223_v25 }
 0xf14   :  { %9425 = vpow2.f32 %v8222_v26 }
 0xf1d   :  { %v9424_v27 = vpop.eup %9423 }
 0xf1e   :  { %v9426_v28 = vpop.eup %9425  ;;  %v1616_v29 = vadd.f32 1.0, %v9424_v27 }
 0xf1f   :  { %v1615_v31 = vadd.f32 1.0, %v9426_v28 }
 0xf20   :  { %9427 = vrcp.f32 %v1616_v29 }
 0xf21   :  { %9429 = vrcp.f32 %v1615_v31 }
 0xf2a   :  { %v9428_v32 = vpop.eup %9427 }
 0xf2b   :  { %v9430_v39 = vpop.eup %9429  ;;  %v1648_v40 = vmul.f32 %v9428_v32, %v1644_v35 }
 0xf2c   :  { %v1647_v42 = vmul.f32 %v9430_v39, %v1642_v41 }
 0xf2d   :  { %1653 = vrot.lane.b32.xlu1 %v1648_v40, %s9891_s9 }
 0xf2e   :  { %1651 = vrot.lane.b32.xlu0 %v1647_v42, %s9891_s9 }
 0xf80   :  { %v1496_v43 = vpop.f32.mrb[10].mxu1 }
 0xf81   :  { %v1497_v34 = vadd.f32 %v10178_v56, %v1496_v43  ;;  %v8654_v46 = vpop.f32.mrb[11].mxu1 }
 0xf83   :  { %v1580_v48 = vrot.slane %v1497_v34, 4  ;;  %v1581_v49 = vrot.slane %v1497_v34, 5 }
 0xf85   :  { %1623 = vrot.lane.b32.xlu1 %v1581_v49, %s9893_s21  ;;  %1621 = vrot.lane.b32.xlu0 %v1580_v48, %s9893_s21  ;;  %v1584_v7 = vadd.f32 %v1580_v48, %v10165_v30  ;;  %v1585_v8 = vadd.f32 %v1581_v49, %v10168_v33 }
 0xf87   :  { %v8220_v9 = vmul.f32 -1.442695, %v1584_v7  ;;  %v8221_v11 = vmul.f32 -1.442695, %v1585_v8 }
 0xf9f   :  { %v1654_v50 = vpop.permute.xlu1 %1653 }
 0xfa0   :  { %v1658_v52 = vadd.f32 %v1654_v50, %v10168_v33  ;;  %v1652_v54 = vpop.permute.xlu0 %1651 }
 0xfa1   :  { %v1657_v58 = vadd.f32 %v1652_v54, %v10165_v30 }
 0xfa2   :  { %9431 = vtanh.f32 %v1658_v52 }
 0xfa3   :  { %9433 = vtanh.f32 %v1657_v58 }
 0xfa4   :  { %9435 = vpow2.f32 %v8220_v9 }
 0xfa5   :  { %9437 = vpow2.f32 %v8221_v11 }
 0xfac   :  { %v9432_v55 = vpop.eup %9431 }
 0xfad   :  { %v9434_v57 = vpop.eup %9433  ;;  %v1694_v59 = vrot.slane %v9432_v55, 7 }
 0xfae   :  { %v1693_v60 = vrot.slane %v9434_v57, 7  ;;  %v9436_v13 = vpop.eup %9435 }
 0xfaf   :  { %v1698_v56 = vsub.f32 %v10363_v44, %v1694_v59  ;;  %v9438_v14 = vpop.eup %9437  ;;  %v1592_v15 = vadd.f32 1.0, %v9436_v13 }
 0xfb0   :  { %v1697_v61 = vsub.f32 %v10365_v37, %v1693_v60  ;;  %v1593_v16 = vadd.f32 1.0, %v9438_v14 }
 0xfb1   :  { %v1702_v62 = vrot.slane %v1698_v56, 1  ;;  %9439 = vrcp.f32 %v1592_v15 }
 0xfb2   :  { %v1701_v63 = vrot.slane %v1697_v61, 1  ;;  %9441 = vrcp.f32 %v1593_v16 }
 0xfb3   :  { %1705 = vrot.lane.b32.xlu1 %v1702_v62, %s9892_s17 }
 0xfb4   :  { %1703 = vrot.lane.b32.xlu0 %v1701_v63, %s9892_s17 }
 0xfbb   :  { %v9440_v18 = vpop.eup %9439 }
 0xfbc   :  { %v9442_v19 = vpop.eup %9441 }
 0xff7   :  { %v1624_v22 = vpop.permute.xlu1 %1623  ;;  %v1622_v23 = vpop.permute.xlu0 %1621 }
 0xff8   :  { %v1628_v24 = vmul.f32 %v9442_v19, %v1624_v22  ;;  %v1627_v25 = vmul.f32 %v9440_v18, %v1622_v23 }
 0xffa   :  { %1633 = vrot.lane.b32.xlu1 %v1628_v24, %s9891_s9  ;;  %1631 = vrot.lane.b32.xlu0 %v1627_v25, %s9891_s9 }
0x1025   :  { %v1706_v26 = vpop.permute.xlu1 %1705 }
0x1026   :  { %v1710_v27 = vmul.f32 %v9428_v32, %v1706_v26  ;;  %v1704_v28 = vpop.permute.xlu0 %1703 }
0x1027   :  { %v1709_v29 = vmul.f32 %v9430_v39, %v1704_v28 }
0x1028   :  { %1715 = vrot.lane.b32.xlu1 %v1710_v27, %s9889_s0 }
0x1029   :  { %1713 = vrot.lane.b32.xlu0 %v1709_v29, %s9889_s0 }
0x106c   :  { %v1634_v31 = vpop.permute.xlu1 %1633  ;;  %v1632_v35 = vpop.permute.xlu0 %1631 }
0x106d   :  { %v1638_v40 = vadd.f32 %v1634_v31, %v10168_v33  ;;  %v1637_v41 = vadd.f32 %v1632_v35, %v10165_v30 }
0x106f   :  { %9443 = vtanh.f32 %v1638_v40 }
0x1070   :  { %9445 = vtanh.f32 %v1637_v41 }
0x1079   :  { %v9444_v42 = vpop.eup %9443 }
0x107a   :  { %v9446_v43 = vpop.eup %9445  ;;  %v1664_v34 = vrot.slane %v9444_v42, 1 }
0x107b   :  { %v1663_v46 = vrot.slane %v9446_v43, 1 }
0x107c   :  { %v1668_v32 = vsub.f32 %v10382_v2, %v1664_v34 }
0x107d   :  { %v1667_v39 = vsub.f32 %v10384_v3, %v1663_v46 }
0x107e   :  { %v1672_v48 = vrot.slane %v1668_v32, 7 }
0x107f   :  { %v1671_v49 = vrot.slane %v1667_v39, 7 }
0x1080   :  { %1675 = vrot.lane.b32.xlu1 %v1672_v48, %s9892_s17 }
0x1081   :  { %1673 = vrot.lane.b32.xlu0 %v1671_v49, %s9892_s17 }
0x109a   :  { %v1716_v50 = vpop.permute.xlu1 %1715 }
0x109b   :  { %v10425_v52 = vadd.f32 %v9432_v55, %v1716_v50  ;;  %v1714_v54 = vpop.permute.xlu0 %1713 }
0x109c   :  { %v10427_v58 = vadd.f32 %v9434_v57, %v1714_v54  ;;  %v10466_v54 = vld [vmem:[%s9947_s29] ss:$0 sm:$0xff]  ;;  %s11736_s29 = sld [smem:[#allocation10_spill]] }
0x109d   :  { %v1803_v59 = vrot.slane %v10425_v52, 2 }
0x109e   :  { %v1802_v60 = vrot.slane %v10427_v58, 3 }
0x10a0   :  { %v1804_v56 = vsel %vm526_vm2, %v1803_v59, %v1802_v60 }
0x10a1   :  { %1805 = vrot.lane.b32.xlu0 %v1804_v56, %s9890_s5 }
0x10f2   :  { %v1676_v61 = vpop.permute.xlu1 %1675 }
0x10f3   :  { %v1680_v62 = vmul.f32 %v9442_v19, %v1676_v61  ;;  %v1674_v63 = vpop.permute.xlu0 %1673  ;;  %v10454_v19 = vld [vmem:[%s9957_s8] ss:$0 sm:$0xff]  ;;  %s11738_s8 = sld [smem:[#allocation11_spill]] }
0x10f4   :  { %v1679_v7 = vmul.f32 %v9440_v18, %v1674_v63 }
0x10f5   :  { %1685 = vrot.lane.b32.xlu0 %v1680_v62, %s9889_s0 }
0x10f6   :  { %1683 = vrot.lane.b32.xlu1 %v1679_v7, %s9889_s0 }
0x1113   :  { %v1806_v55 = vpop.permute.xlu0 %1805 }
0x1114   :  { %8674 = vmatmul.mubr.msk.f32.vlgmr.msra.gmra.mrb[12].mxu0 %vm254_vm3, %v1806_v55 }
0x1115   :  { %9037 = vmatpush3.bf16.msra.mxu0 %v10134_v10  ;;  %8687 = vmatprep.mubr.msk.f32.mxu0 %vm9888_vm1, %v9886_v0 }
0x1116   :  { %9041 = vmatprep.subr.bf16.mxu0 %v9887_v1 }
0x1167   :  { %v1686_v57 = vpop.permute.xlu0 %1685 }
0x1168   :  { %v1684_v8 = vpop.permute.xlu1 %1683  ;;  %v10440_v9 = vadd.f32 %v9444_v42, %v1686_v57 }
0x1169   :  { %v10442_v11 = vadd.f32 %v9446_v43, %v1684_v8 }
0x116a   :  { %v1724_v13 = vrot.slane %v10440_v9, 3 }
0x116b   :  { %v1723_v14 = vrot.slane %v10442_v11, 4 }
0x116d   :  { %v1725_v15 = vsel %vm526_vm2, %v1724_v13, %v1723_v14 }
0x116e   :  { %1726 = vrot.lane.b32.xlu1 %v1725_v15, %s9893_s21 }
0x11e0   :  { %v1727_v16 = vpop.permute.xlu1 %1726 }
0x11e1   :  { %8667 = vmatmul.mubr.msk.f32.vlgmr.msra.gmra.mrb[12].mxu1 %vm254_vm3, %v1727_v16 }
0x11e2   :  { %9034 = vmatpush3.bf16.msra.mxu1 %v10114_v5  ;;  %8680 = vmatprep.mubr.msk.f32.mxu1 %vm9888_vm1, %v9886_v0 }
0x11e3   :  { %9038 = vmatprep.subr.bf16.mxu1 %v9887_v1 }
0x11e7   :  { %v1875_v18 = vpop.f32.mrb[12].mxu0 }
0x11e8   :  { %v1876_v22 = vadd.f32 %v10454_v19, %v1875_v18  ;;  %v8675_v23 = vpop.f32.mrb[13].mxu0 }
0x11ea   :  { %v1899_v24 = vrot.slane %v1876_v22, 6  ;;  %v1900_v25 = vrot.slane %v1876_v22, 7 }
0x11ec   :  { %1903 = vrot.lane.b32.xlu1 %v1900_v25, %s9890_s5  ;;  %1901 = vrot.lane.b32.xlu0 %v1899_v24, %s9890_s5 }
0x11f0   :  { %1943 = vrot.lane.b32.xlu1 %v1900_v25, %s9889_s0  ;;  %1941 = vrot.lane.b32.xlu0 %v1899_v24, %s9889_s0 }
0x125e   :  { %v1904_v26 = vpop.permute.xlu1 %1903  ;;  %v1902_v27 = vpop.permute.xlu0 %1901 }
0x125f   :  { %v1908_v28 = vadd.f32 %v1904_v26, %v10168_v33  ;;  %v1907_v29 = vadd.f32 %v1902_v27, %v10165_v30 }
0x1261   :  { %v8229_v31 = vmul.f32 -1.442695, %v1908_v28  ;;  %v8228_v35 = vmul.f32 -1.442695, %v1907_v29 }
0x1262   :  { %v1944_v46 = vpop.permute.xlu1 %1943  ;;  %v1942_v48 = vpop.permute.xlu0 %1941 }
0x1263   :  { %9447 = vpow2.f32 %v8229_v31 }
0x1264   :  { %9449 = vpow2.f32 %v8228_v35 }
0x126d   :  { %v9448_v40 = vpop.eup %9447 }
0x126e   :  { %v9450_v41 = vpop.eup %9449  ;;  %v1916_v42 = vadd.f32 1.0, %v9448_v40 }
0x126f   :  { %v1915_v43 = vadd.f32 1.0, %v9450_v41 }
0x1270   :  { %9451 = vrcp.f32 %v1916_v42 }
0x1271   :  { %9453 = vrcp.f32 %v1915_v43 }
0x127a   :  { %v9452_v34 = vpop.eup %9451 }
0x127b   :  { %v9454_v32 = vpop.eup %9453  ;;  %v1948_v39 = vmul.f32 %v9452_v34, %v1944_v46 }
0x127c   :  { %v1947_v49 = vmul.f32 %v9454_v32, %v1942_v48 }
0x127d   :  { %1953 = vrot.lane.b32.xlu1 %v1948_v39, %s9891_s9 }
0x127e   :  { %1951 = vrot.lane.b32.xlu0 %v1947_v49, %s9891_s9 }
0x12b4   :  { %v1796_v50 = vpop.f32.mrb[12].mxu1 }
0x12b5   :  { %v1797_v59 = vadd.f32 %v10466_v54, %v1796_v50  ;;  %v8668_v60 = vpop.f32.mrb[13].mxu1 }
0x12b7   :  { %v1880_v56 = vrot.slane %v1797_v59, 3  ;;  %v1881_v61 = vrot.slane %v1797_v59, 4 }
0x12b9   :  { %1923 = vrot.lane.b32.xlu1 %v1881_v61, %s9893_s21  ;;  %1921 = vrot.lane.b32.xlu0 %v1880_v56, %s9893_s21  ;;  %v1884_v62 = vadd.f32 %v1880_v56, %v10165_v30  ;;  %v1885_v63 = vadd.f32 %v1881_v61, %v10168_v33 }
0x12bb   :  { %v8226_v7 = vmul.f32 -1.442695, %v1884_v62  ;;  %v8227_v55 = vmul.f32 -1.442695, %v1885_v63 }
0x12bd   :  { %9455 = vpow2.f32 %v8226_v7 }
0x12be   :  { %9457 = vpow2.f32 %v8227_v55 }
0x12c7   :  { %v9456_v15 = vpop.eup %9455 }
0x12c8   :  { %v9458_v16 = vpop.eup %9457  ;;  %v1892_v18 = vadd.f32 1.0, %v9456_v15 }
0x12c9   :  { %v1893_v22 = vadd.f32 1.0, %v9458_v16 }
0x12ef   :  { %v1954_v57 = vpop.permute.xlu1 %1953 }
0x12f0   :  { %v1952_v8 = vpop.permute.xlu0 %1951  ;;  %v1958_v13 = vadd.f32 %v1954_v57, %v10168_v33 }
0x12f1   :  { %v1957_v14 = vadd.f32 %v1952_v8, %v10165_v30 }
0x12f2   :  { %9459 = vtanh.f32 %v1958_v13 }
0x12f3   :  { %9461 = vtanh.f32 %v1957_v14 }
0x12f4   :  { %9463 = vrcp.f32 %v1892_v18 }
0x12f5   :  { %9465 = vrcp.f32 %v1893_v22 }
0x12fc   :  { %v9460_v23 = vpop.eup %9459 }
0x12fd   :  { %v9462_v24 = vpop.eup %9461  ;;  %v1994_v25 = vrot.slane %v9460_v23, 7 }
0x12fe   :  { %v1993_v26 = vrot.slane %v9462_v24, 7  ;;  %v9464_v27 = vpop.eup %9463 }
0x12ff   :  { %v9466_v28 = vpop.eup %9465  ;;  %v1998_v41 = vsub.f32 %v10425_v52, %v1994_v25 }
0x1300   :  { %v1997_v42 = vsub.f32 %v10427_v58, %v1993_v26 }
0x1301   :  { %v2002_v43 = vrot.slane %v1998_v41, 1 }
0x1302   :  { %v2001_v46 = vrot.slane %v1997_v42, 1 }
0x132b   :  { %v1924_v29 = vpop.permute.xlu1 %1923  ;;  %v1922_v31 = vpop.permute.xlu0 %1921 }
0x132c   :  { %v1928_v35 = vmul.f32 %v9466_v28, %v1924_v29  ;;  %v1927_v40 = vmul.f32 %v9464_v27, %v1922_v31 }
0x132e   :  { %1933 = vrot.lane.b32.xlu1 %v1928_v35, %s9891_s9  ;;  %1931 = vrot.lane.b32.xlu0 %v1927_v40, %s9891_s9 }
0x1332   :  { %2005 = vrot.lane.b32.xlu1 %v2002_v43, %s9892_s17  ;;  %2003 = vrot.lane.b32.xlu0 %v2001_v46, %s9892_s17 }
0x13a0   :  { %v1934_v39 = vpop.permute.xlu1 %1933  ;;  %v1932_v48 = vpop.permute.xlu0 %1931 }
0x13a1   :  { %v1938_v49 = vadd.f32 %v1934_v39, %v10168_v33  ;;  %v1937_v50 = vadd.f32 %v1932_v48, %v10165_v30 }
0x13a3   :  { %9467 = vtanh.f32 %v1938_v49 }
0x13a4   :  { %9469 = vtanh.f32 %v1937_v50  ;;  %v2006_v59 = vpop.permute.xlu1 %2005  ;;  %v2004_v60 = vpop.permute.xlu0 %2003 }
0x13a5   :  { %v2010_v56 = vmul.f32 %v9452_v34, %v2006_v59  ;;  %v2009_v61 = vmul.f32 %v9454_v32, %v2004_v60 }
0x13a7   :  { %2015 = vrot.lane.b32.xlu1 %v2010_v56, %s9889_s0  ;;  %2013 = vrot.lane.b32.xlu0 %v2009_v61, %s9889_s0 }
0x13ad   :  { %v9468_v62 = vpop.eup %9467 }
0x13ae   :  { %v9470_v63 = vpop.eup %9469  ;;  %v1964_v7 = vrot.slane %v9468_v62, 1 }
0x13af   :  { %v1963_v55 = vrot.slane %v9470_v63, 1 }
0x13b0   :  { %v1968_v57 = vsub.f32 %v10440_v9, %v1964_v7 }
0x13b1   :  { %v1967_v8 = vsub.f32 %v10442_v11, %v1963_v55 }
0x13b2   :  { %v1972_v13 = vrot.slane %v1968_v57, 7 }
0x13b3   :  { %v1971_v14 = vrot.slane %v1967_v8, 7 }
0x13b4   :  { %1975 = vrot.lane.b32.xlu1 %v1972_v13, %s9892_s17 }
0x13b5   :  { %1973 = vrot.lane.b32.xlu0 %v1971_v14, %s9892_s17 }
0x1419   :  { %v2016_v34 = vpop.permute.xlu1 %2015  ;;  %v2014_v32 = vpop.permute.xlu0 %2013 }
0x141a   :  { %v10489_v15 = vadd.f32 %v9460_v23, %v2016_v34  ;;  %v10491_v16 = vadd.f32 %v9462_v24, %v2014_v32 }
0x141c   :  { %v2103_v29 = vrot.slane %v10489_v15, 1  ;;  %v2102_v31 = vrot.slane %v10491_v16, 2 }
0x141e   :  { %v2104_v35 = vsel %vm526_vm2, %v2103_v29, %v2102_v31 }
0x1426   :  { %v1976_v18 = vpop.permute.xlu1 %1975 }
0x1427   :  { %v1980_v22 = vmul.f32 %v9466_v28, %v1976_v18  ;;  %v1974_v25 = vpop.permute.xlu0 %1973 }
0x1428   :  { %v1979_v26 = vmul.f32 %v9464_v27, %v1974_v25 }
0x1429   :  { %1985 = vrot.lane.b32.xlu1 %v1980_v22, %s9889_s0 }
0x142a   :  { %1983 = vrot.lane.b32.xlu0 %v1979_v26, %s9889_s0 }
0x142e   :  { %2105 = vrot.lane.b32.xlu0 %v2104_v35, %s9890_s5 }
0x149b   :  { %v1986_v23 = vpop.permute.xlu1 %1985 }
0x149c   :  { %v10499_v40 = vadd.f32 %v9468_v62, %v1986_v23  ;;  %v1984_v24 = vpop.permute.xlu0 %1983 }
0x149d   :  { %v10501_v41 = vadd.f32 %v9470_v63, %v1984_v24 }
0x149e   :  { %v2024_v27 = vrot.slane %v10499_v40, 4 }
0x149f   :  { %v2023_v28 = vrot.slane %v10501_v41, 5 }
0x14a0   :  { %v2106_v42 = vpop.permute.xlu0 %2105 }
0x14a1   :  { %8688 = vmatmul.mubr.msk.f32.vlgmr.msra.gmra.mrb[14].mxu0 %vm254_vm3, %v2106_v42  ;;  %v2025_v43 = vsel %vm526_vm2, %v2024_v27, %v2023_v28 }
0x14a2   :  { %2026 = vrot.lane.b32.xlu1 %v2025_v43, %s9893_s21  ;;  %9043 = vmatpush3.bf16.msra.mxu0 %v10134_v10 }
0x14a3   :  { %8701 = vmatprep.mubr.msk.f32.mxu0 %vm9888_vm1, %v9886_v0  ;;  %9044 = vmatprep.subr.bf16.mxu0 %v9887_v1 }
0x1514   :  { %v2027_v46 = vpop.permute.xlu1 %2026 }
0x1515   :  { %8681 = vmatmul.mubr.msk.f32.vlgmr.msra.gmra.mrb[14].mxu1 %vm254_vm3, %v2027_v46 }
0x1516   :  { %9040 = vmatpush3.bf16.msra.mxu1 %v10114_v5  ;;  %8694 = vmatprep.mubr.msk.f32.mxu1 %vm9888_vm1, %v9886_v0 }
0x1517   :  { %8704 = vmatprep.subr.bf16.mxu1 %v9886_v0 }
0x1574   :  { %v2175_v39 = vpop.f32.mrb[14].mxu0 }
0x1575   :  { %v2176_v48 = vadd.f32 %v10454_v19, %v2175_v39  ;;  %v8689_v49 = vpop.f32.mrb[15].mxu0 }
0x1577   :  { %v2199_v10 = vrot.slane %v2176_v48, 7  ;;  %2202 = vrot.lane.b32.xlu1 %v2176_v48, %s9890_s5 }
0x1579   :  { %2200 = vrot.lane.b32.xlu0 %v2199_v10, %s9890_s5 }
0x157b   :  { %2242 = vrot.lane.b32.xlu1 %v2176_v48, %s9889_s0 }
0x157d   :  { %2240 = vrot.lane.b32.xlu0 %v2199_v10, %s9889_s0 }
0x15e8   :  { %v2096_v50 = vpop.f32.mrb[14].mxu1 }
0x15e9   :  { %v2097_v5 = vadd.f32 %v10466_v54, %v2096_v50  ;;  %v8682_v59 = vpop.f32.mrb[15].mxu1  ;;  %v2203_v60 = vpop.permute.xlu1 %2202 }
0x15ea   :  { %v2207_v56 = vadd.f32 %v2203_v60, %v10168_v33 }
0x15eb   :  { %v2180_v61 = vrot.slane %v2097_v5, 2  ;;  %v2181_v62 = vrot.slane %v2097_v5, 3  ;;  %v2201_v63 = vpop.permute.xlu0 %2200 }
0x15ec   :  { %v8235_v7 = vmul.f32 -1.442695, %v2207_v56  ;;  %v2206_v55 = vadd.f32 %v2201_v63, %v10165_v30 }
0x15ed   :  { %2222 = vrot.lane.b32.xlu1 %v2181_v62, %s9893_s21  ;;  %2220 = vrot.lane.b32.xlu0 %v2180_v61, %s9893_s21  ;;  %v2243_v18 = vpop.permute.xlu1 %2242  ;;  %v2184_v31 = vadd.f32 %v2180_v61, %v10165_v30  ;;  %v2185_v35 = vadd.f32 %v2181_v62, %v10168_v33 }
0x15ee   :  { %9471 = vpow2.f32 %v8235_v7  ;;  %v8234_v57 = vmul.f32 -1.442695, %v2206_v55 }
0x15ef   :  { %v2241_v26 = vpop.permute.xlu0 %2240  ;;  %v8232_v23 = vmul.f32 -1.442695, %v2184_v31  ;;  %v8233_v24 = vmul.f32 -1.442695, %v2185_v35 }
0x15f0   :  { %9473 = vpow2.f32 %v8234_v57 }
0x15f8   :  { %v9472_v8 = vpop.eup %9471 }
0x15f9   :  { %v2215_v13 = vadd.f32 1.0, %v9472_v8 }
0x15fa   :  { %v9474_v14 = vpop.eup %9473 }
0x15fb   :  { %9475 = vrcp.f32 %v2215_v13  ;;  %v2214_v34 = vadd.f32 1.0, %v9474_v14 }
0x15fd   :  { %9477 = vrcp.f32 %v2214_v34 }
0x15fe   :  { %9479 = vpow2.f32 %v8232_v23 }
0x15ff   :  { %9481 = vpow2.f32 %v8233_v24 }
0x1605   :  { %v9476_v32 = vpop.eup %9475 }
0x1606   :  { %v2247_v22 = vmul.f32 %v9476_v32, %v2243_v18 }
0x1607   :  { %v9478_v25 = vpop.eup %9477 }
0x1608   :  { %v2246_v29 = vmul.f32 %v9478_v25, %v2241_v26  ;;  %2252 = vrot.lane.b32.xlu1 %v2247_v22, %s9891_s9  ;;  %v9480_v27 = vpop.eup %9479 }
0x1609   :  { %v9482_v28 = vpop.eup %9481  ;;  %v2192_v42 = vadd.f32 1.0, %v9480_v27 }
0x160a   :  { %2250 = vrot.lane.b32.xlu0 %v2246_v29, %s9891_s9  ;;  %v2193_v43 = vadd.f32 1.0, %v9482_v28 }
0x160b   :  { %9483 = vrcp.f32 %v2192_v42 }
0x160c   :  { %9485 = vrcp.f32 %v2193_v43 }
0x1615   :  { %v9484_v46 = vpop.eup %9483 }
0x1616   :  { %v9486_v39 = vpop.eup %9485 }
0x165f   :  { %v2223_v48 = vpop.permute.xlu1 %2222  ;;  %v2221_v49 = vpop.permute.xlu0 %2220 }
0x1660   :  { %v2227_v10 = vmul.f32 %v9486_v39, %v2223_v48  ;;  %v2226_v50 = vmul.f32 %v9484_v46, %v2221_v49 }
0x1662   :  { %2232 = vrot.lane.b32.xlu1 %v2227_v10, %s9891_s9  ;;  %2230 = vrot.lane.b32.xlu0 %v2226_v50, %s9891_s9 }
0x167a   :  { %v2253_v5 = vpop.permute.xlu1 %2252 }
0x167b   :  { %v2257_v59 = vadd.f32 %v2253_v5, %v10168_v33 }
0x167c   :  { %v2251_v60 = vpop.permute.xlu0 %2250 }
0x167d   :  { %9487 = vtanh.f32 %v2257_v59  ;;  %v2256_v56 = vadd.f32 %v2251_v60, %v10165_v30 }
0x167f   :  { %9489 = vtanh.f32 %v2256_v56 }
0x1687   :  { %v9488_v61 = vpop.eup %9487 }
0x1688   :  { %v2293_v62 = vrot.slane %v9488_v61, 7 }
0x1689   :  { %v9490_v63 = vpop.eup %9489 }
0x168a   :  { %v2297_v7 = vsub.f32 %v10489_v15, %v2293_v62  ;;  %v2292_v55 = vrot.slane %v9490_v63, 7 }
0x168c   :  { %v2301_v57 = vrot.slane %v2297_v7, 1  ;;  %v2296_v8 = vsub.f32 %v10491_v16, %v2292_v55 }
0x168e   :  { %2304 = vrot.lane.b32.xlu1 %v2301_v57, %s9892_s17  ;;  %v2300_v13 = vrot.slane %v2296_v8, 1 }
0x1690   :  { %2302 = vrot.lane.b32.xlu0 %v2300_v13, %s9892_s17 }
0x16d4   :  { %v2233_v14 = vpop.permute.xlu1 %2232  ;;  %v2231_v34 = vpop.permute.xlu0 %2230 }
0x16d5   :  { %v2237_v18 = vadd.f32 %v2233_v14, %v10168_v33  ;;  %v2236_v22 = vadd.f32 %v2231_v34, %v10165_v30 }
0x16d7   :  { %9491 = vtanh.f32 %v2237_v18 }
0x16d8   :  { %9493 = vtanh.f32 %v2236_v22 }
0x16e1   :  { %v9492_v26 = vpop.eup %9491 }
0x16e2   :  { %v9494_v29 = vpop.eup %9493  ;;  %v2263_v31 = vrot.slane %v9492_v26, 1 }
0x16e3   :  { %v2262_v35 = vrot.slane %v9494_v29, 1 }
0x16e4   :  { %v2267_v23 = vsub.f32 %v10499_v40, %v2263_v31 }
0x16e5   :  { %v2266_v24 = vsub.f32 %v10501_v41, %v2262_v35 }
0x16e6   :  { %v2271_v27 = vrot.slane %v2267_v23, 7 }
0x16e7   :  { %v2270_v28 = vrot.slane %v2266_v24, 7 }
0x16e8   :  { %2274 = vrot.lane.b32.xlu1 %v2271_v27, %s9892_s17 }
0x16e9   :  { %2272 = vrot.lane.b32.xlu0 %v2270_v28, %s9892_s17 }
0x1700   :  { %v2305_v42 = vpop.permute.xlu1 %2304 }
0x1701   :  { %v2309_v43 = vmul.f32 %v9476_v32, %v2305_v42 }
0x1702   :  { %v2303_v48 = vpop.permute.xlu0 %2302 }
0x1703   :  { %v2308_v49 = vmul.f32 %v9478_v25, %v2303_v48  ;;  %2314 = vrot.lane.b32.xlu1 %v2309_v43, %s9889_s0 }
0x1705   :  { %2312 = vrot.lane.b32.xlu0 %v2308_v49, %s9889_s0 }
0x175a   :  { %v2275_v10 = vpop.permute.xlu1 %2274 }
0x175b   :  { %v2279_v50 = vmul.f32 %v9486_v39, %v2275_v10  ;;  %v2273_v5 = vpop.permute.xlu0 %2272 }
0x175c   :  { %v2278_v59 = vmul.f32 %v9484_v46, %v2273_v5 }
0x175d   :  { %2284 = vrot.lane.b32.xlu1 %v2279_v50, %s9889_s0 }
0x175e   :  { %2282 = vrot.lane.b32.xlu0 %v2278_v59, %s9889_s0 }
0x1775   :  { %v2315_v60 = vpop.permute.xlu1 %2314 }
0x1776   :  { %v10551_v7 = vadd.f32 %v9488_v61, %v2315_v60 }
0x1777   :  { %v2313_v56 = vpop.permute.xlu0 %2312 }
0x1778   :  { %v10549_v62 = vadd.f32 %v9490_v63, %v2313_v56 }
0x177a   :  { %v2401_v32 = vrot.slane %v10549_v62, 1 }
0x177c   :  { %v2402_v25 = vsel %vm526_vm2, %v10551_v7, %v2401_v32 }
0x177d   :  { %2403 = vrot.lane.b32.xlu0 %v2402_v25, %s9890_s5 }
0x17cf   :  { %v2285_v39 = vpop.permute.xlu1 %2284 }
0x17d0   :  { %v10557_v55 = vadd.f32 %v9492_v26, %v2285_v39  ;;  %v2283_v46 = vpop.permute.xlu0 %2282 }
0x17d1   :  { %v10559_v57 = vadd.f32 %v9494_v29, %v2283_v46 }
0x17d2   :  { %v2323_v8 = vrot.slane %v10557_v55, 5 }
0x17d3   :  { %v2322_v63 = vrot.slane %v10559_v57, 6 }
0x17d5   :  { %v2324_v61 = vsel %vm526_vm2, %v2323_v8, %v2322_v63 }
0x17d6   :  { %2325 = vrot.lane.b32.xlu1 %v2324_v61, %s9893_s21 }
0x17ef   :  { %v2404_v13 = vpop.permute.xlu0 %2403 }
0x17f0   :  { %8702 = vmatmul.mubr.msk.f32.vlgmr.msra.gmra.mrb[16].mxu0 %vm254_vm3, %v2404_v13 }
0x17f1   :  { %8716 = vmatprep.mubr.msk.f32.mxu0 %vm9888_vm1, %v9886_v0 }
0x1848   :  { %v2326_v14 = vpop.permute.xlu1 %2325 }
0x1849   :  { %8695 = vmatmul.mubr.msk.f32.vlgmr.msra.gmra.mrb[16].mxu1 %vm254_vm3, %v2326_v14 }
0x184a   :  { %8708 = vmatprep.mubr.msk.bf16.mxu1 %vm9888_vm1, %v9886_v0 }
0x18c3   :  { %v2473_v34 = vpop.f32.mrb[16].mxu0 }
0x18c4   :  { %v2474_v18 = vadd.f32 %v10454_v19, %v2473_v34  ;;  %v8703_v22 = vpop.f32.mrb[17].mxu0 }
0x18c6   :  { %v2497_v26 = vrot.slane %v2474_v18, 1  ;;  %2498 = vrot.lane.b32.xlu0 %v2474_v18, %s9890_s5 }
0x18c8   :  { %2500 = vrot.lane.b32.xlu1 %v2497_v26, %s9890_s5 }
0x18ca   :  { %2538 = vrot.lane.b32.xlu0 %v2474_v18, %s9889_s0 }
0x18cc   :  { %2540 = vrot.lane.b32.xlu1 %v2497_v26, %s9889_s0 }
0x191c   :  { %v2395_v29 = vpop.f32.mrb[16].mxu1 }
0x191d   :  { %v2396_v31 = vadd.f32 %v10466_v54, %v2395_v29  ;;  %v8696_v35 = vpop.f32.mrb[17].mxu1 }
0x191f   :  { %v2478_v23 = vrot.slane %v2396_v31, 1  ;;  %v2479_v24 = vrot.slane %v2396_v31, 2 }
0x1921   :  { %2518 = vrot.lane.b32.xlu0 %v2478_v23, %s9893_s21  ;;  %2520 = vrot.lane.b32.xlu1 %v2479_v24, %s9893_s21  ;;  %v2482_v39 = vadd.f32 %v2478_v23, %v10165_v30  ;;  %v2483_v46 = vadd.f32 %v2479_v24, %v10168_v33 }
0x1923   :  { %v8238_v8 = vmul.f32 -1.442695, %v2482_v39  ;;  %v8239_v63 = vmul.f32 -1.442695, %v2483_v46 }
0x1938   :  { %v2499_v19 = vpop.permute.xlu0 %2498 }
0x1939   :  { %v2504_v27 = vadd.f32 %v2499_v19, %v10165_v30 }
0x193a   :  { %v2501_v28 = vpop.permute.xlu1 %2500 }
0x193b   :  { %v8240_v42 = vmul.f32 -1.442695, %v2504_v27  ;;  %v2505_v43 = vadd.f32 %v2501_v28, %v10168_v33 }
0x193c   :  { %v2539_v59 = vpop.permute.xlu0 %2538 }
0x193d   :  { %9495 = vpow2.f32 %v8240_v42  ;;  %v8241_v48 = vmul.f32 -1.442695, %v2505_v43 }
0x193e   :  { %v2541_v32 = vpop.permute.xlu1 %2540 }
0x193f   :  { %9497 = vpow2.f32 %v8241_v48 }
0x1947   :  { %v9496_v49 = vpop.eup %9495 }
0x1948   :  { %v2512_v10 = vadd.f32 1.0, %v9496_v49 }
0x1949   :  { %v9498_v54 = vpop.eup %9497 }
0x194a   :  { %9499 = vrcp.f32 %v2512_v10  ;;  %v2513_v50 = vadd.f32 1.0, %v9498_v54 }
0x194c   :  { %9501 = vrcp.f32 %v2513_v50 }
0x194d   :  { %9503 = vpow2.f32 %v8238_v8 }
0x194e   :  { %9505 = vpow2.f32 %v8239_v63 }
0x1954   :  { %v9500_v5 = vpop.eup %9499 }
0x1955   :  { %v2544_v60 = vmul.f32 %v9500_v5, %v2539_v59 }
0x1956   :  { %v9502_v56 = vpop.eup %9501 }
0x1957   :  { %v2545_v25 = vmul.f32 %v9502_v56, %v2541_v32  ;;  %2548 = vrot.lane.b32.xlu0 %v2544_v60, %s9891_s9  ;;  %v9504_v61 = vpop.eup %9503 }
0x1958   :  { %v9506_v13 = vpop.eup %9505  ;;  %v2490_v14 = vadd.f32 1.0, %v9504_v61 }
0x1959   :  { %2550 = vrot.lane.b32.xlu1 %v2545_v25, %s9891_s9  ;;  %v2491_v34 = vadd.f32 1.0, %v9506_v13 }
0x195a   :  { %9507 = vrcp.f32 %v2490_v14 }
0x195b   :  { %9509 = vrcp.f32 %v2491_v34 }
0x1964   :  { %v10585_v18 = vpop.eup %9507 }
0x1965   :  { %v10587_v22 = vpop.eup %9509 }
0x1993   :  { %v2519_v26 = vpop.permute.xlu0 %2518  ;;  %v2521_v29 = vpop.permute.xlu1 %2520 }
0x1994   :  { %v2524_v31 = vmul.f32 %v10585_v18, %v2519_v26  ;;  %v2525_v35 = vmul.f32 %v10587_v22, %v2521_v29 }
0x1996   :  { %2528 = vrot.lane.b32.xlu0 %v2524_v31, %s9891_s9  ;;  %2530 = vrot.lane.b32.xlu1 %v2525_v35, %s9891_s9  ;;  %v2739_v31 = vld [vmem:[%s9972_s24] sm:$0xff]  ;;  %v2740_v35 = vld [vmem:[%s9972_s24 + $0x8] sm:$0xff]  ;;  %s9896_s24 = smov 88  }
0x19c9   :  { %v2549_v23 = vpop.permute.xlu0 %2548 }
0x19ca   :  { %v2554_v24 = vadd.f32 %v2549_v23, %v10165_v30  ;;  %v10614_v23 = vpack.c.bf16 %v2740_v35, %v2739_v31 }
0x19cb   :  { %v2551_v19 = vpop.permute.xlu1 %2550 }
0x19cc   :  { %9511 = vtanh.f32 %v2554_v24  ;;  %v2555_v27 = vadd.f32 %v2551_v19, %v10168_v33  ;;  %9046 = vmatpush3.bf16.msra.mxu0 %v10614_v23  ;;  %v2742_v24 = vld [vmem:[%s9982_s6 + $0x8] sm:$0xff] }
0x19cd   :  { %9047 = vmatprep.subr.bf16.mxu0 %v9887_v1 }
0x19ce   :  { %9513 = vtanh.f32 %v2555_v27 }
0x19cf   :  { %8717 = vmatmul.mubr.f32.vlgmr.msra.gmra.mrb[18].mxu0 %v9886_v0 }
0x19d0   :  { %8723 = vmatprep.mubr.msk.f32.mxu0 %vm9888_vm1, %v9886_v0 }
0x19d6   :  { %v9512_v28 = vpop.eup %9511 }
0x19d7   :  { %v2590_v42 = vrot.slane %v9512_v28, 7 }
0x19d8   :  { %v9514_v43 = vpop.eup %9513 }
0x19d9   :  { %v2594_v48 = vsub.f32 %v10549_v62, %v2590_v42  ;;  %v2591_v49 = vrot.slane %v9514_v43, 7 }
0x19db   :  { %v2598_v10 = vrot.slane %v2594_v48, 1  ;;  %v2595_v54 = vsub.f32 %v10551_v7, %v2591_v49 }
0x19dd   :  { %2600 = vrot.lane.b32.xlu0 %v2598_v10, %s9892_s17  ;;  %v2599_v50 = vrot.slane %v2595_v54, 1  ;;  %v9265_v54 = vld [vmem:[%s9962_s14] sm:$0xff]  }
0x19de   :  { %8705 = vmatpush3.bf16.msra.mxu1 %v9265_v54 }
0x19df   :  { %2602 = vrot.lane.b32.xlu1 %v2599_v50, %s9892_s17  ;;  %8706 = vmatprep.subr.bf16.mxu1 %v9886_v0 }
0x1a08   :  { %v2529_v59 = vpop.permute.xlu0 %2528  ;;  %v2531_v60 = vpop.permute.xlu1 %2530 }
0x1a09   :  { %v2534_v32 = vadd.f32 %v2529_v59, %v10165_v30  ;;  %v2535_v25 = vadd.f32 %v2531_v60, %v10168_v33 }
0x1a0b   :  { %9515 = vtanh.f32 %v2534_v32 }
0x1a0c   :  { %9517 = vtanh.f32 %v2535_v25 }
0x1a15   :  { %v10601_v39 = vpop.eup %9515 }
0x1a16   :  { %v10603_v46 = vpop.eup %9517  ;;  %v2560_v8 = vrot.slane %v10601_v39, 1 }
0x1a17   :  { %v2561_v63 = vrot.slane %v10603_v46, 1 }
0x1a18   :  { %v2564_v61 = vsub.f32 %v10559_v57, %v2560_v8 }
0x1a19   :  { %v2565_v13 = vsub.f32 %v10557_v55, %v2561_v63 }
0x1a1a   :  { %v2568_v14 = vrot.slane %v2564_v61, 7 }
0x1a1b   :  { %v2569_v30 = vrot.slane %v2565_v13, 7 }
0x1a1c   :  { %2570 = vrot.lane.b32.xlu0 %v2568_v14, %s9892_s17  ;;  %v10704_v14 = vld [vmem:[%s9987_s12] ss:$0 sm:$0xff] }
0x1a1d   :  { %2572 = vrot.lane.b32.xlu1 %v2569_v30, %s9892_s17 }
0x1a4f   :  { %v2601_v33 = vpop.permute.xlu0 %2600 }
0x1a50   :  { %v2606_v34 = vmul.f32 %v9500_v5, %v2601_v33  ;;  %v2741_v5 = vld [vmem:[%s9982_s6] sm:$0xff]  ;;  %s9898_s6 = smov 56  }
0x1a51   :  { %v2603_v26 = vpop.permute.xlu1 %2602 }
0x1a52   :  { %v2607_v29 = vmul.f32 %v9502_v56, %v2603_v26  ;;  %2610 = vrot.lane.b32.xlu0 %v2606_v34, %s9889_s0  ;;  %v10624_v56 = vpack.c.bf16 %v2742_v24, %v2741_v5 }
0x1a54   :  { %2612 = vrot.lane.b32.xlu1 %v2607_v29, %s9889_s0  ;;  %9049 = vmatpush3.bf16.msra.mxu0 %v10624_v56 }
0x1a55   :  { %9050 = vmatprep.subr.bf16.mxu0 %v9887_v1 }
0x1a57   :  { %8724 = vmatmul.mubr.f32.vlgmr.msra.gmra.mrb[20].mxu0 %v9886_v0 }
0x1a58   :  { %9052 = vmatpush3.bf16.msra.mxu0 %v10614_v23  ;;  %8730 = vmatprep.mubr.msk.f32.mxu0 %vm9888_vm1, %v9886_v0 }
0x1a59   :  { %9056 = vmatprep.subr.bf16.mxu0 %v9887_v1 }
0x1a8e   :  { %v2571_v19 = vpop.permute.xlu0 %2570 }
0x1a8f   :  { %v2576_v27 = vmul.f32 %v10585_v18, %v2571_v19  ;;  %v2573_v42 = vpop.permute.xlu1 %2572 }
0x1a90   :  { %v2577_v48 = vmul.f32 %v10587_v22, %v2573_v42 }
0x1a91   :  { %2580 = vrot.lane.b32.xlu0 %v2576_v27, %s9889_s0  ;;  %v8242_v27 = vld [vmem:[%s9967_s19] ss:$0 sm:$0xff]  ;;  %s11740_s19 = sld [smem:[#allocation9_spill]] }
0x1a92   :  { %2582 = vrot.lane.b32.xlu1 %v2577_v48, %s9889_s0 }
0x1ac4   :  { %v2611_v49 = vpop.permute.xlu0 %2610 }
0x1ac5   :  { %v2616_v10 = vadd.f32 %v9512_v28, %v2611_v49 }
0x1ac6   :  { %v2613_v50 = vpop.permute.xlu1 %2612 }
0x1ac7   :  { %v2639_v59 = vsel %vm2618_vm4, %v2616_v10, %v10549_v62  ;;  %v2617_v60 = vadd.f32 %v9514_v43, %v2613_v50 }
0x1ac8   :  { %v2641_v18 = vsel %vm2621_vm5, %v2639_v59, %v10491_v16 }
0x1ac9   :  { %v2643_v22 = vsel %vm2624_vm6, %v2641_v18, %v10427_v58  ;;  %v2640_v28 = vsel %vm2618_vm4, %v2617_v60, %v10551_v7 }
0x1aca   :  { %v2645_v62 = vsel %vm2627_vm7, %v2643_v22, %v10365_v37  ;;  %v2642_v43 = vsel %vm2621_vm5, %v2640_v28, %v10489_v15 }
0x1acb   :  { %v2644_v16 = vsel %vm2624_vm6, %v2642_v43, %v10425_v52  ;;  %v2647_v32 = vsel %vm2630_vm8, %v2645_v62, %v10305_v38 }
0x1acc   :  { %v2646_v58 = vsel %vm2627_vm7, %v2644_v16, %v10363_v44  ;;  %v2649_v7 = vsel %vm2633_vm9, %v2647_v32, %v10245_v51  ;;  %v9266_v44 = vld [vmem:[%s9962_s14 + $0x8] sm:$0xff]   ;;  %v2619_v51 = vsel %vm2618_vm4, %v10213_v47, %v10266_v20  ;;  %s11739_s14 = sld [smem:[#allocation13_spill]] }
0x1acd   :  { %v2648_v37 = vsel %vm2630_vm8, %v2646_v58, %v10303_v36  ;;  %v2651_v25 = vsel %vm2636_vm10, %v2649_v7, %v10187_v12  ;;  %8707 = vmatpush3.bf16.msra.mxu1 %v9266_v44  ;;  %v2622_v12 = vsel %vm2621_vm5, %v2619_v51, %v10326_v6 }
0x1ace   :  { %v2650_v15 = vsel %vm2633_vm9, %v2648_v37, %v10247_v53  ;;  %9053 = vmatprep.subr.bf16.mxu1 %v9887_v1  ;;  %v2620_v53 = vsel %vm2618_vm4, %v10211_v45, %v10268_v21  ;;  %v2625_v36 = vsel %vm2624_vm6, %v2622_v12, %v10384_v3 }
0x1acf   :  { %v2652_v52 = vsel %vm2636_vm10, %v2650_v15, %v10189_v17  ;;  %v2623_v17 = vsel %vm2621_vm5, %v2620_v53, %v10324_v4  ;;  %v2628_v47 = vsel %vm2627_vm7, %v2625_v36, %v10442_v11 }
0x1ad0   :  { %v9158_v38 = vpack.i.bf16 %v2652_v52, %v2651_v25  ;;  %v2626_v8 = vsel %vm2624_vm6, %v2623_v17, %v10382_v2  ;;  %v2631_v21 = vsel %vm2630_vm8, %v2628_v47, %v10501_v41  ;;  %v10701_v41 = vpop.f32.mrb[18].mxu0 }
0x1ad1   :  { %v2629_v45 = vsel %vm2627_vm7, %v2626_v8, %v10440_v9  ;;  %v2634_v2 = vsel %vm2633_vm9, %v2631_v21, %v10559_v57 }
0x1ad2   :  { %9159 = vrot.lane.b32.xlu1 %v9158_v38, %s9894_s25  ;;  %v2632_v3 = vsel %vm2630_vm8, %v2629_v45, %v10499_v40 }
0x1ad3   :  { %v2635_v11 = vsel %vm2633_vm9, %v2632_v3, %v10557_v55 }
0x1b03   :  { %v2581_v20 = vpop.permute.xlu0 %2580 }
0x1b04   :  { %v2586_v6 = vadd.f32 %v10601_v39, %v2581_v20  ;;  %v2583_v4 = vpop.permute.xlu1 %2582  ;;  %v8718_v39 = vpop.f32.mrb[19].mxu0  ;;  %v10732_v20 = vld [vmem:[%s9977_s30] ss:$0 sm:$0xff] }
0x1b05   :  { %v2587_v63 = vadd.f32 %v10603_v46, %v2583_v4  ;;  %v2824_v21 = vadd.f32 %v10732_v20, %v10701_v41 }
0x1b06   :  { %v2637_v61 = vsel %vm2636_vm10, %v2634_v2, %v2586_v6 }
0x1b07   :  { %v2638_v9 = vsel %vm2636_vm10, %v2635_v11, %v2587_v63  ;;  %v2898_v2 = vrot.slane %v2824_v21, 1 }
0x1b08   :  { %v9153_v13 = vpack.i.bf16 %v2638_v9, %v2637_v61 }
0x1b0a   :  { %9154 = vrot.lane.b32.xlu0 %v9153_v13, %s9893_s21 }
0x1b2a   :  { %v2893_v40 = vpop.f32.mrb[20].mxu0 }
0x1b2b   :  { %v2894_v57 = vadd.f32 %v10704_v14, %v2893_v40  ;;  %v8725_v30 = vpop.f32.mrb[21].mxu0 }
0x1b2d   :  { %v2916_v46 = vrot.slane %v2894_v57, 1  ;;  %v2917_v33 = vrot.slane %v2894_v57, 2 }
0x1b2f   :  { %2920 = vrot.lane.b32.xlu1 %v2917_v33, %s9890_s5  ;;  %2918 = vrot.lane.b32.xlu0 %v2916_v46, %s9890_s5 }
0x1b33   :  { %2960 = vrot.lane.b32.xlu1 %v2917_v33, %s9889_s0  ;;  %2958 = vrot.lane.b32.xlu0 %v2916_v46, %s9889_s0 }
0x1b44   :  { %v9160_v55 = vpop.permute.xlu1 %9159 }
0x1b45   :  { %v9162_v26 = vunpack.i.h.bf16 %v9160_v55  ;;  %v9161_v29 = vunpack.i.l.bf16 %v9160_v55 }
0x1b7c   :  { %v9155_v34 = vpop.permute.xlu0 %9154 }
0x1b7d   :  { %v9157_v31 = vunpack.i.h.bf16 %v9155_v34  ;;  %v9156_v35 = vunpack.i.l.bf16 %v9155_v34 }
0x1b7f   :  { %v2669_v5 = vsel %vm254_vm3, %v9156_v35, %v9161_v29  ;;  %v2670_v24 = vsel %vm254_vm3, %v9157_v31, %v9162_v26 }
0x1b80   :  { %v2675_v19 = vpack.c.bf16 %v2670_v24, %v2669_v5 }
0x1b82   :  { %8709 = vmatmul.mubr.msk.bf16.vlgmr.msra.gmra.mrb[20].mxu1 %vm191_vm0, %v2675_v19 }
0x1b83   :  { %9055 = vmatpush3.bf16.msra.mxu1 %v10624_v56  ;;  %8737 = vmatprep.mubr.msk.f32.mxu1 %vm9888_vm1, %v9886_v0 }
0x1b84   :  { %9059 = vmatprep.subr.bf16.mxu1 %v9887_v1 }
0x1ba1   :  { %v2919_v10 = vpop.permute.xlu0 %2918  ;;  %v2921_v18 = vpop.permute.xlu1 %2920 }
0x1ba5   :  { %v2959_v37 = vpop.permute.xlu0 %2958  ;;  %v2961_v52 = vpop.permute.xlu1 %2960 }
0x1c55   :  { %v2732_v42 = vpop.f32.mrb[20].mxu1 }
0x1c56   :  { %v10719_v48 = vadd.f32 %v8242_v27, %v2732_v42  ;;  %v8710_v49 = vpop.f32.mrb[21].mxu1 }
0x1c57   :  { %v2735_v54 = vpop.f32.mrb[22].mxu1 }
0x1c58   :  { %v2924_v50 = vadd.f32 %v2919_v10, %v10719_v48  ;;  %v10722_v59 = vadd.f32 %v8242_v27, %v2735_v54  ;;  %v8711_v60 = vpop.f32.mrb[23].mxu1  ;;  %v2901_v61 = vadd.f32 %v2824_v21, %v10719_v48 }
0x1c5a   :  { %v8250_v22 = vmul.f32 -1.442695, %v2924_v50  ;;  %v2925_v28 = vadd.f32 %v2921_v18, %v10722_v59  ;;  %v2902_v63 = vadd.f32 %v2898_v2, %v10722_v59  ;;  %v8248_v9 = vmul.f32 -1.442695, %v2901_v61 }
0x1c5c   :  { %9519 = vpow2.f32 %v8250_v22  ;;  %v8251_v62 = vmul.f32 -1.442695, %v2925_v28  ;;  %v8249_v11 = vmul.f32 -1.442695, %v2902_v63 }
0x1c5e   :  { %9521 = vpow2.f32 %v8251_v62 }
0x1c66   :  { %v9520_v43 = vpop.eup %9519 }
0x1c67   :  { %v2932_v16 = vadd.f32 1.0, %v9520_v43 }
0x1c68   :  { %v9522_v32 = vpop.eup %9521 }
0x1c69   :  { %9523 = vrcp.f32 %v2932_v16  ;;  %v2933_v58 = vadd.f32 1.0, %v9522_v32 }
0x1c6b   :  { %9525 = vrcp.f32 %v2933_v58 }
0x1c73   :  { %v9524_v7 = vpop.eup %9523 }
0x1c74   :  { %v2964_v15 = vmul.f32 %v9524_v7, %v2959_v37 }
0x1c75   :  { %v9526_v25 = vpop.eup %9525 }
0x1c76   :  { %v2965_v38 = vmul.f32 %v9526_v25, %v2961_v52  ;;  %2968 = vrot.lane.b32.xlu0 %v2964_v15, %s9891_s9 }
0x1c78   :  { %2970 = vrot.lane.b32.xlu1 %v2965_v38, %s9891_s9 }
0x1ce8   :  { %v2969_v44 = vpop.permute.xlu0 %2968 }
0x1ce9   :  { %v2974_v51 = vadd.f32 %v2969_v44, %v10719_v48 }
0x1cea   :  { %v2971_v53 = vpop.permute.xlu1 %2970 }
0x1ceb   :  { %9527 = vtanh.f32 %v2974_v51  ;;  %v2975_v12 = vadd.f32 %v2971_v53, %v10722_v59 }
0x1ced   :  { %9529 = vtanh.f32 %v2975_v12 }
0x1cee   :  { %9531 = vpow2.f32 %v8249_v11 }
0x1cef   :  { %9533 = vpow2.f32 %v8248_v9 }
0x1cf5   :  { %v9528_v17 = vpop.eup %9527 }
0x1cf6   :  { %v3000_v36 = vsub.f32 0.0, %v9528_v17 }
0x1cf7   :  { %v9530_v8 = vpop.eup %9529 }
0x1cf8   :  { %3004 = vrot.lane.b32.xlu0 %v3000_v36, %s9892_s17  ;;  %v3001_v47 = vsub.f32 0.0, %v9530_v8  ;;  %v9532_v13 = vpop.eup %9531 }
0x1cf9   :  { %v2910_v41 = vadd.f32 1.0, %v9532_v13  ;;  %v9534_v39 = vpop.eup %9533 }
0x1cfa   :  { %3006 = vrot.lane.b32.xlu1 %v3001_v47, %s9892_s17  ;;  %v2909_v40 = vadd.f32 1.0, %v9534_v39 }
0x1cfb   :  { %9535 = vrcp.f32 %v2910_v41 }
0x1cfc   :  { %9537 = vrcp.f32 %v2909_v40 }
0x1d05   :  { %v9536_v55 = vpop.eup %9535 }
0x1d06   :  { %v9538_v24 = vpop.eup %9537 }
0x1d6a   :  { %v3005_v45 = vpop.permute.xlu0 %3004 }
0x1d6b   :  { %v3010_v6 = vmul.f32 %v9524_v7, %v3005_v45 }
0x1d6c   :  { %v3007_v4 = vpop.permute.xlu1 %3006 }
0x1d6d   :  { %v3011_v3 = vmul.f32 %v9526_v25, %v3007_v4  ;;  %3014 = vrot.lane.b32.xlu0 %v3010_v6, %s9889_s0 }
0x1d6f   :  { %3016 = vrot.lane.b32.xlu1 %v3011_v3, %s9889_s0 }
0x1d71   :  { %2940 = vrot.lane.b32.xlu0 %v2898_v2, %s9893_s21 }
0x1d73   :  { %2938 = vrot.lane.b32.xlu1 %v2824_v21, %s9893_s21 }
0x1ddf   :  { %v3015_v57 = vpop.permute.xlu0 %3014 }
0x1de0   :  { %v10742_v30 = vadd.f32 %v9528_v17, %v3015_v57 }
0x1de1   :  { %v3017_v46 = vpop.permute.xlu1 %3016 }
0x1de2   :  { %v10744_v33 = vadd.f32 %v9530_v8, %v3017_v46  ;;  %v3102_v26 = vrot.slane %v10742_v30, 7 }
0x1de3   :  { %v2941_v34 = vpop.permute.xlu0 %2940 }
0x1de4   :  { %v3103_v29 = vrot.slane %v10744_v33, 6  ;;  %v2945_v31 = vmul.f32 %v9536_v55, %v2941_v34 }
0x1de5   :  { %v2939_v35 = vpop.permute.xlu1 %2938 }
0x1de6   :  { %2950 = vrot.lane.b32.xlu1 %v2945_v31, %s9891_s9  ;;  %v3104_v5 = vsel %vm526_vm2, %v3103_v29, %v3102_v26  ;;  %v2944_v19 = vmul.f32 %v9538_v24, %v2939_v35 }
0x1de7   :  { %3105 = vrot.lane.b32.xlu0 %v3104_v5, %s9890_s5 }
0x1deb   :  { %2948 = vrot.lane.b32.xlu0 %v2944_v19, %s9891_s9 }
0x1e58   :  { %v2951_v27 = vpop.permute.xlu1 %2950 }
0x1e59   :  { %v2955_v42 = vadd.f32 %v2951_v27, %v10722_v59  ;;  %v3106_v49 = vpop.permute.xlu0 %3105 }
0x1e5a   :  { %8738 = vmatmul.mubr.msk.f32.vlgmr.msra.gmra.mrb[18].mxu1 %vm254_vm3, %v3106_v49 }
0x1e5b   :  { %9539 = vtanh.f32 %v2955_v42  ;;  %9061 = vmatpush3.bf16.msra.mxu1 %v10624_v56  ;;  %8751 = vmatprep.mubr.msk.f32.mxu1 %vm9888_vm1, %v9886_v0 }
0x1e5c   :  { %9065 = vmatprep.subr.bf16.mxu1 %v9887_v1 }
0x1e5d   :  { %v2949_v10 = vpop.permute.xlu0 %2948 }
0x1e5e   :  { %v2954_v54 = vadd.f32 %v2949_v10, %v10719_v48 }
0x1e60   :  { %9541 = vtanh.f32 %v2954_v54 }
0x1e65   :  { %v9540_v50 = vpop.eup %9539 }
0x1e66   :  { %v2979_v60 = vsub.f32 0.0, %v9540_v50 }
0x1e68   :  { %2984 = vrot.lane.b32.xlu1 %v2979_v60, %s9892_s17 }
0x1e6a   :  { %v9542_v18 = vpop.eup %9541 }
0x1e6b   :  { %v2978_v22 = vsub.f32 0.0, %v9542_v18 }
0x1e6d   :  { %2982 = vrot.lane.b32.xlu0 %v2978_v22, %s9892_s17 }
0x1eda   :  { %v2985_v28 = vpop.permute.xlu1 %2984 }
0x1edb   :  { %v2989_v62 = vmul.f32 %v9536_v55, %v2985_v28 }
0x1edd   :  { %2994 = vrot.lane.b32.xlu1 %v2989_v62, %s9889_s0 }
0x1edf   :  { %v2983_v43 = vpop.permute.xlu0 %2982 }
0x1ee0   :  { %v2988_v16 = vmul.f32 %v9538_v24, %v2983_v43 }
0x1ee2   :  { %2992 = vrot.lane.b32.xlu0 %v2988_v16, %s9889_s0 }
0x1f2d   :  { %v3175_v32 = vpop.f32.mrb[18].mxu1 }
0x1f2e   :  { %v3176_v58 = vadd.f32 %v10704_v14, %v3175_v32  ;;  %v8739_v7 = vpop.f32.mrb[19].mxu1 }
0x1f30   :  { %v3198_v37 = vrot.slane %v3176_v58, 2  ;;  %v3199_v53 = vrot.slane %v3176_v58, 3 }
0x1f32   :  { %3200 = vrot.lane.b32.xlu0 %v3198_v37, %s9890_s5 }
0x1f36   :  { %3240 = vrot.lane.b32.xlu0 %v3198_v37, %s9889_s0 }
0x1f4f   :  { %v2995_v15 = vpop.permute.xlu1 %2994 }
0x1f50   :  { %v10766_v25 = vadd.f32 %v9540_v50, %v2995_v15 }
0x1f52   :  { %v3024_v38 = vrot.slane %v10766_v25, 7 }
0x1f54   :  { %v2993_v52 = vpop.permute.xlu0 %2992 }
0x1f55   :  { %v10769_v44 = vadd.f32 %v9542_v18, %v2993_v52 }
0x1f57   :  { %v3025_v51 = vsel %vm526_vm2, %v3024_v38, %v10769_v44 }
0x1f58   :  { %3026 = vrot.lane.b32.xlu1 %v3025_v51, %s9893_s21 }
0x1f5c   :  { %3202 = vrot.lane.b32.xlu1 %v3199_v53, %s9890_s5 }
0x1f60   :  { %3242 = vrot.lane.b32.xlu1 %v3199_v53, %s9889_s0 }
0x1fa4   :  { %v3201_v12 = vpop.permute.xlu0 %3200 }
0x1fa5   :  { %v3206_v17 = vadd.f32 %v3201_v12, %v10719_v48 }
0x1fa7   :  { %v8256_v36 = vmul.f32 -1.442695, %v3206_v17 }
0x1fa8   :  { %v3241_v21 = vpop.permute.xlu0 %3240 }
0x1fa9   :  { %9543 = vpow2.f32 %v8256_v36 }
0x1fb3   :  { %v9544_v8 = vpop.eup %9543 }
0x1fb4   :  { %v3214_v47 = vadd.f32 1.0, %v9544_v8 }
0x1fb6   :  { %9545 = vrcp.f32 %v3214_v47 }
0x1fc0   :  { %v9546_v45 = vpop.eup %9545 }
0x1fc1   :  { %v3246_v6 = vmul.f32 %v9546_v45, %v3241_v21 }
0x1fc3   :  { %3250 = vrot.lane.b32.xlu0 %v3246_v6, %s9891_s9 }
0x1fca   :  { %v3027_v4 = vpop.permute.xlu1 %3026 }
0x1fcb   :  { %8731 = vmatmul.mubr.msk.f32.vlgmr.msra.gmra.mrb[22].mxu0 %vm254_vm3, %v3027_v4 }
0x1fcc   :  { %9058 = vmatpush3.bf16.msra.mxu0 %v10614_v23  ;;  %8744 = vmatprep.mubr.msk.f32.mxu0 %vm9888_vm1, %v9886_v0 }
0x1fcd   :  { %9062 = vmatprep.subr.bf16.mxu0 %v9887_v1 }
0x1fce   :  { %v3203_v3 = vpop.permute.xlu1 %3202 }
0x1fcf   :  { %v3207_v2 = vadd.f32 %v3203_v3, %v10722_v59 }
0x1fd1   :  { %v8257_v63 = vmul.f32 -1.442695, %v3207_v2 }
0x1fd2   :  { %v3243_v13 = vpop.permute.xlu1 %3242 }
0x1fd3   :  { %9547 = vpow2.f32 %v8257_v63 }
0x1fdd   :  { %v9548_v11 = vpop.eup %9547 }
0x1fde   :  { %v3215_v61 = vadd.f32 1.0, %v9548_v11 }
0x1fe0   :  { %9549 = vrcp.f32 %v3215_v61 }
0x1fea   :  { %v9550_v9 = vpop.eup %9549 }
0x1feb   :  { %v3247_v41 = vmul.f32 %v9550_v9, %v3243_v13 }
0x1fed   :  { %3252 = vrot.lane.b32.xlu1 %v3247_v41, %s9891_s9 }
0x2035   :  { %v3251_v39 = vpop.permute.xlu0 %3250 }
0x2036   :  { %v3256_v40 = vadd.f32 %v3251_v39, %v10719_v48 }
0x2038   :  { %9551 = vtanh.f32 %v3256_v40 }
0x2042   :  { %v9552_v57 = vpop.eup %9551 }
0x2043   :  { %v3292_v46 = vrot.slane %v9552_v57, 7 }
0x2045   :  { %v3296_v55 = vsub.f32 %v10742_v30, %v3292_v46 }
0x2047   :  { %v3300_v34 = vrot.slane %v3296_v55, 1 }
0x2049   :  { %3302 = vrot.lane.b32.xlu0 %v3300_v34, %s9892_s17 }
0x205f   :  { %v3253_v26 = vpop.permute.xlu1 %3252 }
0x2060   :  { %v3257_v29 = vadd.f32 %v3253_v26, %v10722_v59 }
0x2062   :  { %9553 = vtanh.f32 %v3257_v29 }
0x206c   :  { %v9554_v31 = vpop.eup %9553 }
0x206d   :  { %v3293_v35 = vrot.slane %v9554_v31, 7 }
0x206f   :  { %v3297_v5 = vsub.f32 %v10744_v33, %v3293_v35 }
0x2071   :  { %v3301_v24 = vrot.slane %v3297_v5, 1 }
0x2073   :  { %3304 = vrot.lane.b32.xlu1 %v3301_v24, %s9892_s17 }
0x209e   :  { %v3096_v19 = vpop.f32.mrb[22].mxu0 }
0x209f   :  { %v3097_v27 = vadd.f32 %v10732_v20, %v3096_v19  ;;  %v8732_v42 = vpop.f32.mrb[23].mxu0 }
0x20a1   :  { %v3180_v49 = vrot.slane %v3097_v27, 7  ;;  %3222 = vrot.lane.b32.xlu1 %v3097_v27, %s9893_s21  ;;  %v3184_v18 = vadd.f32 %v3097_v27, %v10722_v59 }
0x20a3   :  { %3220 = vrot.lane.b32.xlu0 %v3180_v49, %s9893_s21  ;;  %v3183_v22 = vadd.f32 %v3180_v49, %v10719_v48  ;;  %v8255_v28 = vmul.f32 -1.442695, %v3184_v18 }
0x20a5   :  { %v8254_v62 = vmul.f32 -1.442695, %v3183_v22  ;;  %9555 = vpow2.f32 %v8255_v28 }
0x20a7   :  { %9557 = vpow2.f32 %v8254_v62 }
0x20af   :  { %v9556_v43 = vpop.eup %9555 }
0x20b0   :  { %v3192_v32 = vadd.f32 1.0, %v9556_v43 }
0x20b1   :  { %v9558_v16 = vpop.eup %9557 }
0x20b2   :  { %v3191_v58 = vadd.f32 1.0, %v9558_v16  ;;  %9559 = vrcp.f32 %v3192_v32 }
0x20b4   :  { %9561 = vrcp.f32 %v3191_v58 }
0x20bb   :  { %v3303_v10 = vpop.permute.xlu0 %3302 }
0x20bc   :  { %v3308_v54 = vmul.f32 %v9546_v45, %v3303_v10  ;;  %v9560_v7 = vpop.eup %9559 }
0x20be   :  { %3312 = vrot.lane.b32.xlu0 %v3308_v54, %s9889_s0  ;;  %v9562_v52 = vpop.eup %9561 }
0x20e5   :  { %v3305_v50 = vpop.permute.xlu1 %3304 }
0x20e6   :  { %v3309_v60 = vmul.f32 %v9550_v9, %v3305_v50 }
0x20e8   :  { %3314 = vrot.lane.b32.xlu1 %v3309_v60, %s9889_s0 }
0x2113   :  { %v3223_v37 = vpop.permute.xlu1 %3222 }
0x2114   :  { %v3227_v15 = vmul.f32 %v9560_v7, %v3223_v37 }
0x2115   :  { %v3221_v38 = vpop.permute.xlu0 %3220 }
0x2116   :  { %v3226_v51 = vmul.f32 %v9562_v52, %v3221_v38  ;;  %3232 = vrot.lane.b32.xlu1 %v3227_v15, %s9891_s9 }
0x2118   :  { %3230 = vrot.lane.b32.xlu0 %v3226_v51, %s9891_s9 }
0x2130   :  { %v3313_v53 = vpop.permute.xlu0 %3312 }
0x2131   :  { %v10800_v12 = vadd.f32 %v9552_v57, %v3313_v53 }
0x2133   :  { %v3400_v8 = vrot.slane %v10800_v12, 6 }
0x215a   :  { %v3315_v17 = vpop.permute.xlu1 %3314 }
0x215b   :  { %v10802_v36 = vadd.f32 %v9554_v31, %v3315_v17 }
0x215d   :  { %v3401_v47 = vrot.slane %v10802_v36, 5 }
0x215f   :  { %v3402_v45 = vsel %vm526_vm2, %v3401_v47, %v3400_v8 }
0x2160   :  { %3403 = vrot.lane.b32.xlu0 %v3402_v45, %s9890_s5 }
0x2188   :  { %v3233_v21 = vpop.permute.xlu1 %3232 }
0x2189   :  { %v3237_v6 = vadd.f32 %v3233_v21, %v10722_v59 }
0x218a   :  { %v3231_v4 = vpop.permute.xlu0 %3230 }
0x218b   :  { %9563 = vtanh.f32 %v3237_v6  ;;  %v3236_v3 = vadd.f32 %v3231_v4, %v10719_v48 }
0x218d   :  { %9565 = vtanh.f32 %v3236_v3 }
0x2195   :  { %v9564_v2 = vpop.eup %9563 }
0x2196   :  { %v3263_v63 = vrot.slane %v9564_v2, 1 }
0x2197   :  { %v9566_v11 = vpop.eup %9565 }
0x2198   :  { %v3267_v61 = vsub.f32 %v10766_v25, %v3263_v63  ;;  %v3262_v9 = vrot.slane %v9566_v11, 1 }
0x219a   :  { %v3271_v13 = vrot.slane %v3267_v61, 7  ;;  %v3266_v41 = vsub.f32 %v10769_v44, %v3262_v9 }
0x219c   :  { %3274 = vrot.lane.b32.xlu0 %v3271_v13, %s9892_s17  ;;  %v3270_v39 = vrot.slane %v3266_v41, 7 }
0x219e   :  { %3272 = vrot.lane.b32.xlu1 %v3270_v39, %s9892_s17 }
0x21d2   :  { %v3404_v40 = vpop.permute.xlu0 %3403 }
0x21d3   :  { %8752 = vmatmul.mubr.msk.f32.vlgmr.msra.gmra.mrb[24].mxu1 %vm254_vm3, %v3404_v40 }
0x21d4   :  { %9067 = vmatpush3.bf16.msra.mxu1 %v10624_v56  ;;  %8765 = vmatprep.mubr.msk.f32.mxu1 %vm9888_vm1, %v9886_v0 }
0x21d5   :  { %9071 = vmatprep.subr.bf16.mxu1 %v9887_v1 }
0x220e   :  { %v3275_v57 = vpop.permute.xlu0 %3274 }
0x220f   :  { %v3279_v46 = vmul.f32 %v9560_v7, %v3275_v57 }
0x2210   :  { %v3273_v55 = vpop.permute.xlu1 %3272 }
0x2211   :  { %v3278_v34 = vmul.f32 %v9562_v52, %v3273_v55  ;;  %3284 = vrot.lane.b32.xlu0 %v3279_v46, %s9889_s0 }
0x2213   :  { %3282 = vrot.lane.b32.xlu1 %v3278_v34, %s9889_s0 }
0x2283   :  { %v3285_v26 = vpop.permute.xlu0 %3284 }
0x2284   :  { %v10823_v35 = vadd.f32 %v9564_v2, %v3285_v26 }
0x2285   :  { %v3283_v29 = vpop.permute.xlu1 %3282 }
0x2286   :  { %v10821_v31 = vadd.f32 %v9566_v11, %v3283_v29 }
0x2288   :  { %v3322_v5 = vrot.slane %v10821_v31, 1 }
0x228a   :  { %v3323_v24 = vsel %vm526_vm2, %v10823_v35, %v3322_v5 }
0x228b   :  { %3324 = vrot.lane.b32.xlu1 %v3323_v24, %s9893_s21 }
0x22a6   :  { %v3473_v19 = vpop.f32.mrb[24].mxu1 }
0x22a7   :  { %v3474_v27 = vadd.f32 %v10704_v14, %v3473_v19  ;;  %v8753_v42 = vpop.f32.mrb[25].mxu1 }
0x22a9   :  { %v3497_v49 = vrot.slane %v3474_v27, 3  ;;  %v3498_v10 = vrot.slane %v3474_v27, 4 }
0x22ab   :  { %3499 = vrot.lane.b32.xlu0 %v3497_v49, %s9890_s5  ;;  %3501 = vrot.lane.b32.xlu1 %v3498_v10, %s9890_s5 }
0x22af   :  { %3539 = vrot.lane.b32.xlu0 %v3497_v49, %s9889_s0  ;;  %3541 = vrot.lane.b32.xlu1 %v3498_v10, %s9889_s0 }
0x22fd   :  { %v3325_v54 = vpop.permute.xlu1 %3324 }
0x22fe   :  { %8745 = vmatmul.mubr.msk.f32.vlgmr.msra.gmra.mrb[24].mxu0 %vm254_vm3, %v3325_v54 }
0x22ff   :  { %9064 = vmatpush3.bf16.msra.mxu0 %v10614_v23  ;;  %8758 = vmatprep.mubr.msk.f32.mxu0 %vm9888_vm1, %v9886_v0 }
0x2300   :  { %9068 = vmatprep.subr.bf16.mxu0 %v9887_v1 }
0x231d   :  { %v3502_v50 = vpop.permute.xlu1 %3501  ;;  %v3500_v60 = vpop.permute.xlu0 %3499 }
0x231e   :  { %v3506_v18 = vadd.f32 %v3502_v50, %v10722_v59  ;;  %v3505_v22 = vadd.f32 %v3500_v60, %v10719_v48 }
0x2320   :  { %v8263_v28 = vmul.f32 -1.442695, %v3506_v18  ;;  %v8262_v62 = vmul.f32 -1.442695, %v3505_v22 }
0x2321   :  { %v3542_v37 = vpop.permute.xlu1 %3541  ;;  %v3540_v38 = vpop.permute.xlu0 %3539 }
0x2322   :  { %9567 = vpow2.f32 %v8263_v28 }
0x2323   :  { %9569 = vpow2.f32 %v8262_v62 }
0x232c   :  { %v9568_v43 = vpop.eup %9567 }
0x232d   :  { %v9570_v16 = vpop.eup %9569  ;;  %v3514_v32 = vadd.f32 1.0, %v9568_v43 }
0x232e   :  { %v3513_v58 = vadd.f32 1.0, %v9570_v16 }
0x232f   :  { %9571 = vrcp.f32 %v3514_v32 }
0x2330   :  { %9573 = vrcp.f32 %v3513_v58 }
0x2339   :  { %v9572_v7 = vpop.eup %9571 }
0x233a   :  { %v9574_v15 = vpop.eup %9573  ;;  %v3546_v52 = vmul.f32 %v9572_v7, %v3542_v37 }
0x233b   :  { %v3545_v51 = vmul.f32 %v9574_v15, %v3540_v38 }
0x233c   :  { %3551 = vrot.lane.b32.xlu1 %v3546_v52, %s9891_s9 }
0x233d   :  { %3549 = vrot.lane.b32.xlu0 %v3545_v51, %s9891_s9 }
0x23ae   :  { %v3552_v53 = vpop.permute.xlu1 %3551 }
0x23af   :  { %v3556_v17 = vadd.f32 %v3552_v53, %v10722_v59  ;;  %v3550_v8 = vpop.permute.xlu0 %3549 }
0x23b0   :  { %v3555_v47 = vadd.f32 %v3550_v8, %v10719_v48 }
0x23b1   :  { %9575 = vtanh.f32 %v3556_v17 }
0x23b2   :  { %9577 = vtanh.f32 %v3555_v47 }
0x23bb   :  { %v9576_v45 = vpop.eup %9575 }
0x23bc   :  { %v9578_v21 = vpop.eup %9577  ;;  %v3592_v6 = vrot.slane %v9576_v45, 7 }
0x23bd   :  { %v3591_v4 = vrot.slane %v9578_v21, 7 }
0x23be   :  { %v3596_v3 = vsub.f32 %v10802_v36, %v3592_v6 }
0x23bf   :  { %v3595_v2 = vsub.f32 %v10800_v12, %v3591_v4 }
0x23c0   :  { %v3600_v63 = vrot.slane %v3596_v3, 1 }
0x23c1   :  { %v3599_v11 = vrot.slane %v3595_v2, 1 }
0x23c2   :  { %3603 = vrot.lane.b32.xlu1 %v3600_v63, %s9892_s17 }
0x23c3   :  { %3601 = vrot.lane.b32.xlu0 %v3599_v11, %s9892_s17 }
0x23d1   :  { %v3394_v61 = vpop.f32.mrb[24].mxu0 }
0x23d2   :  { %v3395_v9 = vadd.f32 %v10732_v20, %v3394_v61  ;;  %v8746_v13 = vpop.f32.mrb[25].mxu0 }
0x23d4   :  { %v3478_v41 = vrot.slane %v3395_v9, 6  ;;  %v3479_v39 = vrot.slane %v3395_v9, 7 }
0x23d6   :  { %3521 = vrot.lane.b32.xlu1 %v3479_v39, %s9893_s21  ;;  %3519 = vrot.lane.b32.xlu0 %v3478_v41, %s9893_s21  ;;  %v3482_v40 = vadd.f32 %v3478_v41, %v10719_v48  ;;  %v3483_v57 = vadd.f32 %v3479_v39, %v10722_v59 }
0x23d8   :  { %v8260_v46 = vmul.f32 -1.442695, %v3482_v40  ;;  %v8261_v55 = vmul.f32 -1.442695, %v3483_v57 }
0x23da   :  { %9579 = vpow2.f32 %v8260_v46 }
0x23db   :  { %9581 = vpow2.f32 %v8261_v55 }
0x23e4   :  { %v9580_v5 = vpop.eup %9579 }
0x23e5   :  { %v9582_v19 = vpop.eup %9581  ;;  %v3490_v27 = vadd.f32 1.0, %v9580_v5 }
0x23e6   :  { %v3491_v42 = vadd.f32 1.0, %v9582_v19 }
0x23e7   :  { %9583 = vrcp.f32 %v3490_v27 }
0x23e8   :  { %9585 = vrcp.f32 %v3491_v42 }
0x23f1   :  { %v9584_v49 = vpop.eup %9583 }
0x23f2   :  { %v9586_v10 = vpop.eup %9585 }
0x2434   :  { %v3604_v34 = vpop.permute.xlu1 %3603 }
0x2435   :  { %v3608_v26 = vmul.f32 %v9572_v7, %v3604_v34  ;;  %v3602_v29 = vpop.permute.xlu0 %3601 }
0x2436   :  { %v3607_v24 = vmul.f32 %v9574_v15, %v3602_v29 }
0x2437   :  { %3613 = vrot.lane.b32.xlu1 %v3608_v26, %s9889_s0 }
0x2438   :  { %3611 = vrot.lane.b32.xlu0 %v3607_v24, %s9889_s0 }
0x2448   :  { %v3522_v54 = vpop.permute.xlu1 %3521  ;;  %v3520_v50 = vpop.permute.xlu0 %3519 }
0x2449   :  { %v3526_v60 = vmul.f32 %v9586_v10, %v3522_v54  ;;  %v3525_v18 = vmul.f32 %v9584_v49, %v3520_v50 }
0x244b   :  { %3531 = vrot.lane.b32.xlu1 %v3526_v60, %s9891_s9  ;;  %3529 = vrot.lane.b32.xlu0 %v3525_v18, %s9891_s9 }
0x24a9   :  { %v3614_v22 = vpop.permute.xlu1 %3613 }
0x24aa   :  { %v10858_v28 = vadd.f32 %v9576_v45, %v3614_v22  ;;  %v3612_v62 = vpop.permute.xlu0 %3611 }
0x24ab   :  { %v10860_v43 = vadd.f32 %v9578_v21, %v3612_v62 }
0x24ac   :  { %v3701_v16 = vrot.slane %v10858_v28, 4 }
0x24ad   :  { %v3700_v32 = vrot.slane %v10860_v43, 5 }
0x24af   :  { %v3702_v58 = vsel %vm526_vm2, %v3701_v16, %v3700_v32 }
0x24b0   :  { %3703 = vrot.lane.b32.xlu0 %v3702_v58, %s9890_s5 }
0x24bd   :  { %v3532_v7 = vpop.permute.xlu1 %3531  ;;  %v3530_v37 = vpop.permute.xlu0 %3529 }
0x24be   :  { %v3536_v15 = vadd.f32 %v3532_v7, %v10722_v59  ;;  %v3535_v52 = vadd.f32 %v3530_v37, %v10719_v48 }
0x24c0   :  { %9587 = vtanh.f32 %v3536_v15 }
0x24c1   :  { %9589 = vtanh.f32 %v3535_v52 }
0x24ca   :  { %v9588_v38 = vpop.eup %9587 }
0x24cb   :  { %v9590_v51 = vpop.eup %9589  ;;  %v3562_v53 = vrot.slane %v9588_v38, 1 }
0x24cc   :  { %v3561_v17 = vrot.slane %v9590_v51, 1 }
0x24cd   :  { %v3566_v8 = vsub.f32 %v10823_v35, %v3562_v53 }
0x24ce   :  { %v3565_v47 = vsub.f32 %v10821_v31, %v3561_v17 }
0x24cf   :  { %v3570_v45 = vrot.slane %v3566_v8, 7 }
0x24d0   :  { %v3569_v21 = vrot.slane %v3565_v47, 7 }
0x24d1   :  { %3573 = vrot.lane.b32.xlu0 %v3570_v45, %s9892_s17 }
0x24d2   :  { %3571 = vrot.lane.b32.xlu1 %v3569_v21, %s9892_s17 }
0x2522   :  { %v3704_v6 = vpop.permute.xlu0 %3703 }
0x2523   :  { %8766 = vmatmul.mubr.msk.f32.vlgmr.msra.gmra.mrb[26].mxu1 %vm254_vm3, %v3704_v6 }
0x2524   :  { %9073 = vmatpush3.bf16.msra.mxu1 %v10624_v56  ;;  %8779 = vmatprep.mubr.msk.f32.mxu1 %vm9888_vm1, %v9886_v0 }
0x2525   :  { %9077 = vmatprep.subr.bf16.mxu1 %v9887_v1 }
0x2543   :  { %v3574_v4 = vpop.permute.xlu0 %3573 }
0x2544   :  { %v3572_v3 = vpop.permute.xlu1 %3571  ;;  %v3578_v2 = vmul.f32 %v9586_v10, %v3574_v4 }
0x2545   :  { %v3577_v63 = vmul.f32 %v9584_v49, %v3572_v3 }
0x2546   :  { %3583 = vrot.lane.b32.xlu0 %v3578_v2, %s9889_s0 }
0x2547   :  { %3581 = vrot.lane.b32.xlu1 %v3577_v63, %s9889_s0 }
0x25b8   :  { %v3584_v11 = vpop.permute.xlu0 %3583 }
0x25b9   :  { %v3582_v61 = vpop.permute.xlu1 %3581  ;;  %v10879_v9 = vadd.f32 %v9588_v38, %v3584_v11 }
0x25ba   :  { %v10881_v13 = vadd.f32 %v9590_v51, %v3582_v61 }
0x25bb   :  { %v3622_v41 = vrot.slane %v10879_v9, 1 }
0x25bc   :  { %v3621_v39 = vrot.slane %v10881_v13, 2 }
0x25be   :  { %v3623_v40 = vsel %vm526_vm2, %v3622_v41, %v3621_v39 }
0x25bf   :  { %3624 = vrot.lane.b32.xlu1 %v3623_v40, %s9893_s21 }
0x25f6   :  { %v3773_v57 = vpop.f32.mrb[26].mxu1 }
0x25f7   :  { %v3774_v46 = vadd.f32 %v10704_v14, %v3773_v57  ;;  %v8767_v55 = vpop.f32.mrb[27].mxu1 }
0x25f9   :  { %v3797_v34 = vrot.slane %v3774_v46, 4  ;;  %v3798_v26 = vrot.slane %v3774_v46, 5 }
0x25fb   :  { %3799 = vrot.lane.b32.xlu0 %v3797_v34, %s9890_s5  ;;  %3801 = vrot.lane.b32.xlu1 %v3798_v26, %s9890_s5 }
0x25ff   :  { %3839 = vrot.lane.b32.xlu0 %v3797_v34, %s9889_s0  ;;  %3841 = vrot.lane.b32.xlu1 %v3798_v26, %s9889_s0 }
0x2631   :  { %v3625_v29 = vpop.permute.xlu1 %3624 }
0x2632   :  { %8759 = vmatmul.mubr.msk.f32.vlgmr.msra.gmra.mrb[26].mxu0 %vm254_vm3, %v3625_v29 }
0x2633   :  { %9070 = vmatpush3.bf16.msra.mxu0 %v10614_v23  ;;  %8772 = vmatprep.mubr.msk.f32.mxu0 %vm9888_vm1, %v9886_v0 }
0x2634   :  { %9074 = vmatprep.subr.bf16.mxu0 %v9887_v1 }
0x266d   :  { %v3802_v14 = vpop.permute.xlu1 %3801  ;;  %v3800_v5 = vpop.permute.xlu0 %3799 }
0x266e   :  { %v3806_v24 = vadd.f32 %v3802_v14, %v10722_v59  ;;  %v3805_v19 = vadd.f32 %v3800_v5, %v10719_v48 }
0x2670   :  { %v8269_v27 = vmul.f32 -1.442695, %v3806_v24  ;;  %v8268_v42 = vmul.f32 -1.442695, %v3805_v19 }
0x2671   :  { %v3842_v18 = vpop.permute.xlu1 %3841  ;;  %v3840_v16 = vpop.permute.xlu0 %3839 }
0x2672   :  { %9591 = vpow2.f32 %v8269_v27 }
0x2673   :  { %9593 = vpow2.f32 %v8268_v42 }
0x267c   :  { %v9592_v49 = vpop.eup %9591 }
0x267d   :  { %v9594_v10 = vpop.eup %9593  ;;  %v3814_v54 = vadd.f32 1.0, %v9592_v49 }
0x267e   :  { %v3813_v50 = vadd.f32 1.0, %v9594_v10 }
0x267f   :  { %9595 = vrcp.f32 %v3814_v54 }
0x2680   :  { %9597 = vrcp.f32 %v3813_v50 }
0x2689   :  { %v9596_v60 = vpop.eup %9595 }
0x268a   :  { %v9598_v22 = vpop.eup %9597  ;;  %v3846_v62 = vmul.f32 %v9596_v60, %v3842_v18 }
0x268b   :  { %v3845_v32 = vmul.f32 %v9598_v22, %v3840_v16 }
0x268c   :  { %3851 = vrot.lane.b32.xlu1 %v3846_v62, %s9891_s9 }
0x268d   :  { %3849 = vrot.lane.b32.xlu0 %v3845_v32, %s9891_s9 }
0x26fe   :  { %v3852_v58 = vpop.permute.xlu1 %3851 }
0x26ff   :  { %v3856_v7 = vadd.f32 %v3852_v58, %v10722_v59  ;;  %v3850_v37 = vpop.permute.xlu0 %3849 }
0x2700   :  { %v3855_v15 = vadd.f32 %v3850_v37, %v10719_v48 }
0x2701   :  { %9599 = vtanh.f32 %v3856_v7 }
0x2702   :  { %9601 = vtanh.f32 %v3855_v15 }
0x2705   :  { %v3694_v52 = vpop.f32.mrb[26].mxu0 }
0x2706   :  { %v3695_v38 = vadd.f32 %v10732_v20, %v3694_v52  ;;  %v8760_v51 = vpop.f32.mrb[27].mxu0 }
0x2708   :  { %v3778_v53 = vrot.slane %v3695_v38, 5  ;;  %v3779_v17 = vrot.slane %v3695_v38, 6 }
0x270a   :  { %3821 = vrot.lane.b32.xlu1 %v3779_v17, %s9893_s21  ;;  %3819 = vrot.lane.b32.xlu0 %v3778_v53, %s9893_s21  ;;  %v3782_v63 = vadd.f32 %v3778_v53, %v10719_v48  ;;  %v3783_v11 = vadd.f32 %v3779_v17, %v10722_v59 }
0x270b   :  { %v9600_v8 = vpop.eup %9599 }
0x270c   :  { %v9602_v47 = vpop.eup %9601  ;;  %v3892_v45 = vrot.slane %v9600_v8, 7  ;;  %v8266_v61 = vmul.f32 -1.442695, %v3782_v63  ;;  %v8267_v41 = vmul.f32 -1.442695, %v3783_v11 }
0x270d   :  { %v3891_v21 = vrot.slane %v9602_v47, 7 }
0x270e   :  { %v3896_v6 = vsub.f32 %v10858_v28, %v3892_v45  ;;  %9603 = vpow2.f32 %v8266_v61 }
0x270f   :  { %v3895_v4 = vsub.f32 %v10860_v43, %v3891_v21  ;;  %9605 = vpow2.f32 %v8267_v41 }
0x2710   :  { %v3900_v3 = vrot.slane %v3896_v6, 1 }
0x2711   :  { %v3899_v2 = vrot.slane %v3895_v4, 1 }
0x2712   :  { %3903 = vrot.lane.b32.xlu1 %v3900_v3, %s9892_s17 }
0x2713   :  { %3901 = vrot.lane.b32.xlu0 %v3899_v2, %s9892_s17 }
0x2718   :  { %v9604_v39 = vpop.eup %9603 }
0x2719   :  { %v9606_v40 = vpop.eup %9605  ;;  %v3790_v57 = vadd.f32 1.0, %v9604_v39 }
0x271a   :  { %v3791_v46 = vadd.f32 1.0, %v9606_v40  ;;  %v10946_v40 = vld [vmem:[%s9987_s12] ss:$0 sm:$0xff]  ;;  %s9899_s12 = smov 80  }
0x271b   :  { %9607 = vrcp.f32 %v3790_v57 }
0x271c   :  { %9609 = vrcp.f32 %v3791_v46 }
0x2725   :  { %v9608_v55 = vpop.eup %9607 }
0x2726   :  { %v9610_v34 = vpop.eup %9609 }
0x277c   :  { %v3822_v26 = vpop.permute.xlu1 %3821  ;;  %v3820_v29 = vpop.permute.xlu0 %3819 }
0x277d   :  { %v3826_v14 = vmul.f32 %v9610_v34, %v3822_v26  ;;  %v3825_v5 = vmul.f32 %v9608_v55, %v3820_v29 }
0x277f   :  { %3831 = vrot.lane.b32.xlu1 %v3826_v14, %s9891_s9  ;;  %3829 = vrot.lane.b32.xlu0 %v3825_v5, %s9891_s9 }
0x2784   :  { %v3904_v24 = vpop.permute.xlu1 %3903 }
0x2785   :  { %v3908_v19 = vmul.f32 %v9596_v60, %v3904_v24  ;;  %v3902_v27 = vpop.permute.xlu0 %3901 }
0x2786   :  { %v3907_v42 = vmul.f32 %v9598_v22, %v3902_v27 }
0x2787   :  { %3913 = vrot.lane.b32.xlu1 %v3908_v19, %s9889_s0 }
0x2788   :  { %3911 = vrot.lane.b32.xlu0 %v3907_v42, %s9889_s0 }
0x27f1   :  { %v3832_v49 = vpop.permute.xlu1 %3831  ;;  %v3830_v10 = vpop.permute.xlu0 %3829 }
0x27f2   :  { %v3836_v54 = vadd.f32 %v3832_v49, %v10722_v59  ;;  %v3835_v50 = vadd.f32 %v3830_v10, %v10719_v48 }
0x27f4   :  { %9611 = vtanh.f32 %v3836_v54 }
0x27f5   :  { %9613 = vtanh.f32 %v3835_v50 }
0x27f9   :  { %v3914_v62 = vpop.permute.xlu1 %3913 }
0x27fa   :  { %v3912_v16 = vpop.permute.xlu0 %3911  ;;  %v10918_v7 = vadd.f32 %v9600_v8, %v3914_v62 }
0x27fb   :  { %v10920_v22 = vadd.f32 %v9602_v47, %v3912_v16 }
0x27fc   :  { %v4001_v51 = vrot.slane %v10918_v7, 3 }
0x27fd   :  { %v4000_v53 = vrot.slane %v10920_v22, 4 }
0x27fe   :  { %v9612_v18 = vpop.eup %9611 }
0x27ff   :  { %v9614_v32 = vpop.eup %9613  ;;  %v3862_v58 = vrot.slane %v9612_v18, 1  ;;  %v4002_v17 = vsel %vm526_vm2, %v4001_v51, %v4000_v53 }
0x2800   :  { %v3861_v60 = vrot.slane %v9614_v32, 1 }
0x2801   :  { %v3866_v37 = vsub.f32 %v10879_v9, %v3862_v58 }
0x2802   :  { %v3865_v15 = vsub.f32 %v10881_v13, %v3861_v60 }
0x2803   :  { %v3870_v52 = vrot.slane %v3866_v37, 7 }
0x2804   :  { %v3869_v38 = vrot.slane %v3865_v15, 7 }
0x2805   :  { %3873 = vrot.lane.b32.xlu1 %v3870_v52, %s9892_s17 }
0x2806   :  { %3871 = vrot.lane.b32.xlu0 %v3869_v38, %s9892_s17 }
0x280a   :  { %4003 = vrot.lane.b32.xlu0 %v4002_v17, %s9890_s5 }
0x2877   :  { %v3874_v8 = vpop.permute.xlu1 %3873 }
0x2878   :  { %v3878_v47 = vmul.f32 %v9610_v34, %v3874_v8  ;;  %v3872_v45 = vpop.permute.xlu0 %3871 }
0x2879   :  { %v3877_v21 = vmul.f32 %v9608_v55, %v3872_v45 }
0x287a   :  { %3883 = vrot.lane.b32.xlu0 %v3878_v47, %s9889_s0 }
0x287b   :  { %3881 = vrot.lane.b32.xlu1 %v3877_v21, %s9889_s0 }
0x287c   :  { %v4004_v6 = vpop.permute.xlu0 %4003 }
0x287d   :  { %8780 = vmatmul.mubr.msk.f32.vlgmr.msra.gmra.mrb[28].mxu1 %vm254_vm3, %v4004_v6 }
0x287e   :  { %9079 = vmatpush3.bf16.msra.mxu1 %v10624_v56  ;;  %8793 = vmatprep.mubr.msk.f32.mxu1 %vm9888_vm1, %v9886_v0 }
0x287f   :  { %9083 = vmatprep.subr.bf16.mxu1 %v9887_v1 }
0x28ec   :  { %v3884_v4 = vpop.permute.xlu0 %3883 }
0x28ed   :  { %v3882_v3 = vpop.permute.xlu1 %3881  ;;  %v10937_v2 = vadd.f32 %v9612_v18, %v3884_v4 }
0x28ee   :  { %v10939_v63 = vadd.f32 %v9614_v32, %v3882_v3 }
0x28ef   :  { %v3922_v11 = vrot.slane %v10937_v2, 2 }
0x28f0   :  { %v3921_v61 = vrot.slane %v10939_v63, 3 }
0x28f2   :  { %v3923_v41 = vsel %vm526_vm2, %v3922_v11, %v3921_v61 }
0x28f3   :  { %3924 = vrot.lane.b32.xlu1 %v3923_v41, %s9893_s21 }
0x2950   :  { %v4073_v39 = vpop.f32.mrb[28].mxu1 }
0x2951   :  { %v4074_v57 = vadd.f32 %v10946_v40, %v4073_v39  ;;  %v8781_v46 = vpop.f32.mrb[29].mxu1 }
0x2953   :  { %v4097_v55 = vrot.slane %v4074_v57, 5  ;;  %v4098_v34 = vrot.slane %v4074_v57, 6 }
0x2955   :  { %4099 = vrot.lane.b32.xlu0 %v4097_v55, %s9890_s5  ;;  %4101 = vrot.lane.b32.xlu1 %v4098_v34, %s9890_s5 }
0x2959   :  { %4139 = vrot.lane.b32.xlu0 %v4097_v55, %s9889_s0  ;;  %4141 = vrot.lane.b32.xlu1 %v4098_v34, %s9889_s0 }
0x2965   :  { %v3925_v26 = vpop.permute.xlu1 %3924 }
0x2966   :  { %8773 = vmatmul.mubr.msk.f32.vlgmr.msra.gmra.mrb[28].mxu0 %vm254_vm3, %v3925_v26 }
0x2967   :  { %9076 = vmatpush3.bf16.msra.mxu0 %v10614_v23  ;;  %8786 = vmatprep.mubr.msk.f32.mxu0 %vm9888_vm1, %v9886_v0 }
0x2968   :  { %9080 = vmatprep.subr.bf16.mxu0 %v9887_v1 }
0x29c7   :  { %v4102_v29 = vpop.permute.xlu1 %4101  ;;  %v4100_v14 = vpop.permute.xlu0 %4099 }
0x29c8   :  { %v4106_v5 = vadd.f32 %v4102_v29, %v10722_v59  ;;  %v4105_v24 = vadd.f32 %v4100_v14, %v10719_v48 }
0x29ca   :  { %v8275_v19 = vmul.f32 -1.442695, %v4106_v5  ;;  %v8274_v27 = vmul.f32 -1.442695, %v4105_v24 }
0x29cb   :  { %v4142_v18 = vpop.permute.xlu1 %4141  ;;  %v4140_v32 = vpop.permute.xlu0 %4139 }
0x29cc   :  { %9615 = vpow2.f32 %v8275_v19 }
0x29cd   :  { %9617 = vpow2.f32 %v8274_v27 }
0x29d6   :  { %v9616_v42 = vpop.eup %9615 }
0x29d7   :  { %v9618_v49 = vpop.eup %9617  ;;  %v4114_v10 = vadd.f32 1.0, %v9616_v42 }
0x29d8   :  { %v4113_v54 = vadd.f32 1.0, %v9618_v49 }
0x29d9   :  { %9619 = vrcp.f32 %v4114_v10 }
0x29da   :  { %9621 = vrcp.f32 %v4113_v54 }
0x29e3   :  { %v9620_v50 = vpop.eup %9619 }
0x29e4   :  { %v9622_v62 = vpop.eup %9621  ;;  %v4146_v16 = vmul.f32 %v9620_v50, %v4142_v18 }
0x29e5   :  { %v4145_v58 = vmul.f32 %v9622_v62, %v4140_v32 }
0x29e6   :  { %4151 = vrot.lane.b32.xlu1 %v4146_v16, %s9891_s9 }
0x29e7   :  { %4149 = vrot.lane.b32.xlu0 %v4145_v58, %s9891_s9 }
0x2a39   :  { %v3994_v60 = vpop.f32.mrb[28].mxu0 }
0x2a3a   :  { %v3995_v37 = vadd.f32 %v10732_v20, %v3994_v60  ;;  %v8774_v15 = vpop.f32.mrb[29].mxu0 }
0x2a3c   :  { %v4078_v52 = vrot.slane %v3995_v37, 4  ;;  %v4079_v38 = vrot.slane %v3995_v37, 5 }
0x2a3e   :  { %4121 = vrot.lane.b32.xlu1 %v4079_v38, %s9893_s21  ;;  %4119 = vrot.lane.b32.xlu0 %v4078_v52, %s9893_s21  ;;  %v4082_v61 = vadd.f32 %v4078_v52, %v10719_v48  ;;  %v4083_v41 = vadd.f32 %v4079_v38, %v10722_v59 }
0x2a40   :  { %v8272_v39 = vmul.f32 -1.442695, %v4082_v61  ;;  %v8273_v57 = vmul.f32 -1.442695, %v4083_v41 }
0x2a58   :  { %v4152_v51 = vpop.permute.xlu1 %4151 }
0x2a59   :  { %v4156_v53 = vadd.f32 %v4152_v51, %v10722_v59  ;;  %v4150_v17 = vpop.permute.xlu0 %4149 }
0x2a5a   :  { %v4155_v8 = vadd.f32 %v4150_v17, %v10719_v48 }
0x2a5b   :  { %9623 = vtanh.f32 %v4156_v53 }
0x2a5c   :  { %9625 = vtanh.f32 %v4155_v8 }
0x2a5d   :  { %9627 = vpow2.f32 %v8272_v39 }
0x2a5e   :  { %9629 = vpow2.f32 %v8273_v57 }
0x2a65   :  { %v9624_v47 = vpop.eup %9623 }
0x2a66   :  { %v9626_v45 = vpop.eup %9625  ;;  %v4192_v21 = vrot.slane %v9624_v47, 7 }
0x2a67   :  { %v4191_v6 = vrot.slane %v9626_v45, 7  ;;  %v9628_v46 = vpop.eup %9627 }
0x2a68   :  { %v4196_v20 = vsub.f32 %v10918_v7, %v4192_v21  ;;  %v9630_v55 = vpop.eup %9629  ;;  %v4090_v34 = vadd.f32 1.0, %v9628_v46 }
0x2a69   :  { %v4195_v4 = vsub.f32 %v10920_v22, %v4191_v6  ;;  %v4091_v26 = vadd.f32 1.0, %v9630_v55 }
0x2a6a   :  { %v4200_v3 = vrot.slane %v4196_v20, 1  ;;  %9631 = vrcp.f32 %v4090_v34 }
0x2a6b   :  { %v4199_v11 = vrot.slane %v4195_v4, 1  ;;  %9633 = vrcp.f32 %v4091_v26 }
0x2a6c   :  { %4203 = vrot.lane.b32.xlu1 %v4200_v3, %s9892_s17 }
0x2a6d   :  { %4201 = vrot.lane.b32.xlu0 %v4199_v11, %s9892_s17 }
0x2a74   :  { %v9632_v29 = vpop.eup %9631 }
0x2a75   :  { %v9634_v14 = vpop.eup %9633 }
0x2ab0   :  { %v4122_v5 = vpop.permute.xlu1 %4121  ;;  %v4120_v24 = vpop.permute.xlu0 %4119 }
0x2ab1   :  { %v4126_v19 = vmul.f32 %v9634_v14, %v4122_v5  ;;  %v4125_v27 = vmul.f32 %v9632_v29, %v4120_v24 }
0x2ab3   :  { %4131 = vrot.lane.b32.xlu1 %v4126_v19, %s9891_s9  ;;  %4129 = vrot.lane.b32.xlu0 %v4125_v27, %s9891_s9 }
0x2ade   :  { %v4204_v42 = vpop.permute.xlu1 %4203 }
0x2adf   :  { %v4208_v49 = vmul.f32 %v9620_v50, %v4204_v42  ;;  %v4202_v10 = vpop.permute.xlu0 %4201 }
0x2ae0   :  { %v4207_v54 = vmul.f32 %v9622_v62, %v4202_v10 }
0x2ae1   :  { %4213 = vrot.lane.b32.xlu1 %v4208_v49, %s9889_s0 }
0x2ae2   :  { %4211 = vrot.lane.b32.xlu0 %v4207_v54, %s9889_s0 }
0x2b25   :  { %v4132_v18 = vpop.permute.xlu1 %4131  ;;  %v4130_v16 = vpop.permute.xlu0 %4129 }
0x2b26   :  { %v4136_v32 = vadd.f32 %v4132_v18, %v10722_v59  ;;  %v4135_v58 = vadd.f32 %v4130_v16, %v10719_v48 }
0x2b28   :  { %9635 = vtanh.f32 %v4136_v32 }
0x2b29   :  { %9637 = vtanh.f32 %v4135_v58 }
0x2b32   :  { %v9636_v60 = vpop.eup %9635 }
0x2b33   :  { %v9638_v37 = vpop.eup %9637  ;;  %v4162_v15 = vrot.slane %v9636_v60, 1 }
0x2b34   :  { %v4161_v52 = vrot.slane %v9638_v37, 1 }
0x2b35   :  { %v4166_v50 = vsub.f32 %v10937_v2, %v4162_v15 }
0x2b36   :  { %v4165_v62 = vsub.f32 %v10939_v63, %v4161_v52 }
0x2b37   :  { %v4170_v38 = vrot.slane %v4166_v50, 7 }
0x2b38   :  { %v4169_v51 = vrot.slane %v4165_v62, 7 }
0x2b39   :  { %4173 = vrot.lane.b32.xlu1 %v4170_v38, %s9892_s17 }
0x2b3a   :  { %4171 = vrot.lane.b32.xlu0 %v4169_v51, %s9892_s17 }
0x2b53   :  { %v4214_v53 = vpop.permute.xlu1 %4213 }
0x2b54   :  { %v10983_v17 = vadd.f32 %v9624_v47, %v4214_v53  ;;  %v4212_v8 = vpop.permute.xlu0 %4211  ;;  %v11021_v53 = vld [vmem:[%s9977_s30] ss:$0 sm:$0xff]  ;;  %s9897_s30 = smov 120  }
0x2b55   :  { %v10985_v21 = vadd.f32 %v9626_v45, %v4212_v8 }
0x2b56   :  { %v4301_v6 = vrot.slane %v10983_v17, 2 }
0x2b57   :  { %v4300_v20 = vrot.slane %v10985_v21, 3 }
0x2b59   :  { %v4302_v4 = vsel %vm526_vm2, %v4301_v6, %v4300_v20 }
0x2b5a   :  { %4303 = vrot.lane.b32.xlu0 %v4302_v4, %s9890_s5 }
0x2bab   :  { %v4174_v3 = vpop.permute.xlu1 %4173 }
0x2bac   :  { %v4178_v11 = vmul.f32 %v9634_v14, %v4174_v3  ;;  %v4172_v61 = vpop.permute.xlu0 %4171 }
0x2bad   :  { %v4177_v41 = vmul.f32 %v9632_v29, %v4172_v61 }
0x2bae   :  { %4183 = vrot.lane.b32.xlu0 %v4178_v11, %s9889_s0 }
0x2baf   :  { %4181 = vrot.lane.b32.xlu1 %v4177_v41, %s9889_s0 }
0x2bcc   :  { %v4304_v47 = vpop.permute.xlu0 %4303 }
0x2bcd   :  { %8794 = vmatmul.mubr.msk.f32.vlgmr.msra.gmra.mrb[30].mxu1 %vm254_vm3, %v4304_v47 }
0x2bce   :  { %9085 = vmatpush3.bf16.msra.mxu1 %v10624_v56  ;;  %8807 = vmatprep.mubr.msk.f32.mxu1 %vm9888_vm1, %v9886_v0 }
0x2bcf   :  { %9089 = vmatprep.subr.bf16.mxu1 %v9887_v1 }
0x2c20   :  { %v4184_v45 = vpop.permute.xlu0 %4183 }
0x2c21   :  { %v4182_v39 = vpop.permute.xlu1 %4181  ;;  %v10998_v57 = vadd.f32 %v9636_v60, %v4184_v45 }
0x2c22   :  { %v11000_v46 = vadd.f32 %v9638_v37, %v4182_v39 }
0x2c23   :  { %v4222_v55 = vrot.slane %v10998_v57, 3 }
0x2c24   :  { %v4221_v34 = vrot.slane %v11000_v46, 4 }
0x2c26   :  { %v4223_v26 = vsel %vm526_vm2, %v4222_v55, %v4221_v34 }
0x2c27   :  { %4224 = vrot.lane.b32.xlu1 %v4223_v26, %s9893_s21 }
0x2c99   :  { %v4225_v29 = vpop.permute.xlu1 %4224 }
0x2c9a   :  { %8787 = vmatmul.mubr.msk.f32.vlgmr.msra.gmra.mrb[30].mxu0 %vm254_vm3, %v4225_v29 }
0x2c9b   :  { %9082 = vmatpush3.bf16.msra.mxu0 %v10614_v23  ;;  %8800 = vmatprep.mubr.msk.f32.mxu0 %vm9888_vm1, %v9886_v0 }
0x2c9c   :  { %9086 = vmatprep.subr.bf16.mxu0 %v9887_v1 }
0x2ca0   :  { %v4373_v14 = vpop.f32.mrb[30].mxu1 }
0x2ca1   :  { %v4374_v5 = vadd.f32 %v10946_v40, %v4373_v14  ;;  %v8795_v24 = vpop.f32.mrb[31].mxu1 }
0x2ca3   :  { %v4397_v19 = vrot.slane %v4374_v5, 6  ;;  %v4398_v27 = vrot.slane %v4374_v5, 7 }
0x2ca5   :  { %4399 = vrot.lane.b32.xlu0 %v4397_v19, %s9890_s5  ;;  %4401 = vrot.lane.b32.xlu1 %v4398_v27, %s9890_s5 }
0x2ca9   :  { %4439 = vrot.lane.b32.xlu0 %v4397_v19, %s9889_s0  ;;  %4441 = vrot.lane.b32.xlu1 %v4398_v27, %s9889_s0 }
0x2d17   :  { %v4402_v42 = vpop.permute.xlu1 %4401  ;;  %v4400_v49 = vpop.permute.xlu0 %4399 }
0x2d18   :  { %v4406_v10 = vadd.f32 %v4402_v42, %v10722_v59  ;;  %v4405_v1 = vadd.f32 %v4400_v49, %v10719_v48 }
0x2d1a   :  { %v8281_v54 = vmul.f32 -1.442695, %v4406_v10  ;;  %v8280_v18 = vmul.f32 -1.442695, %v4405_v1 }
0x2d1b   :  { %v4442_v15 = vpop.permute.xlu1 %4441  ;;  %v4440_v62 = vpop.permute.xlu0 %4439 }
0x2d1c   :  { %9639 = vpow2.f32 %v8281_v54 }
0x2d1d   :  { %9641 = vpow2.f32 %v8280_v18 }
0x2d26   :  { %v9640_v16 = vpop.eup %9639 }
0x2d27   :  { %v9642_v32 = vpop.eup %9641  ;;  %v4414_v58 = vadd.f32 1.0, %v9640_v16 }
0x2d28   :  { %v4413_v60 = vadd.f32 1.0, %v9642_v32 }
0x2d29   :  { %9643 = vrcp.f32 %v4414_v58 }
0x2d2a   :  { %9645 = vrcp.f32 %v4413_v60 }
0x2d33   :  { %v9644_v37 = vpop.eup %9643 }
0x2d34   :  { %v9646_v52 = vpop.eup %9645  ;;  %v4446_v50 = vmul.f32 %v9644_v37, %v4442_v15 }
0x2d35   :  { %v4445_v38 = vmul.f32 %v9646_v52, %v4440_v62 }
0x2d36   :  { %4451 = vrot.lane.b32.xlu1 %v4446_v50, %s9891_s9 }
0x2d37   :  { %4449 = vrot.lane.b32.xlu0 %v4445_v38, %s9891_s9 }
0x2d6d   :  { %v4294_v51 = vpop.f32.mrb[30].mxu0 }
0x2d6e   :  { %v4295_v8 = vadd.f32 %v11021_v53, %v4294_v51  ;;  %v8788_v6 = vpop.f32.mrb[31].mxu0 }
0x2d70   :  { %v4378_v20 = vrot.slane %v4295_v8, 3  ;;  %v4379_v4 = vrot.slane %v4295_v8, 4 }
0x2d72   :  { %4421 = vrot.lane.b32.xlu1 %v4379_v4, %s9893_s21  ;;  %4419 = vrot.lane.b32.xlu0 %v4378_v20, %s9893_s21  ;;  %v4382_v3 = vadd.f32 %v4378_v20, %v10719_v48  ;;  %v4383_v11 = vadd.f32 %v4379_v4, %v10722_v59 }
0x2d74   :  { %v8278_v61 = vmul.f32 -1.442695, %v4382_v3  ;;  %v8279_v41 = vmul.f32 -1.442695, %v4383_v11 }
0x2d76   :  { %9647 = vpow2.f32 %v8278_v61 }
0x2d77   :  { %9649 = vpow2.f32 %v8279_v41 }
0x2d80   :  { %v9648_v34 = vpop.eup %9647 }
0x2d81   :  { %v9650_v26 = vpop.eup %9649  ;;  %v4390_v29 = vadd.f32 1.0, %v9648_v34 }
0x2d82   :  { %v4391_v14 = vadd.f32 1.0, %v9650_v26 }
0x2da8   :  { %v4452_v47 = vpop.permute.xlu1 %4451 }
0x2da9   :  { %v4450_v45 = vpop.permute.xlu0 %4449  ;;  %v4456_v39 = vadd.f32 %v4452_v47, %v10722_v59 }
0x2daa   :  { %v4455_v55 = vadd.f32 %v4450_v45, %v10719_v48 }
0x2dab   :  { %9651 = vtanh.f32 %v4456_v39 }
0x2dac   :  { %9653 = vtanh.f32 %v4455_v55 }
0x2dad   :  { %9655 = vrcp.f32 %v4390_v29 }
0x2dae   :  { %9657 = vrcp.f32 %v4391_v14 }
0x2db5   :  { %v9652_v5 = vpop.eup %9651 }
0x2db6   :  { %v9654_v24 = vpop.eup %9653  ;;  %v4492_v19 = vrot.slane %v9652_v5, 7 }
0x2db7   :  { %v4491_v27 = vrot.slane %v9654_v24, 7  ;;  %v9656_v42 = vpop.eup %9655 }
0x2db8   :  { %v9658_v49 = vpop.eup %9657  ;;  %v4496_v16 = vsub.f32 %v10983_v17, %v4492_v19 }
0x2db9   :  { %v4495_v32 = vsub.f32 %v10985_v21, %v4491_v27 }
0x2dba   :  { %v4500_v58 = vrot.slane %v4496_v16, 1 }
0x2dbb   :  { %v4499_v60 = vrot.slane %v4495_v32, 1 }
0x2de4   :  { %v4422_v10 = vpop.permute.xlu1 %4421  ;;  %v4420_v1 = vpop.permute.xlu0 %4419 }
0x2de5   :  { %v4426_v54 = vmul.f32 %v9658_v49, %v4422_v10  ;;  %v4425_v18 = vmul.f32 %v9656_v42, %v4420_v1 }
0x2de7   :  { %4431 = vrot.lane.b32.xlu1 %v4426_v54, %s9891_s9  ;;  %4429 = vrot.lane.b32.xlu0 %v4425_v18, %s9891_s9 }
0x2deb   :  { %4503 = vrot.lane.b32.xlu1 %v4500_v58, %s9892_s17  ;;  %4501 = vrot.lane.b32.xlu0 %v4499_v60, %s9892_s17 }
0x2e59   :  { %v4432_v15 = vpop.permute.xlu1 %4431  ;;  %v4430_v50 = vpop.permute.xlu0 %4429 }
0x2e5a   :  { %v4436_v62 = vadd.f32 %v4432_v15, %v10722_v59  ;;  %v4435_v38 = vadd.f32 %v4430_v50, %v10719_v48 }
0x2e5c   :  { %9659 = vtanh.f32 %v4436_v62 }
0x2e5d   :  { %9661 = vtanh.f32 %v4435_v38  ;;  %v4504_v51 = vpop.permute.xlu1 %4503  ;;  %v4502_v8 = vpop.permute.xlu0 %4501 }
0x2e5e   :  { %v4508_v6 = vmul.f32 %v9644_v37, %v4504_v51  ;;  %v4507_v20 = vmul.f32 %v9646_v52, %v4502_v8 }
0x2e60   :  { %4513 = vrot.lane.b32.xlu1 %v4508_v6, %s9889_s0  ;;  %4511 = vrot.lane.b32.xlu0 %v4507_v20, %s9889_s0 }
0x2e66   :  { %v9660_v4 = vpop.eup %9659 }
0x2e67   :  { %v9662_v3 = vpop.eup %9661  ;;  %v4462_v11 = vrot.slane %v9660_v4, 1 }
0x2e68   :  { %v4461_v61 = vrot.slane %v9662_v3, 1 }
0x2e69   :  { %v4466_v41 = vsub.f32 %v10998_v57, %v4462_v11 }
0x2e6a   :  { %v4465_v47 = vsub.f32 %v11000_v46, %v4461_v61 }
0x2e6b   :  { %v4470_v45 = vrot.slane %v4466_v41, 7 }
0x2e6c   :  { %v4469_v39 = vrot.slane %v4465_v47, 7 }
0x2e6d   :  { %4473 = vrot.lane.b32.xlu1 %v4470_v45, %s9892_s17 }
0x2e6e   :  { %4471 = vrot.lane.b32.xlu0 %v4469_v39, %s9892_s17 }
0x2ed2   :  { %v4514_v37 = vpop.permute.xlu1 %4513  ;;  %v4512_v52 = vpop.permute.xlu0 %4511 }
0x2ed3   :  { %v11044_v55 = vadd.f32 %v9652_v5, %v4514_v37  ;;  %v11046_v34 = vadd.f32 %v9654_v24, %v4512_v52 }
0x2ed5   :  { %v4601_v27 = vrot.slane %v11044_v55, 1  ;;  %v4600_v10 = vrot.slane %v11046_v34, 2 }
0x2ed7   :  { %v4602_v1 = vsel %vm526_vm2, %v4601_v27, %v4600_v10 }
0x2edf   :  { %v4474_v26 = vpop.permute.xlu1 %4473 }
0x2ee0   :  { %v4478_v29 = vmul.f32 %v9658_v49, %v4474_v26  ;;  %v4472_v14 = vpop.permute.xlu0 %4471 }
0x2ee1   :  { %v4477_v19 = vmul.f32 %v9656_v42, %v4472_v14 }
0x2ee2   :  { %4483 = vrot.lane.b32.xlu1 %v4478_v29, %s9889_s0 }
0x2ee3   :  { %4481 = vrot.lane.b32.xlu0 %v4477_v19, %s9889_s0 }
0x2ee7   :  { %4603 = vrot.lane.b32.xlu0 %v4602_v1, %s9890_s5 }
0x2f54   :  { %v4484_v5 = vpop.permute.xlu1 %4483 }
0x2f55   :  { %v11054_v54 = vadd.f32 %v9660_v4, %v4484_v5  ;;  %v4482_v24 = vpop.permute.xlu0 %4481 }
0x2f56   :  { %v11056_v18 = vadd.f32 %v9662_v3, %v4482_v24 }
0x2f57   :  { %v4522_v42 = vrot.slane %v11054_v54, 4 }
0x2f58   :  { %v4521_v49 = vrot.slane %v11056_v18, 5 }
0x2f59   :  { %v4604_v16 = vpop.permute.xlu0 %4603 }
0x2f5a   :  { %8808 = vmatmul.mubr.msk.f32.vlgmr.msra.gmra.mrb[32].mxu1 %vm254_vm3, %v4604_v16  ;;  %v4523_v32 = vsel %vm526_vm2, %v4522_v42, %v4521_v49 }
0x2f5b   :  { %4524 = vrot.lane.b32.xlu1 %v4523_v32, %s9893_s21  ;;  %9091 = vmatpush3.bf16.msra.mxu1 %v10624_v56 }
0x2f5c   :  { %8821 = vmatprep.mubr.msk.f32.mxu1 %vm9888_vm1, %v9886_v0  ;;  %8832 = vmatprep.subr.bf16.mxu1 %v9886_v0 }
0x2fcd   :  { %v4525_v58 = vpop.permute.xlu1 %4524 }
0x2fce   :  { %8801 = vmatmul.mubr.msk.f32.vlgmr.msra.gmra.mrb[32].mxu0 %vm254_vm3, %v4525_v58 }
0x2fcf   :  { %9088 = vmatpush3.bf16.msra.mxu0 %v10614_v23  ;;  %8814 = vmatprep.mubr.msk.f32.mxu0 %vm9888_vm1, %v9886_v0 }
0x2fd0   :  { %8824 = vmatprep.subr.bf16.mxu0 %v9886_v0 }
0x302d   :  { %v4673_v60 = vpop.f32.mrb[32].mxu1 }
0x302e   :  { %v4674_v15 = vadd.f32 %v10946_v40, %v4673_v60  ;;  %v8809_v50 = vpop.f32.mrb[33].mxu1 }
0x3030   :  { %v4697_v56 = vrot.slane %v4674_v15, 7  ;;  %4700 = vrot.lane.b32.xlu1 %v4674_v15, %s9890_s5 }
0x3032   :  { %4698 = vrot.lane.b32.xlu0 %v4697_v56, %s9890_s5 }
0x3034   :  { %4740 = vrot.lane.b32.xlu1 %v4674_v15, %s9889_s0 }
0x3036   :  { %4738 = vrot.lane.b32.xlu0 %v4697_v56, %s9889_s0 }
0x30a1   :  { %v4594_v62 = vpop.f32.mrb[32].mxu0 }
0x30a2   :  { %v4595_v23 = vadd.f32 %v11021_v53, %v4594_v62  ;;  %v4701_v38 = vpop.permute.xlu1 %4700  ;;  %v8802_v51 = vpop.f32.mrb[33].mxu0 }
0x30a3   :  { %v4705_v8 = vadd.f32 %v4701_v38, %v10722_v59 }
0x30a4   :  { %v4678_v6 = vrot.slane %v4595_v23, 2  ;;  %v4679_v20 = vrot.slane %v4595_v23, 3  ;;  %v4699_v4 = vpop.permute.xlu0 %4698 }
0x30a5   :  { %v8287_v3 = vmul.f32 -1.442695, %v4705_v8  ;;  %v4704_v11 = vadd.f32 %v4699_v4, %v10719_v48 }
0x30a6   :  { %4720 = vrot.lane.b32.xlu1 %v4679_v20, %s9893_s21  ;;  %4718 = vrot.lane.b32.xlu0 %v4678_v6, %s9893_s21  ;;  %v4741_v52 = vpop.permute.xlu1 %4740  ;;  %v4682_v27 = vadd.f32 %v4678_v6, %v10719_v48  ;;  %v4683_v10 = vadd.f32 %v4679_v20, %v10722_v59 }
0x30a7   :  { %9663 = vpow2.f32 %v8287_v3  ;;  %v8286_v61 = vmul.f32 -1.442695, %v4704_v11 }
0x30a8   :  { %v4739_v14 = vpop.permute.xlu0 %4738  ;;  %v8284_v1 = vmul.f32 -1.442695, %v4682_v27  ;;  %v8285_v5 = vmul.f32 -1.442695, %v4683_v10 }
0x30a9   :  { %9665 = vpow2.f32 %v8286_v61 }
0x30b1   :  { %v9664_v41 = vpop.eup %9663 }
0x30b2   :  { %v4713_v47 = vadd.f32 1.0, %v9664_v41 }
0x30b3   :  { %v9666_v45 = vpop.eup %9665 }
0x30b4   :  { %9667 = vrcp.f32 %v4713_v47  ;;  %v4712_v39 = vadd.f32 1.0, %v9666_v45 }
0x30b6   :  { %9669 = vrcp.f32 %v4712_v39 }
0x30b7   :  { %9671 = vpow2.f32 %v8284_v1 }
0x30b8   :  { %9673 = vpow2.f32 %v8285_v5 }
0x30be   :  { %v9668_v37 = vpop.eup %9667 }
0x30bf   :  { %v4745_v26 = vmul.f32 %v9668_v37, %v4741_v52 }
0x30c0   :  { %v9670_v29 = vpop.eup %9669 }
0x30c1   :  { %v4744_v19 = vmul.f32 %v9670_v29, %v4739_v14  ;;  %4750 = vrot.lane.b32.xlu1 %v4745_v26, %s9891_s9  ;;  %v9672_v24 = vpop.eup %9671 }
0x30c2   :  { %v9674_v42 = vpop.eup %9673  ;;  %v4690_v49 = vadd.f32 1.0, %v9672_v24 }
0x30c3   :  { %4748 = vrot.lane.b32.xlu0 %v4744_v19, %s9891_s9  ;;  %v4691_v16 = vadd.f32 1.0, %v9674_v42 }
0x30c4   :  { %9675 = vrcp.f32 %v4690_v49 }
0x30c5   :  { %9677 = vrcp.f32 %v4691_v16 }
0x30ce   :  { %v9676_v32 = vpop.eup %9675 }
0x30cf   :  { %v9678_v58 = vpop.eup %9677 }
0x3118   :  { %v4721_v60 = vpop.permute.xlu1 %4720  ;;  %v4719_v15 = vpop.permute.xlu0 %4718 }
0x3119   :  { %v4725_v50 = vmul.f32 %v9678_v58, %v4721_v60  ;;  %v4724_v56 = vmul.f32 %v9676_v32, %v4719_v15 }
0x311b   :  { %4730 = vrot.lane.b32.xlu1 %v4725_v50, %s9891_s9  ;;  %4728 = vrot.lane.b32.xlu0 %v4724_v56, %s9891_s9 }
0x3133   :  { %v4751_v62 = vpop.permute.xlu1 %4750 }
0x3134   :  { %v4755_v23 = vadd.f32 %v4751_v62, %v10722_v59 }
0x3135   :  { %v4749_v38 = vpop.permute.xlu0 %4748 }
0x3136   :  { %9679 = vtanh.f32 %v4755_v23  ;;  %v4754_v51 = vadd.f32 %v4749_v38, %v10719_v48 }
0x3138   :  { %9681 = vtanh.f32 %v4754_v51 }
0x3140   :  { %v9680_v8 = vpop.eup %9679 }
0x3141   :  { %v4791_v6 = vrot.slane %v9680_v8, 7 }
0x3142   :  { %v9682_v20 = vpop.eup %9681 }
0x3143   :  { %v4795_v4 = vsub.f32 %v11044_v55, %v4791_v6  ;;  %v4790_v3 = vrot.slane %v9682_v20, 7 }
0x3145   :  { %v4799_v11 = vrot.slane %v4795_v4, 1  ;;  %v4794_v61 = vsub.f32 %v11046_v34, %v4790_v3 }
0x3147   :  { %4802 = vrot.lane.b32.xlu1 %v4799_v11, %s9892_s17  ;;  %v4798_v41 = vrot.slane %v4794_v61, 1 }
0x3149   :  { %4800 = vrot.lane.b32.xlu0 %v4798_v41, %s9892_s17 }
0x318d   :  { %v4731_v47 = vpop.permute.xlu1 %4730  ;;  %v4729_v45 = vpop.permute.xlu0 %4728 }
0x318e   :  { %v4735_v39 = vadd.f32 %v4731_v47, %v10722_v59  ;;  %v4734_v52 = vadd.f32 %v4729_v45, %v10719_v48 }
0x3190   :  { %9683 = vtanh.f32 %v4735_v39 }
0x3191   :  { %9685 = vtanh.f32 %v4734_v52 }
0x319a   :  { %v9684_v26 = vpop.eup %9683 }
0x319b   :  { %v9686_v14 = vpop.eup %9685  ;;  %v4761_v19 = vrot.slane %v9684_v26, 1 }
0x319c   :  { %v4760_v27 = vrot.slane %v9686_v14, 1 }
0x319d   :  { %v4765_v10 = vsub.f32 %v11054_v54, %v4761_v19 }
0x319e   :  { %v4764_v1 = vsub.f32 %v11056_v18, %v4760_v27 }
0x319f   :  { %v4769_v5 = vrot.slane %v4765_v10, 7 }
0x31a0   :  { %v4768_v24 = vrot.slane %v4764_v1, 7 }
0x31a1   :  { %4772 = vrot.lane.b32.xlu1 %v4769_v5, %s9892_s17 }
0x31a2   :  { %4770 = vrot.lane.b32.xlu0 %v4768_v24, %s9892_s17 }
0x31b9   :  { %v4803_v42 = vpop.permute.xlu1 %4802 }
0x31ba   :  { %v4807_v49 = vmul.f32 %v9668_v37, %v4803_v42 }
0x31bb   :  { %v4801_v16 = vpop.permute.xlu0 %4800 }
0x31bc   :  { %v4806_v60 = vmul.f32 %v9670_v29, %v4801_v16  ;;  %4812 = vrot.lane.b32.xlu1 %v4807_v49, %s9889_s0 }
0x31be   :  { %4810 = vrot.lane.b32.xlu0 %v4806_v60, %s9889_s0 }
0x3213   :  { %v4773_v15 = vpop.permute.xlu1 %4772 }
0x3214   :  { %v4777_v50 = vmul.f32 %v9678_v58, %v4773_v15  ;;  %v4771_v56 = vpop.permute.xlu0 %4770 }
0x3215   :  { %v4776_v62 = vmul.f32 %v9676_v32, %v4771_v56 }
0x3216   :  { %4782 = vrot.lane.b32.xlu1 %v4777_v50, %s9889_s0 }
0x3217   :  { %4780 = vrot.lane.b32.xlu0 %v4776_v62, %s9889_s0 }
0x322e   :  { %v4813_v23 = vpop.permute.xlu1 %4812 }
0x322f   :  { %v11106_v6 = vadd.f32 %v9680_v8, %v4813_v23 }
0x3230   :  { %v4811_v38 = vpop.permute.xlu0 %4810 }
0x3231   :  { %v11104_v51 = vadd.f32 %v9682_v20, %v4811_v38 }
0x3233   :  { %v4899_v37 = vrot.slane %v11104_v51, 1 }
0x3235   :  { %v4900_v29 = vsel %vm526_vm2, %v11106_v6, %v4899_v37 }
0x3236   :  { %4901 = vrot.lane.b32.xlu0 %v4900_v29, %s9890_s5 }
0x3288   :  { %v4783_v58 = vpop.permute.xlu1 %4782 }
0x3289   :  { %v11112_v4 = vadd.f32 %v9684_v26, %v4783_v58  ;;  %v4781_v32 = vpop.permute.xlu0 %4780 }
0x328a   :  { %v11114_v3 = vadd.f32 %v9686_v14, %v4781_v32 }
0x328b   :  { %v4821_v11 = vrot.slane %v11112_v4, 5 }
0x328c   :  { %v4820_v20 = vrot.slane %v11114_v3, 6 }
0x328e   :  { %v4822_v8 = vsel %vm526_vm2, %v4821_v11, %v4820_v20 }
0x328f   :  { %4823 = vrot.lane.b32.xlu1 %v4822_v8, %s9893_s21 }
0x32a8   :  { %v4902_v61 = vpop.permute.xlu0 %4901 }
0x32a9   :  { %8822 = vmatmul.mubr.msk.f32.vlgmr.msra.gmra.mrb[34].mxu1 %vm254_vm3, %v4902_v61 }
0x32aa   :  { %8836 = vmatprep.mubr.msk.bf16.mxu1 %vm9888_vm1, %v9886_v0 }
0x3301   :  { %v4824_v41 = vpop.permute.xlu1 %4823 }
0x3302   :  { %8815 = vmatmul.mubr.msk.f32.vlgmr.msra.gmra.mrb[34].mxu0 %vm254_vm3, %v4824_v41 }
0x3303   :  { %8828 = vmatprep.mubr.msk.bf16.mxu0 %vm9888_vm1, %v9886_v0 }
0x337c   :  { %v4971_v47 = vpop.f32.mrb[34].mxu1 }
0x337d   :  { %v4972_v45 = vadd.f32 %v10946_v40, %v4971_v47  ;;  %v8823_v39 = vpop.f32.mrb[35].mxu1 }
0x337f   :  { %v4995_v52 = vrot.slane %v4972_v45, 1  ;;  %4996 = vrot.lane.b32.xlu0 %v4972_v45, %s9890_s5 }
0x3381   :  { %4998 = vrot.lane.b32.xlu1 %v4995_v52, %s9890_s5 }
0x3383   :  { %5036 = vrot.lane.b32.xlu0 %v4972_v45, %s9889_s0 }
0x3385   :  { %5038 = vrot.lane.b32.xlu1 %v4995_v52, %s9889_s0 }
0x33d5   :  { %v4893_v26 = vpop.f32.mrb[34].mxu0 }
0x33d6   :  { %v4894_v14 = vadd.f32 %v11021_v53, %v4893_v26  ;;  %v8816_v19 = vpop.f32.mrb[35].mxu0 }
0x33d8   :  { %v4976_v27 = vrot.slane %v4894_v14, 1  ;;  %v4977_v10 = vrot.slane %v4894_v14, 2 }
0x33da   :  { %5018 = vrot.lane.b32.xlu1 %v4977_v10, %s9893_s21  ;;  %5016 = vrot.lane.b32.xlu0 %v4976_v27, %s9893_s21  ;;  %v4980_v29 = vadd.f32 %v4976_v27, %v10719_v48  ;;  %v4981_v58 = vadd.f32 %v4977_v10, %v10722_v59 }
0x33dc   :  { %v8290_v32 = vmul.f32 -1.442695, %v4980_v29  ;;  %v8291_v11 = vmul.f32 -1.442695, %v4981_v58 }
0x33f1   :  { %v4997_v40 = vpop.permute.xlu0 %4996 }
0x33f2   :  { %v5002_v1 = vadd.f32 %v4997_v40, %v10719_v48 }
0x33f3   :  { %v4999_v5 = vpop.permute.xlu1 %4998 }
0x33f4   :  { %v8292_v24 = vmul.f32 -1.442695, %v5002_v1  ;;  %v5003_v42 = vadd.f32 %v4999_v5, %v10722_v59 }
0x33f5   :  { %v5037_v56 = vpop.permute.xlu0 %5036 }
0x33f6   :  { %9687 = vpow2.f32 %v8292_v24  ;;  %v8293_v49 = vmul.f32 -1.442695, %v5003_v42 }
0x33f7   :  { %v5039_v38 = vpop.permute.xlu1 %5038 }
0x33f8   :  { %9689 = vpow2.f32 %v8293_v49 }
0x3400   :  { %v9688_v16 = vpop.eup %9687 }
0x3401   :  { %v5010_v60 = vadd.f32 1.0, %v9688_v16 }
0x3402   :  { %v9690_v53 = vpop.eup %9689 }
0x3403   :  { %9691 = vrcp.f32 %v5010_v60  ;;  %v5011_v15 = vadd.f32 1.0, %v9690_v53 }
0x3405   :  { %9693 = vrcp.f32 %v5011_v15 }
0x3406   :  { %9695 = vpow2.f32 %v8290_v32 }
0x3407   :  { %9697 = vpow2.f32 %v8291_v11 }
0x340d   :  { %v9692_v50 = vpop.eup %9691 }
0x340e   :  { %v5042_v62 = vmul.f32 %v9692_v50, %v5037_v56 }
0x340f   :  { %v9694_v23 = vpop.eup %9693 }
0x3410   :  { %v5043_v37 = vmul.f32 %v9694_v23, %v5039_v38  ;;  %5046 = vrot.lane.b32.xlu0 %v5042_v62, %s9891_s9  ;;  %v9696_v20 = vpop.eup %9695 }
0x3411   :  { %v9698_v8 = vpop.eup %9697  ;;  %v4988_v61 = vadd.f32 1.0, %v9696_v20 }
0x3412   :  { %5048 = vrot.lane.b32.xlu1 %v5043_v37, %s9891_s9  ;;  %v4989_v41 = vadd.f32 1.0, %v9698_v8 }
0x3413   :  { %9699 = vrcp.f32 %v4988_v61 }
0x3414   :  { %9701 = vrcp.f32 %v4989_v41 }
0x341d   :  { %v9700_v47 = vpop.eup %9699 }
0x341e   :  { %v9702_v45 = vpop.eup %9701 }
0x344c   :  { %v5019_v39 = vpop.permute.xlu1 %5018  ;;  %v5017_v52 = vpop.permute.xlu0 %5016 }
0x344d   :  { %v5023_v26 = vmul.f32 %v9702_v45, %v5019_v39  ;;  %v5022_v14 = vmul.f32 %v9700_v47, %v5017_v52 }
0x344f   :  { %5028 = vrot.lane.b32.xlu1 %v5023_v26, %s9891_s9  ;;  %5026 = vrot.lane.b32.xlu0 %v5022_v14, %s9891_s9 }
0x3482   :  { %v5047_v19 = vpop.permute.xlu0 %5046 }
0x3483   :  { %v5052_v27 = vadd.f32 %v5047_v19, %v10719_v48 }
0x3484   :  { %v5049_v10 = vpop.permute.xlu1 %5048 }
0x3485   :  { %9703 = vtanh.f32 %v5052_v27  ;;  %v5053_v40 = vadd.f32 %v5049_v10, %v10722_v59 }
0x3487   :  { %9705 = vtanh.f32 %v5053_v40  ;;  %v9267_v40 = vld [vmem:[%s11736_s29] sm:$0xff]  }
0x3488   :  { %8825 = vmatpush3.bf16.msra.mxu0 %v9267_v40 }
0x3489   :  { %8826 = vmatprep.subr.bf16.mxu0 %v9886_v0 }
0x348f   :  { %v9704_v1 = vpop.eup %9703 }
0x3490   :  { %v5088_v5 = vrot.slane %v9704_v1, 7 }
0x3491   :  { %v9706_v24 = vpop.eup %9705 }
0x3492   :  { %v5092_v42 = vsub.f32 %v11104_v51, %v5088_v5  ;;  %v5089_v49 = vrot.slane %v9706_v24, 7 }
0x3494   :  { %v5096_v16 = vrot.slane %v5092_v42, 1  ;;  %v5093_v60 = vsub.f32 %v11106_v6, %v5089_v49 }
0x3496   :  { %5098 = vrot.lane.b32.xlu0 %v5096_v16, %s9892_s17  ;;  %v5097_v53 = vrot.slane %v5093_v60, 1 }
0x3498   :  { %5100 = vrot.lane.b32.xlu1 %v5097_v53, %s9892_s17 }
0x34c1   :  { %v5029_v15 = vpop.permute.xlu1 %5028  ;;  %v5027_v56 = vpop.permute.xlu0 %5026 }
0x34c2   :  { %v5033_v62 = vadd.f32 %v5029_v15, %v10722_v59  ;;  %v5032_v38 = vadd.f32 %v5027_v56, %v10719_v48 }
0x34c4   :  { %9707 = vtanh.f32 %v5033_v62 }
0x34c5   :  { %9709 = vtanh.f32 %v5032_v38 }
0x34ce   :  { %v9708_v37 = vpop.eup %9707 }
0x34cf   :  { %v9710_v29 = vpop.eup %9709  ;;  %v5059_v58 = vrot.slane %v9708_v37, 1 }
0x34d0   :  { %v5058_v32 = vrot.slane %v9710_v29, 1 }
0x34d1   :  { %v5063_v11 = vsub.f32 %v11112_v4, %v5059_v58  ;;  %v9269_v58 = vld [vmem:[%s11737_s3] sm:$0xff]  }
0x34d2   :  { %v5062_v20 = vsub.f32 %v11114_v3, %v5058_v32  ;;  %8833 = vmatpush3.bf16.msra.mxu1 %v9269_v58  ;;  %v9270_v32 = vld [vmem:[%s11737_s3 + $0x8] sm:$0xff]   ;;  %s11752_s3 = sld [smem:[#allocation25_spill]] }
0x34d3   :  { %v5067_v8 = vrot.slane %v5063_v11, 7  ;;  %8834 = vmatprep.subr.bf16.mxu1 %v9886_v0  ;;  %v8294_v11 = vld [vmem:[%s11738_s8] ss:$0 sm:$0xff]  ;;  %s11753_s8 = sld [smem:[#allocation26_spill]] }
0x34d4   :  { %v5066_v61 = vrot.slane %v5062_v20, 7 }
0x34d5   :  { %5070 = vrot.lane.b32.xlu1 %v5067_v8, %s9892_s17 }
0x34d6   :  { %5068 = vrot.lane.b32.xlu0 %v5066_v61, %s9892_s17  ;;  %8835 = vmatpush3.bf16.msra.mxu1 %v9270_v32 }
0x34d7   :  { %8845 = vmatprep.subr.mxu1 %v9886_v0 }
0x3508   :  { %v5099_v59 = vpop.permute.xlu0 %5098 }
0x3509   :  { %v5104_v41 = vmul.f32 %v9692_v50, %v5099_v59 }
0x350a   :  { %v5101_v48 = vpop.permute.xlu1 %5100 }
0x350b   :  { %v5105_v39 = vmul.f32 %v9694_v23, %v5101_v48  ;;  %5108 = vrot.lane.b32.xlu0 %v5104_v41, %s9889_s0 }
0x350d   :  { %5110 = vrot.lane.b32.xlu1 %v5105_v39, %s9889_s0 }
0x3547   :  { %v5071_v52 = vpop.permute.xlu1 %5070 }
0x3548   :  { %v5075_v26 = vmul.f32 %v9702_v45, %v5071_v52  ;;  %v5069_v14 = vpop.permute.xlu0 %5068  ;;  %v8298_v52 = vld [vmem:[%s11739_s14] ss:$0 sm:$0xff]  ;;  %s11754_s14 = sld [smem:[#allocation27_spill]] }
0x3549   :  { %v5074_v19 = vmul.f32 %v9700_v47, %v5069_v14 }
0x354a   :  { %5080 = vrot.lane.b32.xlu1 %v5075_v26, %s9889_s0 }
0x354b   :  { %5078 = vrot.lane.b32.xlu0 %v5074_v19, %s9889_s0 }
0x357d   :  { %v5109_v27 = vpop.permute.xlu0 %5108 }
0x357e   :  { %v5114_v10 = vadd.f32 %v9704_v1, %v5109_v27 }
0x357f   :  { %v5111_v5 = vpop.permute.xlu1 %5110 }
0x3580   :  { %v5130_v50 = vsel %vm2618_vm4, %v5114_v10, %v11104_v51  ;;  %v5115_v23 = vadd.f32 %v9706_v24, %v5111_v5 }
0x3581   :  { %v5132_v42 = vsel %vm2621_vm5, %v5130_v50, %v11046_v34 }
0x3582   :  { %v5134_v47 = vsel %vm2624_vm6, %v5132_v42, %v10985_v21  ;;  %v5131_v45 = vsel %vm2618_vm4, %v5115_v23, %v11106_v6  ;;  %v9895_v23 = vmov 1966171168  }
0x3583   :  { %v5136_v1 = vsel %vm2627_vm7, %v5134_v47, %v10920_v22  ;;  %v5133_v51 = vsel %vm2621_vm5, %v5131_v45, %v11044_v55  ;;  %v5303_v42 = vunpack.c.l.s4 %v9895_v23  ;;  %v5305_v47 = vlaneseq }
0x3584   :  { %v5135_v24 = vsel %vm2624_vm6, %v5133_v51, %v10983_v17  ;;  %v5138_v34 = vsel %vm2630_vm8, %v5136_v1, %v10860_v43  ;;  %v9268_v43 = vld [vmem:[%s11736_s29 + $0x8] sm:$0xff]   ;;  %v166_v51 = vld [vmem:[%s11740_s19] sm:$0x3]  ;;  %s11751_s29 = sld [smem:[#allocation24_spill]] }
0x3585   :  { %v5137_v49 = vsel %vm2627_vm7, %v5135_v24, %v10918_v7  ;;  %v5140_v21 = vsel %vm2633_vm9, %v5138_v34, %v10800_v12  ;;  %8827 = vmatpush3.bf16.msra.mxu0 %v9268_v43  ;;  %v5117_v12 = vsel %vm2618_vm4, %v10766_v25, %v10823_v35  ;;  %v5304_v45 = vunpack.c.0.s8 %v5303_v42 }
0x3586   :  { %v5139_v6 = vsel %vm2630_vm8, %v5137_v49, %v10858_v28  ;;  %v5142_v55 = vsel %vm2636_vm10, %v5140_v21, %v10742_v30  ;;  %8840 = vmatprep.subr.mxu0 %v9886_v0  ;;  %v5119_v30 = vsel %vm2621_vm5, %v5117_v12, %v10879_v9  ;;  %v11256_v1 = vshrl.u32 %v5305_v47, 7 }
0x3587   :  { %v5141_v22 = vsel %vm2633_vm9, %v5139_v6, %v10802_v36  ;;  %v5116_v36 = vsel %vm2618_vm4, %v10769_v44, %v10821_v31  ;;  %v5121_v28 = vsel %vm2624_vm6, %v5119_v30, %v10937_v2  ;;  %v5300_v24 = vsub.f32 1.0, %v166_v51 }
0x3588   :  { %v5143_v17 = vsel %vm2636_vm10, %v5141_v22, %v10744_v33  ;;  %v5118_v33 = vsel %vm2621_vm5, %v5116_v36, %v10881_v13  ;;  %v5123_v25 = vsel %vm2627_vm7, %v5121_v28, %v10998_v57  ;;  %v5307_v34 = vsub.s32 %v5304_v45, %v11256_v1 }
0x3589   :  { %v9168_v16 = vpack.i.bf16 %v5143_v17, %v5142_v55  ;;  %v5120_v7 = vsel %vm2624_vm6, %v5118_v33, %v10939_v63  ;;  %v5125_v44 = vsel %vm2630_vm8, %v5123_v25, %v11054_v54  ;;  %v11261_v17 = vsub.s32 0, %v11256_v1 }
0x358a   :  { %v5122_v60 = vsel %vm2627_vm7, %v5120_v7, %v11000_v46  ;;  %v5127_v2 = vsel %vm2633_vm9, %v5125_v44, %v11112_v4  ;;  %v5308_v49 = vrot.slane %v5300_v24, %v5307_v34 }
0x358b   :  { %9169 = vrot.lane.b32.xlu1 %v9168_v16, %s9894_s25  ;;  %v5124_v13 = vsel %vm2630_vm8, %v5122_v60, %v11056_v18 }
0x358c   :  { %v5126_v63 = vsel %vm2633_vm9, %v5124_v13, %v11114_v3  ;;  %v5309_v21 = vcombine.high %v5308_v49, %v5308_v49  ;;  %v5316_v6 = vrot.slane %v5308_v49, %v5307_v34 }
0x358e   :  { %v5323_v22 = vrot.slane %v5309_v21, %v5307_v34  ;;  %v5326_v55 = vmul.f32 -1e+09, %v5316_v6 }
0x3590   :  { %v5327_v16 = vmul.f32 -1e+09, %v5323_v22  ;;  %v11264_v43 = vrot.slane %v5326_v55, %v11261_v17 }
0x3592   :  { %v11267_v33 = vrot.slane %v5327_v16, %v11261_v17 }
0x35bc   :  { %v5081_v35 = vpop.permute.xlu1 %5080 }
0x35bd   :  { %v5085_v31 = vadd.f32 %v9708_v37, %v5081_v35  ;;  %v5079_v9 = vpop.permute.xlu0 %5078 }
0x35be   :  { %v5084_v53 = vadd.f32 %v9710_v29, %v5079_v9 }
0x35bf   :  { %v5129_v57 = vsel %vm2636_vm10, %v5127_v2, %v5085_v31 }
0x35c0   :  { %v5128_v46 = vsel %vm2636_vm10, %v5126_v63, %v5084_v53 }
0x35c1   :  { %v9163_v15 = vpack.i.bf16 %v5129_v57, %v5128_v46 }
0x35c3   :  { %9164 = vrot.lane.b32.xlu0 %v9163_v15, %s9893_s21 }
0x35fd   :  { %v9170_v54 = vpop.permute.xlu1 %9169 }
0x35fe   :  { %v9172_v18 = vunpack.i.h.bf16 %v9170_v54  ;;  %v9171_v62 = vunpack.i.l.bf16 %v9170_v54 }
0x3635   :  { %v9165_v56 = vpop.permute.xlu0 %9164 }
0x3636   :  { %v9167_v38 = vunpack.i.h.bf16 %v9165_v56  ;;  %v9166_v4 = vunpack.i.l.bf16 %v9165_v56 }
0x3638   :  { %v5161_v37 = vsel %vm254_vm3, %v9167_v38, %v9172_v18  ;;  %v5160_v3 = vsel %vm254_vm3, %v9166_v4, %v9171_v62 }
0x3639   :  { %v5166_v29 = vpack.c.bf16 %v5161_v37, %v5160_v3 }
0x363b   :  { %8829 = vmatmul.mubr.msk.bf16.vlgmr.msra.gmra.mrb[36].mxu0 %vm191_vm0, %v5166_v29 }
0x363c   :  { %8842 = vmatprep.mubr.msk.f32.mxu0 %vm9888_vm1, %v9886_v0 }
0x370e   :  { %v5223_v20 = vpop.f32.mrb[36].mxu0 }
0x370f   :  { %v5224_v8 = vadd.f32 %v8294_v11, %v5223_v20  ;;  %v8830_v61 = vpop.f32.mrb[37].mxu0 }
0x3710   :  { %v5226_v59 = vpop.f32.mrb[38].mxu0 }
0x3711   :  { %5230 = vst.msk [vmem:[#allocation3] sm:$0xff] %vm191_vm0, %v5224_v8  ;;  %v5227_v41 = vadd.f32 %v8294_v11, %v5226_v59  ;;  %v8831_v48 = vpop.f32.mrb[39].mxu0 }
0x3713   :  { %5231 = vst.msk [vmem:[#allocation3 + $0x8] sm:$0xff] %vm191_vm0, %v5227_v41  ;;  %v5236_v39 = vpack.c.bf16 %v5227_v41, %v5224_v8 }
0x3715   :  { %8837 = vmatmul.mubr.msk.bf16.vlgmr.msra.gmra.mrb[36].mxu1 %vm191_vm0, %v5236_v39 }
0x3716   :  { %8847 = vmatprep.mubr.msk.f32.mxu1 %vm9888_vm1, %v9886_v0 }
0x37e8   :  { %v5293_v26 = vpop.f32.mrb[36].mxu1 }
0x37e9   :  { %v11236_v14 = vadd.f32 %v8298_v52, %v5293_v26  ;;  %v8838_v19 = vpop.f32.mrb[37].mxu1 }
0x37ea   :  { %v5296_v27 = vpop.f32.mrb[38].mxu1 }
0x37eb   :  { %v11238_v10 = vadd.f32 %v8298_v52, %v5296_v27  ;;  %5329 = vrot.lane.b32.xlu0 %v11236_v14, %s9893_s21  ;;  %v8839_v40 = vpop.f32.mrb[39].mxu1 }
0x37ed   :  { %5407 = vrot.lane.b32.xlu1 %v11238_v10, %s9893_s21 }
0x385d   :  { %v5330_v5 = vpop.permute.xlu0 %5329 }
0x385e   :  { %8841 = vmatpush3.xpose.msk.msra.mxu0 %vm5331_vm11, %v5330_v5 }
0x385f   :  { %v5408_v50 = vpop.permute.xlu1 %5407  ;;  %8850 = vmatprep.subr.mxu0 %v9886_v0 }
0x3860   :  { %8846 = vmatpush3.xpose.msk.msra.mxu1 %vm5331_vm11, %v5408_v50 }
0x3861   :  { %8843 = vmatmul.mubr.msk.f32.vlgmr.msra.gmra.mrb[40].mxu0 %vm5331_vm11, %v11236_v14  ;;  %8855 = vmatprep.subr.mxu1 %v9886_v0 }
0x3862   :  { %8852 = vmatprep.mubr.msk.f32.mxu0 %vm9888_vm1, %v9886_v0 }
0x3863   :  { %8848 = vmatmul.mubr.msk.f32.vlgmr.msra.gmra.mrb[40].mxu1 %vm5331_vm11, %v11238_v10 }
0x3864   :  { %8857 = vmatprep.mubr.msk.f32.mxu1 %vm9888_vm1, %v9886_v0 }
0x3934   :  { %v5402_v12 = vpop.f32.mrb[40].mxu0 }
0x3935   :  { %v5483_v36 = vmul.f32 0.35355338, %v5402_v12  ;;  %v8844_v30 = vpop.f32.mrb[41].mxu0 }
0x3936   :  { %v5479_v28 = vpop.f32.mrb[40].mxu1 }
0x3937   :  { %v5497_v7 = vadd.f32 %v11264_v43, %v5483_v36  ;;  %v5484_v25 = vmul.f32 0.35355338, %v5479_v28  ;;  %v8849_v35 = vpop.f32.mrb[41].mxu1 }
0x3939   :  { %v5498_v60 = vadd.f32 %v11267_v33, %v5484_v25  ;;  %v5499_v44 = vsel %vm5331_vm11, %v5497_v7, -inf }
0x393a   :  { %5500 = vmax.xlane.f32.xlu0 %v5499_v44 }
0x393b   :  { %v5502_v31 = vsel %vm5331_vm11, %v5498_v60, -inf }
0x393c   :  { %5503 = vmax.xlane.f32.xlu1 %v5502_v31 }
0x394d   :  { %5521 = vrot.lane.b32.xlu1 %v11236_v14, %s9894_s25 }
0x3950   :  { %5597 = vrot.lane.b32.xlu0 %v11238_v10, %s9894_s25 }
0x3951   :  { %5675 = vrot.lane.b32.xlu1 %v11236_v14, %s9896_s24 }
0x3955   :  { %5753 = vrot.lane.b32.xlu1 %v11238_v10, %s9896_s24 }
0x3959   :  { %5751 = vrot.lane.b32.xlu1 %v11238_v10, %s9897_s30 }
0x39c7   :  { %v5501_v9 = vpop.xlane.xlu0 %5500 }
0x39c8   :  { %v5505_v13 = vsub.f32 %v5497_v7, %v5501_v9 }
0x39c9   :  { %v5504_v2 = vpop.xlane.xlu1 %5503 }
0x39ca   :  { %v5507_v53 = vmul.f32 1.442695, %v5505_v13  ;;  %v5506_v63 = vsub.f32 %v5498_v60, %v5504_v2 }
0x39cb   :  { %v5598_v57 = vpop.permute.xlu0 %5597 }
0x39cc   :  { %9711 = vpow2.f32 %v5507_v53  ;;  %v5509_v46 = vmul.f32 1.442695, %v5506_v63  ;;  %8856 = vmatpush3.msra.mxu1 %v5598_v57 }
0x39cd   :  { %v5522_v15 = vpop.permute.xlu1 %5521  ;;  %8865 = vmatprep.subr.mxu1 %v9886_v0 }
0x39ce   :  { %9713 = vpow2.f32 %v5509_v46  ;;  %8851 = vmatpush3.msra.mxu0 %v5522_v15 }
0x39cf   :  { %8860 = vmatprep.subr.mxu0 %v9886_v0 }
0x39d1   :  { %v5676_v37 = vpop.permute.xlu1 %5675 }
0x39d5   :  { %v5754_v32 = vpop.permute.xlu1 %5753 }
0x39d6   :  { %v9712_v54 = vpop.eup %9711 }
0x39d7   :  { %v5511_v56 = vsel %vm5331_vm11, %v9712_v54, 0.0 }
0x39d8   :  { %v9714_v18 = vpop.eup %9713  ;;  %5512 = vadd.xlane.f32.xlu0 %v5511_v56 }
0x39d9   :  { %v5514_v62 = vsel %vm5331_vm11, %v9714_v18, 0.0  ;;  %v5752_v8 = vpop.permute.xlu1 %5751 }
0x39dc   :  { %5515 = vadd.xlane.f32.xlu0 %v5514_v62 }
0x39f2   :  { %5673 = vrot.lane.b32.xlu0 %v11236_v14, %s9897_s30 }
0x3a65   :  { %v5513_v38 = vpop.xlane.xlu0 %5512 }
0x3a66   :  { %9715 = vrcp.f32 %v5513_v38 }
0x3a69   :  { %v5516_v4 = vpop.xlane.xlu0 %5515 }
0x3a6a   :  { %9717 = vrcp.f32 %v5516_v4 }
0x3a6d   :  { %v5674_v20 = vpop.permute.xlu0 %5673 }
0x3a70   :  { %v9716_v3 = vpop.eup %9715 }
0x3a71   :  { %v5519_v29 = vmul.f32 %v9716_v3, %v9712_v54 }
0x3a73   :  { %8853 = vmatmul.mubr.msk.f32.vlgmr.msra.gmra.mrb[42].mxu0 %vm5331_vm11, %v5519_v29 }
0x3a74   :  { %v9718_v58 = vpop.eup %9717  ;;  %8861 = vmatpush3.xpose.msk.msra.mxu0 %vm5331_vm11, %v5676_v37  ;;  %8862 = vmatprep.mubr.msk.f32.mxu0 %vm9888_vm1, %v9886_v0 }
0x3a75   :  { %v5520_v11 = vmul.f32 %v9718_v58, %v9714_v18  ;;  %8870 = vmatprep.subr.mxu0 %v9886_v0 }
0x3a77   :  { %8858 = vmatmul.mubr.msk.f32.vlgmr.msra.gmra.mrb[42].mxu1 %vm5331_vm11, %v5520_v11  ;;  %8863 = vmatmul.mubr.msk.f32.vlgmr.msra.gmra.mrb[44].mxu0 %vm5331_vm11, %v5674_v20 }
0x3a78   :  { %8866 = vmatpush3.xpose.msk.msra.mxu1 %vm5331_vm11, %v5754_v32  ;;  %8867 = vmatprep.mubr.msk.f32.mxu1 %vm9888_vm1, %v9886_v0 }
0x3a79   :  { %8875 = vmatprep.subr.mxu1 %v9886_v0  ;;  %8872 = vmatprep.mubr.msk.f32.mxu0 %vm9888_vm1, %v9886_v0 }
0x3a7b   :  { %8868 = vmatmul.mubr.msk.f32.vlgmr.msra.gmra.mrb[44].mxu1 %vm5331_vm11, %v5752_v8 }
0x3a7c   :  { %8877 = vmatprep.mubr.msk.f32.mxu1 %vm9888_vm1, %v9886_v0 }
0x3b46   :  { %v11301_v61 = vpop.f32.mrb[42].mxu0 }
0x3b47   :  { %v8854_v59 = vpop.f32.mrb[43].mxu0 }
0x3b4a   :  { %v11303_v41 = vpop.f32.mrb[42].mxu1  ;;  %v5747_v48 = vpop.f32.mrb[44].mxu0 }
0x3b4b   :  { %v5829_v39 = vmul.f32 0.35355338, %v5747_v48  ;;  %v8859_v52 = vpop.f32.mrb[43].mxu1  ;;  %v8864_v26 = vpop.f32.mrb[45].mxu0 }
0x3b4d   :  { %v5831_v19 = vadd.f32 %v5829_v39, %v11264_v43 }
0x3b4e   :  { %v5825_v27 = vpop.f32.mrb[44].mxu1 }
0x3b4f   :  { %v5830_v40 = vmul.f32 0.35355338, %v5825_v27  ;;  %v8869_v5 = vpop.f32.mrb[45].mxu1  ;;  %v5833_v50 = vsel %vm5331_vm11, %v5831_v19, -inf }
0x3b50   :  { %5834 = vmax.xlane.f32.xlu0 %v5833_v50 }
0x3b51   :  { %v5832_v23 = vadd.f32 %v5830_v40, %v11267_v33 }
0x3b53   :  { %v5836_v42 = vsel %vm5331_vm11, %v5832_v23, -inf }
0x3b54   :  { %5837 = vmax.xlane.f32.xlu1 %v5836_v42 }
0x3b65   :  { %5855 = vrot.lane.b32.xlu1 %v11236_v14, %s9898_s6 }
0x3b66   :  { %5931 = vrot.lane.b32.xlu0 %v11238_v10, %s9898_s6 }
0x3b69   :  { %6009 = vrot.lane.b32.xlu1 %v11236_v14, %s9899_s12 }
0x3b6d   :  { %6087 = vrot.lane.b32.xlu1 %v11238_v10, %s9899_s12 }
0x3b71   :  { %6085 = vrot.lane.b32.xlu1 %v11238_v10, %s9892_s17 }
0x3bdd   :  { %v5835_v47 = vpop.xlane.xlu0 %5834 }
0x3bde   :  { %v5839_v45 = vsub.f32 %v5831_v19, %v5835_v47 }
0x3be0   :  { %v5841_v51 = vmul.f32 1.442695, %v5839_v45 }
0x3be1   :  { %v5838_v24 = vpop.xlane.xlu1 %5837  ;;  %v5932_v34 = vpop.permute.xlu0 %5931 }
0x3be2   :  { %9719 = vpow2.f32 %v5841_v51  ;;  %v5840_v49 = vsub.f32 %v5832_v23, %v5838_v24  ;;  %8876 = vmatpush3.msra.mxu1 %v5932_v34 }
0x3be3   :  { %8885 = vmatprep.subr.mxu1 %v9886_v0 }
0x3be4   :  { %v5843_v21 = vmul.f32 1.442695, %v5840_v49 }
0x3be5   :  { %v5856_v6 = vpop.permute.xlu1 %5855 }
0x3be6   :  { %9721 = vpow2.f32 %v5843_v21  ;;  %8871 = vmatpush3.msra.mxu0 %v5856_v6 }
0x3be7   :  { %8880 = vmatprep.subr.mxu0 %v9886_v0 }
0x3be9   :  { %v6010_v28 = vpop.permute.xlu1 %6009 }
0x3bec   :  { %v9720_v22 = vpop.eup %9719 }
0x3bed   :  { %v5845_v55 = vsel %vm5331_vm11, %v9720_v22, 0.0  ;;  %v6088_v60 = vpop.permute.xlu1 %6087 }
0x3bee   :  { %5846 = vadd.xlane.f32.xlu0 %v5845_v55 }
0x3bf0   :  { %v9722_v16 = vpop.eup %9721 }
0x3bf1   :  { %v5848_v12 = vsel %vm5331_vm11, %v9722_v16, 0.0  ;;  %v6086_v9 = vpop.permute.xlu1 %6085 }
0x3bf2   :  { %5849 = vadd.xlane.f32.xlu0 %v5848_v12 }
0x3c08   :  { %6007 = vrot.lane.b32.xlu0 %v11236_v14, %s9892_s17  ;;  %s11750_s17 = sld [smem:[#allocation23_spill]] }
0x3c7b   :  { %v5847_v36 = vpop.xlane.xlu0 %5846 }
0x3c7c   :  { %9723 = vrcp.f32 %v5847_v36 }
0x3c7f   :  { %v5850_v30 = vpop.xlane.xlu0 %5849 }
0x3c80   :  { %9725 = vrcp.f32 %v5850_v30 }
0x3c83   :  { %v6008_v31 = vpop.permute.xlu0 %6007 }
0x3c86   :  { %v9724_v7 = vpop.eup %9723 }
0x3c87   :  { %v5853_v25 = vmul.f32 %v9724_v7, %v9720_v22 }
0x3c89   :  { %8873 = vmatmul.mubr.msk.f32.vlgmr.msra.gmra.mrb[46].mxu0 %vm5331_vm11, %v5853_v25 }
0x3c8a   :  { %v9726_v35 = vpop.eup %9725  ;;  %8881 = vmatpush3.xpose.msk.msra.mxu0 %vm5331_vm11, %v6010_v28  ;;  %8882 = vmatprep.mubr.msk.f32.mxu0 %vm9888_vm1, %v9886_v0 }
0x3c8b   :  { %v5854_v44 = vmul.f32 %v9726_v35, %v9722_v16  ;;  %8890 = vmatprep.subr.mxu0 %v9886_v0 }
0x3c8d   :  { %8878 = vmatmul.mubr.msk.f32.vlgmr.msra.gmra.mrb[46].mxu1 %vm5331_vm11, %v5854_v44  ;;  %8883 = vmatmul.mubr.msk.f32.vlgmr.msra.gmra.mrb[48].mxu0 %vm5331_vm11, %v6008_v31 }
0x3c8e   :  { %8886 = vmatpush3.xpose.msk.msra.mxu1 %vm5331_vm11, %v6088_v60  ;;  %8887 = vmatprep.mubr.msk.f32.mxu1 %vm9888_vm1, %v9886_v0 }
0x3c8f   :  { %8895 = vmatprep.subr.mxu1 %v9886_v0  ;;  %8892 = vmatprep.mubr.msk.f32.mxu0 %vm9888_vm1, %v9886_v0 }
0x3c91   :  { %8888 = vmatmul.mubr.msk.f32.vlgmr.msra.gmra.mrb[48].mxu1 %vm5331_vm11, %v6086_v9 }
0x3c92   :  { %8897 = vmatprep.mubr.msk.f32.mxu1 %vm9888_vm1, %v9886_v0 }
0x3d5c   :  { %v11337_v13 = vpop.f32.mrb[46].mxu0 }
0x3d5d   :  { %v8874_v2 = vpop.f32.mrb[47].mxu0 }
0x3d60   :  { %v11339_v53 = vpop.f32.mrb[46].mxu1  ;;  %v6081_v63 = vpop.f32.mrb[48].mxu0 }
0x3d61   :  { %v9173_v57 = vpack.i.bf16 %v11339_v53, %v11337_v13  ;;  %v6163_v46 = vmul.f32 0.35355338, %v6081_v63  ;;  %v8879_v15 = vpop.f32.mrb[47].mxu1  ;;  %v8884_v54 = vpop.f32.mrb[49].mxu0 }
0x3d63   :  { %v6165_v56 = vadd.f32 %v6163_v46, %v11264_v43 }
0x3d64   :  { %v6159_v18 = vpop.f32.mrb[48].mxu1 }
0x3d65   :  { %v6164_v62 = vmul.f32 0.35355338, %v6159_v18  ;;  %v8889_v38 = vpop.f32.mrb[49].mxu1  ;;  %v6167_v4 = vsel %vm5331_vm11, %v6165_v56, -inf }
0x3d66   :  { %6168 = vmax.xlane.f32.xlu0 %v6167_v4  ;;  %v9271_v4 = vld [vmem:[%s11741_s23] sm:$0xff]  }
0x3d67   :  { %v6166_v37 = vadd.f32 %v6164_v62, %v11267_v33 }
0x3d69   :  { %v6170_v3 = vsel %vm5331_vm11, %v6166_v37, -inf }
0x3d6a   :  { %6171 = vmax.xlane.f32.xlu1 %v6170_v3 }
0x3d7b   :  { %6189 = vrot.lane.b32.xlu1 %v11236_v14, %s9890_s5 }
0x3d7c   :  { %6265 = vrot.lane.b32.xlu0 %v11238_v10, %s9890_s5  ;;  %s11749_s5 = sld [smem:[#allocation22_spill]] }
0x3d7f   :  { %6343 = vrot.lane.b32.xlu1 %v11236_v14, %s9900_s15 }
0x3d83   :  { %6421 = vrot.lane.b32.xlu1 %v11238_v10, %s9900_s15 }
0x3d87   :  { %6419 = vrot.lane.b32.xlu1 %v11238_v10, %s9901_s16 }
0x3df3   :  { %v6169_v29 = vpop.xlane.xlu0 %6168 }
0x3df4   :  { %v6173_v58 = vsub.f32 %v6165_v56, %v6169_v29 }
0x3df6   :  { %v6175_v32 = vmul.f32 1.442695, %v6173_v58 }
0x3df7   :  { %v6172_v11 = vpop.xlane.xlu1 %6171  ;;  %v6266_v20 = vpop.permute.xlu0 %6265 }
0x3df8   :  { %9727 = vpow2.f32 %v6175_v32  ;;  %v6174_v8 = vsub.f32 %v6166_v37, %v6172_v11  ;;  %8896 = vmatpush3.msra.mxu1 %v6266_v20 }
0x3df9   :  { %8905 = vmatprep.subr.mxu1 %v9886_v0 }
0x3dfa   :  { %v6177_v59 = vmul.f32 1.442695, %v6174_v8 }
0x3dfb   :  { %v6190_v48 = vpop.permute.xlu1 %6189 }
0x3dfc   :  { %9729 = vpow2.f32 %v6177_v59  ;;  %8891 = vmatpush3.msra.mxu0 %v6190_v48 }
0x3dfd   :  { %8900 = vmatprep.subr.mxu0 %v9886_v0 }
0x3dff   :  { %v6344_v5 = vpop.permute.xlu1 %6343 }
0x3e02   :  { %v9728_v39 = vpop.eup %9727 }
0x3e03   :  { %v6179_v52 = vsel %vm5331_vm11, %v9728_v39, 0.0  ;;  %v6422_v47 = vpop.permute.xlu1 %6421 }
0x3e04   :  { %6180 = vadd.xlane.f32.xlu0 %v6179_v52 }
0x3e06   :  { %v9730_v26 = vpop.eup %9729 }
0x3e07   :  { %v6182_v19 = vsel %vm5331_vm11, %v9730_v26, 0.0  ;;  %v6420_v24 = vpop.permute.xlu1 %6419 }
0x3e08   :  { %6183 = vadd.xlane.f32.xlu0 %v6182_v19 }
0x3e1e   :  { %6341 = vrot.lane.b32.xlu0 %v11236_v14, %s9901_s16 }
0x3e91   :  { %v6181_v27 = vpop.xlane.xlu0 %6180 }
0x3e92   :  { %9731 = vrcp.f32 %v6181_v27 }
0x3e95   :  { %v6184_v40 = vpop.xlane.xlu0 %6183 }
0x3e96   :  { %9733 = vrcp.f32 %v6184_v40 }
0x3e99   :  { %v6342_v51 = vpop.permute.xlu0 %6341 }
0x3e9c   :  { %v9732_v50 = vpop.eup %9731 }
0x3e9d   :  { %v6187_v23 = vmul.f32 %v9732_v50, %v9728_v39 }
0x3e9f   :  { %8893 = vmatmul.mubr.msk.f32.vlgmr.msra.gmra.mrb[50].mxu0 %vm5331_vm11, %v6187_v23 }
0x3ea0   :  { %v9734_v42 = vpop.eup %9733  ;;  %8901 = vmatpush3.xpose.msk.msra.mxu0 %vm5331_vm11, %v6344_v5  ;;  %8902 = vmatprep.mubr.msk.f32.mxu0 %vm9888_vm1, %v9886_v0 }
0x3ea1   :  { %v6188_v45 = vmul.f32 %v9734_v42, %v9730_v26  ;;  %8910 = vmatprep.subr.mxu0 %v9886_v0 }
0x3ea3   :  { %8898 = vmatmul.mubr.msk.f32.vlgmr.msra.gmra.mrb[50].mxu1 %vm5331_vm11, %v6188_v45  ;;  %8903 = vmatmul.mubr.msk.f32.vlgmr.msra.gmra.mrb[52].mxu0 %vm5331_vm11, %v6342_v51  ;;  %v9273_v45 = vld [vmem:[%s11742_s28] sm:$0xff]   ;;  %v9905_v51 = vmov 0  }
0x3ea4   :  { %8906 = vmatpush3.xpose.msk.msra.mxu1 %vm5331_vm11, %v6422_v47  ;;  %8907 = vmatprep.mubr.msk.f32.mxu1 %vm9888_vm1, %v9886_v0 }
0x3ea5   :  { %8915 = vmatprep.subr.mxu1 %v9886_v0  ;;  %8912 = vmatprep.mubr.msk.f32.mxu0 %vm9888_vm1, %v9886_v0 }
0x3ea7   :  { %8908 = vmatmul.mubr.msk.f32.vlgmr.msra.gmra.mrb[52].mxu1 %vm5331_vm11, %v6420_v24  ;;  %v9276_v24 = vld [vmem:[%s11742_s28 + $0x18] sm:$0xff]  }
0x3ea8   :  { %8917 = vmatprep.mubr.msk.f32.mxu1 %vm9888_vm1, %v9886_v0 }
0x3f72   :  { %v6261_v34 = vpop.f32.mrb[50].mxu0 }
0x3f73   :  { %v8894_v49 = vpop.f32.mrb[51].mxu0 }
0x3f74   :  { %v9278_v49 = vld [vmem:[%s11742_s28 + $0x28] sm:$0xff]  }
0x3f76   :  { %v6337_v21 = vpop.f32.mrb[50].mxu1  ;;  %v6415_v6 = vpop.f32.mrb[52].mxu0 }
0x3f77   :  { %v9178_v22 = vpack.i.bf16 %v6337_v21, %v6261_v34  ;;  %v6497_v55 = vmul.f32 0.35355338, %v6415_v6  ;;  %v8899_v16 = vpop.f32.mrb[51].mxu1  ;;  %v8904_v12 = vpop.f32.mrb[53].mxu0  ;;  %v9277_v34 = vld [vmem:[%s11742_s28 + $0x20] sm:$0xff]   ;;  %v9279_v21 = vld [vmem:[%s11742_s28 + $0x30] sm:$0xff]  }
0x3f78   :  { %v9280_v6 = vld [vmem:[%s11742_s28 + $0x38] sm:$0xff]  }
0x3f79   :  { %v6499_v36 = vadd.f32 %v6497_v55, %v11264_v43 }
0x3f7a   :  { %v6493_v30 = vpop.f32.mrb[52].mxu1 }
0x3f7b   :  { %v6498_v28 = vmul.f32 0.35355338, %v6493_v30  ;;  %v8909_v7 = vpop.f32.mrb[53].mxu1  ;;  %v6501_v25 = vsel %vm5331_vm11, %v6499_v36, -inf }
0x3f7c   :  { %6502 = vmax.xlane.f32.xlu0 %v6501_v25  ;;  %v9281_v7 = vld [vmem:[%s11742_s28 + $0x40] sm:$0xff]   ;;  %v9282_v25 = vld [vmem:[%s11742_s28 + $0x48] sm:$0xff]  }
0x3f7d   :  { %v6500_v35 = vadd.f32 %v6498_v28, %v11267_v33 }
0x3f7f   :  { %v6504_v60 = vsel %vm5331_vm11, %v6500_v35, -inf }
0x3f80   :  { %6505 = vmax.xlane.f32.xlu1 %v6504_v60 }
0x3f91   :  { %6523 = vrot.lane.b32.xlu1 %v11236_v14, %s9902_s18 }
0x3f95   :  { %9174 = vrot.lane.b32.xlu1 %v9173_v57, %s9903_s22 }
0x3f99   :  { %9179 = vrot.lane.b32.xlu1 %v9178_v22, %s9889_s0  ;;  %v8326_v22 = vld [vmem:[%s11743_s1] ss:$0 sm:$0xff]  ;;  %s11748_s0 = sld [smem:[#allocation21_spill]] }
0x4009   :  { %v6503_v43 = vpop.xlane.xlu0 %6502 }
0x400a   :  { %v6507_v44 = vsub.f32 %v6499_v36, %v6503_v43 }
0x400c   :  { %v6509_v31 = vmul.f32 1.442695, %v6507_v44 }
0x400d   :  { %v6506_v9 = vpop.xlane.xlu1 %6505 }
0x400e   :  { %9735 = vpow2.f32 %v6509_v31  ;;  %v6508_v33 = vsub.f32 %v6500_v35, %v6506_v9 }
0x4010   :  { %v6511_v2 = vmul.f32 1.442695, %v6508_v33 }
0x4011   :  { %v6524_v63 = vpop.permute.xlu1 %6523 }
0x4012   :  { %9737 = vpow2.f32 %v6511_v2  ;;  %8911 = vmatpush3.msra.mxu0 %v6524_v63 }
0x4013   :  { %8920 = vmatprep.subr.bf16.mxu0 %v9886_v0 }
0x4015   :  { %v9175_v11 = vpop.permute.xlu1 %9174 }
0x4016   :  { %v9177_v8 = vunpack.i.h.bf16 %v9175_v11  ;;  %v9176_v59 = vunpack.i.l.bf16 %v9175_v11 }
0x4018   :  { %v9736_v14 = vpop.eup %9735  ;;  %v6700_v26 = vsel %vm5331_vm11, %v11303_v41, %v9177_v8  ;;  %v6699_v19 = vsel %vm5331_vm11, %v11301_v61, %v9176_v59  ;;  %v9274_v61 = vld [vmem:[%s11742_s28 + $0x8] sm:$0xff]   ;;  %v9275_v41 = vld [vmem:[%s11742_s28 + $0x10] sm:$0xff]   ;;  %v8330_v59 = vld [vmem:[%s11744_s2] ss:$0 sm:$0xff] }
0x4019   :  { %v6513_v46 = vsel %vm5331_vm11, %v9736_v14, 0.0  ;;  %v9180_v20 = vpop.permute.xlu1 %9179 }
0x401a   :  { %6514 = vadd.xlane.f32.xlu0 %v6513_v46  ;;  %v9182_v48 = vunpack.i.h.bf16 %v9180_v20  ;;  %v9181_v39 = vunpack.i.l.bf16 %v9180_v20 }
0x401c   :  { %v9738_v13 = vpop.eup %9737  ;;  %v6702_v5 = vsel %vm254_vm3, %v6700_v26, %v9182_v48  ;;  %v6701_v50 = vsel %vm254_vm3, %v6699_v19, %v9181_v39 }
0x401d   :  { %v6516_v53 = vsel %vm5331_vm11, %v9738_v13, 0.0 }
0x401e   :  { %6517 = vadd.xlane.f32.xlu0 %v6516_v53 }
0x4034   :  { %6599 = vrot.lane.b32.xlu0 %v11238_v10, %s9902_s18  ;;  %v9272_v10 = vld [vmem:[%s11741_s23 + $0x8] sm:$0xff]  }
0x40a7   :  { %v6515_v57 = vpop.xlane.xlu0 %6514 }
0x40a8   :  { %9739 = vrcp.f32 %v6515_v57 }
0x40ab   :  { %v6518_v15 = vpop.xlane.xlu0 %6517 }
0x40ac   :  { %9741 = vrcp.f32 %v6518_v15 }
0x40af   :  { %v6600_v54 = vpop.permute.xlu0 %6599 }
0x40b0   :  { %8916 = vmatpush3.msra.mxu1 %v6600_v54 }
0x40b1   :  { %6917 = vmatprep.subr.bf16.mxu1 %v9905_v51 }
0x40b2   :  { %v9740_v56 = vpop.eup %9739 }
0x40b3   :  { %v6521_v18 = vmul.f32 %v9740_v56, %v9736_v14 }
0x40b5   :  { %8913 = vmatmul.mubr.msk.f32.vlgmr.msra.gmra.mrb[54].mxu0 %vm5331_vm11, %v6521_v18 }
0x40b6   :  { %v9742_v62 = vpop.eup %9741  ;;  %8924 = vmatprep.mubr.msk.bf16.mxu0 %vm9888_vm1, %v9886_v0  ;;  %8921 = vmatpush3.bf16.msra.mxu0 %v9271_v4 }
0x40b7   :  { %v6522_v38 = vmul.f32 %v9742_v62, %v9738_v13  ;;  %8922 = vmatprep.subr.bf16.mxu0 %v9886_v0 }
0x40b9   :  { %8918 = vmatmul.mubr.msk.f32.vlgmr.msra.gmra.mrb[54].mxu1 %vm5331_vm11, %v6522_v38 }
0x40ba   :  { %8923 = vmatpush3.bf16.msra.mxu0 %v9272_v10  ;;  %6918 = vmatpush1.bf16.msra.mxu1 %v9273_v45 }
0x40bb   :  { %7126 = vmatprep.subr.bf16.mxu0 %v9905_v51  ;;  %6919 = vmatprep.subr.bf16.mxu1 %v9905_v51 }
0x40be   :  { %6920 = vmatpush1.bf16.msra.mxu1 %v9274_v61 }
0x40bf   :  { %6921 = vmatprep.subr.bf16.mxu1 %v9905_v51 }
0x40c2   :  { %6922 = vmatpush1.bf16.msra.mxu1 %v9275_v41 }
0x40c3   :  { %6923 = vmatprep.subr.bf16.mxu1 %v9905_v51 }
0x40c6   :  { %6924 = vmatpush1.bf16.msra.mxu1 %v9276_v24 }
0x40c7   :  { %6925 = vmatprep.subr.bf16.mxu1 %v9905_v51 }
0x40ca   :  { %6926 = vmatpush1.bf16.msra.mxu1 %v9277_v34 }
0x40cb   :  { %6927 = vmatprep.subr.bf16.mxu1 %v9905_v51 }
0x40ce   :  { %6928 = vmatpush1.bf16.msra.mxu1 %v9278_v49 }
0x40cf   :  { %6929 = vmatprep.subr.bf16.mxu1 %v9905_v51 }
0x40d2   :  { %6930 = vmatpush1.bf16.msra.mxu1 %v9279_v21 }
0x40d3   :  { %6931 = vmatprep.subr.bf16.mxu1 %v9905_v51 }
0x40d6   :  { %6932 = vmatpush1.bf16.msra.mxu1 %v9280_v6 }
0x40d7   :  { %6933 = vmatprep.subr.bf16.mxu1 %v9905_v51 }
0x40da   :  { %6934 = vmatpush1.bf16.msra.mxu1 %v9281_v7  ;;  %v9288_v7 = vld [vmem:[%s11745_s7 + $0x28] sm:$0xff]  }
0x40db   :  { %6935 = vmatprep.subr.bf16.mxu1 %v9905_v51 }
0x40de   :  { %6936 = vmatpush1.bf16.msra.mxu1 %v9282_v25  ;;  %v9289_v25 = vld [vmem:[%s11745_s7 + $0x30] sm:$0xff]  }
0x40df   :  { %7335 = vmatprep.subr.bf16.mxu1 %v9905_v51 }
0x4188   :  { %v6595_v37 = vpop.f32.mrb[54].mxu0 }
0x4189   :  { %v8914_v3 = vpop.f32.mrb[55].mxu0 }
0x418c   :  { %v6671_v29 = vpop.f32.mrb[54].mxu1 }
0x418d   :  { %v9183_v58 = vpack.i.bf16 %v6671_v29, %v6595_v37  ;;  %v8919_v32 = vpop.f32.mrb[55].mxu1 }
0x418f   :  { %9184 = vrot.lane.b32.xlu0 %v9183_v58, %s9904_s26 }
0x4201   :  { %v9185_v52 = vpop.permute.xlu0 %9184 }
0x4202   :  { %v9187_v27 = vunpack.i.h.bf16 %v9185_v52  ;;  %v9186_v40 = vunpack.i.l.bf16 %v9185_v52 }
0x4204   :  { %v6705_v23 = vsel %vm6703_vm12, %v6702_v5, %v9187_v27  ;;  %v6704_v42 = vsel %vm6703_vm12, %v6701_v50, %v9186_v40 }
0x4205   :  { %v6710_v47 = vpack.c.bf16 %v6705_v23, %v6704_v42 }
0x4207   :  { %8925 = vmatmul.mubr.msk.bf16.vlgmr.msra.gmra.mrb[56].mxu0 %vm191_vm0, %v6710_v47 }
0x42da   :  { %v6767_v55 = vpop.f32.mrb[56].mxu0 }
0x42db   :  { %v11422_v16 = vadd.f32 %v8326_v22, %v6767_v55  ;;  %v8926_v12 = vpop.f32.mrb[57].mxu0  ;;  %v9284_v55 = vld [vmem:[%s11745_s7 + $0x8] sm:$0xff]  }
0x42dc   :  { %v6770_v36 = vpop.f32.mrb[58].mxu0  ;;  %v9285_v12 = vld [vmem:[%s11745_s7 + $0x10] sm:$0xff]  }
0x42dd   :  { %6802 = vst.msk [vmem:[#allocation2 + $0x6] sm:$0xff] %vm191_vm0, %v11422_v16  ;;  %v11426_v30 = vadd.f32 %v8326_v22, %v6770_v36  ;;  %v8927_v28 = vpop.f32.mrb[59].mxu0  ;;  %v9283_v22 = vld [vmem:[%s11745_s7] sm:$0xff]   ;;  %v9286_v36 = vld [vmem:[%s11745_s7 + $0x18] sm:$0xff]  }
0x42de   :  { %7127 = vmatpush1.bf16.msra.mxu0 %v9283_v22  ;;  %v9287_v28 = vld [vmem:[%s11745_s7 + $0x20] sm:$0xff]  }
0x42df   :  { %6803 = vst.msk [vmem:[#allocation2 + $0x1e] sm:$0xff] %vm191_vm0, %v11426_v30  ;;  %7128 = vmatprep.subr.bf16.mxu0 %v9905_v51 }
0x42e2   :  { %7129 = vmatpush1.bf16.msra.mxu0 %v9284_v55 }
0x42e3   :  { %7130 = vmatprep.subr.bf16.mxu0 %v9905_v51 }
0x42e4   :  { %v6812_v35 = vld [vmem:[#allocation2 + $0x8] sm:$0xff] }
0x42e5   :  { %v6808_v60 = vld [vmem:[#allocation2 + $0x6] sm:$0xff] }
0x42e6   :  { %v6806_v43 = vld [vmem:[#allocation2 + $0x5] sm:$0xff]  ;;  %v6807_v9 = vld [vmem:[#allocation2 + $0x1d] sm:$0xff]  ;;  %7131 = vmatpush1.bf16.msra.mxu0 %v9285_v12 }
0x42e7   :  { %v6813_v44 = vld [vmem:[#allocation2 + $0x20] sm:$0xff]  ;;  %v9188_v63 = vpack.i.bf16 %v6807_v9, %v6806_v43  ;;  %7132 = vmatprep.subr.bf16.mxu0 %v9905_v51 }
0x42e8   :  { %v6809_v31 = vld [vmem:[#allocation2 + $0x1e] sm:$0xff]  ;;  %v6847_v33 = vpack.c.bf16 %v6813_v44, %v6812_v35  ;;  %v6810_v46 = vld [vmem:[#allocation2 + $0x7] sm:$0xff] }
0x42e9   :  { %v9193_v2 = vpack.i.bf16 %v6809_v31, %v6808_v60  ;;  %v6811_v14 = vld [vmem:[#allocation2 + $0x1f] sm:$0xff]  ;;  %9189 = vrot.lane.b32.xlu1 %v9188_v63, %s9891_s9 }
0x42ea   :  { %8341 = vmatprep.mubr.msk.bf16.mxu1 %vm191_vm0, %v6847_v33  ;;  %v9198_v13 = vpack.i.bf16 %v6811_v14, %v6810_v46  ;;  %v6804_v62 = vld [vmem:[#allocation2 + $0x4] sm:$0xff]  ;;  %v6805_v38 = vld [vmem:[#allocation2 + $0x1c] sm:$0xff]  ;;  %7133 = vmatpush1.bf16.msra.mxu0 %v9286_v36 }
0x42eb   :  { %9194 = vrot.lane.b32.xlu0 %v9193_v2, %s9894_s25  ;;  %7134 = vmatprep.subr.bf16.mxu0 %v9905_v51  ;;  %v9290_v35 = vld [vmem:[%s11745_s7 + $0x38] sm:$0xff]   ;;  %v9291_v9 = vld [vmem:[%s11745_s7 + $0x40] sm:$0xff]   ;;  %v9292_v33 = vld [vmem:[%s11745_s7 + $0x48] sm:$0xff]  }
0x42ed   :  { %9199 = vrot.lane.b32.xlu1 %v9198_v13, %s9893_s21 }
0x42ee   :  { %7135 = vmatpush1.bf16.msra.mxu0 %v9287_v28 }
0x42ef   :  { %7136 = vmatprep.subr.bf16.mxu0 %v9905_v51 }
0x42f2   :  { %7137 = vmatpush1.bf16.msra.mxu0 %v9288_v7  ;;  %v9293_v7 = vld [vmem:[%s11747_s11] sm:$0xff]  }
0x42f3   :  { %7138 = vmatprep.subr.bf16.mxu0 %v9905_v51 }
0x42f6   :  { %7139 = vmatpush1.bf16.msra.mxu0 %v9289_v25  ;;  %v9294_v25 = vld [vmem:[%s11747_s11 + $0x8] sm:$0xff]  }
0x42f7   :  { %7140 = vmatprep.subr.bf16.mxu0 %v9905_v51 }
0x42fa   :  { %7141 = vmatpush1.bf16.msra.mxu0 %v9290_v35  ;;  %v9295_v35 = vld [vmem:[%s11747_s11 + $0x10] sm:$0xff]  }
0x42fb   :  { %7142 = vmatprep.subr.bf16.mxu0 %v9905_v51 }
0x42fe   :  { %7143 = vmatpush1.bf16.msra.mxu0 %v9291_v9  ;;  %v9298_v9 = vld [vmem:[%s11747_s11 + $0x28] sm:$0xff]  }
0x42ff   :  { %7144 = vmatprep.subr.bf16.mxu0 %v9905_v51 }
0x4302   :  { %7145 = vmatpush1.bf16.msra.mxu0 %v9292_v33  ;;  %v9299_v33 = vld [vmem:[%s11747_s11 + $0x30] sm:$0xff]  }
0x4303   :  { %8928 = vmatprep.subr.bf16.mxu0 %v9886_v0 }
0x435b   :  { %v9190_v57 = vpop.permute.xlu1 %9189 }
0x435c   :  { %v9192_v15 = vunpack.i.h.bf16 %v9190_v57  ;;  %v9191_v54 = vunpack.i.l.bf16 %v9190_v57 }
0x435d   :  { %v9195_v53 = vpop.permute.xlu0 %9194 }
0x435e   :  { %v9197_v56 = vunpack.i.h.bf16 %v9195_v53  ;;  %v9196_v18 = vunpack.i.l.bf16 %v9195_v53  ;;  %v6838_v4 = vsel %vm191_vm0, %v6804_v62, %v9191_v54  ;;  %v6839_v10 = vsel %vm191_vm0, %v6805_v38, %v9192_v15 }
0x435f   :  { %v9200_v37 = vpop.permute.xlu1 %9199 }
0x4360   :  { %v9202_v3 = vunpack.i.h.bf16 %v9200_v37  ;;  %v9201_v29 = vunpack.i.l.bf16 %v9200_v37  ;;  %v6841_v58 = vsel %vm6840_vm13, %v6838_v4, %v9196_v18  ;;  %v6842_v32 = vsel %vm6840_vm13, %v6839_v10, %v9197_v56 }
0x4362   :  { %v6844_v11 = vsel %vm6843_vm14, %v6841_v58, %v9201_v29  ;;  %v6845_v20 = vsel %vm6843_vm14, %v6842_v32, %v9202_v3 }
0x4363   :  { %v6846_v8 = vpack.c.bf16 %v6845_v20, %v6844_v11 }
0x4365   :  { %6950 = vmatmul.mubr.bf16.vlgmr.msra.gmra.mrb[56].mxu1 %v6846_v8 }
0x4366   :  { %7336 = vmatpush1.bf16.msra.mxu1 %v9293_v7 }
0x4367   :  { %7337 = vmatprep.subr.bf16.mxu1 %v9905_v51 }
0x436a   :  { %7338 = vmatpush1.bf16.msra.mxu1 %v9294_v25 }
0x436b   :  { %7339 = vmatprep.subr.bf16.mxu1 %v9905_v51 }
0x436e   :  { %7340 = vmatpush1.bf16.msra.mxu1 %v9295_v35 }
0x436f   :  { %7341 = vmatprep.subr.bf16.mxu1 %v9905_v51 }
0x4438   :  { %v6951_v48 = vpop.f32.mrb[56].mxu1 }
0x4439   :  { %v6952_v39 = vadd.f32 %v8330_v59, %v6951_v48  ;;  %v6953_v52 = vpop.f32.mrb[57].mxu1 }
0x443a   :  { %v6954_v26 = vpop.f32.mrb[58].mxu1 }
0x443b   :  { %v6970_v19 = vsub.f32 %v6952_v39, %v11422_v16  ;;  %v6955_v27 = vadd.f32 %v8330_v59, %v6954_v26  ;;  %v6956_v40 = vpop.f32.mrb[59].mxu1  ;;  %v8342_v50 = vmul.f32 -1.442695, %v6952_v39 }
0x443d   :  { %v6971_v5 = vsub.f32 %v6955_v27, %v11426_v30  ;;  %6974 = vrot.lane.b32.xlu0 %v6970_v19, %s9891_s9  ;;  %v8343_v23 = vmul.f32 -1.442695, %v6955_v27  ;;  %9743 = vpow2.f32 %v8342_v50  ;;  %v8344_v19 = vld [vmem:[%s11746_s10] ss:$0 sm:$0xff] }
0x443f   :  { %6976 = vrot.lane.b32.xlu1 %v6971_v5, %s9891_s9  ;;  %9745 = vpow2.f32 %v8343_v23 }
0x4447   :  { %v9744_v42 = vpop.eup %9743 }
0x4448   :  { %v6964_v45 = vadd.f32 1.0, %v9744_v42 }
0x4449   :  { %v9746_v47 = vpop.eup %9745 }
0x444a   :  { %v6965_v61 = vadd.f32 1.0, %v9746_v47  ;;  %9747 = vrcp.f32 %v6964_v45 }
0x444c   :  { %9749 = vrcp.f32 %v6965_v61 }
0x4454   :  { %v9748_v41 = vpop.eup %9747 }
0x4456   :  { %v9750_v49 = vpop.eup %9749 }
0x44af   :  { %v6975_v24 = vpop.permute.xlu0 %6974 }
0x44b0   :  { %v6980_v34 = vmul.f32 %v9748_v41, %v6975_v24 }
0x44b1   :  { %v6977_v21 = vpop.permute.xlu1 %6976 }
0x44b2   :  { %v6981_v6 = vmul.f32 %v9750_v49, %v6977_v21  ;;  %6984 = vrot.lane.b32.xlu0 %v6980_v34, %s9893_s21 }
0x44b4   :  { %6986 = vrot.lane.b32.xlu1 %v6981_v6, %s9893_s21 }
0x4524   :  { %v6985_v60 = vpop.permute.xlu0 %6984 }
0x4525   :  { %v11470_v43 = vadd.f32 %v6985_v60, %v11422_v16  ;;  %v9296_v60 = vld [vmem:[%s11747_s11 + $0x18] sm:$0xff]  }
0x4526   :  { %v6987_v44 = vpop.permute.xlu1 %6986  ;;  %7342 = vmatpush1.bf16.msra.mxu1 %v9296_v60 }
0x4527   :  { %7013 = vst.msk [vmem:[#allocation2 + $0x6] sm:$0xff] %vm191_vm0, %v11470_v43  ;;  %v11475_v31 = vadd.f32 %v6987_v44, %v11426_v30  ;;  %v9297_v44 = vld [vmem:[%s11747_s11 + $0x20] sm:$0xff]   ;;  %7343 = vmatprep.subr.bf16.mxu1 %v9905_v51 }
0x4529   :  { %7014 = vst.msk [vmem:[#allocation2 + $0x1e] sm:$0xff] %vm191_vm0, %v11475_v31 }
0x452a   :  { %7344 = vmatpush1.bf16.msra.mxu1 %v9297_v44  ;;  %v9303_v44 = vld [vmem:[%s11749_s5] sm:$0xff]  }
0x452b   :  { %7345 = vmatprep.subr.bf16.mxu1 %v9905_v51 }
0x452e   :  { %v7023_v16 = vld [vmem:[#allocation2 + $0xa] sm:$0xff]  ;;  %v7015_v29 = vld [vmem:[#allocation2 + $0x2] sm:$0xff]  ;;  %7346 = vmatpush1.bf16.msra.mxu1 %v9298_v9 }
0x452f   :  { %v7019_v2 = vld [vmem:[#allocation2 + $0x6] sm:$0xff]  ;;  %7347 = vmatprep.subr.bf16.mxu1 %v9905_v51 }
0x4530   :  { %v7017_v63 = vld [vmem:[#allocation2 + $0x4] sm:$0xff]  ;;  %v7018_v13 = vld [vmem:[#allocation2 + $0x1c] sm:$0xff] }
0x4531   :  { %v7024_v14 = vld [vmem:[#allocation2 + $0x22] sm:$0xff]  ;;  %v9203_v57 = vpack.i.bf16 %v7018_v13, %v7017_v63  ;;  %v7016_v3 = vld [vmem:[#allocation2 + $0x1a] sm:$0xff] }
0x4532   :  { %v7020_v46 = vld [vmem:[#allocation2 + $0x1e] sm:$0xff]  ;;  %v7056_v53 = vpack.c.bf16 %v7024_v14, %v7023_v16  ;;  %v7021_v54 = vld [vmem:[#allocation2 + $0x8] sm:$0xff]  ;;  %7348 = vmatpush1.bf16.msra.mxu1 %v9299_v33  ;;  %v9305_v33 = vld [vmem:[%s11749_s5 + $0x10] sm:$0xff]  }
0x4533   :  { %v9208_v30 = vpack.i.bf16 %v7020_v46, %v7019_v2  ;;  %v7022_v15 = vld [vmem:[#allocation2 + $0x20] sm:$0xff]  ;;  %9204 = vrot.lane.b32.xlu0 %v9203_v57, %s9891_s9  ;;  %v9300_v16 = vld [vmem:[%s11747_s11 + $0x38] sm:$0xff]   ;;  %7349 = vmatprep.subr.bf16.mxu1 %v9905_v51  ;;  %v9304_v9 = vld [vmem:[%s11749_s5 + $0x8] sm:$0xff]  }
0x4534   :  { %8355 = vmatprep.mubr.msk.bf16.mxu0 %vm191_vm0, %v7056_v53  ;;  %v9213_v56 = vpack.i.bf16 %v7022_v15, %v7021_v54  ;;  %v9301_v13 = vld [vmem:[%s11747_s11 + $0x40] sm:$0xff]   ;;  %v9302_v53 = vld [vmem:[%s11747_s11 + $0x48] sm:$0xff]  }
0x4535   :  { %9209 = vrot.lane.b32.xlu1 %v9208_v30, %s9894_s25 }
0x4536   :  { %7350 = vmatpush1.bf16.msra.mxu1 %v9300_v16  ;;  %v9306_v16 = vld [vmem:[%s11749_s5 + $0x18] sm:$0xff]  }
0x4537   :  { %9214 = vrot.lane.b32.xlu0 %v9213_v56, %s9893_s21  ;;  %7351 = vmatprep.subr.bf16.mxu1 %v9905_v51 }
0x453a   :  { %7352 = vmatpush1.bf16.msra.mxu1 %v9301_v13 }
0x453b   :  { %7353 = vmatprep.subr.bf16.mxu1 %v9905_v51 }
0x453e   :  { %7354 = vmatpush1.bf16.msra.mxu1 %v9302_v53 }
0x453f   :  { %8960 = vmatprep.subr.bf16.mxu1 %v9886_v0 }
0x45a5   :  { %v9205_v62 = vpop.permute.xlu0 %9204 }
0x45a6   :  { %v9207_v38 = vunpack.i.h.bf16 %v9205_v62  ;;  %v9206_v4 = vunpack.i.l.bf16 %v9205_v62 }
0x45a7   :  { %v9210_v18 = vpop.permute.xlu1 %9209 }
0x45a8   :  { %v9212_v10 = vunpack.i.h.bf16 %v9210_v18  ;;  %v9211_v37 = vunpack.i.l.bf16 %v9210_v18  ;;  %v7050_v58 = vsel %vm191_vm0, %v7016_v3, %v9207_v38  ;;  %v7049_v32 = vsel %vm191_vm0, %v7015_v29, %v9206_v4 }
0x45a9   :  { %v9215_v11 = vpop.permute.xlu0 %9214 }
0x45aa   :  { %v9217_v20 = vunpack.i.h.bf16 %v9215_v11  ;;  %v9216_v8 = vunpack.i.l.bf16 %v9215_v11  ;;  %v7051_v59 = vsel %vm6840_vm13, %v7049_v32, %v9211_v37  ;;  %v7052_v48 = vsel %vm6840_vm13, %v7050_v58, %v9212_v10 }
0x45ac   :  { %v7053_v39 = vsel %vm6843_vm14, %v7051_v59, %v9216_v8  ;;  %v7054_v52 = vsel %vm6843_vm14, %v7052_v48, %v9217_v20 }
0x45ad   :  { %v7055_v26 = vpack.c.bf16 %v7054_v52, %v7053_v39 }
0x45af   :  { %7159 = vmatmul.mubr.bf16.vlgmr.msra.gmra.mrb[60].mxu0 %v7055_v26 }
0x45b0   :  { %8940 = vmatprep.mubr.msk.bf16.mxu0 %vm9888_vm1, %v9886_v0  ;;  %8929 = vmatpush3.bf16.msra.mxu0 %v9303_v44 }
0x45b1   :  { %8930 = vmatprep.subr.bf16.mxu0 %v9886_v0 }
0x45b4   :  { %8931 = vmatpush3.bf16.msra.mxu0 %v9304_v9 }
0x45b5   :  { %8932 = vmatprep.subr.bf16.mxu0 %v9886_v0 }
0x45b8   :  { %8933 = vmatpush3.bf16.msra.mxu0 %v9305_v33 }
0x45b9   :  { %8934 = vmatprep.subr.bf16.mxu0 %v9886_v0 }
0x45bc   :  { %8935 = vmatpush3.bf16.msra.mxu0 %v9306_v16 }
0x45bd   :  { %8936 = vmatprep.subr.bf16.mxu0 %v9886_v0 }
0x4682   :  { %v7160_v27 = vpop.f32.mrb[60].mxu0 }
0x4683   :  { %v7161_v40 = vadd.f32 %v8344_v19, %v7160_v27  ;;  %v7162_v5 = vpop.f32.mrb[61].mxu0 }
0x4684   :  { %v7163_v50 = vpop.f32.mrb[62].mxu0 }
0x4685   :  { %v7179_v23 = vsub.f32 %v7161_v40, %v11470_v43  ;;  %v7164_v42 = vadd.f32 %v8344_v19, %v7163_v50  ;;  %v7165_v47 = vpop.f32.mrb[63].mxu0  ;;  %v8356_v61 = vmul.f32 -1.442695, %v7161_v40  ;;  %v8358_v50 = vld [vmem:[%s11748_s0] ss:$0 sm:$0xff] }
0x4687   :  { %v7180_v45 = vsub.f32 %v7164_v42, %v11475_v31  ;;  %7183 = vrot.lane.b32.xlu1 %v7179_v23, %s9891_s9  ;;  %v8357_v41 = vmul.f32 -1.442695, %v7164_v42  ;;  %9751 = vpow2.f32 %v8356_v61 }
0x4689   :  { %7185 = vrot.lane.b32.xlu0 %v7180_v45, %s9891_s9  ;;  %9753 = vpow2.f32 %v8357_v41 }
0x4691   :  { %v9752_v24 = vpop.eup %9751 }
0x4692   :  { %v7173_v49 = vadd.f32 1.0, %v9752_v24 }
0x4693   :  { %v9754_v34 = vpop.eup %9753 }
0x4694   :  { %v7174_v21 = vadd.f32 1.0, %v9754_v34  ;;  %9755 = vrcp.f32 %v7173_v49 }
0x4696   :  { %9757 = vrcp.f32 %v7174_v21 }
0x469e   :  { %v9756_v6 = vpop.eup %9755 }
0x46a0   :  { %v9758_v12 = vpop.eup %9757 }
0x46f9   :  { %v7184_v22 = vpop.permute.xlu1 %7183 }
0x46fa   :  { %v7189_v55 = vmul.f32 %v9756_v6, %v7184_v22 }
0x46fb   :  { %v7186_v36 = vpop.permute.xlu0 %7185 }
0x46fc   :  { %v7190_v28 = vmul.f32 %v9758_v12, %v7186_v36  ;;  %7193 = vrot.lane.b32.xlu1 %v7189_v55, %s9893_s21 }
0x46fe   :  { %7195 = vrot.lane.b32.xlu0 %v7190_v28, %s9893_s21 }
0x476e   :  { %v7194_v2 = vpop.permute.xlu1 %7193 }
0x476f   :  { %v11519_v63 = vadd.f32 %v7194_v2, %v11470_v43  ;;  %v9307_v2 = vld [vmem:[%s11749_s5 + $0x20] sm:$0xff]  }
0x4770   :  { %v7196_v14 = vpop.permute.xlu0 %7195  ;;  %8937 = vmatpush3.bf16.msra.mxu0 %v9307_v2 }
0x4771   :  { %7222 = vst.msk [vmem:[#allocation2 + $0x6] sm:$0xff] %vm191_vm0, %v11519_v63  ;;  %v11524_v46 = vadd.f32 %v7196_v14, %v11475_v31  ;;  %8938 = vmatprep.subr.bf16.mxu0 %v9886_v0 }
0x4773   :  { %7223 = vst.msk [vmem:[#allocation2 + $0x1e] sm:$0xff] %vm191_vm0, %v11524_v46 }
0x4778   :  { %v7232_v43 = vld [vmem:[#allocation2 + $0xc] sm:$0xff]  ;;  %v7226_v57 = vld [vmem:[#allocation2 + $0x3] sm:$0xff] }
0x4779   :  { %v7228_v30 = vld [vmem:[#allocation2 + $0x6] sm:$0xff] }
0x477a   :  { %v7233_v15 = vld [vmem:[#allocation2 + $0x24] sm:$0xff]  ;;  %v7227_v56 = vld [vmem:[#allocation2 + $0x1b] sm:$0xff] }
0x477b   :  { %v7229_v54 = vld [vmem:[#allocation2 + $0x1e] sm:$0xff]  ;;  %v7265_v18 = vpack.c.bf16 %v7233_v15, %v7232_v43  ;;  %v9218_v62 = vpack.i.bf16 %v7227_v56, %v7226_v57  ;;  %v7230_v51 = vld [vmem:[#allocation2 + $0x9] sm:$0xff] }
0x477c   :  { %v9223_v31 = vpack.i.bf16 %v7229_v54, %v7228_v30  ;;  %v7231_v38 = vld [vmem:[#allocation2 + $0x21] sm:$0xff]  ;;  %v7225_v11 = vld [vmem:[#allocation2 + $0x18] sm:$0xff] }
0x477d   :  { %8369 = vmatprep.mubr.msk.bf16.mxu1 %vm191_vm0, %v7265_v18  ;;  %9219 = vrot.lane.b32.xlu1 %v9218_v62, %s9891_s9  ;;  %v9228_v4 = vpack.i.bf16 %v7231_v38, %v7230_v51  ;;  %v7224_v20 = vld [vmem:[#allocation2] sm:$0xff]  ;;  %v9308_v30 = vld [vmem:[%s11749_s5 + $0x28] sm:$0xff]  }
0x477e   :  { %9224 = vrot.lane.b32.xlu0 %v9223_v31, %s9894_s25  ;;  %8939 = vmatpush3.bf16.msra.mxu0 %v9308_v30 }
0x477f   :  { %8944 = vmatprep.subr.bf16.mxu0 %v9886_v0 }
0x4781   :  { %9229 = vrot.lane.b32.xlu1 %v9228_v4, %s9893_s21 }
0x47ef   :  { %v9220_v37 = vpop.permute.xlu1 %9219 }
0x47f0   :  { %v9225_v10 = vpop.permute.xlu0 %9224  ;;  %v9222_v3 = vunpack.i.h.bf16 %v9220_v37  ;;  %v9221_v29 = vunpack.i.l.bf16 %v9220_v37 }
0x47f1   :  { %v9227_v58 = vunpack.i.h.bf16 %v9225_v10  ;;  %v9226_v32 = vunpack.i.l.bf16 %v9225_v10 }
0x47f2   :  { %v7259_v8 = vsel %vm191_vm0, %v7225_v11, %v9222_v3  ;;  %v7258_v59 = vsel %vm191_vm0, %v7224_v20, %v9221_v29  ;;  %v8372_v20 = vld [vmem:[%s11750_s17] ss:$0 sm:$0xff] }
0x47f3   :  { %v9230_v48 = vpop.permute.xlu1 %9229  ;;  %v7260_v26 = vsel %vm6840_vm13, %v7258_v59, %v9226_v32  ;;  %v7261_v19 = vsel %vm6840_vm13, %v7259_v8, %v9227_v58 }
0x47f4   :  { %v9232_v39 = vunpack.i.h.bf16 %v9230_v48  ;;  %v9231_v52 = vunpack.i.l.bf16 %v9230_v48 }
0x47f6   :  { %v7262_v27 = vsel %vm6843_vm14, %v7260_v26, %v9231_v52  ;;  %v7263_v40 = vsel %vm6843_vm14, %v7261_v19, %v9232_v39 }
0x47f7   :  { %v7264_v5 = vpack.c.bf16 %v7263_v40, %v7262_v27 }
0x47f9   :  { %7368 = vmatmul.mubr.bf16.vlgmr.msra.gmra.mrb[60].mxu1 %v7264_v5 }
0x47fa   :  { %8972 = vmatprep.mubr.msk.bf16.mxu1 %vm9888_vm1, %v9886_v0 }
0x48cc   :  { %v7369_v23 = vpop.f32.mrb[60].mxu1 }
0x48cd   :  { %v7370_v42 = vadd.f32 %v8358_v50, %v7369_v23  ;;  %v7371_v47 = vpop.f32.mrb[61].mxu1 }
0x48ce   :  { %v7372_v45 = vpop.f32.mrb[62].mxu1 }
0x48cf   :  { %v7388_v61 = vsub.f32 %v7370_v42, %v11519_v63  ;;  %v7373_v41 = vadd.f32 %v8358_v50, %v7372_v45  ;;  %v7374_v24 = vpop.f32.mrb[63].mxu1  ;;  %v8370_v49 = vmul.f32 -1.442695, %v7370_v42 }
0x48d1   :  { %v7389_v34 = vsub.f32 %v7373_v41, %v11524_v46  ;;  %7392 = vrot.lane.b32.xlu0 %v7388_v61, %s9891_s9  ;;  %v8371_v21 = vmul.f32 -1.442695, %v7373_v41  ;;  %9759 = vpow2.f32 %v8370_v49 }
0x48d3   :  { %7394 = vrot.lane.b32.xlu1 %v7389_v34, %s9891_s9  ;;  %9761 = vpow2.f32 %v8371_v21  ;;  %v9309_v21 = vld [vmem:[%s11751_s29] sm:$0xff]  }
0x48db   :  { %v9760_v6 = vpop.eup %9759 }
0x48dc   :  { %v7382_v55 = vadd.f32 1.0, %v9760_v6  ;;  %v9310_v6 = vld [vmem:[%s11751_s29 + $0x8] sm:$0xff]  }
0x48dd   :  { %v9762_v22 = vpop.eup %9761 }
0x48de   :  { %v7383_v12 = vadd.f32 1.0, %v9762_v22  ;;  %9763 = vrcp.f32 %v7382_v55  ;;  %v9311_v22 = vld [vmem:[%s11751_s29 + $0x10] sm:$0xff]   ;;  %v9312_v55 = vld [vmem:[%s11751_s29 + $0x18] sm:$0xff]  }
0x48e0   :  { %9765 = vrcp.f32 %v7383_v12  ;;  %v9313_v12 = vld [vmem:[%s11751_s29 + $0x20] sm:$0xff]  }
0x48e8   :  { %v9764_v36 = vpop.eup %9763 }
0x48ea   :  { %v9766_v25 = vpop.eup %9765 }
0x4943   :  { %v7393_v28 = vpop.permute.xlu0 %7392 }
0x4944   :  { %v7398_v7 = vmul.f32 %v9764_v36, %v7393_v28 }
0x4945   :  { %v7395_v35 = vpop.permute.xlu1 %7394 }
0x4946   :  { %v7399_v60 = vmul.f32 %v9766_v25, %v7395_v35  ;;  %7402 = vrot.lane.b32.xlu0 %v7398_v7, %s9893_s21  ;;  %v9314_v35 = vld [vmem:[%s11751_s29 + $0x28] sm:$0xff]  }
0x4948   :  { %7404 = vrot.lane.b32.xlu1 %v7399_v60, %s9893_s21 }
0x49b8   :  { %v7403_v14 = vpop.permute.xlu0 %7402 }
0x49b9   :  { %v11562_v13 = vadd.f32 %v7403_v14, %v11519_v63 }
0x49ba   :  { %v7405_v53 = vpop.permute.xlu1 %7404 }
0x49bb   :  { %7423 = vst.msk [vmem:[#allocation2 + $0x6] sm:$0xff] %vm191_vm0, %v11562_v13  ;;  %v11567_v43 = vadd.f32 %v7405_v53, %v11524_v46 }
0x49bd   :  { %7424 = vst.msk [vmem:[#allocation2 + $0x1e] sm:$0xff] %vm191_vm0, %v11567_v43 }
0x49c2   :  { %v7429_v57 = vld [vmem:[#allocation2 + $0x7] sm:$0xff] }
0x49c3   :  { %v7427_v54 = vld [vmem:[#allocation2 + $0x6] sm:$0xff] }
0x49c4   :  { %v7430_v15 = vld [vmem:[#allocation2 + $0x1f] sm:$0xff] }
0x49c5   :  { %v7428_v56 = vld [vmem:[#allocation2 + $0x1e] sm:$0xff]  ;;  %v9238_v63 = vpack.i.bf16 %v7430_v15, %v7429_v57 }
0x49c6   :  { %v9233_v18 = vpack.i.bf16 %v7428_v56, %v7427_v54  ;;  %v7426_v10 = vld [vmem:[#allocation2 + $0x1d] sm:$0xff]  ;;  %v7425_v37 = vld [vmem:[#allocation2 + $0x5] sm:$0xff] }
0x49c7   :  { %9239 = vrot.lane.b32.xlu1 %v9238_v63, %s9894_s25 }
0x49c8   :  { %9234 = vrot.lane.b32.xlu0 %v9233_v18, %s9891_s9 }
0x4a39   :  { %v9240_v46 = vpop.permute.xlu1 %9239 }
0x4a3a   :  { %v9235_v31 = vpop.permute.xlu0 %9234  ;;  %v9242_v62 = vunpack.i.h.bf16 %v9240_v46  ;;  %v9241_v38 = vunpack.i.l.bf16 %v9240_v46 }
0x4a3b   :  { %v9237_v51 = vunpack.i.h.bf16 %v9235_v31  ;;  %v9236_v4 = vunpack.i.l.bf16 %v9235_v31 }
0x4a3d   :  { %v7448_v3 = vsel %vm191_vm0, %v7426_v10, %v9237_v51  ;;  %v7447_v29 = vsel %vm191_vm0, %v7425_v37, %v9236_v4 }
0x4a3e   :  { %v7450_v58 = vsel %vm6840_vm13, %v7448_v3, %v9242_v62  ;;  %v7449_v32 = vsel %vm6840_vm13, %v7447_v29, %v9241_v38  ;;  %v8382_v62 = vld [vmem:[%s11752_s3] ss:$0 sm:$0xff] }
0x4a3f   :  { %v7451_v11 = vpack.c.bf16 %v7450_v58, %v7449_v32 }
0x4a41   :  { %8941 = vmatmul.mubr.msk.bf16.vlgmr.msra.gmra.mrb[64].mxu0 %vm6843_vm14, %v7451_v11 }
0x4a42   :  { %8956 = vmatprep.mubr.msk.bf16.mxu0 %vm9888_vm1, %v9886_v0  ;;  %8945 = vmatpush3.bf16.msra.mxu0 %v9309_v21 }
0x4a43   :  { %8946 = vmatprep.subr.bf16.mxu0 %v9886_v0 }
0x4a46   :  { %8947 = vmatpush3.bf16.msra.mxu0 %v9310_v6 }
0x4a47   :  { %8948 = vmatprep.subr.bf16.mxu0 %v9886_v0 }
0x4a4a   :  { %8949 = vmatpush3.bf16.msra.mxu0 %v9311_v22 }
0x4a4b   :  { %8950 = vmatprep.subr.bf16.mxu0 %v9886_v0 }
0x4a4e   :  { %8951 = vmatpush3.bf16.msra.mxu0 %v9312_v55 }
0x4a4f   :  { %8952 = vmatprep.subr.bf16.mxu0 %v9886_v0 }
0x4a52   :  { %8953 = vmatpush3.bf16.msra.mxu0 %v9313_v12 }
0x4a53   :  { %8954 = vmatprep.subr.bf16.mxu0 %v9886_v0 }
0x4a56   :  { %8955 = vmatpush3.bf16.msra.mxu0 %v9314_v35 }
0x4a57   :  { %8976 = vmatprep.subr.bf16.mxu0 %v9886_v0 }
0x4b14   :  { %v7531_v8 = vpop.f32.mrb[64].mxu0 }
0x4b15   :  { %v7532_v59 = vadd.f32 %v8372_v20, %v7531_v8  ;;  %v8942_v48 = vpop.f32.mrb[65].mxu0 }
0x4b16   :  { %v7534_v39 = vpop.f32.mrb[66].mxu0 }
0x4b17   :  { %v7550_v52 = vsub.f32 %v7532_v59, %v11562_v13  ;;  %v7535_v26 = vadd.f32 %v8372_v20, %v7534_v39  ;;  %v8943_v19 = vpop.f32.mrb[67].mxu0  ;;  %v8380_v40 = vmul.f32 -1.442695, %v7532_v59 }
0x4b19   :  { %v7551_v27 = vsub.f32 %v7535_v26, %v11567_v43  ;;  %7554 = vrot.lane.b32.xlu0 %v7550_v52, %s9891_s9  ;;  %v8381_v5 = vmul.f32 -1.442695, %v7535_v26  ;;  %9767 = vpow2.f32 %v8380_v40 }
0x4b1b   :  { %7556 = vrot.lane.b32.xlu1 %v7551_v27, %s9891_s9  ;;  %9769 = vpow2.f32 %v8381_v5  ;;  %v9315_v5 = vld [vmem:[%s11753_s8] sm:$0xff]  }
0x4b1c   :  { %8961 = vmatpush3.bf16.msra.mxu1 %v9315_v5 }
0x4b1d   :  { %8962 = vmatprep.subr.bf16.mxu1 %v9886_v0 }
0x4b23   :  { %v9768_v50 = vpop.eup %9767 }
0x4b24   :  { %v7544_v42 = vadd.f32 1.0, %v9768_v50  ;;  %v9316_v50 = vld [vmem:[%s11753_s8 + $0x8] sm:$0xff]  }
0x4b25   :  { %v9770_v23 = vpop.eup %9769  ;;  %8963 = vmatpush3.bf16.msra.mxu1 %v9316_v50 }
0x4b26   :  { %v7545_v47 = vadd.f32 1.0, %v9770_v23  ;;  %9771 = vrcp.f32 %v7544_v42  ;;  %v9317_v23 = vld [vmem:[%s11753_s8 + $0x10] sm:$0xff]   ;;  %8964 = vmatprep.subr.bf16.mxu1 %v9886_v0  ;;  %v9318_v42 = vld [vmem:[%s11753_s8 + $0x18] sm:$0xff]  }
0x4b28   :  { %9773 = vrcp.f32 %v7545_v47  ;;  %v9319_v47 = vld [vmem:[%s11753_s8 + $0x20] sm:$0xff]  }
0x4b29   :  { %8965 = vmatpush3.bf16.msra.mxu1 %v9317_v23 }
0x4b2a   :  { %8966 = vmatprep.subr.bf16.mxu1 %v9886_v0 }
0x4b2d   :  { %8967 = vmatpush3.bf16.msra.mxu1 %v9318_v42 }
0x4b2e   :  { %8968 = vmatprep.subr.bf16.mxu1 %v9886_v0 }
0x4b30   :  { %v9772_v45 = vpop.eup %9771 }
0x4b31   :  { %8969 = vmatpush3.bf16.msra.mxu1 %v9319_v47 }
0x4b32   :  { %v9774_v24 = vpop.eup %9773  ;;  %8970 = vmatprep.subr.bf16.mxu1 %v9886_v0 }
0x4b8b   :  { %v7555_v61 = vpop.permute.xlu0 %7554 }
0x4b8c   :  { %v7560_v41 = vmul.f32 %v9772_v45, %v7555_v61 }
0x4b8d   :  { %v7557_v34 = vpop.permute.xlu1 %7556 }
0x4b8e   :  { %v7561_v49 = vmul.f32 %v9774_v24, %v7557_v34  ;;  %7564 = vrot.lane.b32.xlu0 %v7560_v41, %s9893_s21  ;;  %v9320_v34 = vld [vmem:[%s11753_s8 + $0x28] sm:$0xff]  }
0x4b8f   :  { %8971 = vmatpush3.bf16.msra.mxu1 %v9320_v34 }
0x4b90   :  { %7566 = vrot.lane.b32.xlu1 %v7561_v49, %s9893_s21  ;;  %8988 = vmatprep.subr.bf16.mxu1 %v9886_v0 }
0x4c00   :  { %v7565_v36 = vpop.permute.xlu0 %7564 }
0x4c01   :  { %v11600_v28 = vadd.f32 %v7565_v36, %v11562_v13 }
0x4c02   :  { %v7567_v7 = vpop.permute.xlu1 %7566 }
0x4c03   :  { %7585 = vst.msk [vmem:[#allocation2 + $0x6] sm:$0xff] %vm191_vm0, %v11600_v28  ;;  %v11605_v25 = vadd.f32 %v7567_v7, %v11567_v43 }
0x4c05   :  { %7586 = vst.msk [vmem:[#allocation2 + $0x1e] sm:$0xff] %vm191_vm0, %v11605_v25 }
0x4c0a   :  { %v7591_v60 = vld [vmem:[#allocation2 + $0x8] sm:$0xff] }
0x4c0b   :  { %v7589_v9 = vld [vmem:[#allocation2 + $0x6] sm:$0xff] }
0x4c0c   :  { %v7592_v44 = vld [vmem:[#allocation2 + $0x20] sm:$0xff] }
0x4c0d   :  { %v7590_v33 = vld [vmem:[#allocation2 + $0x1e] sm:$0xff]  ;;  %v9248_v16 = vpack.i.bf16 %v7592_v44, %v7591_v60 }
0x4c0e   :  { %v9243_v2 = vpack.i.bf16 %v7590_v33, %v7589_v9  ;;  %v7587_v15 = vld [vmem:[#allocation2 + $0x4] sm:$0xff]  ;;  %v7588_v54 = vld [vmem:[#allocation2 + $0x1c] sm:$0xff] }
0x4c0f   :  { %9249 = vrot.lane.b32.xlu1 %v9248_v16, %s9894_s25 }
0x4c10   :  { %9244 = vrot.lane.b32.xlu0 %v9243_v2, %s9891_s9 }
0x4c81   :  { %v9250_v14 = vpop.permute.xlu1 %9249 }
0x4c82   :  { %v9245_v13 = vpop.permute.xlu0 %9244  ;;  %v9252_v53 = vunpack.i.h.bf16 %v9250_v14  ;;  %v9251_v43 = vunpack.i.l.bf16 %v9250_v14 }
0x4c83   :  { %v9247_v30 = vunpack.i.h.bf16 %v9245_v13  ;;  %v9246_v57 = vunpack.i.l.bf16 %v9245_v13 }
0x4c85   :  { %v7609_v56 = vsel %vm191_vm0, %v7587_v15, %v9246_v57  ;;  %v7610_v63 = vsel %vm191_vm0, %v7588_v54, %v9247_v30  ;;  %v7905_v15 = vsub.s32 1, %v11256_v1 }
0x4c86   :  { %v7611_v18 = vsel %vm6840_vm13, %v7609_v56, %v9251_v43  ;;  %v7612_v46 = vsel %vm6840_vm13, %v7610_v63, %v9252_v53  ;;  %v8392_v53 = vld [vmem:[%s11754_s14] ss:$0 sm:$0xff] }
0x4c87   :  { %v7613_v31 = vpack.c.bf16 %v7612_v46, %v7611_v18 }
0x4c89   :  { %8957 = vmatmul.mubr.msk.bf16.vlgmr.msra.gmra.mrb[68].mxu0 %vm6843_vm14, %v7613_v31  ;;  %v9799_v31 = vld [vmem:[%s11740_s19] sm:$0x3] }
0x4c8a   :  { %8984 = vmatprep.mubr.msk.bf16.mxu0 %vm9888_vm1, %v9886_v0 }
0x4d5c   :  { %v7693_v38 = vpop.f32.mrb[68].mxu0 }
0x4d5d   :  { %v7694_v51 = vadd.f32 %v8382_v62, %v7693_v38  ;;  %v8958_v4 = vpop.f32.mrb[69].mxu0 }
0x4d5e   :  { %v7696_v10 = vpop.f32.mrb[70].mxu0 }
0x4d5f   :  { %v7712_v37 = vsub.f32 %v7694_v51, %v11600_v28  ;;  %v7697_v3 = vadd.f32 %v8382_v62, %v7696_v10  ;;  %v8959_v29 = vpop.f32.mrb[71].mxu0  ;;  %v8390_v32 = vmul.f32 -1.442695, %v7694_v51  ;;  %v7906_v62 = vrot.slane %v9799_v31, %v7905_v15 }
0x4d61   :  { %v7713_v58 = vsub.f32 %v7697_v3, %v11605_v25  ;;  %7716 = vrot.lane.b32.xlu0 %v7712_v37, %s9891_s9  ;;  %v8391_v11 = vmul.f32 -1.442695, %v7697_v3  ;;  %9775 = vpow2.f32 %v8390_v32 }
0x4d63   :  { %7718 = vrot.lane.b32.xlu1 %v7713_v58, %s9891_s9  ;;  %9777 = vpow2.f32 %v8391_v11 }
0x4d6b   :  { %v9776_v20 = vpop.eup %9775 }
0x4d6c   :  { %v7706_v59 = vadd.f32 1.0, %v9776_v20 }
0x4d6d   :  { %v9778_v8 = vpop.eup %9777 }
0x4d6e   :  { %v7707_v48 = vadd.f32 1.0, %v9778_v8  ;;  %9779 = vrcp.f32 %v7706_v59  ;;  %v7899_v59 = vrot.slane %v9799_v31, %v11261_v17 }
0x4d70   :  { %9781 = vrcp.f32 %v7707_v48 }
0x4d78   :  { %v9780_v39 = vpop.eup %9779 }
0x4d7a   :  { %v9782_v19 = vpop.eup %9781 }
0x4dd3   :  { %v7717_v52 = vpop.permute.xlu0 %7716 }
0x4dd4   :  { %v7722_v26 = vmul.f32 %v9780_v39, %v7717_v52 }
0x4dd5   :  { %v7719_v27 = vpop.permute.xlu1 %7718 }
0x4dd6   :  { %v7723_v40 = vmul.f32 %v9782_v19, %v7719_v27  ;;  %7726 = vrot.lane.b32.xlu0 %v7722_v26, %s9893_s21 }
0x4dd8   :  { %7728 = vrot.lane.b32.xlu1 %v7723_v40, %s9893_s21 }
0x4e48   :  { %v7727_v45 = vpop.permute.xlu0 %7726 }
0x4e49   :  { %v11638_v61 = vadd.f32 %v7727_v45, %v11600_v28 }
0x4e4a   :  { %v7729_v41 = vpop.permute.xlu1 %7728 }
0x4e4b   :  { %7747 = vst.msk [vmem:[#allocation2 + $0x6] sm:$0xff] %vm191_vm0, %v11638_v61  ;;  %v11643_v24 = vadd.f32 %v7729_v41, %v11605_v25 }
0x4e4d   :  { %7748 = vst.msk [vmem:[#allocation2 + $0x1e] sm:$0xff] %vm191_vm0, %v11643_v24 }
0x4e52   :  { %v7753_v49 = vld [vmem:[#allocation2 + $0x9] sm:$0xff] }
0x4e53   :  { %v7751_v6 = vld [vmem:[#allocation2 + $0x6] sm:$0xff] }
0x4e54   :  { %v7754_v21 = vld [vmem:[#allocation2 + $0x21] sm:$0xff] }
0x4e55   :  { %v7752_v22 = vld [vmem:[#allocation2 + $0x1e] sm:$0xff]  ;;  %v9258_v55 = vpack.i.bf16 %v7754_v21, %v7753_v49 }
0x4e56   :  { %v9253_v12 = vpack.i.bf16 %v7752_v22, %v7751_v6  ;;  %v7749_v44 = vld [vmem:[#allocation2 + $0x3] sm:$0xff]  ;;  %v7750_v9 = vld [vmem:[#allocation2 + $0x1b] sm:$0xff] }
0x4e57   :  { %9259 = vrot.lane.b32.xlu1 %v9258_v55, %s9894_s25  ;;  %s11755_s25 = sld [smem:[#allocation28_spill]] }
0x4e58   :  { %9254 = vrot.lane.b32.xlu0 %v9253_v12, %s9891_s9 }
0x4e5d   :  { %v9321_v48 = vld [vmem:[%s11755_s25] sm:$0xff]   ;;  %v9322_v39 = vld [vmem:[%s11755_s25 + $0x8] sm:$0xff]   ;;  %v9323_v52 = vld [vmem:[%s11755_s25 + $0x10] sm:$0xff]  }
0x4e5e   :  { %8977 = vmatpush3.bf16.msra.mxu0 %v9321_v48 }
0x4e5f   :  { %8978 = vmatprep.subr.bf16.mxu0 %v9886_v0 }
0x4e62   :  { %8979 = vmatpush3.bf16.msra.mxu0 %v9322_v39 }
0x4e63   :  { %8980 = vmatprep.subr.bf16.mxu0 %v9886_v0 }
0x4e66   :  { %8981 = vmatpush3.bf16.msra.mxu0 %v9323_v52 }
0x4e67   :  { %8982 = vmatprep.subr.bf16.mxu0 %v9886_v0 }
0x4ec9   :  { %v9260_v36 = vpop.permute.xlu1 %9259 }
0x4eca   :  { %v9255_v28 = vpop.permute.xlu0 %9254  ;;  %v9262_v7 = vunpack.i.h.bf16 %v9260_v36  ;;  %v9261_v25 = vunpack.i.l.bf16 %v9260_v36 }
0x4ecb   :  { %v9257_v35 = vunpack.i.h.bf16 %v9255_v28  ;;  %v9256_v60 = vunpack.i.l.bf16 %v9255_v28 }
0x4ecd   :  { %v7771_v33 = vsel %vm191_vm0, %v7749_v44, %v9256_v60  ;;  %v7772_v16 = vsel %vm191_vm0, %v7750_v9, %v9257_v35 }
0x4ece   :  { %v7773_v2 = vsel %vm6840_vm13, %v7771_v33, %v9261_v25  ;;  %v7774_v14 = vsel %vm6840_vm13, %v7772_v16, %v9262_v7 }
0x4ecf   :  { %v7775_v13 = vpack.c.bf16 %v7774_v14, %v7773_v2 }
0x4ed1   :  { %8973 = vmatmul.mubr.msk.bf16.vlgmr.msra.gmra.mrb[64].mxu1 %vm6843_vm14, %v7775_v13 }
0x4ed2   :  { %8992 = vmatprep.mubr.msk.bf16.mxu1 %vm9888_vm1, %v9886_v0  ;;  %vm7946_vm1 = vcmask 58368  }
0x4ed3   :  { %v7947_v38 = vsel %vm7946_vm1, %v9799_v31, 0.0 }
0x4fa4   :  { %v7855_v43 = vpop.f32.mrb[64].mxu1 }
0x4fa5   :  { %v7856_v30 = vadd.f32 %v8392_v53, %v7855_v43  ;;  %v8974_v57 = vpop.f32.mrb[65].mxu1 }
0x4fa6   :  { %v7858_v54 = vpop.f32.mrb[66].mxu1 }
0x4fa7   :  { %v7874_v56 = vsub.f32 %v7856_v30, %v11638_v61  ;;  %v7859_v63 = vadd.f32 %v8392_v53, %v7858_v54  ;;  %v8975_v18 = vpop.f32.mrb[67].mxu1  ;;  %v8400_v51 = vmul.f32 -1.442695, %v7856_v30 }
0x4fa9   :  { %v7875_v46 = vsub.f32 %v7859_v63, %v11643_v24  ;;  %7878 = vrot.lane.b32.xlu1 %v7874_v56, %s9891_s9  ;;  %9783 = vpow2.f32 %v8400_v51  ;;  %v8401_v1 = vmul.f32 -1.442695, %v7859_v63 }
0x4fab   :  { %7880 = vrot.lane.b32.xlu0 %v7875_v46, %s9891_s9  ;;  %9785 = vpow2.f32 %v8401_v1 }
0x4fad   :  { %7908 = vbcast.lane.b32.xlu1 %v7906_v62, 256 }
0x4fb3   :  { %v9784_v4 = vpop.eup %9783 }
0x4fb4   :  { %v7868_v10 = vadd.f32 1.0, %v9784_v4 }
0x4fb5   :  { %v9786_v37 = vpop.eup %9785 }
0x4fb6   :  { %9787 = vrcp.f32 %v7868_v10  ;;  %v7869_v3 = vadd.f32 1.0, %v9786_v37 }
0x4fb8   :  { %9789 = vrcp.f32 %v7869_v3 }
0x4fc0   :  { %v9788_v29 = vpop.eup %9787 }
0x4fc2   :  { %v9790_v20 = vpop.eup %9789 }
0x4fca   :  { %7948 = vadd.xlane.f32.xlu0 %v7947_v38 }
0x501b   :  { %v7879_v58 = vpop.permute.xlu1 %7878 }
0x501c   :  { %v7884_v32 = vmul.f32 %v9788_v29, %v7879_v58 }
0x501d   :  { %v7881_v11 = vpop.permute.xlu0 %7880 }
0x501e   :  { %7888 = vrot.lane.b32.xlu1 %v7884_v32, %s9893_s21  ;;  %v7885_v8 = vmul.f32 %v9790_v20, %v7881_v11  ;;  %v9325_v32 = vld [vmem:[%s10092_s20] sm:$0xff]   ;;  %v9326_v11 = vld [vmem:[%s10092_s20 + $0x8] sm:$0xff]  }
0x501f   :  { %v7909_v26 = vpop.permute.xlu1 %7908  ;;  %8989 = vmatpush3.bf16.msra.mxu1 %v9325_v32 }
0x5020   :  { %v7911_v27 = vsub.f32 1.0, %v7909_v26  ;;  %8990 = vmatprep.subr.bf16.mxu1 %v9886_v0 }
0x5022   :  { %7890 = vrot.lane.b32.xlu1 %v7885_v8, %s9893_s21  ;;  %v7913_v17 = vmul.f32 -1e+09, %v7911_v27  ;;  %s11756_s21 = sld [smem:[#allocation29_spill]] }
0x5023   :  { %8991 = vmatpush3.bf16.msra.mxu1 %v9326_v11 }
0x5026   :  { %7901 = vbcast.lane.b32.xlu1 %v7899_v59, 256 }
0x5028   :  { %v8402_v20 = vld [vmem:[%s11756_s21] ss:$0 sm:$0xff] }
0x5057   :  { %v7949_v40 = vpop.xlane.xlu0 %7948 }
0x5058   :  { %v7951_v50 = vrot.slane %v7949_v40, 1 }
0x505a   :  { %9791 = vrcp.f32 %v7951_v50 }
0x505b   :  { %9793 = vrcp.f32 %v7949_v40 }
0x5064   :  { %v9792_v14 = vpop.eup %9791 }
0x5065   :  { %v9794_v31 = vpop.eup %9793 }
0x5090   :  { %v7889_v19 = vpop.permute.xlu1 %7888 }
0x5091   :  { %v7894_v42 = vadd.f32 %v7889_v19, %v11638_v61  ;;  %v9324_v61 = vld [vmem:[%s11755_s25 + $0x18] sm:$0xff]  }
0x5092   :  { %8983 = vmatpush3.bf16.msra.mxu0 %v9324_v61 }
0x5094   :  { %v7891_v5 = vpop.permute.xlu1 %7890 }
0x5095   :  { %v7895_v23 = vadd.f32 %v7891_v5, %v11643_v24 }
0x5097   :  { %v7915_v47 = vadd.f32 %v7913_v17, %v7895_v23  ;;  %v7931_v45 = vmul.f32 %v7909_v26, %v7895_v23 }
0x5098   :  { %v7902_v41 = vpop.permute.xlu1 %7901 }
0x5099   :  { %v7923_v34 = vsel %vm191_vm0, %v7915_v47, -inf  ;;  %v7939_v49 = vsel %vm191_vm0, %v7931_v45, 0.0  ;;  %v7910_v21 = vsub.f32 1.0, %v7902_v41  ;;  %v7930_v6 = vmul.f32 %v7902_v41, %v7894_v42 }
0x509a   :  { %v7924_v22 = vrot.slane %v7923_v34, 4  ;;  %v7940_v55 = vrot.slane %v7939_v49, 4 }
0x509b   :  { %v7912_v12 = vmul.f32 -1e+09, %v7910_v21  ;;  %v7932_v36 = vsel %vm191_vm0, %v7930_v6, 0.0 }
0x509c   :  { %v7925_v28 = vmax.f32 %v7923_v34, %v7924_v22  ;;  %v7941_v24 = vadd.f32 %v7940_v55, %v7939_v49  ;;  %v7933_v7 = vrot.slane %v7932_v36, 4 }
0x509d   :  { %v7914_v25 = vadd.f32 %v7912_v12, %v7894_v42 }
0x509e   :  { %v7926_v35 = vrot.slane %v7925_v28, 2  ;;  %v7942_v60 = vrot.slane %v7941_v24, 2  ;;  %v7934_v44 = vadd.f32 %v7933_v7, %v7932_v36 }
0x509f   :  { %v7916_v9 = vsel %vm191_vm0, %v7914_v25, -inf }
0x50a0   :  { %v7943_v33 = vadd.f32 %v7942_v60, %v7941_v24  ;;  %v7917_v16 = vrot.slane %v7916_v9, 4  ;;  %v7935_v2 = vrot.slane %v7934_v44, 2  ;;  %v7927_v13 = vmax.f32 %v7925_v28, %v7926_v35 }
0x50a2   :  { %v7944_v53 = vrot.slane %v7943_v33, 1  ;;  %v7918_v43 = vmax.f32 %v7916_v9, %v7917_v16  ;;  %v7936_v30 = vadd.f32 %v7935_v2, %v7934_v44  ;;  %v7928_v56 = vrot.slane %v7927_v13, 1 }
0x50a4   :  { %v7945_v57 = vadd.f32 %v7944_v53, %v7943_v33  ;;  %v7919_v15 = vrot.slane %v7918_v43, 2  ;;  %v7937_v54 = vrot.slane %v7936_v30, 1  ;;  %v7929_v4 = vmax.f32 %v7927_v13, %v7928_v56 }
0x50a6   :  { %v7920_v63 = vmax.f32 %v7918_v43, %v7919_v15  ;;  %v7938_v18 = vadd.f32 %v7937_v54, %v7936_v30  ;;  %v7957_v46 = vmul.f32 %v9792_v14, %v7945_v57 }
0x50a8   :  { %v7955_v62 = vmul.f32 %v9794_v31, %v7938_v18  ;;  %v7964_v38 = vrot.slane %v7957_v46, 7  ;;  %v7921_v51 = vrot.slane %v7920_v63, 1 }
0x50aa   :  { %v7965_v1 = vsel %vm526_vm2, %v7964_v38, %v7955_v62  ;;  %v7922_v10 = vmax.f32 %v7920_v63, %v7921_v51 }
0x50ab   :  { %7966 = vrot.lane.b32.xlu1 %v7965_v1, %s9891_s9  ;;  %s9906_s9 = smov [#allocation3]  }
0x50ac   :  { %v7960_v37 = vsel %vm526_vm2, %v7929_v4, %v7922_v10  ;;  %s8127_s19 = sshll.u32 %s9906_s9, 4  ;;  %s8128_s19 = int_to_ptr.vmem [resolvable:$true] %s8127_s19 }
0x50ad   :  { %s9800_s24 = scalar_lea.vmem %s8128_s19, 256  ;;  %p9805_p1 = scmp.lt.s32.totalorder %s8128_s19, %s8128_s19 }
0x50ae   :  { %p9801_p0 = scmp.ne.s32.totalorder %s8128_s19, %s9800_s24  ;;  %p9806_p2 = scmp.lt.s32.totalorder %s9800_s24, %s9800_s24 }
0x50b0   :  { %p9807_p3 = por %p9806_p2, %p9805_p1 }
0x50b2   :  { %p9808_p4 = pnand %p9807_p3, %p9801_p0 }
0x511d   :  { %v7967_v3 = vpop.permute.xlu1 %7966 }
0x511e   :  { %v7969_v29 = vsel %vm191_vm0, %v7960_v37, %v7967_v3 }
0x511f   :  { %v7982_v58 = vpack.c.bf16 %v7969_v29, %v7969_v29 }
0x5121   :  { %8985 = vmatmul.mubr.msk.bf16.vlgmr.msra.gmra.mrb[72].mxu0 %vm6840_vm13, %v7982_v58 }
0x51f4   :  { %v8051_v8 = vpop.f32.mrb[72].mxu0 }
0x51f5   :  { %v8052_v59 = vadd.f32 %v8402_v20, %v8051_v8  ;;  %v8986_v48 = vpop.f32.mrb[73].mxu0 }
0x51f6   :  { %v8054_v39 = vpop.f32.mrb[74].mxu0 }
0x51f7   :  { %v8057_v52 = vmax.f32 %v8052_v59, 0.0  ;;  %v8987_v26 = vpop.f32.mrb[75].mxu0 }
0x51f9   :  { %v8058_v19 = vpack.c.bf16 %v8057_v52, %v8057_v52 }
0x51fb   :  { %8993 = vmatmul.mubr.msk.bf16.vlgmr.msra.gmra.mrb[68].mxu1 %vm191_vm0, %v8058_v19 }
0x51fc   :  { %9811 = shalt.err (!%p9808_p4)
}
0x51fd   :  { %s9812_s20 = scalar_lea.hbm %s10102_s4, 256 }
0x51fe   :  { %p9813_p5 = scmp.ne.s32.totalorder %s10102_s4, %s9812_s20  ;;  %p9816_p6 = scmp.lt.u32.totalorder %s9812_s20, %s10102_s4 }
0x5200   :  { %p9818_p7 = pnand %p9816_p6, %p9813_p5 }
0x5202   :  { %9821 = shalt.err (!%p9818_p7)
}
0x5203   :  { %s9907_s30 = smov 128   ;;  %v8408_v0 = vld [vmem:[%s10097_s27] ss:$0 sm:$0xff]  ;;  %s9908_s6 = smov [#allocation5]  }
0x5204   :  { %8133 = dma.vmem_to_hbm [thread:$0]  %s8128_s19, 256, %s10102_s4, [#allocation4], %s9907_s30, %s9907_s30, %s9903_s22  }
0x5205   :  { %s8140_s12 = sshll.u32 %s9908_s6, 4  ;;  %s8141_s12 = int_to_ptr.vmem [resolvable:$true] %s8140_s12 }
0x5206   :  { %s9822_s15 = scalar_lea.vmem %s8141_s12, 32  ;;  %p9827_p9 = scmp.lt.s32.totalorder %s8141_s12, %s8141_s12 }
0x5207   :  { %p9823_p8 = scmp.ne.s32.totalorder %s8141_s12, %s9822_s15  ;;  %p9828_p10 = scmp.lt.s32.totalorder %s9822_s15, %s9822_s15 }
0x5209   :  { %p9829_p11 = por %p9828_p10, %p9827_p9 }
0x520b   :  { %p9830_p12 = pnand %p9829_p11, %p9823_p8 }
0x52ce   :  { %v8115_v27 = vpop.f32.mrb[68].mxu1 }
0x52cf   :  { %v8116_v40 = vadd.f32 %v8408_v0, %v8115_v27  ;;  %v8994_v5 = vpop.f32.mrb[69].mxu1 }
0x52d0   :  { %v8118_v50 = vpop.f32.mrb[70].mxu1 }
0x52d1   :  { %8121 = vst.msk [vmem:[#allocation5] sm:$0x3] %vm7946_vm1, %v8116_v40  ;;  %v8995_v17 = vpop.f32.mrb[71].mxu1 }
0x52d2   :  { %9833 = shalt.err (!%p9830_p12)
}
0x52d3   :  { %s9834_s27 = scalar_lea.hbm %s10107_s13, 32 }
0x52d4   :  { %p9835_p13 = scmp.ne.s32.totalorder %s10107_s13, %s9834_s27  ;;  %p9838_p0 = scmp.lt.u32.totalorder %s9834_s27, %s10107_s13 }
0x52d6   :  { %p9840_p1 = pnand %p9838_p0, %p9835_p13 }
0x52d8   :  { %9843 = shalt.err (!%p9840_p1)
}
0x52d9   :  { %8143 = dma.vmem_to_hbm [thread:$0]  %s8141_s12, 32, %s10107_s13, [#allocation6]  }
0x52da   :  { %9844 = dma.done.wait [#allocation4], 256  }
0x52db   :  { %9845 = vsyncadd [#allocation4], 4294967040 }
0x52dc   :  { %9846 = dma.done.wait [#allocation6], 32  }
0x52dd   :  { %9847 = vsyncadd [#allocation6], 4294967264 }
0x52de   :  { %8150 = vsyncpa [#allocation4], 1 }
0x52df   :  { %8151 = vsyncpa [#allocation6], 1 }

</bundles_post_ra>
